<compile_context>
chip_gen: v5e
topology: v5e:2x2
jax: 0.10.0
libtpu: 0.0.40
codegen_flags: <defaults>
</compile_context>

<pallas_src>
import functools

import jax
import jax.numpy as jnp
from jax.experimental import pallas as pl
from jax.experimental.pallas import tpu as pltpu


def _round_up(x, m):
    return ((x + m - 1) // m) * m


# ----------------------------------------------------------------------------
# Fused kernel: conv3x3 (9 per-tap MXU dots) + bias + ReLU + GAP
#               + embedding-concat-FC head.  Grid: one "parallel" batch axis.
# ----------------------------------------------------------------------------
def _fused_kernel(x_ref, usr_ref, wconv_ref, bconv_ref,
                  wimg_ref, wusr_ref, bfc_ref, out_ref,
                  *, tile_b, H, W, h_chunk):
    # x_ref    : (tile_b, H+2, W+2, Cin) bf16  zero-padded NHWC image tile
    # usr_ref  : (tile_b, Ep)            bf16  gathered user embeddings
    # wconv_ref: (9, Cin, Fp) bf16    bconv_ref: (1, Fp) f32
    # wimg_ref : (Fp, Cp) bf16        wusr_ref : (Ep, Cp) bf16
    # bfc_ref  : (1, Cp) f32          out_ref  : (tile_b, Cp) f32 (lane-dense)
    Cin = x_ref.shape[-1]
    Fp = wconv_ref.shape[-1]

    w_taps = [wconv_ref[t] for t in range(9)]          # 9 x (Cin, Fp), tiny
    bconv = bconv_ref[...]                             # (1, Fp) f32

    # Global-average-pool accumulator; built chunk-by-chunk over rows so the
    # f32 conv intermediate never exceeds ~tile_b * h_chunk * W * Fp floats.
    gap = jnp.zeros((tile_b, Fp), jnp.float32)
    for h0 in range(0, H, h_chunk):
        hc = min(h_chunk, H - h0)
        rows = tile_b * hc * W
        acc = jnp.zeros((rows, Fp), jnp.float32)
        for dy in range(3):
            for dx in range(3):
                # static shifted window of the padded image ("same" conv tap)
                tap = x_ref[:, h0 + dy:h0 + dy + hc, dx:dx + W, :]
                acc = acc + jnp.dot(tap.reshape(rows, Cin),
                                    w_taps[dy * 3 + dx],
                                    preferred_element_type=jnp.float32)
        acc = jnp.maximum(acc + bconv, 0.0)             # bias + ReLU (f32)
        gap = gap + acc.reshape(tile_b, hc * W, Fp).sum(axis=1)

    feats = gap * (1.0 / (H * W))                       # (tile_b, Fp) f32

    # Head: concat+Linear as split matmul; dropout = identity (eval mode).
    out = jnp.dot(feats.astype(jnp.bfloat16), wimg_ref[...],
                  preferred_element_type=jnp.float32)
    out = out + jnp.dot(usr_ref[...], wusr_ref[...],
                        preferred_element_type=jnp.float32)
    out_ref[...] = out + bfc_ref[...]


# ----------------------------------------------------------------------------
# Wrapper: layout plumbing only (NCHW->NHWC, "same" zero-pad, gather, padding,
# bf16 casts).  No im2col / no compute hoisted out of the kernel.
# ----------------------------------------------------------------------------
def hms_forward(params, x_nchw, user_id):
    conv_w = params["conv_w"]          # (3, 3, Cin, F)  HWIO
    conv_b = params["conv_b"]          # (F,)
    emb = params["emb"]                # (U, E)
    fc_w = params["fc_w"]              # (F + E, 90)
    fc_b = params["fc_b"]              # (90,)

    B, Cin, H, W = x_nchw.shape
    F = conv_w.shape[-1]
    E = emb.shape[-1]
    C = fc_w.shape[-1]
    Hp, Wp = H + 2, W + 2
    HW = H * W

    # Lane-dense padded dims (128-aligned works on v5e/v6e/v7x MXUs).
    Fp = _round_up(F, 128)
    Ep = _round_up(E, 128)
    Cp = _round_up(C, 128)

    # ---- batch tiling -------------------------------------------------------
    if B <= 8:
        tile_b = B                      # one grid step: no serial-loop overhead
    else:
        # VMEM bytes for one image's bf16 block after Mosaic's (16,128) layout
        # padding of the trailing (Wp, Cin) dims, x2 for double buffering.
        img_vmem = Hp * _round_up(Wp, 16) * _round_up(Cin, 128) * 2 * 2
        budget = 24 * 1024 * 1024       # v7x-safe per-step budget (64 MiB/TC)
        cap = max(8, (budget // max(img_vmem, 1)) // 8 * 8)
        tile_b = min(_round_up(B, 8), cap)   # multiple of 8 -> (8,128) vregs
    steps = pl.cdiv(B, tile_b)
    Bp = steps * tile_b

    # Spatial rows per conv chunk: keep the f32 conv intermediate under ~2 MiB.
    h_chunk = max(1, min(H, (2 * 1024 * 1024) // max(tile_b * W * Fp * 4, 1)))

    # ---- inputs: zero-padded NHWC image (raw bytes; no im2col in HBM) -------
    x_nhwc = jnp.transpose(x_nchw, (0, 2, 3, 1)).astype(jnp.float32)
    x_pad = jnp.pad(x_nhwc, ((0, Bp - B), (1, 1), (1, 1), (0, 0)))
    x_pad = x_pad.astype(jnp.bfloat16)                       # (Bp, Hp, Wp, Cin)

    # Embedding: gather first, THEN cast/pad (never copies the full table).
    usr = emb[user_id].astype(jnp.float32)                   # (B, E)
    usr = jnp.pad(usr, ((0, Bp - B), (0, Ep - E))).astype(jnp.bfloat16)

    # Weights: zero-padded to lane-dense shapes; bf16 MXU operands, f32 biases.
    w_conv = jnp.pad(conv_w.astype(jnp.float32),
                     ((0, 0), (0, 0), (0, 0), (0, Fp - F)))
    w_conv = w_conv.reshape(9, Cin, Fp).astype(jnp.bfloat16)
    b_conv = jnp.pad(conv_b.reshape(1, F).astype(jnp.float32),
                     ((0, 0), (0, Fp - F)))
    w_img = jnp.pad(fc_w[:F, :].astype(jnp.float32),
                    ((0, Fp - F), (0, Cp - C))).astype(jnp.bfloat16)
    w_usr = jnp.pad(fc_w[F:, :].astype(jnp.float32),
                    ((0, Ep - E), (0, Cp - C))).astype(jnp.bfloat16)
    b_fc = jnp.pad(fc_b.reshape(1, C).astype(jnp.float32),
                   ((0, 0), (0, Cp - C)))

    kernel = functools.partial(_fused_kernel, tile_b=tile_b, H=H, W=W,
                               h_chunk=h_chunk)

    cost = pl.CostEstimate(
        flops=2 * B * HW * 9 * Cin * F + 2 * B * (F + E) * C,
        transcendentals=0,
        bytes_accessed=(x_pad.size * 2 + usr.size * 2 + w_conv.size * 2
                        + w_img.size * 2 + w_usr.size * 2
                        + b_conv.size * 4 + b_fc.size * 4 + Bp * Cp * 4),
    )

    out = pl.pallas_call(
        kernel,
        out_shape=jax.ShapeDtypeStruct((Bp, Cp), jnp.float32),
        grid=(steps,),
        in_specs=[
            pl.BlockSpec((tile_b, Hp, Wp, Cin), lambda i: (i, 0, 0, 0)),  # image
            pl.BlockSpec((tile_b, Ep), lambda i: (i, 0)),                 # user
            pl.BlockSpec((9, Cin, Fp), lambda i: (0, 0, 0)),              # conv W
            pl.BlockSpec((1, Fp), lambda i: (0, 0)),                      # conv b
            pl.BlockSpec((Fp, Cp), lambda i: (0, 0)),                     # fc W img
            pl.BlockSpec((Ep, Cp), lambda i: (0, 0)),                     # fc W usr
            pl.BlockSpec((1, Cp), lambda i: (0, 0)),                      # fc b
        ],
        out_specs=pl.BlockSpec((tile_b, Cp), lambda i: (i, 0)),
        compiler_params=pltpu.CompilerParams(
            dimension_semantics=("parallel",),
            # Safe on v5e/v6e (128 MiB VMEM) and v7x (64 MiB/TC); lets larger
            # batch tiles pipeline on v6e.
            vmem_limit_bytes=48 * 1024 * 1024,
        ),
        cost_estimate=cost,
    )(x_pad, usr, w_conv, b_conv, w_img, w_usr, b_fc)

    return out[:B, :C]


# ----------------------------------------------------------------------------
# Pure-JAX reference (same math, f32) for a sanity check.
# ----------------------------------------------------------------------------
def hms_reference(params, x_nchw, user_id):
    B, Cin, H, W = x_nchw.shape
    F = params["conv_w"].shape[-1]
    x = jnp.transpose(x_nchw, (0, 2, 3, 1)).astype(jnp.float32)
    xp = jnp.pad(x, ((0, 0), (1, 1), (1, 1), (0, 0)))
    acc = jnp.zeros((B, H, W, F), jnp.float32)
    for dy in range(3):
        for dx in range(3):
            acc += jnp.einsum("bhwc,cf->bhwf", xp[:, dy:dy + H, dx:dx + W, :],
                              params["conv_w"][dy, dx])
    acc = jnp.maximum(acc + params["conv_b"], 0.0)
    img = acc.mean(axis=(1, 2))                                   # (B, F)
    usr = params["emb"][user_id]                                  # (B, E)
    comb = jnp.concatenate([img, usr], axis=1)
    return comb @ params["fc_w"] + params["fc_b"]


def init_params(key, *, in_channels, num_features, num_users, embedding_dim,
                num_classes=90):
    k1, k2, k3, k4 = jax.random.split(key, 4)
    return {
        "conv_w": 0.1 * jax.random.normal(
            k1, (3, 3, in_channels, num_features), jnp.float32),   # HWIO
        "conv_b": jnp.zeros((num_features,), jnp.float32),
        "emb": 0.1 * jax.random.normal(
            k2, (num_users, embedding_dim), jnp.float32),
        "fc_w": 0.1 * jax.random.normal(
            k3, (num_features + embedding_dim, num_classes), jnp.float32),
        "fc_b": 0.01 * jax.random.normal(k4, (num_classes,), jnp.float32),
    }


if __name__ == "__main__":
    B, Cin, H, W = 2, 4, 16, 16
    num_users, embedding_dim, num_features = 10, 8, 32

    key = jax.random.PRNGKey(0)
    kx, ku, kp = jax.random.split(key, 3)
    x = jax.random.normal(kx, (B, Cin, H, W), jnp.float32)        # NCHW input
    user_id = jax.random.randint(ku, (B,), 0, num_users, jnp.int32)

    params = init_params(kp, in_channels=Cin, num_features=num_features,
                         num_users=num_users, embedding_dim=embedding_dim)

    out = hms_forward(params, x, user_id)
    out = jax.block_until_ready(out)
    assert out.shape == (B, 90), out.shape

    ref = jax.block_until_ready(hms_reference(params, x, user_id))
    assert jnp.allclose(out, ref, rtol=5e-2, atol=5e-2), (
        float(jnp.max(jnp.abs(out - ref))))

    print("KERNEL_OK")
</pallas_src>

<mosaic_0001>
module attributes {stable_mosaic.version = 11 : i64} {
  func.func @_fused_kernel(%arg0: i32, %arg1: memref<2x18x18x4xbf16, #tpu.memory_space<vmem>>, %arg2: memref<2x128xbf16, #tpu.memory_space<vmem>>, %arg3: memref<9x4x128xbf16, #tpu.memory_space<vmem>>, %arg4: memref<1x128xf32, #tpu.memory_space<vmem>>, %arg5: memref<128x128xbf16, #tpu.memory_space<vmem>>, %arg6: memref<128x128xbf16, #tpu.memory_space<vmem>>, %arg7: memref<1x128xf32, #tpu.memory_space<vmem>>, %arg8: memref<2x128xf32, #tpu.memory_space<vmem>>) attributes {dimension_semantics = [#tpu.dimension_semantics<parallel>], iteration_bounds = array<i64: 1>, scalar_prefetch = 0 : i64, scratch_operands = 0 : i64, tpu.core_type = #tpu.core_type<tc>, window_params = [{transform_indices = @transform_0, window_bounds = array<i64: 2, 18, 18, 4>}, {transform_indices = @transform_1, window_bounds = array<i64: 2, 128>}, {pipeline_mode = #tpu.pipeline_mode<synchronous>, transform_indices = @transform_2, window_bounds = array<i64: 9, 4, 128>}, {pipeline_mode = #tpu.pipeline_mode<synchronous>, transform_indices = @transform_3, window_bounds = array<i64: 1, 128>}, {pipeline_mode = #tpu.pipeline_mode<synchronous>, transform_indices = @transform_4, window_bounds = array<i64: 128, 128>}, {pipeline_mode = #tpu.pipeline_mode<synchronous>, transform_indices = @transform_5, window_bounds = array<i64: 128, 128>}, {pipeline_mode = #tpu.pipeline_mode<synchronous>, transform_indices = @transform_6, window_bounds = array<i64: 1, 128>}, {transform_indices = @transform_7, window_bounds = array<i64: 2, 128>}]} {
    %c0 = arith.constant 0 : index
    %c0_0 = arith.constant 0 : index
    %c0_1 = arith.constant 0 : index
    %0 = vector.load %arg3[%c0, %c0_0, %c0_1] : memref<9x4x128xbf16, #tpu.memory_space<vmem>>, vector<1x4x128xbf16>
    %1 = vector.shape_cast %0 : vector<1x4x128xbf16> to vector<4x128xbf16>
    %c1 = arith.constant 1 : index
    %c0_2 = arith.constant 0 : index
    %c0_3 = arith.constant 0 : index
    %2 = vector.load %arg3[%c1, %c0_2, %c0_3] : memref<9x4x128xbf16, #tpu.memory_space<vmem>>, vector<1x4x128xbf16>
    %3 = vector.shape_cast %2 : vector<1x4x128xbf16> to vector<4x128xbf16>
    %c2 = arith.constant 2 : index
    %c0_4 = arith.constant 0 : index
    %c0_5 = arith.constant 0 : index
    %4 = vector.load %arg3[%c2, %c0_4, %c0_5] : memref<9x4x128xbf16, #tpu.memory_space<vmem>>, vector<1x4x128xbf16>
    %5 = vector.shape_cast %4 : vector<1x4x128xbf16> to vector<4x128xbf16>
    %c3 = arith.constant 3 : index
    %c0_6 = arith.constant 0 : index
    %c0_7 = arith.constant 0 : index
    %6 = vector.load %arg3[%c3, %c0_6, %c0_7] : memref<9x4x128xbf16, #tpu.memory_space<vmem>>, vector<1x4x128xbf16>
    %7 = vector.shape_cast %6 : vector<1x4x128xbf16> to vector<4x128xbf16>
    %c4 = arith.constant 4 : index
    %c0_8 = arith.constant 0 : index
    %c0_9 = arith.constant 0 : index
    %8 = vector.load %arg3[%c4, %c0_8, %c0_9] : memref<9x4x128xbf16, #tpu.memory_space<vmem>>, vector<1x4x128xbf16>
    %9 = vector.shape_cast %8 : vector<1x4x128xbf16> to vector<4x128xbf16>
    %c5 = arith.constant 5 : index
    %c0_10 = arith.constant 0 : index
    %c0_11 = arith.constant 0 : index
    %10 = vector.load %arg3[%c5, %c0_10, %c0_11] : memref<9x4x128xbf16, #tpu.memory_space<vmem>>, vector<1x4x128xbf16>
    %11 = vector.shape_cast %10 : vector<1x4x128xbf16> to vector<4x128xbf16>
    %c6 = arith.constant 6 : index
    %c0_12 = arith.constant 0 : index
    %c0_13 = arith.constant 0 : index
    %12 = vector.load %arg3[%c6, %c0_12, %c0_13] : memref<9x4x128xbf16, #tpu.memory_space<vmem>>, vector<1x4x128xbf16>
    %13 = vector.shape_cast %12 : vector<1x4x128xbf16> to vector<4x128xbf16>
    %c7 = arith.constant 7 : index
    %c0_14 = arith.constant 0 : index
    %c0_15 = arith.constant 0 : index
    %14 = vector.load %arg3[%c7, %c0_14, %c0_15] : memref<9x4x128xbf16, #tpu.memory_space<vmem>>, vector<1x4x128xbf16>
    %15 = vector.shape_cast %14 : vector<1x4x128xbf16> to vector<4x128xbf16>
    %c8 = arith.constant 8 : index
    %c0_16 = arith.constant 0 : index
    %c0_17 = arith.constant 0 : index
    %16 = vector.load %arg3[%c8, %c0_16, %c0_17] : memref<9x4x128xbf16, #tpu.memory_space<vmem>>, vector<1x4x128xbf16>
    %17 = vector.shape_cast %16 : vector<1x4x128xbf16> to vector<4x128xbf16>
    %c0_18 = arith.constant 0 : index
    %c0_19 = arith.constant 0 : index
    %18 = vector.load %arg4[%c0_18, %c0_19] : memref<1x128xf32, #tpu.memory_space<vmem>>, vector<1x128xf32>
    %cst = arith.constant 0.000000e+00 : f32
    %19 = vector.broadcast %cst : f32 to vector<2x128xf32>
    %cst_20 = arith.constant 0.000000e+00 : f32
    %20 = vector.broadcast %cst_20 : f32 to vector<512x128xf32>
    %c0_21 = arith.constant 0 : index
    %c0_22 = arith.constant 0 : index
    %c0_23 = arith.constant 0 : index
    %c0_24 = arith.constant 0 : index
    %21 = vector.load %arg1[%c0_21, %c0_22, %c0_23, %c0_24] : memref<2x18x18x4xbf16, #tpu.memory_space<vmem>>, vector<2x16x16x4xbf16>
    %22 = vector.shape_cast %21 : vector<2x16x16x4xbf16> to vector<512x4xbf16>
    %cst_25 = arith.constant dense<0.000000e+00> : vector<512x128xf32>
    %23 = tpu.matmul %22, %1, %cst_25 {dimension_numbers = #tpu.dot_dimension_numbers<[1], [0], [0], [1], [0, 0, 1, 1], [], []>} : vector<512x4xbf16>, vector<4x128xbf16>, vector<512x128xf32> -> vector<512x128xf32>
    %24 = arith.addf %20, %23 : vector<512x128xf32>
    %c0_26 = arith.constant 0 : index
    %c0_27 = arith.constant 0 : index
    %c1_28 = arith.constant 1 : index
    %c0_29 = arith.constant 0 : index
    %25 = vector.load %arg1[%c0_26, %c0_27, %c1_28, %c0_29] : memref<2x18x18x4xbf16, #tpu.memory_space<vmem>>, vector<2x16x16x4xbf16>
    %26 = vector.shape_cast %25 : vector<2x16x16x4xbf16> to vector<512x4xbf16>
    %cst_30 = arith.constant dense<0.000000e+00> : vector<512x128xf32>
    %27 = tpu.matmul %26, %3, %cst_30 {dimension_numbers = #tpu.dot_dimension_numbers<[1], [0], [0], [1], [0, 0, 1, 1], [], []>} : vector<512x4xbf16>, vector<4x128xbf16>, vector<512x128xf32> -> vector<512x128xf32>
    %28 = arith.addf %24, %27 : vector<512x128xf32>
    %c0_31 = arith.constant 0 : index
    %c0_32 = arith.constant 0 : index
    %c2_33 = arith.constant 2 : index
    %c0_34 = arith.constant 0 : index
    %29 = vector.load %arg1[%c0_31, %c0_32, %c2_33, %c0_34] : memref<2x18x18x4xbf16, #tpu.memory_space<vmem>>, vector<2x16x16x4xbf16>
    %30 = vector.shape_cast %29 : vector<2x16x16x4xbf16> to vector<512x4xbf16>
    %cst_35 = arith.constant dense<0.000000e+00> : vector<512x128xf32>
    %31 = tpu.matmul %30, %5, %cst_35 {dimension_numbers = #tpu.dot_dimension_numbers<[1], [0], [0], [1], [0, 0, 1, 1], [], []>} : vector<512x4xbf16>, vector<4x128xbf16>, vector<512x128xf32> -> vector<512x128xf32>
    %32 = arith.addf %28, %31 : vector<512x128xf32>
    %c0_36 = arith.constant 0 : index
    %c1_37 = arith.constant 1 : index
    %c0_38 = arith.constant 0 : index
    %c0_39 = arith.constant 0 : index
    %33 = vector.load %arg1[%c0_36, %c1_37, %c0_38, %c0_39] : memref<2x18x18x4xbf16, #tpu.memory_space<vmem>>, vector<2x16x16x4xbf16>
    %34 = vector.shape_cast %33 : vector<2x16x16x4xbf16> to vector<512x4xbf16>
    %cst_40 = arith.constant dense<0.000000e+00> : vector<512x128xf32>
    %35 = tpu.matmul %34, %7, %cst_40 {dimension_numbers = #tpu.dot_dimension_numbers<[1], [0], [0], [1], [0, 0, 1, 1], [], []>} : vector<512x4xbf16>, vector<4x128xbf16>, vector<512x128xf32> -> vector<512x128xf32>
    %36 = arith.addf %32, %35 : vector<512x128xf32>
    %c0_41 = arith.constant 0 : index
    %c1_42 = arith.constant 1 : index
    %c1_43 = arith.constant 1 : index
    %c0_44 = arith.constant 0 : index
    %37 = vector.load %arg1[%c0_41, %c1_42, %c1_43, %c0_44] : memref<2x18x18x4xbf16, #tpu.memory_space<vmem>>, vector<2x16x16x4xbf16>
    %38 = vector.shape_cast %37 : vector<2x16x16x4xbf16> to vector<512x4xbf16>
    %cst_45 = arith.constant dense<0.000000e+00> : vector<512x128xf32>
    %39 = tpu.matmul %38, %9, %cst_45 {dimension_numbers = #tpu.dot_dimension_numbers<[1], [0], [0], [1], [0, 0, 1, 1], [], []>} : vector<512x4xbf16>, vector<4x128xbf16>, vector<512x128xf32> -> vector<512x128xf32>
    %40 = arith.addf %36, %39 : vector<512x128xf32>
    %c0_46 = arith.constant 0 : index
    %c1_47 = arith.constant 1 : index
    %c2_48 = arith.constant 2 : index
    %c0_49 = arith.constant 0 : index
    %41 = vector.load %arg1[%c0_46, %c1_47, %c2_48, %c0_49] : memref<2x18x18x4xbf16, #tpu.memory_space<vmem>>, vector<2x16x16x4xbf16>
    %42 = vector.shape_cast %41 : vector<2x16x16x4xbf16> to vector<512x4xbf16>
    %cst_50 = arith.constant dense<0.000000e+00> : vector<512x128xf32>
    %43 = tpu.matmul %42, %11, %cst_50 {dimension_numbers = #tpu.dot_dimension_numbers<[1], [0], [0], [1], [0, 0, 1, 1], [], []>} : vector<512x4xbf16>, vector<4x128xbf16>, vector<512x128xf32> -> vector<512x128xf32>
    %44 = arith.addf %40, %43 : vector<512x128xf32>
    %c0_51 = arith.constant 0 : index
    %c2_52 = arith.constant 2 : index
    %c0_53 = arith.constant 0 : index
    %c0_54 = arith.constant 0 : index
    %45 = vector.load %arg1[%c0_51, %c2_52, %c0_53, %c0_54] : memref<2x18x18x4xbf16, #tpu.memory_space<vmem>>, vector<2x16x16x4xbf16>
    %46 = vector.shape_cast %45 : vector<2x16x16x4xbf16> to vector<512x4xbf16>
    %cst_55 = arith.constant dense<0.000000e+00> : vector<512x128xf32>
    %47 = tpu.matmul %46, %13, %cst_55 {dimension_numbers = #tpu.dot_dimension_numbers<[1], [0], [0], [1], [0, 0, 1, 1], [], []>} : vector<512x4xbf16>, vector<4x128xbf16>, vector<512x128xf32> -> vector<512x128xf32>
    %48 = arith.addf %44, %47 : vector<512x128xf32>
    %c0_56 = arith.constant 0 : index
    %c2_57 = arith.constant 2 : index
    %c1_58 = arith.constant 1 : index
    %c0_59 = arith.constant 0 : index
    %49 = vector.load %arg1[%c0_56, %c2_57, %c1_58, %c0_59] : memref<2x18x18x4xbf16, #tpu.memory_space<vmem>>, vector<2x16x16x4xbf16>
    %50 = vector.shape_cast %49 : vector<2x16x16x4xbf16> to vector<512x4xbf16>
    %cst_60 = arith.constant dense<0.000000e+00> : vector<512x128xf32>
    %51 = tpu.matmul %50, %15, %cst_60 {dimension_numbers = #tpu.dot_dimension_numbers<[1], [0], [0], [1], [0, 0, 1, 1], [], []>} : vector<512x4xbf16>, vector<4x128xbf16>, vector<512x128xf32> -> vector<512x128xf32>
    %52 = arith.addf %48, %51 : vector<512x128xf32>
    %c0_61 = arith.constant 0 : index
    %c2_62 = arith.constant 2 : index
    %c2_63 = arith.constant 2 : index
    %c0_64 = arith.constant 0 : index
    %53 = vector.load %arg1[%c0_61, %c2_62, %c2_63, %c0_64] : memref<2x18x18x4xbf16, #tpu.memory_space<vmem>>, vector<2x16x16x4xbf16>
    %54 = vector.shape_cast %53 : vector<2x16x16x4xbf16> to vector<512x4xbf16>
    %cst_65 = arith.constant dense<0.000000e+00> : vector<512x128xf32>
    %55 = tpu.matmul %54, %17, %cst_65 {dimension_numbers = #tpu.dot_dimension_numbers<[1], [0], [0], [1], [0, 0, 1, 1], [], []>} : vector<512x4xbf16>, vector<4x128xbf16>, vector<512x128xf32> -> vector<512x128xf32>
    %56 = arith.addf %52, %55 : vector<512x128xf32>
    %57 = vector.broadcast %18 : vector<1x128xf32> to vector<512x128xf32>
    %58 = arith.addf %56, %57 : vector<512x128xf32>
    %cst_66 = arith.constant 0.000000e+00 : f32
    %59 = vector.broadcast %cst_66 : f32 to vector<512x128xf32>
    %60 = arith.maximumf %58, %59 : vector<512x128xf32>
    %61 = vector.shape_cast %60 : vector<512x128xf32> to vector<2x256x128xf32>
    %cst_67 = arith.constant dense<0.000000e+00> : vector<2x128xf32>
    %62 = vector.multi_reduction <add>, %61, %cst_67 [1] : vector<2x256x128xf32> to vector<2x128xf32>
    %63 = arith.addf %19, %62 : vector<2x128xf32>
    %cst_68 = arith.constant 3.906250e-03 : f32
    %64 = vector.broadcast %cst_68 : f32 to vector<2x128xf32>
    %65 = arith.mulf %63, %64 : vector<2x128xf32>
    %66 = arith.truncf %65 : vector<2x128xf32> to vector<2x128xbf16>
    %c0_69 = arith.constant 0 : index
    %c0_70 = arith.constant 0 : index
    %67 = vector.load %arg5[%c0_69, %c0_70] : memref<128x128xbf16, #tpu.memory_space<vmem>>, vector<128x128xbf16>
    %cst_71 = arith.constant dense<0.000000e+00> : vector<2x128xf32>
    %68 = tpu.matmul %66, %67, %cst_71 {dimension_numbers = #tpu.dot_dimension_numbers<[1], [0], [0], [1], [0, 0, 1, 1], [], []>} : vector<2x128xbf16>, vector<128x128xbf16>, vector<2x128xf32> -> vector<2x128xf32>
    %c0_72 = arith.constant 0 : index
    %c0_73 = arith.constant 0 : index
    %69 = vector.load %arg2[%c0_72, %c0_73] : memref<2x128xbf16, #tpu.memory_space<vmem>>, vector<2x128xbf16>
    %c0_74 = arith.constant 0 : index
    %c0_75 = arith.constant 0 : index
    %70 = vector.load %arg6[%c0_74, %c0_75] : memref<128x128xbf16, #tpu.memory_space<vmem>>, vector<128x128xbf16>
    %cst_76 = arith.constant dense<0.000000e+00> : vector<2x128xf32>
    %71 = tpu.matmul %69, %70, %cst_76 {dimension_numbers = #tpu.dot_dimension_numbers<[1], [0], [0], [1], [0, 0, 1, 1], [], []>} : vector<2x128xbf16>, vector<128x128xbf16>, vector<2x128xf32> -> vector<2x128xf32>
    %72 = arith.addf %68, %71 : vector<2x128xf32>
    %c0_77 = arith.constant 0 : index
    %c0_78 = arith.constant 0 : index
    %73 = vector.load %arg7[%c0_77, %c0_78] : memref<1x128xf32, #tpu.memory_space<vmem>>, vector<1x128xf32>
    %74 = vector.broadcast %73 : vector<1x128xf32> to vector<2x128xf32>
    %75 = arith.addf %72, %74 : vector<2x128xf32>
    %c0_79 = arith.constant 0 : index
    %c0_80 = arith.constant 0 : index
    %76 = vector.load %arg8[%c0_79, %c0_80] : memref<2x128xf32, #tpu.memory_space<vmem>>, vector<2x128xf32>
    tpu.vector_store %arg8[%c0_79, %c0_80], %75 {strides = array<i32>} : memref<2x128xf32, #tpu.memory_space<vmem>>, vector<2x128xf32>,
    return
  }
  func.func @transform_0(%arg0: i32) -> (i32, i32, i32, i32) {
    %c0_i32 = arith.constant 0 : i32
    %c0_i32_0 = arith.constant 0 : i32
    %c0_i32_1 = arith.constant 0 : i32
    %c0_i32_2 = arith.constant 0 : i32
    return %arg0, %c0_i32, %c0_i32_0, %c0_i32_1 : i32, i32, i32, i32
  }
  func.func @transform_1(%arg0: i32) -> (i32, i32) {
    %c0_i32 = arith.constant 0 : i32
    %c0_i32_0 = arith.constant 0 : i32
    return %arg0, %c0_i32 : i32, i32
  }
  func.func @transform_2(%arg0: i32) -> (i32, i32, i32) {
    %c0_i32 = arith.constant 0 : i32
    %c0_i32_0 = arith.constant 0 : i32
    %c0_i32_1 = arith.constant 0 : i32
    %c0_i32_2 = arith.constant 0 : i32
    return %c0_i32, %c0_i32_0, %c0_i32_1 : i32, i32, i32
  }
  func.func @transform_3(%arg0: i32) -> (i32, i32) {
    %c0_i32 = arith.constant 0 : i32
    %c0_i32_0 = arith.constant 0 : i32
    %c0_i32_1 = arith.constant 0 : i32
    return %c0_i32, %c0_i32_0 : i32, i32
  }
  func.func @transform_4(%arg0: i32) -> (i32, i32) {
    %c0_i32 = arith.constant 0 : i32
    %c0_i32_0 = arith.constant 0 : i32
    %c0_i32_1 = arith.constant 0 : i32
    return %c0_i32, %c0_i32_0 : i32, i32
  }
  func.func @transform_5(%arg0: i32) -> (i32, i32) {
    %c0_i32 = arith.constant 0 : i32
    %c0_i32_0 = arith.constant 0 : i32
    %c0_i32_1 = arith.constant 0 : i32
    return %c0_i32, %c0_i32_0 : i32, i32
  }
  func.func @transform_6(%arg0: i32) -> (i32, i32) {
    %c0_i32 = arith.constant 0 : i32
    %c0_i32_0 = arith.constant 0 : i32
    %c0_i32_1 = arith.constant 0 : i32
    return %c0_i32, %c0_i32_0 : i32, i32
  }
  func.func @transform_7(%arg0: i32) -> (i32, i32) {
    %c0_i32 = arith.constant 0 : i32
    %c0_i32_0 = arith.constant 0 : i32
    return %arg0, %c0_i32 : i32, i32
  }
}

</mosaic_0001>

<bundles_post_ra>
// kernel: tpu_custom_call.1
= control target key start
LH: loop header
LB: loop body
LE: loop exit
PB: predicated region body
PF: predicated region fallthrough
CT: control target
= control target key end

     0   :  { %vm1106_vm0 = vcmask 1041408   ;;  %vm142_vm1 = vsmask.f32 3328  ;;  %vm143_vm2 = vsmask.f32 7440  ;;  %vm1009_vm3 = vcmask 31744   ;;  %s13857_s0 = inlined_call_operand.vmem [shape: bf16[2,18,18,4], index: 0, kind: input, shape index: {}]   ;;  %s13858_s1 = inlined_call_operand.vmem [shape: bf16[2,128], index: 1, kind: input, shape index: {}]   ;;  %s13859_s2 = inlined_call_operand.vmem [shape: bf16[9,4,128], index: 2, kind: input, shape index: {}]   ;;  %s13860_s3 = inlined_call_operand.vmem [shape: f32[1,128], index: 3, kind: input, shape index: {}]   ;;  %s13861_s4 = inlined_call_operand.vmem [shape: bf16[128,128], index: 4, kind: input, shape index: {}]   ;;  %s13862_s5 = inlined_call_operand.vmem [shape: bf16[128,128], index: 5, kind: input, shape index: {}]   ;;  %s13863_s6 = inlined_call_operand.vmem [shape: f32[1,128], index: 6, kind: input, shape index: {}]   ;;  %s13864_s7 = inlined_call_operand.hbm [shape: f32[2,128], index: 7, kind: output, shape index: {}]  }
   0x1   :  { %v8112_v0 = vld [vmem:[%s13859_s2 + $0x2] sm:$0x3]  ;;  %v47_v3 = vld [vmem:[%s13857_s0 + $0x4] sm:$0xf]  ;;  %v110_v4 = vld [vmem:[%s13857_s0 + $0x8] sm:$0x1] }
   0x2   :  { %v46_v1 = vld [vmem:[%s13857_s0] sm:$0xf]  ;;  %v1108_v2 = vsel %vm1106_vm0, %v8112_v0, 0  ;;  %v155_v7 = vshll.u32 %v47_v3, 16  ;;  %v159_v9 = vshrl.u32 %v47_v3, 16  ;;  %v165_v10 = vshll.u32 %v110_v4, 16  ;;  %vm9673_vm4 = vmor %vm142_vm1, %vm143_vm2 }
   0x3   :  { %v146_v5 = vshrl.u32 %v46_v1, 16  ;;  %1117 = vmatpush.bf16.msra.mxu0 %v1108_v2  ;;  %9448 = vmatpush.bf16.msra.mxu1 %v1108_v2  ;;  %v149_v6 = vshll.u32 %v46_v1, 16  ;;  %v64_v11 = vld [vmem:[%s13857_s0 + $0x6c] sm:$0xf]  ;;  %v65_v14 = vld [vmem:[%s13857_s0 + $0x70] sm:$0xf] }
   0x4   :  { %9450 = vmatpush.bf16.msra.mxu3 %v1108_v2  ;;  %9449 = vmatpush.bf16.msra.mxu2 %v1108_v2  ;;  %v157_v13 = vrot.slane %v155_v7, 5  ;;  %v119_v15 = vld [vmem:[%s13857_s0 + $0x74] sm:$0x1]  ;;  %v161_v16 = vrot.slane %v159_v9, 4  ;;  %v362_v17 = vshrl.u32 %v64_v11, 16  ;;  %v365_v18 = vshll.u32 %v64_v11, 16 }
   0x5   :  { %v148_v8 = vrot.slane %v146_v5, 4  ;;  %v151_v12 = vrot.slane %v149_v6, 5  ;;  %v371_v20 = vshll.u32 %v65_v14, 16  ;;  %v375_v21 = vshrl.u32 %v65_v14, 16  ;;  %v92_v23 = vld [vmem:[%s13857_s0 + $0x12c] sm:$0xf] }
   0x6   :  { %v381_v22 = vshll.u32 %v119_v15, 16  ;;  %v162_v25 = vor.u32 %v161_v16, %v157_v13  ;;  %v167_v26 = vrot.slane %v165_v10, 5  ;;  %v364_v27 = vrot.slane %v362_v17, 4  ;;  %v93_v29 = vld [vmem:[%s13857_s0 + $0x130] sm:$0xf] }
   0x7   :  { %v152_v19 = vor.u32 %v151_v12, %v148_v8  ;;  %v367_v28 = vrot.slane %v365_v18, 5  ;;  %v373_v31 = vrot.slane %v371_v20, 5  ;;  %v377_v32 = vrot.slane %v375_v21, 4  ;;  %v133_v40 = vld [vmem:[%s13857_s0 + $0x134] sm:$0x1] }
   0x8   :  { %v383_v33 = vrot.slane %v381_v22, 5  ;;  %v163_v34 = vrot.slane %v162_v25, 4  ;;  %v698_v36 = vshrl.u32 %v92_v23, 16  ;;  %v701_v37 = vshll.u32 %v92_v23, 16  ;;  %v8114_v51 = vld [vmem:[%s13859_s2 + $0x6] sm:$0x3] }
   0x9   :  { %v153_v30 = vrot.slane %v152_v19, 4  ;;  %v368_v35 = vor.u32 %v367_v28, %v364_v27  ;;  %v378_v39 = vor.u32 %v377_v32, %v373_v31  ;;  %v707_v41 = vshll.u32 %v93_v29, 16  ;;  %v8115_v55 = vld [vmem:[%s13859_s2 + $0x8] sm:$0x3]  ;;  %v48_v56 = vld [vmem:[%s13857_s0 + $0xc] sm:$0xf] }
   0xa   :  { %v711_v42 = vshrl.u32 %v93_v29, 16  ;;  %v168_v43 = vsel %vm9673_vm4, %v163_v34, %v167_v26  ;;  %v700_v46 = vrot.slane %v698_v36, 4  ;;  %v703_v49 = vrot.slane %v701_v37, 5  ;;  %v49_v61 = vld [vmem:[%s13857_s0 + $0x10] sm:$0xf] }
   0xb   :  { %v158_v38 = vsel %vm9673_vm4, %v153_v30, %v157_v13  ;;  %v369_v45 = vrot.slane %v368_v35, 4  ;;  %v914_v47 = vunpack.c.l.b16 %v168_v43  ;;  %v379_v48 = vrot.slane %v378_v39, 4  ;;  %v111_v2 = vld [vmem:[%s13857_s0 + $0x14] sm:$0x1]  ;;  %v66_v11 = vld [vmem:[%s13857_s0 + $0x78] sm:$0xf] }
   0xc   :  { %v913_v44 = vunpack.c.l.b16 %v158_v38  ;;  %v709_v50 = vrot.slane %v707_v41, 5  ;;  %v713_v53 = vrot.slane %v711_v42, 4  ;;  %v717_v54 = vshll.u32 %v133_v40, 16  ;;  %v67_v16 = vld [vmem:[%s13857_s0 + $0x7c] sm:$0xf] }
   0xd   :  { %v374_v52 = vsel %vm9673_vm4, %v369_v45, %v373_v31  ;;  %v384_v58 = vsel %vm9673_vm4, %v379_v48, %v383_v33  ;;  %v704_v60 = vor.u32 %v703_v49, %v700_v46  ;;  %v2780_v1 = vsel %vm1106_vm0, %v8114_v51, 0  ;;  %v120_v21 = vld [vmem:[%s13857_s0 + $0x80] sm:$0x1]  ;;  %v94_v31 = vld [vmem:[%s13857_s0 + $0x138] sm:$0xf] }
   0xe   :  { %v977_v57 = vpack.c.b16 %v914_v47, %v913_v44  ;;  %v931_v59 = vunpack.c.l.b16 %v374_v52  ;;  %v932_v62 = vunpack.c.l.b16 %v384_v58  ;;  %v714_v63 = vor.u32 %v713_v53, %v709_v50  ;;  %2789 = vmatpush.bf16.msrb.mxu3 %v2780_v1  ;;  %v95_v40 = vld [vmem:[%s13857_s0 + $0x13c] sm:$0xf]  ;;  %v134_v43 = vld [vmem:[%s13857_s0 + $0x140] sm:$0x1] }
   0xf   :  { %v719_v0 = vrot.slane %v717_v54, 5  ;;  %v705_v3 = vrot.slane %v704_v60, 4  ;;  %v4072_v4 = vsel %vm1106_vm0, %v8115_v55, 0  ;;  %v170_v5 = vshrl.u32 %v48_v56, 16 }
  0x10   :  { %8120 = vmatmul.msk.bf16.vlgmr.msra.gmra.mxu0 %vm1009_vm3, %v977_v57  ;;  %v173_v6 = vshll.u32 %v48_v56, 16  ;;  %v986_v7 = vpack.c.b16 %v932_v62, %v931_v59  ;;  %v715_v8 = vrot.slane %v714_v63, 4  ;;  %v179_v9 = vshll.u32 %v49_v61, 16 }
  0x11   :  { %4081 = vmatpush.bf16.msrb.mxu0 %v4072_v4  ;;  %v183_v10 = vshrl.u32 %v49_v61, 16  ;;  %v710_v12 = vsel %vm9673_vm4, %v705_v3, %v709_v50  ;;  %v172_v13 = vrot.slane %v170_v5, 4  ;;  %v189_v15 = vshll.u32 %v111_v2, 16 }
  0x12   :  { %v175_v14 = vrot.slane %v173_v6, 5  ;;  %8129 = vmatmul.msk.bf16.vlgmr.msra.gmra.mxu1 %vm1009_vm3, %v986_v7  ;;  %v720_v17 = vsel %vm9673_vm4, %v715_v8, %v719_v0  ;;  %v959_v18 = vunpack.c.l.b16 %v710_v12  ;;  %v181_v19 = vrot.slane %v179_v9, 5 }
  0x13   :  { %v185_v20 = vrot.slane %v183_v10, 4  ;;  %v960_v22 = vunpack.c.l.b16 %v720_v17  ;;  %v191_v25 = vrot.slane %v189_v15, 5  ;;  %v386_v26 = vshrl.u32 %v66_v11, 16 }
  0x14   :  { %v176_v23 = vor.u32 %v175_v14, %v172_v13  ;;  %v389_v28 = vshll.u32 %v66_v11, 16  ;;  %v395_v29 = vshll.u32 %v67_v16, 16  ;;  %v399_v30 = vshrl.u32 %v67_v16, 16 }
  0x15   :  { %v186_v27 = vor.u32 %v185_v20, %v181_v19  ;;  %v1000_v32 = vpack.c.b16 %v960_v22, %v959_v18  ;;  %v388_v34 = vrot.slane %v386_v26, 4  ;;  %v405_v35 = vshll.u32 %v120_v21, 16 }
  0x16   :  { %v177_v33 = vrot.slane %v176_v23, 4  ;;  %v391_v37 = vrot.slane %v389_v28, 5  ;;  %v397_v38 = vrot.slane %v395_v29, 5  ;;  %v401_v39 = vrot.slane %v399_v30, 4 }
  0x17   :  { %v187_v36 = vrot.slane %v186_v27, 4  ;;  %8143 = vmatmul.msk.bf16.vlgmr.msra.gmra.mxu3 %vm1009_vm3, %v1000_v32  ;;  %v407_v42 = vrot.slane %v405_v35, 5  ;;  %v722_v44 = vshrl.u32 %v94_v31, 16 }
  0x18   :  { %v182_v41 = vsel %vm9673_vm4, %v177_v33, %v181_v19  ;;  %v392_v47 = vor.u32 %v391_v37, %v388_v34  ;;  %v402_v48 = vor.u32 %v401_v39, %v397_v38 }
  0x19   :  { %v192_v45 = vsel %vm9673_vm4, %v187_v36, %v191_v25  ;;  %v915_v46 = vunpack.c.l.b16 %v182_v41 }
  0x1a   :  { %12 = vsyncpa [#allocation3], 0  ;;  %v916_v49 = vunpack.c.l.b16 %v192_v45  ;;  %v724_v50 = vrot.slane %v722_v44, 4  ;;  %v725_v51 = vshll.u32 %v94_v31, 16  ;;  %v731_v52 = vshll.u32 %v95_v40, 16  ;;  %s9605_s23 = smov [#allocation2]  }
  0x1b   :  { %v393_v53 = vrot.slane %v392_v47, 4  ;;  %v403_v54 = vrot.slane %v402_v48, 4  ;;  %v735_v55 = vshrl.u32 %v95_v40, 16  ;;  %v741_v56 = vshll.u32 %v134_v43, 16  ;;  %v28_v57 = vld [vmem:[%s13859_s2] sm:$0x3] }
  0x1c   :  { %v978_v58 = vpack.c.b16 %v916_v49, %v915_v46  ;;  %v727_v59 = vrot.slane %v725_v51, 5  ;;  %v733_v60 = vrot.slane %v731_v52, 5  ;;  %v80_v61 = vld [vmem:[%s13857_s0 + $0xe4] sm:$0xf]  ;;  %v81_v62 = vld [vmem:[%s13857_s0 + $0xe8] sm:$0xf] }
  0x1d   :  { %v398_v63 = vsel %vm9673_vm4, %v393_v53, %v397_v38  ;;  %v408_v0 = vsel %vm9673_vm4, %v403_v54, %v407_v42  ;;  %v737_v1 = vrot.slane %v735_v55, 4  ;;  %v743_v2 = vrot.slane %v741_v56, 5  ;;  %v127_v3 = vld [vmem:[%s13857_s0 + $0xec] sm:$0x1]  ;;  %v50_v16 = vld [vmem:[%s13857_s0 + $0x18] sm:$0xf] }
  0x1e   :  { %v933_v4 = vunpack.c.l.b16 %v398_v63  ;;  %v934_v5 = vunpack.c.l.b16 %v408_v0  ;;  %v728_v6 = vor.u32 %v727_v59, %v724_v50  ;;  %v1536_v7 = vsel %vm1106_vm0, %v28_v57, 0  ;;  %v51_v21 = vld [vmem:[%s13857_s0 + $0x1c] sm:$0xf]  ;;  %v112_v26 = vld [vmem:[%s13857_s0 + $0x20] sm:$0x1]  ;;  %s8101_s24 = sshll.u32 %s9605_s23, 4  ;;  %s8102_s24 = int_to_ptr.vmem [resolvable:$true] %s8101_s24 }
  0x1f   :  { %v738_v8 = vor.u32 %v737_v1, %v733_v60  ;;  %1545 = vmatpush.bf16.msrb.mxu1 %v1536_v7  ;;  %v554_v9 = vshrl.u32 %v80_v61, 16  ;;  %v557_v10 = vshll.u32 %v80_v61, 16  ;;  %v563_v11 = vshll.u32 %v81_v62, 16  ;;  %v68_v35 = vld [vmem:[%s13857_s0 + $0x84] sm:$0xf]  ;;  %s8103_s27 = sshll.u32 %s13864_s7, 4  ;;  %s8104_s27 = int_to_ptr.hbm [resolvable:$true] %s8103_s27 }
  0x20   :  { %8121 = vmatmul.msk.bf16.gmra.mxu0 %vm1009_vm3, %v978_v58  ;;  %v987_v12 = vpack.c.b16 %v934_v5, %v933_v4  ;;  %v729_v13 = vrot.slane %v728_v6, 4  ;;  %v567_v14 = vshrl.u32 %v81_v62, 16  ;;  %v573_v15 = vshll.u32 %v127_v3, 16  ;;  %v69_v44 = vld [vmem:[%s13857_s0 + $0x88] sm:$0xf] }
  0x21   :  { %v739_v17 = vrot.slane %v738_v8, 4  ;;  %v556_v18 = vrot.slane %v554_v9, 4  ;;  %v559_v19 = vrot.slane %v557_v10, 5  ;;  %v565_v20 = vrot.slane %v563_v11, 5  ;;  %v121_v48 = vld [vmem:[%s13857_s0 + $0x8c] sm:$0x1] }
  0x22   :  { %v734_v22 = vsel %vm9673_vm4, %v729_v13, %v733_v60  ;;  %v569_v23 = vrot.slane %v567_v14, 4  ;;  %v575_v25 = vrot.slane %v573_v15, 5  ;;  %8130 = vmatmul.msk.bf16.gmra.mxu1 %vm1009_vm3, %v987_v12  ;;  %v194_v30 = vshrl.u32 %v50_v16, 16  ;;  %v96_v62 = vld [vmem:[%s13857_s0 + $0x144] sm:$0xf] }
  0x23   :  { %v744_v27 = vsel %vm9673_vm4, %v739_v17, %v743_v2  ;;  %v961_v28 = vunpack.c.l.b16 %v734_v22  ;;  %v560_v29 = vor.u32 %v559_v19, %v556_v18  ;;  %v197_v33 = vshll.u32 %v50_v16, 16  ;;  %v97_v2 = vld [vmem:[%s13857_s0 + $0x148] sm:$0xf]  ;;  %v135_v7 = vld [vmem:[%s13857_s0 + $0x14c] sm:$0x1] }
  0x24   :  { %v962_v31 = vunpack.c.l.b16 %v744_v27  ;;  %v570_v32 = vor.u32 %v569_v23, %v565_v20  ;;  %v203_v34 = vshll.u32 %v51_v21, 16  ;;  %v196_v37 = vrot.slane %v194_v30, 4  ;;  %v128_v30 = vld [vmem:[%s13857_s0 + $0xf8] sm:$0x1] }
  0x25   :  { %v561_v36 = vrot.slane %v560_v29, 4  ;;  %v207_v38 = vshrl.u32 %v51_v21, 16  ;;  %v213_v39 = vshll.u32 %v112_v26, 16  ;;  %v199_v42 = vrot.slane %v197_v33, 5  ;;  %v83_v26 = vld [vmem:[%s13857_s0 + $0xf4] sm:$0xf] }
  0x26   :  { %v1001_v40 = vpack.c.b16 %v962_v31, %v961_v28  ;;  %v571_v41 = vrot.slane %v570_v32, 4  ;;  %v205_v43 = vrot.slane %v203_v34, 5  ;;  %v410_v49 = vshrl.u32 %v68_v35, 16 }
  0x27   :  { %v566_v45 = vsel %vm9673_vm4, %v561_v36, %v565_v20  ;;  %v209_v46 = vrot.slane %v207_v38, 4  ;;  %v215_v47 = vrot.slane %v213_v39, 5  ;;  %v200_v52 = vor.u32 %v199_v42, %v196_v37  ;;  %v82_v20 = vld [vmem:[%s13857_s0 + $0xf0] sm:$0xf]  ;;  %v52_v39 = vld [vmem:[%s13857_s0 + $0x24] sm:$0xf] }
  0x28   :  { %8144 = vmatmul.msk.bf16.gmra.mxu3 %vm1009_vm3, %v1001_v40  ;;  %v576_v50 = vsel %vm9673_vm4, %v571_v41, %v575_v25  ;;  %v947_v51 = vunpack.c.l.b16 %v566_v45  ;;  %v413_v53 = vshll.u32 %v68_v35, 16  ;;  %v412_v56 = vrot.slane %v410_v49, 4 }
  0x29   :  { %v948_v54 = vunpack.c.l.b16 %v576_v50  ;;  %v210_v55 = vor.u32 %v209_v46, %v205_v43  ;;  %v419_v57 = vshll.u32 %v69_v44, 16  ;;  %v201_v58 = vrot.slane %v200_v52, 4  ;;  %v53_v52 = vld [vmem:[%s13857_s0 + $0x28] sm:$0xf] }
  0x2a   :  { %v415_v59 = vrot.slane %v413_v53, 5  ;;  %v423_v60 = vshrl.u32 %v69_v44, 16  ;;  %v429_v61 = vshll.u32 %v121_v48, 16  ;;  %v746_v10 = vshrl.u32 %v96_v62, 16  ;;  %v8113_v44 = vld [vmem:[%s13859_s2 + $0x4] sm:$0x3] }
  0x2b   :  { %v994_v63 = vpack.c.b16 %v948_v54, %v947_v51  ;;  %v211_v0 = vrot.slane %v210_v55, 4  ;;  %v421_v1 = vrot.slane %v419_v57, 5  ;;  %v206_v3 = vsel %vm9673_vm4, %v201_v58, %v205_v43  ;;  %v113_v53 = vld [vmem:[%s13857_s0 + $0x2c] sm:$0x1] }
  0x2c   :  { %v416_v4 = vor.u32 %v415_v59, %v412_v56  ;;  %v425_v5 = vrot.slane %v423_v60, 4  ;;  %v431_v6 = vrot.slane %v429_v61, 5  ;;  %v917_v9 = vunpack.c.l.b16 %v206_v3 }
  0x2d   :  { %8137 = vmatmul.msk.bf16.vlgmr.msra.gmra.mxu2 %vm1009_vm3, %v994_v63  ;;  %v216_v8 = vsel %vm9673_vm4, %v211_v0, %v215_v47  ;;  %v749_v11 = vshll.u32 %v96_v62, 16  ;;  %v755_v15 = vshll.u32 %v97_v2, 16  ;;  %v748_v16 = vrot.slane %v746_v10, 4 }
  0x2e   :  { %v918_v12 = vunpack.c.l.b16 %v216_v8  ;;  %v417_v13 = vrot.slane %v416_v4, 4  ;;  %v426_v14 = vor.u32 %v425_v5, %v421_v1  ;;  %v759_v18 = vshrl.u32 %v97_v2, 16  ;;  %v70_v2 = vld [vmem:[%s13857_s0 + $0x90] sm:$0xf] }
  0x2f   :  { %v751_v17 = vrot.slane %v749_v11, 5  ;;  %v765_v19 = vshll.u32 %v135_v7, 16  ;;  %v757_v25 = vrot.slane %v755_v15, 5  ;;  %v578_v33 = vshrl.u32 %v82_v20, 16  ;;  %v71_v7 = vld [vmem:[%s13857_s0 + $0x94] sm:$0xf] }
  0x30   :  { %v979_v21 = vpack.c.b16 %v918_v12, %v917_v9  ;;  %v422_v22 = vsel %vm9673_vm4, %v417_v13, %v421_v1  ;;  %v427_v23 = vrot.slane %v426_v14, 4  ;;  %v761_v29 = vrot.slane %v759_v18, 4  ;;  %v122_v12 = vld [vmem:[%s13857_s0 + $0x98] sm:$0x1] }
  0x31   :  { %v935_v27 = vunpack.c.l.b16 %v422_v22  ;;  %v752_v28 = vor.u32 %v751_v17, %v748_v16  ;;  %v767_v32 = vrot.slane %v765_v19, 5  ;;  %v581_v34 = vshll.u32 %v82_v20, 16 }
  0x32   :  { %8122 = vmatmul.msk.bf16.gmra.mxu0 %vm1009_vm3, %v979_v21  ;;  %v432_v31 = vsel %vm9673_vm4, %v427_v23, %v431_v6  ;;  %v762_v37 = vor.u32 %v761_v29, %v757_v25  ;;  %v587_v38 = vshll.u32 %v83_v26, 16  ;;  %v580_v40 = vrot.slane %v578_v33, 4 }
  0x33   :  { %v936_v35 = vunpack.c.l.b16 %v432_v31  ;;  %v753_v36 = vrot.slane %v752_v28, 4  ;;  %v583_v41 = vrot.slane %v581_v34, 5  ;;  %v591_v42 = vshrl.u32 %v83_v26, 16  ;;  %v98_v26 = vld [vmem:[%s13857_s0 + $0x150] sm:$0xf] }
  0x34   :  { %v597_v43 = vshll.u32 %v128_v30, 16  ;;  %v763_v47 = vrot.slane %v762_v37, 4  ;;  %v589_v48 = vrot.slane %v587_v38, 5  ;;  %v2223_v56 = vsel %vm1106_vm0, %v8113_v44, 0  ;;  %v99_v31 = vld [vmem:[%s13857_s0 + $0x154] sm:$0xf] }
  0x35   :  { %v988_v45 = vpack.c.b16 %v936_v35, %v935_v27  ;;  %v758_v46 = vsel %vm9673_vm4, %v753_v36, %v757_v25  ;;  %v584_v50 = vor.u32 %v583_v41, %v580_v40  ;;  %v593_v51 = vrot.slane %v591_v42, 4  ;;  %2232 = vmatpush.bf16.msrb.mxu2 %v2223_v56  ;;  %v136_v35 = vld [vmem:[%s13857_s0 + $0x158] sm:$0x1] }
  0x36   :  { %v963_v49 = vunpack.c.l.b16 %v758_v46  ;;  %v768_v54 = vsel %vm9673_vm4, %v763_v47, %v767_v32  ;;  %v599_v55 = vrot.slane %v597_v43, 5  ;;  %v218_v57 = vshrl.u32 %v52_v39, 16 }
  0x37   :  { %8131 = vmatmul.msk.bf16.gmra.mxu1 %vm1009_vm3, %v988_v45  ;;  %v964_v58 = vunpack.c.l.b16 %v768_v54  ;;  %v585_v59 = vrot.slane %v584_v50, 4  ;;  %v594_v60 = vor.u32 %v593_v51, %v589_v48  ;;  %v221_v61 = vshll.u32 %v52_v39, 16 }
  0x38   :  { %v220_v62 = vrot.slane %v218_v57, 4  ;;  %v227_v63 = vshll.u32 %v53_v52, 16  ;;  %v231_v0 = vshrl.u32 %v53_v52, 16  ;;  %v237_v1 = vshll.u32 %v113_v53, 16  ;;  %v85_v53 = vld [vmem:[%s13857_s0 + $0x100] sm:$0xf] }
  0x39   :  { %v1002_v3 = vpack.c.b16 %v964_v58, %v963_v49  ;;  %v590_v4 = vsel %vm9673_vm4, %v585_v59, %v589_v48  ;;  %v595_v5 = vrot.slane %v594_v60, 4  ;;  %v223_v6 = vrot.slane %v221_v61, 5  ;;  %v84_v48 = vld [vmem:[%s13857_s0 + $0xfc] sm:$0xf]  ;;  %v129_v57 = vld [vmem:[%s13857_s0 + $0x104] sm:$0x1] }
  0x3a   :  { %v949_v8 = vunpack.c.l.b16 %v590_v4  ;;  %v229_v9 = vrot.slane %v227_v63, 5  ;;  %v233_v10 = vrot.slane %v231_v0, 4  ;;  %v239_v11 = vrot.slane %v237_v1, 5 }
  0x3b   :  { %8145 = vmatmul.msk.bf16.gmra.mxu3 %vm1009_vm3, %v1002_v3  ;;  %v600_v13 = vsel %vm9673_vm4, %v595_v5, %v599_v55  ;;  %v224_v14 = vor.u32 %v223_v6, %v220_v62  ;;  %v434_v15 = vshrl.u32 %v70_v2, 16  ;;  %v437_v16 = vshll.u32 %v70_v2, 16  ;;  %v54_v2 = vld [vmem:[%s13857_s0 + $0x30] sm:$0xf] }
  0x3c   :  { %v950_v17 = vunpack.c.l.b16 %v600_v13  ;;  %v234_v18 = vor.u32 %v233_v10, %v229_v9  ;;  %v443_v19 = vshll.u32 %v71_v7, 16  ;;  %v447_v20 = vshrl.u32 %v71_v7, 16 }
  0x3d   :  { %v225_v21 = vrot.slane %v224_v14, 4  ;;  %v436_v22 = vrot.slane %v434_v15, 4  ;;  %v439_v23 = vrot.slane %v437_v16, 5  ;;  %v453_v25 = vshll.u32 %v122_v12, 16  ;;  %v114_v14 = vld [vmem:[%s13857_s0 + $0x38] sm:$0x1] }
  0x3e   :  { %v995_v27 = vpack.c.b16 %v950_v17, %v949_v8  ;;  %v235_v28 = vrot.slane %v234_v18, 4  ;;  %v445_v29 = vrot.slane %v443_v19, 5  ;;  %v449_v30 = vrot.slane %v447_v20, 4  ;;  %v72_v20 = vld [vmem:[%s13857_s0 + $0x9c] sm:$0xf] }
  0x3f   :  { %v230_v32 = vsel %vm9673_vm4, %v225_v21, %v229_v9  ;;  %v440_v33 = vor.u32 %v439_v23, %v436_v22  ;;  %v455_v34 = vrot.slane %v453_v25, 5  ;;  %v770_v39 = vshrl.u32 %v98_v26, 16 }
  0x40   :  { %8138 = vmatmul.msk.bf16.gmra.mxu2 %vm1009_vm3, %v995_v27  ;;  %v240_v36 = vsel %vm9673_vm4, %v235_v28, %v239_v11  ;;  %v919_v37 = vunpack.c.l.b16 %v230_v32  ;;  %v450_v38 = vor.u32 %v449_v30, %v445_v29  ;;  %v773_v42 = vshll.u32 %v98_v26, 16  ;;  %v55_v11 = vld [vmem:[%s13857_s0 + $0x34] sm:$0xf] }
  0x41   :  { %v920_v40 = vunpack.c.l.b16 %v240_v36  ;;  %v441_v41 = vrot.slane %v440_v33, 4  ;;  %v779_v43 = vshll.u32 %v99_v31, 16  ;;  %v772_v45 = vrot.slane %v770_v39, 4  ;;  %v73_v33 = vld [vmem:[%s13857_s0 + $0xa0] sm:$0xf] }
  0x42   :  { %v451_v44 = vrot.slane %v450_v38, 4  ;;  %v783_v46 = vshrl.u32 %v99_v31, 16  ;;  %v789_v47 = vshll.u32 %v136_v35, 16  ;;  %v775_v51 = vrot.slane %v773_v42, 5  ;;  %v123_v39 = vld [vmem:[%s13857_s0 + $0xa4] sm:$0x1] }
  0x43   :  { %v980_v49 = vpack.c.b16 %v920_v40, %v919_v37  ;;  %v446_v50 = vsel %vm9673_vm4, %v441_v41, %v445_v29  ;;  %v781_v52 = vrot.slane %v779_v43, 5  ;;  %v602_v61 = vshrl.u32 %v84_v48, 16 }
  0x44   :  { %v456_v54 = vsel %vm9673_vm4, %v451_v44, %v455_v34  ;;  %v937_v55 = vunpack.c.l.b16 %v446_v50  ;;  %v785_v56 = vrot.slane %v783_v46, 4  ;;  %v776_v59 = vor.u32 %v775_v51, %v772_v45 }
  0x45   :  { %8123 = vmatmul.msk.bf16.gmra.mxu0 %vm1009_vm3, %v980_v49  ;;  %v938_v58 = vunpack.c.l.b16 %v456_v54  ;;  %v791_v60 = vrot.slane %v789_v47, 5  ;;  %v605_v63 = vshll.u32 %v84_v48, 16  ;;  %v611_v0 = vshll.u32 %v85_v53, 16  ;;  %v100_v48 = vld [vmem:[%s13857_s0 + $0x15c] sm:$0xf] }
  0x46   :  { %v786_v62 = vor.u32 %v785_v56, %v781_v52  ;;  %v615_v1 = vshrl.u32 %v85_v53, 16  ;;  %v777_v4 = vrot.slane %v776_v59, 4  ;;  %v604_v5 = vrot.slane %v602_v61, 4  ;;  %v101_v56 = vld [vmem:[%s13857_s0 + $0x160] sm:$0xf] }
  0x47   :  { %v989_v3 = vpack.c.b16 %v938_v58, %v937_v55  ;;  %v621_v6 = vshll.u32 %v129_v57, 16  ;;  %v607_v8 = vrot.slane %v605_v63, 5  ;;  %v613_v9 = vrot.slane %v611_v0, 5  ;;  %v137_v59 = vld [vmem:[%s13857_s0 + $0x164] sm:$0x1] }
  0x48   :  { %v787_v7 = vrot.slane %v786_v62, 4  ;;  %v617_v10 = vrot.slane %v615_v1, 4  ;;  %v782_v12 = vsel %vm9673_vm4, %v777_v4, %v781_v52  ;;  %v242_v15 = vshrl.u32 %v54_v2, 16 }
  0x49   :  { %8132 = vmatmul.msk.bf16.gmra.mxu1 %vm1009_vm3, %v989_v3  ;;  %v623_v13 = vrot.slane %v621_v6, 5  ;;  %v965_v17 = vunpack.c.l.b16 %v782_v12  ;;  %v608_v18 = vor.u32 %v607_v8, %v604_v5  ;;  %v245_v23 = vshll.u32 %v54_v2, 16 }
  0x4a   :  { %v792_v16 = vsel %vm9673_vm4, %v787_v7, %v791_v60  ;;  %v618_v19 = vor.u32 %v617_v10, %v613_v9  ;;  %v244_v22 = vrot.slane %v242_v15, 4  ;;  %v251_v25 = vshll.u32 %v55_v11, 16  ;;  %v86_v10 = vld [vmem:[%s13857_s0 + $0x108] sm:$0xf] }
  0x4b   :  { %v966_v21 = vunpack.c.l.b16 %v792_v16  ;;  %v609_v26 = vrot.slane %v608_v18, 4  ;;  %v255_v28 = vshrl.u32 %v55_v11, 16  ;;  %v261_v29 = vshll.u32 %v114_v14, 16  ;;  %v87_v14 = vld [vmem:[%s13857_s0 + $0x10c] sm:$0xf] }
  0x4c   :  { %v619_v27 = vrot.slane %v618_v19, 4  ;;  %v247_v31 = vrot.slane %v245_v23, 5  ;;  %v253_v32 = vrot.slane %v251_v25, 5  ;;  %v458_v34 = vshrl.u32 %v72_v20, 16  ;;  %v130_v19 = vld [vmem:[%s13857_s0 + $0x110] sm:$0x1] }
  0x4d   :  { %v1003_v30 = vpack.c.b16 %v966_v21, %v965_v17  ;;  %v614_v35 = vsel %vm9673_vm4, %v609_v26, %v613_v9  ;;  %v257_v37 = vrot.slane %v255_v28, 4  ;;  %v263_v38 = vrot.slane %v261_v29, 5  ;;  %v56_v29 = vld [vmem:[%s13857_s0 + $0x3c] sm:$0xf] }
  0x4e   :  { %v624_v36 = vsel %vm9673_vm4, %v619_v27, %v623_v13  ;;  %v951_v40 = vunpack.c.l.b16 %v614_v35  ;;  %v248_v42 = vor.u32 %v247_v31, %v244_v22  ;;  %v460_v43 = vrot.slane %v458_v34, 4  ;;  %v57_v34 = vld [vmem:[%s13857_s0 + $0x40] sm:$0xf] }
  0x4f   :  { %8146 = vmatmul.msk.bf16.gmra.mxu3 %vm1009_vm3, %v1003_v30  ;;  %v952_v41 = vunpack.c.l.b16 %v624_v36  ;;  %v258_v44 = vor.u32 %v257_v37, %v253_v32  ;;  %v461_v45 = vshll.u32 %v72_v20, 16  ;;  %v467_v46 = vshll.u32 %v73_v33, 16 }
  0x50   :  { %v471_v47 = vshrl.u32 %v73_v33, 16  ;;  %v249_v50 = vrot.slane %v248_v42, 4  ;;  %v477_v51 = vshll.u32 %v123_v39, 16  ;;  %v794_v60 = vshrl.u32 %v100_v48, 16 }
  0x51   :  { %v996_v49 = vpack.c.b16 %v952_v41, %v951_v40  ;;  %v259_v52 = vrot.slane %v258_v44, 4  ;;  %v463_v53 = vrot.slane %v461_v45, 5  ;;  %v469_v54 = vrot.slane %v467_v46, 5  ;;  %v115_v41 = vld [vmem:[%s13857_s0 + $0x44] sm:$0x1] }
  0x52   :  { %v473_v55 = vrot.slane %v471_v47, 4  ;;  %v254_v57 = vsel %vm9673_vm4, %v249_v50, %v253_v32  ;;  %v479_v58 = vrot.slane %v477_v51, 5  ;;  %v797_v61 = vshll.u32 %v100_v48, 16  ;;  %v74_v47 = vld [vmem:[%s13857_s0 + $0xa8] sm:$0xf] }
  0x53   :  { %8139 = vmatmul.msk.bf16.gmra.mxu2 %vm1009_vm3, %v996_v49  ;;  %v264_v62 = vsel %vm9673_vm4, %v259_v52, %v263_v38  ;;  %v921_v63 = vunpack.c.l.b16 %v254_v57  ;;  %v464_v0 = vor.u32 %v463_v53, %v460_v43  ;;  %v796_v3 = vrot.slane %v794_v60, 4 }
  0x54   :  { %v474_v1 = vor.u32 %v473_v55, %v469_v54  ;;  %v922_v2 = vunpack.c.l.b16 %v264_v62  ;;  %v799_v4 = vrot.slane %v797_v61, 5  ;;  %v803_v5 = vshll.u32 %v101_v56, 16 }
  0x55   :  { %v465_v6 = vrot.slane %v464_v0, 4  ;;  %v807_v8 = vshrl.u32 %v101_v56, 16  ;;  %v813_v9 = vshll.u32 %v137_v59, 16  ;;  %v626_v23 = vshrl.u32 %v86_v10, 16  ;;  %v75_v59 = vld [vmem:[%s13857_s0 + $0xac] sm:$0xf] }
  0x56   :  { %v475_v7 = vrot.slane %v474_v1, 4  ;;  %v981_v11 = vpack.c.b16 %v922_v2, %v921_v63  ;;  %v800_v12 = vor.u32 %v799_v4, %v796_v3  ;;  %v805_v13 = vrot.slane %v803_v5, 5  ;;  %v124_v0 = vld [vmem:[%s13857_s0 + $0xb0] sm:$0x1] }
  0x57   :  { %v470_v15 = vsel %vm9673_vm4, %v465_v6, %v469_v54  ;;  %v809_v17 = vrot.slane %v807_v8, 4  ;;  %v815_v18 = vrot.slane %v813_v9, 5  ;;  %v629_v26 = vshll.u32 %v86_v10, 16 }
  0x58   :  { %v480_v16 = vsel %vm9673_vm4, %v475_v7, %v479_v58  ;;  %8124 = vmatmul.msk.bf16.gmra.mxu0 %vm1009_vm3, %v981_v11  ;;  %v939_v20 = vunpack.c.l.b16 %v470_v15  ;;  %v801_v22 = vrot.slane %v800_v12, 4  ;;  %v635_v27 = vshll.u32 %v87_v14, 16 }
  0x59   :  { %v940_v21 = vunpack.c.l.b16 %v480_v16  ;;  %v810_v25 = vor.u32 %v809_v17, %v805_v13  ;;  %v639_v28 = vshrl.u32 %v87_v14, 16  ;;  %v628_v32 = vrot.slane %v626_v23, 4 }
  0x5a   :  { %v806_v31 = vsel %vm9673_vm4, %v801_v22, %v805_v13  ;;  %v645_v33 = vshll.u32 %v130_v19, 16  ;;  %v631_v36 = vrot.slane %v629_v26, 5  ;;  %v637_v37 = vrot.slane %v635_v27, 5  ;;  %v102_v13 = vld [vmem:[%s13857_s0 + $0x168] sm:$0xf] }
  0x5b   :  { %v990_v30 = vpack.c.b16 %v940_v21, %v939_v20  ;;  %v811_v35 = vrot.slane %v810_v25, 4  ;;  %v967_v38 = vunpack.c.l.b16 %v806_v31  ;;  %v641_v39 = vrot.slane %v639_v28, 4  ;;  %v138_v19 = vld [vmem:[%s13857_s0 + $0x170] sm:$0x1] }
  0x5c   :  { %v647_v40 = vrot.slane %v645_v33, 5  ;;  %v266_v42 = vshrl.u32 %v56_v29, 16  ;;  %v632_v44 = vor.u32 %v631_v36, %v628_v32  ;;  %v269_v45 = vshll.u32 %v56_v29, 16  ;;  %v88_v33 = vld [vmem:[%s13857_s0 + $0x114] sm:$0xf] }
  0x5d   :  { %8133 = vmatmul.msk.bf16.gmra.mxu1 %vm1009_vm3, %v990_v30  ;;  %v816_v43 = vsel %vm9673_vm4, %v811_v35, %v815_v18  ;;  %v275_v46 = vshll.u32 %v57_v34, 16  ;;  %v642_v49 = vor.u32 %v641_v39, %v637_v37  ;;  %v279_v51 = vshrl.u32 %v57_v34, 16  ;;  %v103_v18 = vld [vmem:[%s13857_s0 + $0x16c] sm:$0xf] }
  0x5e   :  { %v968_v48 = vunpack.c.l.b16 %v816_v43  ;;  %v268_v50 = vrot.slane %v266_v42, 4  ;;  %v633_v52 = vrot.slane %v632_v44, 4  ;;  %v271_v53 = vrot.slane %v269_v45, 5  ;;  %v131_v45 = vld [vmem:[%s13857_s0 + $0x11c] sm:$0x1] }
  0x5f   :  { %v277_v54 = vrot.slane %v275_v46, 5  ;;  %v285_v55 = vshll.u32 %v115_v41, 16  ;;  %v643_v57 = vrot.slane %v642_v49, 4  ;;  %v281_v58 = vrot.slane %v279_v51, 4 }
  0x60   :  { %v1004_v56 = vpack.c.b16 %v968_v48, %v967_v38  ;;  %v482_v60 = vshrl.u32 %v74_v47, 16  ;;  %v638_v61 = vsel %vm9673_vm4, %v633_v52, %v637_v37  ;;  %v272_v62 = vor.u32 %v271_v53, %v268_v50  ;;  %v89_v38 = vld [vmem:[%s13857_s0 + $0x118] sm:$0xf] }
  0x61   :  { %v287_v63 = vrot.slane %v285_v55, 5  ;;  %v485_v1 = vshll.u32 %v74_v47, 16  ;;  %v648_v2 = vsel %vm9673_vm4, %v643_v57, %v647_v40  ;;  %v953_v3 = vunpack.c.l.b16 %v638_v61 }
  0x62   :  { %8147 = vmatmul.msk.bf16.gmra.mxu3 %vm1009_vm3, %v1004_v56  ;;  %v282_v4 = vor.u32 %v281_v58, %v277_v54  ;;  %v484_v5 = vrot.slane %v482_v60, 4  ;;  %v954_v6 = vunpack.c.l.b16 %v648_v2  ;;  %v273_v7 = vrot.slane %v272_v62, 4  ;;  %v9989_v60 = vld [vmem:[%s13857_s0 + $0x8] sm:$0x1]  ;;  %v10002_v2 = vld [vmem:[%s13857_s0 + $0x50] sm:$0x1] }
  0x63   :  { %v487_v8 = vrot.slane %v485_v1, 5  ;;  %v491_v9 = vshll.u32 %v75_v59, 16  ;;  %v495_v11 = vshrl.u32 %v75_v59, 16  ;;  %v501_v12 = vshll.u32 %v124_v0, 16  ;;  %v58_v59 = vld [vmem:[%s13857_s0 + $0x48] sm:$0xf] }
  0x64   :  { %v283_v10 = vrot.slane %v282_v4, 4  ;;  %v997_v14 = vpack.c.b16 %v954_v6, %v953_v3  ;;  %v278_v15 = vsel %vm9673_vm4, %v273_v7, %v277_v54  ;;  %v818_v27 = vshrl.u32 %v102_v13, 16  ;;  %v9997_v1 = vld [vmem:[%s13857_s0 + $0x4c] sm:$0xf] }
  0x65   :  { %v488_v16 = vor.u32 %v487_v8, %v484_v5  ;;  %v493_v17 = vrot.slane %v491_v9, 5  ;;  %v923_v21 = vunpack.c.l.b16 %v278_v15  ;;  %v497_v22 = vrot.slane %v495_v11, 4 }
  0x66   :  { %v288_v20 = vsel %vm9673_vm4, %v283_v10, %v287_v63  ;;  %v503_v23 = vrot.slane %v501_v12, 5  ;;  %8140 = vmatmul.msk.bf16.gmra.mxu2 %vm1009_vm3, %v997_v14  ;;  %v821_v28 = vshll.u32 %v102_v13, 16  ;;  %v827_v30 = vshll.u32 %v103_v18, 16 }
  0x67   :  { %v924_v25 = vunpack.c.l.b16 %v288_v20  ;;  %v489_v26 = vrot.slane %v488_v16, 4  ;;  %v498_v29 = vor.u32 %v497_v22, %v493_v17  ;;  %v831_v31 = vshrl.u32 %v103_v18, 16 }
  0x68   :  { %v837_v32 = vshll.u32 %v138_v19, 16  ;;  %v820_v36 = vrot.slane %v818_v27, 4  ;;  %v823_v37 = vrot.slane %v821_v28, 5  ;;  %v829_v40 = vrot.slane %v827_v30, 5  ;;  %v76_v19 = vld [vmem:[%s13857_s0 + $0xb4] sm:$0xf] }
  0x69   :  { %v982_v34 = vpack.c.b16 %v924_v25, %v923_v21  ;;  %v494_v35 = vsel %vm9673_vm4, %v489_v26, %v493_v17  ;;  %v499_v39 = vrot.slane %v498_v29, 4  ;;  %v833_v41 = vrot.slane %v831_v31, 4  ;;  %v125_v25 = vld [vmem:[%s13857_s0 + $0xbc] sm:$0x1] }
  0x6a   :  { %v941_v42 = vunpack.c.l.b16 %v494_v35  ;;  %v824_v43 = vor.u32 %v823_v37, %v820_v36  ;;  %v839_v44 = vrot.slane %v837_v32, 5  ;;  %v650_v46 = vshrl.u32 %v88_v33, 16 }
  0x6b   :  { %8125 = vmatmul.msk.bf16.gmra.mxu0 %vm1009_vm3, %v982_v34  ;;  %v504_v47 = vsel %vm9673_vm4, %v499_v39, %v503_v23  ;;  %v834_v48 = vor.u32 %v833_v41, %v829_v40  ;;  %v653_v49 = vshll.u32 %v88_v33, 16  ;;  %v659_v50 = vshll.u32 %v89_v38, 16  ;;  %v77_v23 = vld [vmem:[%s13857_s0 + $0xb8] sm:$0xf] }
  0x6c   :  { %v942_v51 = vunpack.c.l.b16 %v504_v47  ;;  %v825_v52 = vrot.slane %v824_v43, 4  ;;  %v652_v53 = vrot.slane %v650_v46, 4  ;;  %v663_v54 = vshrl.u32 %v89_v38, 16  ;;  %v105_v46 = vld [vmem:[%s13857_s0 + $0x178] sm:$0xf] }
  0x6d   :  { %v835_v55 = vrot.slane %v834_v48, 4  ;;  %v655_v56 = vrot.slane %v653_v49, 5  ;;  %v661_v57 = vrot.slane %v659_v50, 5  ;;  %v669_v58 = vshll.u32 %v131_v45, 16  ;;  %v139_v47 = vld [vmem:[%s13857_s0 + $0x17c] sm:$0x1] }
  0x6e   :  { %v1811_v61 = vrot.slane %v9989_v60, 5  ;;  %v991_v62 = vpack.c.b16 %v942_v51, %v941_v42  ;;  %v830_v63 = vsel %vm9673_vm4, %v825_v52, %v829_v40  ;;  %v665_v0 = vrot.slane %v663_v54, 4  ;;  %v104_v42 = vld [vmem:[%s13857_s0 + $0x174] sm:$0xf] }
  0x6f   :  { %v840_v3 = vsel %vm9673_vm4, %v835_v55, %v839_v44  ;;  %v969_v4 = vunpack.c.l.b16 %v830_v63  ;;  %v656_v5 = vor.u32 %v655_v56, %v652_v53  ;;  %v671_v6 = vrot.slane %v669_v58, 5  ;;  %v141_v60 = vld [vmem:[%s13857_s0 + $0x194] sm:$0x1] }
  0x70   :  { %8134 = vmatmul.msk.bf16.gmra.mxu1 %vm1009_vm3, %v991_v62  ;;  %v970_v7 = vunpack.c.l.b16 %v840_v3  ;;  %v666_v8 = vor.u32 %v665_v0, %v661_v57  ;;  %v290_v9 = vshrl.u32 %v58_v59, 16  ;;  %v293_v10 = vshll.u32 %v58_v59, 16 }
  0x71   :  { %v657_v11 = vrot.slane %v656_v5, 4  ;;  %v299_v12 = vshll.u32 %v9997_v1, 16  ;;  %v303_v13 = vshrl.u32 %v9997_v1, 16  ;;  %v309_v14 = vshll.u32 %v10002_v2, 16 }
  0x72   :  { %v1005_v15 = vpack.c.b16 %v970_v7, %v969_v4  ;;  %v667_v16 = vrot.slane %v666_v8, 4  ;;  %v292_v17 = vrot.slane %v290_v9, 4  ;;  %v295_v18 = vrot.slane %v293_v10, 5  ;;  %v90_v4 = vld [vmem:[%s13857_s0 + $0x120] sm:$0xf] }
  0x73   :  { %v662_v20 = vsel %vm9673_vm4, %v657_v11, %v661_v57  ;;  %v301_v21 = vrot.slane %v299_v12, 5  ;;  %v305_v22 = vrot.slane %v303_v13, 4  ;;  %v311_v29 = vrot.slane %v309_v14, 5  ;;  %v91_v8 = vld [vmem:[%s13857_s0 + $0x124] sm:$0xf] }
  0x74   :  { %8148 = vmatmul.msk.bf16.gmra.mxu3 %vm1009_vm3, %v1005_v15  ;;  %v672_v26 = vsel %vm9673_vm4, %v667_v16, %v671_v6  ;;  %v955_v27 = vunpack.c.l.b16 %v662_v20  ;;  %v296_v28 = vor.u32 %v295_v18, %v292_v17  ;;  %v506_v32 = vshrl.u32 %v76_v19, 16  ;;  %v132_v9 = vld [vmem:[%s13857_s0 + $0x128] sm:$0x1] }
  0x75   :  { %v956_v30 = vunpack.c.l.b16 %v672_v26  ;;  %v306_v31 = vor.u32 %v305_v22, %v301_v21  ;;  %v509_v33 = vshll.u32 %v76_v19, 16  ;;  %v515_v35 = vshll.u32 %v77_v23, 16 }
  0x76   :  { %v297_v34 = vrot.slane %v296_v28, 4  ;;  %v519_v36 = vshrl.u32 %v77_v23, 16  ;;  %v525_v37 = vshll.u32 %v125_v25, 16  ;;  %v508_v40 = vrot.slane %v506_v32, 4  ;;  %v10065_v32 = vld [vmem:[%s13857_s0 + $0x5c] sm:$0x1] }
  0x77   :  { %v998_v38 = vpack.c.b16 %v956_v30, %v955_v27  ;;  %v307_v39 = vrot.slane %v306_v31, 4  ;;  %v511_v41 = vrot.slane %v509_v33, 5  ;;  %v517_v44 = vrot.slane %v515_v35, 5  ;;  %v60_v27 = vld [vmem:[%s13857_s0 + $0x54] sm:$0xf] }
  0x78   :  { %v302_v43 = vsel %vm9673_vm4, %v297_v34, %v301_v21  ;;  %v521_v45 = vrot.slane %v519_v36, 4  ;;  %v527_v51 = vrot.slane %v525_v37, 5  ;;  %v842_v54 = vshrl.u32 %v104_v42, 16  ;;  %v10060_v31 = vld [vmem:[%s13857_s0 + $0x58] sm:$0xf] }
  0x79   :  { %8141 = vmatmul.msk.bf16.gmra.mxu2 %vm1009_vm3, %v998_v38  ;;  %v312_v48 = vsel %vm9673_vm4, %v307_v39, %v311_v29  ;;  %v925_v49 = vunpack.c.l.b16 %v302_v43  ;;  %v512_v50 = vor.u32 %v511_v41, %v508_v40  ;;  %v845_v55 = vshll.u32 %v104_v42, 16 }
  0x7a   :  { %v926_v52 = vunpack.c.l.b16 %v312_v48  ;;  %v522_v53 = vor.u32 %v521_v45, %v517_v44  ;;  %v851_v57 = vshll.u32 %v105_v46, 16  ;;  %v855_v58 = vshrl.u32 %v105_v46, 16 }
  0x7b   :  { %v513_v56 = vrot.slane %v512_v50, 4  ;;  %v861_v59 = vshll.u32 %v139_v47, 16  ;;  %v844_v0 = vrot.slane %v842_v54, 4  ;;  %v847_v3 = vrot.slane %v845_v55, 5  ;;  %v126_v54 = vld [vmem:[%s13857_s0 + $0xe0] sm:$0x1] }
  0x7c   :  { %v983_v62 = vpack.c.b16 %v926_v52, %v925_v49  ;;  %v523_v63 = vrot.slane %v522_v53, 4  ;;  %v853_v6 = vrot.slane %v851_v57, 5  ;;  %v857_v7 = vrot.slane %v855_v58, 4  ;;  %v78_v49 = vld [vmem:[%s13857_s0 + $0xd8] sm:$0xf] }
  0x7d   :  { %v518_v5 = vsel %vm9673_vm4, %v513_v56, %v517_v44  ;;  %v848_v12 = vor.u32 %v847_v3, %v844_v0  ;;  %v863_v13 = vrot.slane %v861_v59, 5  ;;  %v674_v16 = vshrl.u32 %v90_v4, 16  ;;  %v79_v53 = vld [vmem:[%s13857_s0 + $0xdc] sm:$0xf] }
  0x7e   :  { %8126 = vmatmul.msk.bf16.gmra.mxu0 %vm1009_vm3, %v983_v62  ;;  %v528_v10 = vsel %vm9673_vm4, %v523_v63, %v527_v51  ;;  %v943_v11 = vunpack.c.l.b16 %v518_v5  ;;  %v858_v15 = vor.u32 %v857_v7, %v853_v6  ;;  %v677_v17 = vshll.u32 %v90_v4, 16 }
  0x7f   :  { %v944_v14 = vunpack.c.l.b16 %v528_v10  ;;  %v849_v18 = vrot.slane %v848_v12, 4  ;;  %v683_v19 = vshll.u32 %v91_v8, 16  ;;  %v687_v20 = vshrl.u32 %v91_v8, 16  ;;  %v106_v12 = vld [vmem:[%s13857_s0 + $0x180] sm:$0xf] }
  0x80   :  { %v693_v21 = vshll.u32 %v132_v9, 16  ;;  %v859_v23 = vrot.slane %v858_v15, 4  ;;  %v676_v25 = vrot.slane %v674_v16, 4  ;;  %v679_v26 = vrot.slane %v677_v17, 5  ;;  %v107_v16 = vld [vmem:[%s13857_s0 + $0x184] sm:$0xf] }
  0x81   :  { %v992_v22 = vpack.c.b16 %v944_v14, %v943_v11  ;;  %v854_v28 = vsel %vm9673_vm4, %v849_v18, %v853_v6  ;;  %v685_v29 = vrot.slane %v683_v19, 5  ;;  %v689_v30 = vrot.slane %v687_v20, 4  ;;  %v140_v17 = vld [vmem:[%s13857_s0 + $0x188] sm:$0x1] }
  0x82   :  { %v864_v33 = vsel %vm9673_vm4, %v859_v23, %v863_v13  ;;  %v971_v34 = vunpack.c.l.b16 %v854_v28  ;;  %v680_v35 = vor.u32 %v679_v26, %v676_v25  ;;  %v695_v36 = vrot.slane %v693_v21, 5 }
  0x83   :  { %8135 = vmatmul.msk.bf16.gmra.mxu1 %vm1009_vm3, %v992_v22  ;;  %v972_v37 = vunpack.c.l.b16 %v864_v33  ;;  %v690_v38 = vor.u32 %v689_v30, %v685_v29  ;;  %v314_v39 = vshrl.u32 %v60_v27, 16  ;;  %v317_v40 = vshll.u32 %v60_v27, 16 }
  0x84   :  { %v681_v41 = vrot.slane %v680_v35, 4  ;;  %v323_v42 = vshll.u32 %v10060_v31, 16  ;;  %v327_v43 = vshrl.u32 %v10060_v31, 16  ;;  %v333_v44 = vshll.u32 %v10065_v32, 16 }
  0x85   :  { %v1006_v45 = vpack.c.b16 %v972_v37, %v971_v34  ;;  %v691_v46 = vrot.slane %v690_v38, 4  ;;  %v316_v47 = vrot.slane %v314_v39, 4  ;;  %v319_v48 = vrot.slane %v317_v40, 5 }
  0x86   :  { %v686_v50 = vsel %vm9673_vm4, %v681_v41, %v685_v29  ;;  %v325_v51 = vrot.slane %v323_v42, 5  ;;  %v329_v52 = vrot.slane %v327_v43, 4  ;;  %v335_v58 = vrot.slane %v333_v44, 5  ;;  %v1707_v41 = vld [vmem:[%s13857_s0] sm:$0xe] }
  0x87   :  { %8149 = vmatmul.msk.bf16.gmra.mxu3 %vm1009_vm3, %v1006_v45  ;;  %v696_v55 = vsel %vm9673_vm4, %v691_v46, %v695_v36  ;;  %v957_v56 = vunpack.c.l.b16 %v686_v50  ;;  %v320_v57 = vor.u32 %v319_v48, %v316_v47  ;;  %v530_v63 = vshrl.u32 %v78_v49, 16  ;;  %v62_v42 = vld [vmem:[%s13857_s0 + $0x60] sm:$0xf]  ;;  %v10119_v47 = vld [vmem:[%s13857_s0 + $0x64] sm:$0xf] }
  0x88   :  { %v958_v59 = vunpack.c.l.b16 %v696_v55  ;;  %v330_v62 = vor.u32 %v329_v52, %v325_v51  ;;  %v533_v0 = vshll.u32 %v78_v49, 16  ;;  %v539_v4 = vshll.u32 %v79_v53, 16 }
  0x89   :  { %v321_v3 = vrot.slane %v320_v57, 4  ;;  %v543_v5 = vshrl.u32 %v79_v53, 16  ;;  %v549_v6 = vshll.u32 %v126_v54, 16  ;;  %v532_v10 = vrot.slane %v530_v63, 4  ;;  %v9455_v54 = vld [vmem:[%s13857_s0 + $0x4] sm:$0xf] }
  0x8a   :  { %v999_v8 = vpack.c.b16 %v958_v59, %v957_v56  ;;  %v331_v9 = vrot.slane %v330_v62, 4  ;;  %v535_v11 = vrot.slane %v533_v0, 5  ;;  %v541_v14 = vrot.slane %v539_v4, 5 }
  0x8b   :  { %v326_v13 = vsel %vm9673_vm4, %v321_v3, %v325_v51  ;;  %v545_v15 = vrot.slane %v543_v5, 4  ;;  %v551_v21 = vrot.slane %v549_v6, 5  ;;  %v866_v26 = vshrl.u32 %v106_v12, 16  ;;  %v10140_v5 = vld [vmem:[%s13857_s0 + $0x68] sm:$0x1] }
  0x8c   :  { %8142 = vmatmul.msk.bf16.gmra.mxu2 %vm1009_vm3, %v999_v8  ;;  %v336_v18 = vsel %vm9673_vm4, %v331_v9, %v335_v58  ;;  %v927_v19 = vunpack.c.l.b16 %v326_v13  ;;  %v536_v20 = vor.u32 %v535_v11, %v532_v10  ;;  %v869_v27 = vshll.u32 %v106_v12, 16  ;;  %v108_v12 = vld [vmem:[%s13857_s0 + $0x18c] sm:$0xf] }
  0x8d   :  { %v10087_v7 = vpop.f32.mrf.mxu0  ;;  %v928_v23 = vunpack.c.l.b16 %v336_v18  ;;  %v546_v25 = vor.u32 %v545_v15, %v541_v14  ;;  %v875_v29 = vshll.u32 %v107_v16, 16  ;;  %v879_v30 = vshrl.u32 %v107_v16, 16 }
  0x8e   :  { %v537_v28 = vrot.slane %v536_v20, 4  ;;  %v885_v33 = vshll.u32 %v140_v17, 16  ;;  %v868_v36 = vrot.slane %v866_v26, 4  ;;  %v871_v37 = vrot.slane %v869_v27, 5  ;;  %v109_v17 = vld [vmem:[%s13857_s0 + $0x190] sm:$0xf] }
  0x8f   :  { %v10103_v22 = vpop.f32.mrf.mxu1  ;;  %v984_v34 = vpack.c.b16 %v928_v23, %v927_v19  ;;  %v547_v35 = vrot.slane %v546_v25, 4  ;;  %v877_v39 = vrot.slane %v875_v29, 5  ;;  %v881_v40 = vrot.slane %v879_v30, 4 }
  0x90   :  { %v542_v38 = vsel %vm9673_vm4, %v537_v28, %v541_v14  ;;  %v872_v45 = vor.u32 %v871_v37, %v868_v36  ;;  %v887_v46 = vrot.slane %v885_v33, 5  ;;  %vm1803_vm5 = vcmask 1042432  }
  0x91   :  { %8127 = vmatmul.msk.bf16.gmra.mxu0 %vm1009_vm3, %v984_v34  ;;  %v552_v43 = vsel %vm9673_vm4, %v547_v35, %v551_v21  ;;  %v945_v44 = vunpack.c.l.b16 %v542_v38  ;;  %v882_v50 = vor.u32 %v881_v40, %v877_v39  ;;  %vm1804_vm6 = vcmask 1046532   ;;  %v1708_v38 = vld [vmem:[%s13857_s0 + $0xc] sm:$0xe] }
  0x92   :  { %v946_v49 = vunpack.c.l.b16 %v552_v43  ;;  %v873_v51 = vrot.slane %v872_v45, 4  ;;  %vm10123_vm7 = vmor %vm1803_vm5, %vm1804_vm6  ;;  %v8312_v53 = vrot.slane %v1707_v41, 9  ;;  %v1808_v55 = vrot.slane %v9455_v54, 5  ;;  %v8117_v43 = vld [vmem:[%s13859_s2 + $0xc] sm:$0x3] }
  0x93   :  { %v338_v56 = vshrl.u32 %v62_v42, 16  ;;  %v883_v58 = vrot.slane %v882_v50, 4  ;;  %v341_v59 = vshll.u32 %v62_v42, 16  ;;  %v347_v62 = vshll.u32 %v10119_v47, 16  ;;  %v8600_v50 = vld [vmem:[%s13857_s0 + $0xc] sm:$0xf] }
  0x94   :  { %v993_v57 = vpack.c.b16 %v946_v49, %v945_v44  ;;  %v878_v0 = vsel %vm9673_vm4, %v873_v51, %v877_v39  ;;  %v1809_v3 = vsel %vm10123_vm7, %v8312_v53, %v1808_v55  ;;  %v1810_v4 = vrot.slane %v1808_v55, 4  ;;  %v9456_v54 = vld [vmem:[%s13857_s0 + $0x10] sm:$0xf] }
  0x95   :  { %v10121_v48 = vpop.f32.mrf.mxu0  ;;  %v340_v6 = vrot.slane %v338_v56, 4  ;;  %v888_v8 = vsel %vm9673_vm4, %v883_v58, %v887_v46  ;;  %v973_v9 = vunpack.c.l.b16 %v878_v0  ;;  %v2030_v10 = vunpack.c.l.b16 %v1809_v3  ;;  %v9457_v56 = vld [vmem:[%s13857_s0 + $0x14] sm:$0x1] }
  0x96   :  { %8136 = vmatmul.msk.bf16.gmra.mxu1 %vm1009_vm3, %v993_v57  ;;  %v343_v11 = vrot.slane %v341_v59, 5  ;;  %v974_v13 = vunpack.c.l.b16 %v888_v8  ;;  %v1812_v14 = vsel %vm10123_vm7, %v1810_v4, %v1811_v61  ;;  %v349_v15 = vrot.slane %v347_v62, 5 }
  0x97   :  { %v10131_v63 = vpop.f32.mrf.mxu1  ;;  %v351_v16 = vshrl.u32 %v10119_v47, 16  ;;  %v2031_v19 = vunpack.c.l.b16 %v1812_v14  ;;  %v357_v21 = vshll.u32 %v10140_v5, 16  ;;  %v890_v61 = vshrl.u32 %v108_v12, 16 }
  0x98   :  { %v344_v20 = vor.u32 %v343_v11, %v340_v6  ;;  %v1007_v23 = vpack.c.b16 %v974_v13, %v973_v9  ;;  %v893_v26 = vshll.u32 %v108_v12, 16  ;;  %v899_v33 = vshll.u32 %v109_v17, 16  ;;  %v8601_v9 = vld [vmem:[%s13857_s0 + $0x10] sm:$0xf]  ;;  %v8602_v13 = vld [vmem:[%s13857_s0 + $0x14] sm:$0x1] }
  0x99   :  { %v353_v25 = vrot.slane %v351_v16, 4  ;;  %v2094_v28 = vpack.c.b16 %v2031_v19, %v2030_v10  ;;  %v359_v30 = vrot.slane %v357_v21, 5  ;;  %v892_v35 = vrot.slane %v890_v61, 4  ;;  %v9336_v19 = vld [vmem:[%s13857_s0] sm:$0xff] }
  0x9a   :  { %v10156_v18 = vpop.f32.mrf.mxu3  ;;  %v345_v29 = vrot.slane %v344_v20, 4  ;;  %8150 = vmatmul.msk.bf16.gmra.mxu3 %vm1009_vm3, %v1007_v23  ;;  %v895_v36 = vrot.slane %v893_v26, 5  ;;  %v903_v37 = vshrl.u32 %v109_v17, 16  ;;  %v901_v40 = vrot.slane %v899_v33, 5  ;;  %v8118_v26 = vld [vmem:[%s13859_s2 + $0xe] sm:$0x3] }
  0x9b   :  { %13869 = vst [vmem:[#allocation5_spill] sm:$0xff] %v10156_v18  ;;  %v354_v34 = vor.u32 %v353_v25, %v349_v15  ;;  %v909_v41 = vshll.u32 %v141_v60, 16  ;;  %v8313_v53 = vrot.slane %v1708_v38, 9  ;;  %v1815_v55 = vrot.slane %v9456_v54, 5  ;;  %v1716_v18 = vld [vmem:[%s13857_s0 + $0x6c] sm:$0xe] }
  0x9c   :  { %8344 = vmatmul.msk.bf16.vlgmr.msrb.gmra.mxu2 %vm1009_vm3, %v2094_v28  ;;  %v350_v39 = vsel %vm9673_vm4, %v345_v29, %v349_v15  ;;  %v896_v46 = vor.u32 %v895_v36, %v892_v35  ;;  %v905_v49 = vrot.slane %v903_v37, 4  ;;  %v1818_v57 = vrot.slane %v9457_v56, 5  ;;  %v8119_v35 = vld [vmem:[%s13859_s2 + $0x10] sm:$0x3]  ;;  %v9458_v56 = vld [vmem:[%s13857_s0 + $0x1c] sm:$0xf] }
  0x9d   :  { %v10162_v27 = vpop.f32.mrf.mxu0  ;;  %v355_v44 = vrot.slane %v354_v34, 4  ;;  %v929_v45 = vunpack.c.l.b16 %v350_v39  ;;  %v911_v51 = vrot.slane %v909_v41, 5  ;;  %v5409_v3 = vsel %vm1106_vm0, %v8117_v43, 0  ;;  %v8116_v34 = vld [vmem:[%s13859_s2 + $0xa] sm:$0x3] }
  0x9e   :  { %v897_v59 = vrot.slane %v896_v46, 4  ;;  %v906_v62 = vor.u32 %v905_v49, %v901_v40  ;;  %v1816_v6 = vsel %vm10123_vm7, %v8313_v53, %v1815_v55  ;;  %v1817_v8 = vrot.slane %v1815_v55, 4  ;;  %5418 = vmatpush.bf16.msra.mxu2 %v5409_v3  ;;  %v8603_v41 = vld [vmem:[%s13857_s0 + $0x18] sm:$0xf]  ;;  %v8604_v43 = vld [vmem:[%s13857_s0 + $0x1c] sm:$0xf] }
  0x9f   :  { %v10171_v42 = vpop.f32.mrf.mxu1  ;;  %v360_v58 = vsel %vm9673_vm4, %v355_v44, %v359_v30  ;;  %v3112_v10 = vshrl.u32 %v8600_v50, 16  ;;  %v3115_v14 = vshll.u32 %v8600_v50, 16  ;;  %v2032_v25 = vunpack.c.l.b16 %v1816_v6  ;;  %v1709_v55 = vld [vmem:[%s13857_s0 + $0x18] sm:$0xe] }
  0xa0   :  { %v930_v4 = vunpack.c.l.b16 %v360_v58  ;;  %v902_v11 = vsel %vm9673_vm4, %v897_v59, %v901_v40  ;;  %v907_v12 = vrot.slane %v906_v62, 4  ;;  %v1819_v20 = vsel %vm10123_vm7, %v1817_v8, %v1818_v57  ;;  %v9459_v8 = vld [vmem:[%s13857_s0 + $0x20] sm:$0x1] }
  0xa1   :  { %v975_v17 = vunpack.c.l.b16 %v902_v11  ;;  %v3114_v21 = vrot.slane %v3112_v10, 4  ;;  %v3117_v60 = vrot.slane %v3115_v14, 5  ;;  %v3121_v61 = vshll.u32 %v8601_v9, 16 }
  0xa2   :  { %v10187_v0 = vpop.f32.mrf.mxu3  ;;  %v985_v16 = vpack.c.b16 %v930_v4, %v929_v45  ;;  %v912_v23 = vsel %vm9673_vm4, %v907_v12, %v911_v51  ;;  %v2033_v29 = vunpack.c.l.b16 %v1819_v20  ;;  %v3125_v30 = vshrl.u32 %v8601_v9, 16 }
  0xa3   :  { %13870 = vst [vmem:[#allocation6_spill] sm:$0xff] %v10187_v0  ;;  %v976_v28 = vunpack.c.l.b16 %v912_v23  ;;  %v3131_v33 = vshll.u32 %v8602_v13, 16  ;;  %v3118_v36 = vor.u32 %v3117_v60, %v3114_v21  ;;  %v3123_v37 = vrot.slane %v3121_v61, 5  ;;  %v8605_v23 = vld [vmem:[%s13857_s0 + $0x20] sm:$0x1] }
  0xa4   :  { %8128 = vmatmul.msk.bf16.gmra.mxu0 %vm1009_vm3, %v985_v16  ;;  %v3127_v39 = vrot.slane %v3125_v30, 4  ;;  %v6701_v45 = vsel %vm1106_vm0, %v8118_v26, 0  ;;  %v4852_v46 = vsel %vm1106_vm0, %v8116_v34, 0  ;;  %v7481_v50 = vsel %vm1106_vm0, %v8119_v35, 0  ;;  %v9337_v35 = vld [vmem:[%s13857_s0 + $0xc] sm:$0xff] }
  0xa5   :  { %v10200_v15 = vpop.f32.mrf.mxu0  ;;  %v1008_v38 = vpack.c.b16 %v976_v28, %v975_v17  ;;  %v3119_v44 = vrot.slane %v3118_v36, 4  ;;  %v2095_v51 = vpack.c.b16 %v2033_v29, %v2032_v25  ;;  %v3133_v54 = vrot.slane %v3131_v33, 5  ;;  %6710 = vmatpush.bf16.msra.mxu3 %v6701_v45  ;;  %4861 = vmatpush.bf16.msra.mxu1 %v4852_v46  ;;  %v8607_v46 = vld [vmem:[%s13857_s0 + $0x28] sm:$0xf] }
  0xa6   :  { %8280 = vmatmul.msk.bf16.vlgmr.msrb.gmra.mxu1 %vm1009_vm3, %v9336_v19  ;;  %v3128_v53 = vor.u32 %v3127_v39, %v3123_v37  ;;  %v1822_v57 = vrot.slane %v9458_v56, 5  ;;  %7490 = vmatpush.bf16.msra.mxu0 %v7481_v50  ;;  %v3136_v59 = vshrl.u32 %v8603_v41, 16  ;;  %v3139_v62 = vshll.u32 %v8603_v41, 16  ;;  %v9368_v50 = vld [vmem:[%s13857_s0 + $0xc] sm:$0xff] }
  0xa7   :  { %v10220_v40 = vpop.f32.mrf.mxu1  ;;  %v3124_v58 = vsel %vm9673_vm4, %v3119_v44, %v3123_v37  ;;  %v3145_v3 = vshll.u32 %v8604_v43, 16  ;;  %v8314_v6 = vrot.slane %v1709_v55, 9  ;;  %v1825_v9 = vrot.slane %v9459_v8, 5  ;;  %v8606_v44 = vld [vmem:[%s13857_s0 + $0x24] sm:$0xf] }
  0xa8   :  { %v3129_v4 = vrot.slane %v3128_v53, 4  ;;  %v3879_v12 = vunpack.c.l.b16 %v3124_v58  ;;  %v1824_v13 = vrot.slane %v1822_v57, 4  ;;  %v3149_v16 = vshrl.u32 %v8604_v43, 16  ;;  %v1710_v53 = vld [vmem:[%s13857_s0 + $0x24] sm:$0xe] }
  0xa9   :  { %v3138_v19 = vrot.slane %v3136_v59, 4  ;;  %v3141_v20 = vrot.slane %v3139_v62, 5  ;;  %v3147_v21 = vrot.slane %v3145_v3, 5  ;;  %v1823_v61 = vsel %vm10123_vm7, %v8314_v6, %v1822_v57 }
  0xaa   :  { %8151 = vmatmul.msk.bf16.gmra.mxu3 %vm1009_vm3, %v1008_v38  ;;  %v3134_v11 = vsel %vm9673_vm4, %v3129_v4, %v3133_v54  ;;  %v3151_v25 = vrot.slane %v3149_v16, 4  ;;  %v1826_v29 = vsel %vm10123_vm7, %v1824_v13, %v1825_v9  ;;  %v3155_v34 = vshll.u32 %v8605_v23, 16  ;;  %v9460_v54 = vld [vmem:[%s13857_s0 + $0x28] sm:$0xf]  ;;  %v8608_v23 = vld [vmem:[%s13857_s0 + $0x2c] sm:$0x1] }
  0xab   :  { %v10230_v49 = vpop.f32.mrf.mxu3  ;;  %v3880_v17 = vunpack.c.l.b16 %v3134_v11  ;;  %v3142_v30 = vor.u32 %v3141_v20, %v3138_v19  ;;  %v2034_v36 = vunpack.c.l.b16 %v1823_v61  ;;  %v2035_v37 = vunpack.c.l.b16 %v1826_v29 }
  0xac   :  { %13871 = vst [vmem:[#allocation7_spill] sm:$0xff] %v10230_v49  ;;  %8345 = vmatmul.msk.bf16.gmra.mxu2 %vm1009_vm3, %v2095_v51  ;;  %v3152_v33 = vor.u32 %v3151_v25, %v3147_v21  ;;  %v3157_v41 = vrot.slane %v3155_v34, 5  ;;  %v1829_v55 = vrot.slane %v9460_v54, 5  ;;  %v3160_v56 = vshrl.u32 %v8606_v44, 16  ;;  %v9369_v54 = vld [vmem:[%s13857_s0 + $0x18] sm:$0xff] }
  0xad   :  { %v3943_v60 = vpack.c.b16 %v3880_v17, %v3879_v12  ;;  %v3143_v38 = vrot.slane %v3142_v30, 4  ;;  %v2096_v51 = vpack.c.b16 %v2035_v37, %v2034_v36  ;;  %v3163_v57 = vshll.u32 %v8606_v44, 16  ;;  %v9461_v17 = vld [vmem:[%s13857_s0 + $0x2c] sm:$0x1]  ;;  %v9338_v36 = vld [vmem:[%s13857_s0 + $0x18] sm:$0xff] }
  0xae   :  { %v3153_v39 = vrot.slane %v3152_v33, 4  ;;  %v3169_v62 = vshll.u32 %v8607_v46, 16  ;;  %v3173_v3 = vshrl.u32 %v8607_v46, 16  ;;  %v8315_v8 = vrot.slane %v1710_v53, 9  ;;  %v8610_v53 = vld [vmem:[%s13857_s0 + $0x34] sm:$0xf] }
  0xaf   :  { %v10245_v10 = vpop.f32.mrf.mxu0  ;;  %v3148_v58 = vsel %vm9673_vm4, %v3143_v38, %v3147_v21  ;;  %v3162_v12 = vrot.slane %v3160_v56, 4  ;;  %v3165_v13 = vrot.slane %v3163_v57, 5  ;;  %v1831_v16 = vrot.slane %v1829_v55, 4 }
  0xb0   :  { %v10250_v14 = vpop.f32.mrf.mxu2  ;;  %v3158_v59 = vsel %vm9673_vm4, %v3153_v39, %v3157_v41  ;;  %v3881_v9 = vunpack.c.l.b16 %v3148_v58  ;;  %v1832_v19 = vrot.slane %v9461_v17, 5  ;;  %v3171_v20 = vrot.slane %v3169_v62, 5 }
  0xb1   :  { %v3882_v11 = vunpack.c.l.b16 %v3158_v59  ;;  %v3175_v21 = vrot.slane %v3173_v3, 4  ;;  %v3166_v29 = vor.u32 %v3165_v13, %v3162_v12  ;;  %v1830_v30 = vsel %vm10123_vm7, %v8315_v8, %v1829_v55  ;;  %v9462_v3 = vld [vmem:[%s13857_s0 + $0x34] sm:$0xf]  ;;  %v1711_v13 = vld [vmem:[%s13857_s0 + $0x30] sm:$0xe] }
  0xb2   :  { %v1833_v33 = vsel %vm10123_vm7, %v1831_v16, %v1832_v19  ;;  %v2036_v37 = vunpack.c.l.b16 %v1830_v30  ;;  %v1836_v8 = vrot.slane %v9462_v3, 5  ;;  %v9463_v19 = vld [vmem:[%s13857_s0 + $0x38] sm:$0x1]  ;;  %vm8025_vm8 = vcmask 1041409  }
  0xb3   :  { %v10259_v28 = vpop.f32.mrf.mxu3  ;;  %v3176_v34 = vor.u32 %v3175_v21, %v3171_v20  ;;  %v2037_v38 = vunpack.c.l.b16 %v1833_v33  ;;  %v3167_v41 = vrot.slane %v3166_v29, 4 }
  0xb4   :  { %v10257_v26 = vpop.f32.mrf.mxu1  ;;  %13872 = vst [vmem:[#allocation8_spill] sm:$0xff] %v10259_v28  ;;  %8696 = vmatmul.msk.bf16.vlgmr.msrb.gmra.mxu0 %vm1009_vm3, %v3943_v60  ;;  %v3944_v60 = vpack.c.b16 %v3882_v11, %v3881_v9  ;;  %v3193_v9 = vshll.u32 %v8610_v53, 16  ;;  %v3197_v11 = vshrl.u32 %v8610_v53, 16  ;;  %v1838_v29 = vrot.slane %v1836_v8, 4  ;;  %v9339_v53 = vld [vmem:[%s13857_s0 + $0x24] sm:$0xff] }
  0xb5   :  { %v3177_v46 = vrot.slane %v3176_v34, 4  ;;  %v2097_v55 = vpack.c.b16 %v2037_v38, %v2036_v37  ;;  %v3172_v56 = vsel %vm9673_vm4, %v3167_v41, %v3171_v20  ;;  %v1839_v20 = vrot.slane %v9463_v19, 5 }
  0xb6   :  { %8281 = vmatmul.msk.bf16.gmra.mxu1 %vm1009_vm3, %v9337_v35  ;;  %v3179_v35 = vshll.u32 %v8608_v23, 16  ;;  %v3883_v16 = vunpack.c.l.b16 %v3172_v56  ;;  %v3195_v30 = vrot.slane %v3193_v9, 5  ;;  %v3199_v33 = vrot.slane %v3197_v11, 4  ;;  %v8613_v9 = vld [vmem:[%s13857_s0 + $0x40] sm:$0xf]  ;;  %v9370_v11 = vld [vmem:[%s13857_s0 + $0x24] sm:$0xff] }
  0xb7   :  { %v10267_v43 = vpop.f32.mrf.mxu0 }
  0xb8   :  { %v10273_v45 = vpop.f32.mrf.mxu2 }
  0xba   :  { %8568 = vmatmul.msk.bf16.vlgmr.msrb.gmra.mxu3 %vm1009_vm3, %v9368_v50  ;;  %v3181_v50 = vrot.slane %v3179_v35, 5  ;;  %v8611_v35 = vld [vmem:[%s13857_s0 + $0x38] sm:$0x1] }
  0xbc   :  { %v10291_v4 = vpop.f32.mrf.mxu1  ;;  %8346 = vmatmul.msk.bf16.gmra.mxu2 %vm1009_vm3, %v2096_v51  ;;  %v8609_v51 = vld [vmem:[%s13857_s0 + $0x30] sm:$0xf]  ;;  %v3182_v59 = vsel %vm9673_vm4, %v3177_v46, %v3181_v50  ;;  %v1840_v46 = vsel %vm10123_vm7, %v1838_v29, %v1839_v20  ;;  %v3200_v50 = vor.u32 %v3199_v33, %v3195_v30  ;;  %v3217_v33 = vshll.u32 %v8613_v9, 16 }
  0xbd   :  { %v3184_v57 = vshrl.u32 %v8609_v51, 16  ;;  %v3187_v58 = vshll.u32 %v8609_v51, 16  ;;  %v3884_v17 = vunpack.c.l.b16 %v3182_v59  ;;  %v3203_v51 = vshll.u32 %v8611_v35, 16 }
  0xbe   :  { %v10294_v6 = vpop.f32.mrf.mxu3  ;;  %v2039_v56 = vunpack.c.l.b16 %v1840_v46  ;;  %v3201_v59 = vrot.slane %v3200_v50, 4  ;;  %v3221_v35 = vshrl.u32 %v8613_v9, 16  ;;  %v9465_v46 = vld [vmem:[%s13857_s0 + $0x44] sm:$0x1] }
  0xbf   :  { %13873 = vst [vmem:[#allocation9_spill] sm:$0xff] %v10294_v6  ;;  %v3186_v21 = vrot.slane %v3184_v57, 4  ;;  %v3189_v23 = vrot.slane %v3187_v58, 5  ;;  %v3945_v37 = vpack.c.b16 %v3884_v17, %v3883_v16  ;;  %v3205_v3 = vrot.slane %v3203_v51, 5 }
  0xc0   :  { %v1846_v50 = vrot.slane %v9465_v46, 5  ;;  %v8615_v46 = vld [vmem:[%s13857_s0 + $0x48] sm:$0xf] }
  0xc1   :  { %v3190_v38 = vor.u32 %v3189_v23, %v3186_v21  ;;  %v3206_v23 = vsel %vm9673_vm4, %v3201_v59, %v3205_v3  ;;  %v3223_v59 = vrot.slane %v3221_v35, 4 }
  0xc2   :  { %v10303_v25 = vpop.f32.mrf.mxu0 }
  0xc3   :  { %v10305_v61 = vpop.f32.mrf.mxu2  ;;  %v3191_v58 = vrot.slane %v3190_v38, 4  ;;  %v3886_v38 = vunpack.c.l.b16 %v3206_v23  ;;  %v9340_v23 = vld [vmem:[%s13857_s0 + $0x30] sm:$0xff] }
  0xc4   :  { %8697 = vmatmul.msk.bf16.gmra.mxu0 %vm1009_vm3, %v3944_v60  ;;  %v8316_v60 = vrot.slane %v1711_v13, 9 }
  0xc5   :  { %v3196_v17 = vsel %vm9673_vm4, %v3191_v58, %v3195_v30  ;;  %v3219_v58 = vrot.slane %v3217_v33, 5 }
  0xc6   :  { %v10315_v39 = vpop.f32.mrf.mxu1  ;;  %v10317_v44 = vpop.f32.mrf.mxu3  ;;  %8282 = vmatmul.msk.bf16.gmra.mxu1 %vm1009_vm3, %v9338_v36  ;;  %v1837_v41 = vsel %vm10123_vm7, %v8316_v60, %v1836_v8  ;;  %v8612_v8 = vld [vmem:[%s13857_s0 + $0x3c] sm:$0xf]  ;;  %v9464_v60 = vld [vmem:[%s13857_s0 + $0x40] sm:$0xf]  ;;  %v3885_v30 = vunpack.c.l.b16 %v3196_v17 }
  0xc7   :  { %13874 = vst [vmem:[#allocation10_spill] sm:$0xff] %v10317_v44  ;;  %v3208_v19 = vshrl.u32 %v8612_v8, 16  ;;  %v3211_v20 = vshll.u32 %v8612_v8, 16  ;;  %v1843_v29 = vrot.slane %v9464_v60, 5  ;;  %v8614_v8 = vld [vmem:[%s13857_s0 + $0x44] sm:$0x1] }
  0xc8   :  { %v3946_v9 = vpack.c.b16 %v3886_v38, %v3885_v30  ;;  %v8620_v44 = vld [vmem:[%s13857_s0 + $0x5c] sm:$0x1] }
  0xc9   :  { %v3210_v51 = vrot.slane %v3208_v19, 4  ;;  %v3224_v19 = vor.u32 %v3223_v59, %v3219_v58 }
  0xca   :  { %v10333_v62 = vpop.f32.mrf.mxu0  ;;  %8569 = vmatmul.msk.bf16.gmra.mxu3 %vm1009_vm3, %v9369_v54 }
  0xcb   :  { %v10338_v12 = vpop.f32.mrf.mxu2  ;;  %v3225_v38 = vrot.slane %v3224_v19, 4 }
  0xcc   :  { %13875 = vst [vmem:[#allocation11_spill] sm:$0xff] %v10338_v12  ;;  %8347 = vmatmul.msk.bf16.gmra.mxu2 %vm1009_vm3, %v2097_v55  ;;  %v2038_v55 = vunpack.c.l.b16 %v1837_v41 }
  0xce   :  { %v10348_v34 = vpop.f32.mrf.mxu1  ;;  %v2098_v13 = vpack.c.b16 %v2039_v56, %v2038_v55  ;;  %v1845_v56 = vrot.slane %v1843_v29, 4 }
  0xd0   :  { %v1847_v17 = vsel %vm10123_vm7, %v1845_v56, %v1846_v50 }
  0xd2   :  { %v10353_v36 = vpop.f32.mrf.mxu3 }
  0xd3   :  { %13876 = vst [vmem:[#allocation12_spill] sm:$0xff] %v10353_v36 }
  0xd4   :  { %8698 = vmatmul.msk.bf16.gmra.mxu0 %vm1009_vm3, %v3945_v37  ;;  %v1712_v37 = vld [vmem:[%s13857_s0 + $0x3c] sm:$0xe] }
  0xd5   :  { %v10362_v54 = vpop.f32.mrf.mxu0  ;;  %v8317_v55 = vrot.slane %v1712_v37, 9  ;;  %v2041_v37 = vunpack.c.l.b16 %v1847_v17 }
  0xd6   :  { %v10365_v57 = vpop.f32.mrf.mxu2  ;;  %8283 = vmatmul.msk.bf16.gmra.mxu1 %vm1009_vm3, %v9339_v53  ;;  %v3213_v53 = vrot.slane %v3211_v20, 5  ;;  %v3227_v20 = vshll.u32 %v8614_v8, 16  ;;  %v3232_v8 = vshrl.u32 %v8615_v46, 16 }
  0xd7   :  { %13877 = vst [vmem:[#allocation13_spill] sm:$0xff] %v10365_v57 }
  0xda   :  { %v10377_v16 = vpop.f32.mrf.mxu1  ;;  %v10381_v21 = vpop.f32.mrf.mxu3  ;;  %8570 = vmatmul.msk.bf16.gmra.mxu3 %vm1009_vm3, %v9370_v11  ;;  %v3214_v11 = vor.u32 %v3213_v53, %v3210_v51  ;;  %v8616_v51 = vld [vmem:[%s13857_s0 + $0x4c] sm:$0xf]  ;;  %v9371_v53 = vld [vmem:[%s13857_s0 + $0x30] sm:$0xff] }
  0xdb   :  { %13878 = vst [vmem:[#allocation14_spill] sm:$0xff] %v10381_v21  ;;  %v3241_v17 = vshll.u32 %v8616_v51, 16  ;;  %v3245_v19 = vshrl.u32 %v8616_v51, 16 }
  0xdc   :  { %8348 = vmatmul.msk.bf16.gmra.mxu2 %vm1009_vm3, %v2098_v13  ;;  %v1844_v13 = vsel %vm10123_vm7, %v8317_v55, %v1843_v29  ;;  %v3215_v30 = vrot.slane %v3214_v11, 4  ;;  %v3229_v29 = vrot.slane %v3227_v20, 5  ;;  %v1713_v20 = vld [vmem:[%s13857_s0 + $0x48] sm:$0xe] }
  0xdd   :  { %v10393_v41 = vpop.f32.mrf.mxu0  ;;  %v2040_v35 = vunpack.c.l.b16 %v1844_v13  ;;  %v1850_v13 = vrot.slane %v9997_v1, 5  ;;  %v3243_v51 = vrot.slane %v3241_v17, 5 }
  0xde   :  { %v10398_v3 = vpop.f32.mrf.mxu2  ;;  %v3220_v59 = vsel %vm9673_vm4, %v3215_v30, %v3219_v58  ;;  %v3230_v11 = vsel %vm9673_vm4, %v3225_v38, %v3229_v29  ;;  %v3234_v38 = vrot.slane %v3232_v8, 4  ;;  %v8318_v29 = vrot.slane %v1713_v20, 9 }
  0xdf   :  { %13879 = vst [vmem:[#allocation15_spill] sm:$0xff] %v10398_v3  ;;  %v2099_v55 = vpack.c.b16 %v2041_v37, %v2040_v35  ;;  %v3887_v37 = vunpack.c.l.b16 %v3220_v59  ;;  %v3888_v30 = vunpack.c.l.b16 %v3230_v11  ;;  %v9341_v11 = vld [vmem:[%s13857_s0 + $0x3c] sm:$0xff] }
  0xe1   :  { %v3947_v21 = vpack.c.b16 %v3888_v30, %v3887_v37 }
  0xe2   :  { %v10410_v60 = vpop.f32.mrf.mxu1 }
  0xe4   :  { %8699 = vmatmul.msk.bf16.gmra.mxu0 %vm1009_vm3, %v3946_v9  ;;  %v3235_v9 = vshll.u32 %v8615_v46, 16  ;;  %v1852_v46 = vrot.slane %v1850_v13, 4 }
  0xe5   :  { %v10412_v33 = vpop.f32.mrf.mxu3 }
  0xe6   :  { %13880 = vst [vmem:[#allocation16_spill] sm:$0xff] %v10412_v33  ;;  %8284 = vmatmul.msk.bf16.gmra.mxu1 %vm1009_vm3, %v9340_v23  ;;  %v1853_v23 = vrot.slane %v10002_v2, 5  ;;  %v3237_v1 = vrot.slane %v3235_v9, 5  ;;  %v3247_v33 = vrot.slane %v3245_v19, 4  ;;  %v8617_v2 = vld [vmem:[%s13857_s0 + $0x50] sm:$0x1] }
  0xe7   :  { %v3251_v9 = vshll.u32 %v8617_v2, 16 }
  0xe8   :  { %v10419_v50 = vpop.f32.mrf.mxu0  ;;  %v1854_v59 = vsel %vm10123_vm7, %v1852_v46, %v1853_v23  ;;  %v3248_v8 = vor.u32 %v3247_v33, %v3243_v51  ;;  %v8619_v23 = vld [vmem:[%s13857_s0 + $0x58] sm:$0xf] }
  0xe9   :  { %v10427_v56 = vpop.f32.mrf.mxu2  ;;  %v2043_v19 = vunpack.c.l.b16 %v1854_v59  ;;  %v3265_v59 = vshll.u32 %v8619_v23, 16 }
  0xea   :  { %13881 = vst [vmem:[#allocation17_spill] sm:$0xff] %v10427_v56  ;;  %8571 = vmatmul.msk.bf16.gmra.mxu3 %vm1009_vm3, %v9371_v53  ;;  %v3249_v30 = vrot.slane %v3248_v8, 4  ;;  %v3269_v8 = vshrl.u32 %v8619_v23, 16 }
  0xeb   :  { %v3267_v23 = vrot.slane %v3265_v59, 5 }
  0xec   :  { %8349 = vmatmul.msk.bf16.gmra.mxu2 %vm1009_vm3, %v2099_v55  ;;  %v1851_v55 = vsel %vm10123_vm7, %v8318_v29, %v1850_v13  ;;  %v8618_v13 = vld [vmem:[%s13857_s0 + $0x54] sm:$0xf] }
  0xed   :  { %v10439_v35 = vpop.f32.mrf.mxu3  ;;  %v10442_v58 = vpop.f32.mrf.mxu1  ;;  %v2042_v17 = vunpack.c.l.b16 %v1851_v55  ;;  %v3256_v29 = vshrl.u32 %v8618_v13, 16  ;;  %v3259_v46 = vshll.u32 %v8618_v13, 16  ;;  %v1857_v55 = vrot.slane %v10060_v31, 5 }
  0xee   :  { %13882 = vst [vmem:[#allocation18_spill] sm:$0xff] %v10439_v35  ;;  %v3238_v35 = vor.u32 %v3237_v1, %v3234_v38  ;;  %v3253_v38 = vrot.slane %v3251_v9, 5 }
  0xef   :  { %v3261_v31 = vrot.slane %v3259_v46, 5  ;;  %v1859_v13 = vrot.slane %v1857_v55, 4  ;;  %v3275_v46 = vshll.u32 %v8620_v44, 16  ;;  %v8622_v44 = vld [vmem:[%s13857_s0 + $0x64] sm:$0xf] }
  0xf0   :  { %v10447_v53 = vpop.f32.mrf.mxu0  ;;  %v3239_v20 = vrot.slane %v3238_v35, 4  ;;  %v2100_v35 = vpack.c.b16 %v2043_v19, %v2042_v17  ;;  %v3254_v2 = vsel %vm9673_vm4, %v3249_v30, %v3253_v38  ;;  %v1860_v17 = vrot.slane %v10065_v32, 5 }
  0xf1   :  { %v10449_v36 = vpop.f32.mrf.mxu2  ;;  %v3258_v30 = vrot.slane %v3256_v29, 4 }
  0xf2   :  { %13883 = vst [vmem:[#allocation19_spill] sm:$0xff] %v10449_v36  ;;  %v3244_v1 = vsel %vm9673_vm4, %v3239_v20, %v3243_v51  ;;  %v3890_v20 = vunpack.c.l.b16 %v3254_v2  ;;  %v9342_v2 = vld [vmem:[%s13857_s0 + $0x48] sm:$0xff] }
  0xf3   :  { %v3889_v19 = vunpack.c.l.b16 %v3244_v1  ;;  %v3262_v28 = vor.u32 %v3261_v31, %v3258_v30  ;;  %v1861_v1 = vsel %vm10123_vm7, %v1859_v13, %v1860_v17  ;;  %v9373_v17 = vld [vmem:[%s13857_s0 + $0x48] sm:$0xff] }
  0xf4   :  { %8700 = vmatmul.msk.bf16.gmra.mxu0 %vm1009_vm3, %v3947_v21  ;;  %v9372_v21 = vld [vmem:[%s13857_s0 + $0x3c] sm:$0xff] }
  0xf5   :  { %v10459_v37 = vpop.f32.mrf.mxu1 }
  0xf6   :  { %8285 = vmatmul.msk.bf16.gmra.mxu1 %vm1009_vm3, %v9341_v11  ;;  %v1714_v11 = vld [vmem:[%s13857_s0 + $0x54] sm:$0xe] }
  0xf7   :  { %v10465_v33 = vpop.f32.mrf.mxu3  ;;  %v8319_v38 = vrot.slane %v1714_v11, 9  ;;  %v2045_v11 = vunpack.c.l.b16 %v1861_v1  ;;  %v1864_v1 = vrot.slane %v10119_v47, 5 }
  0xf8   :  { %13884 = vst [vmem:[#allocation20_spill] sm:$0xff] %v10465_v33  ;;  %v3271_v33 = vrot.slane %v3269_v8, 4 }
  0xf9   :  { %v1866_v47 = vrot.slane %v1864_v1, 4 }
  0xfa   :  { %8572 = vmatmul.msk.bf16.gmra.mxu3 %vm1009_vm3, %v9372_v21  ;;  %v3948_v21 = vpack.c.b16 %v3890_v20, %v3889_v19  ;;  %v3272_v29 = vor.u32 %v3271_v33, %v3267_v23  ;;  %v3263_v19 = vrot.slane %v3262_v28, 4  ;;  %v8621_v33 = vld [vmem:[%s13857_s0 + $0x60] sm:$0xf] }
  0xfb   :  { %v10478_v9 = vpop.f32.mrf.mxu0  ;;  %v3283_v13 = vshll.u32 %v8621_v33, 16 }
  0xfc   :  { %v10485_v51 = vpop.f32.mrf.mxu2  ;;  %8350 = vmatmul.msk.bf16.gmra.mxu2 %vm1009_vm3, %v2100_v35  ;;  %v1858_v35 = vsel %vm10123_vm7, %v8319_v38, %v1857_v55  ;;  %v3273_v30 = vrot.slane %v3272_v29, 4  ;;  %v3277_v55 = vrot.slane %v3275_v46, 5  ;;  %v3268_v28 = vsel %vm9673_vm4, %v3263_v19, %v3267_v23 }
  0xfd   :  { %13885 = vst [vmem:[#allocation21_spill] sm:$0xff] %v10485_v51  ;;  %v2044_v8 = vunpack.c.l.b16 %v1858_v35  ;;  %v3280_v38 = vshrl.u32 %v8621_v33, 16  ;;  %v3289_v29 = vshll.u32 %v8622_v44, 16  ;;  %v3293_v46 = vshrl.u32 %v8622_v44, 16 }
  0xfe   :  { %v3278_v35 = vsel %vm9673_vm4, %v3273_v30, %v3277_v55  ;;  %v3891_v23 = vunpack.c.l.b16 %v3268_v28  ;;  %v3285_v30 = vrot.slane %v3283_v13, 5 }
  0xff   :  { %v10493_v32 = vpop.f32.mrf.mxu3  ;;  %v2101_v31 = vpack.c.b16 %v2045_v11, %v2044_v8  ;;  %v1715_v8 = vld [vmem:[%s13857_s0 + $0x60] sm:$0xe]  ;;  %v1867_v11 = vrot.slane %v10140_v5, 5  ;;  %v3892_v19 = vunpack.c.l.b16 %v3278_v35  ;;  %v3282_v33 = vrot.slane %v3280_v38, 4  ;;  %v9343_v35 = vld [vmem:[%s13857_s0 + $0x54] sm:$0xff] }
 0x100   :  { %v10491_v6 = vpop.f32.mrf.mxu1  ;;  %13886 = vst [vmem:[#allocation22_spill] sm:$0xff] %v10493_v32  ;;  %v8320_v55 = vrot.slane %v1715_v8, 9  ;;  %v3291_v32 = vrot.slane %v3289_v29, 5  ;;  %v3295_v44 = vrot.slane %v3293_v46, 4 }
 0x101   :  { %v3949_v5 = vpack.c.b16 %v3892_v19, %v3891_v23  ;;  %v1868_v28 = vsel %vm10123_vm7, %v1866_v47, %v1867_v11  ;;  %v8624_v11 = vld [vmem:[%s13857_s0 + $0x6c] sm:$0xf] }
 0x102   :  { %v3296_v38 = vor.u32 %v3295_v44, %v3291_v32  ;;  %v2047_v23 = vunpack.c.l.b16 %v1868_v28 }
 0x103   :  { %v10503_v59 = vpop.f32.mrf.mxu0 }
 0x104   :  { %8701 = vmatmul.msk.bf16.gmra.mxu0 %vm1009_vm3, %v3948_v21  ;;  %v10505_v20 = vpop.f32.mrf.mxu2 }
 0x105   :  { %13887 = vst [vmem:[#allocation23_spill] sm:$0xff] %v10505_v20 }
 0x106   :  { %8286 = vmatmul.msk.bf16.gmra.mxu1 %vm1009_vm3, %v9342_v2 }
 0x108   :  { %v10519_v21 = vpop.f32.mrf.mxu1 }
 0x10a   :  { %v10524_v2 = vpop.f32.mrf.mxu3  ;;  %8573 = vmatmul.msk.bf16.gmra.mxu3 %vm1009_vm3, %v9373_v17  ;;  %v3286_v17 = vor.u32 %v3285_v30, %v3282_v33  ;;  %v3297_v33 = vrot.slane %v3296_v38, 4  ;;  %v9374_v30 = vld [vmem:[%s13857_s0 + $0x54] sm:$0xff]  ;;  %v9466_v38 = vld [vmem:[%s13857_s0 + $0x70] sm:$0xf] }
 0x10b   :  { %13888 = vst [vmem:[#allocation24_spill] sm:$0xff] %v10524_v2  ;;  %v8623_v2 = vld [vmem:[%s13857_s0 + $0x68] sm:$0x1] }
 0x10c   :  { %8351 = vmatmul.msk.bf16.gmra.mxu2 %vm1009_vm3, %v2101_v31  ;;  %v1865_v31 = vsel %vm10123_vm7, %v8320_v55, %v1864_v1  ;;  %v3299_v13 = vshll.u32 %v8623_v2, 16  ;;  %v3287_v19 = vrot.slane %v3286_v17, 4  ;;  %v8625_v2 = vld [vmem:[%s13857_s0 + $0x70] sm:$0xf]  ;;  %v3304_v17 = vshrl.u32 %v8624_v11, 16 }
 0x10d   :  { %v2046_v8 = vunpack.c.l.b16 %v1865_v31  ;;  %v3307_v31 = vshll.u32 %v8624_v11, 16 }
 0x10e   :  { %v10532_v49 = vpop.f32.mrf.mxu0  ;;  %v3301_v1 = vrot.slane %v3299_v13, 5  ;;  %v1871_v13 = vrot.slane %v9466_v38, 5 }
 0x10f   :  { %v10537_v0 = vpop.f32.mrf.mxu2  ;;  %v2102_v44 = vpack.c.b16 %v2047_v23, %v2046_v8  ;;  %v3309_v11 = vrot.slane %v3307_v31, 5 }
 0x110   :  { %13889 = vst [vmem:[#allocation25_spill] sm:$0xff] %v10537_v0  ;;  %v3302_v28 = vsel %vm9673_vm4, %v3297_v33, %v3301_v1  ;;  %v3306_v1 = vrot.slane %v3304_v17, 4  ;;  %v1873_v38 = vrot.slane %v1871_v13, 4 }
 0x111   :  { %v3894_v33 = vunpack.c.l.b16 %v3302_v28 }
 0x112   :  { %v10548_v46 = vpop.f32.mrf.mxu3  ;;  %v3310_v36 = vor.u32 %v3309_v11, %v3306_v1 }
 0x113   :  { %v10546_v29 = vpop.f32.mrf.mxu1  ;;  %13890 = vst [vmem:[#allocation26_spill] sm:$0xff] %v10548_v46  ;;  %v3317_v46 = vshrl.u32 %v8625_v2, 16 }
 0x114   :  { %8702 = vmatmul.msk.bf16.gmra.mxu0 %vm1009_vm3, %v3949_v5  ;;  %v3292_v5 = vsel %vm9673_vm4, %v3287_v19, %v3291_v32  ;;  %v9467_v32 = vld [vmem:[%s13857_s0 + $0x74] sm:$0x1] }
 0x115   :  { %v1874_v8 = vrot.slane %v9467_v32, 5  ;;  %v3893_v19 = vunpack.c.l.b16 %v3292_v5  ;;  %v3319_v0 = vrot.slane %v3317_v46, 4  ;;  %v8626_v32 = vld [vmem:[%s13857_s0 + $0x74] sm:$0x1]  ;;  %v9344_v46 = vld [vmem:[%s13857_s0 + $0x60] sm:$0xff] }
 0x116   :  { %8287 = vmatmul.msk.bf16.gmra.mxu1 %vm1009_vm3, %v9343_v35  ;;  %v10561_v55 = vpop.f32.mrf.mxu0  ;;  %v3313_v35 = vshll.u32 %v8625_v2, 16  ;;  %v8321_v2 = vrot.slane %v1716_v18, 9  ;;  %v3323_v17 = vshll.u32 %v8626_v32, 16 }
 0x117   :  { %v10563_v47 = vpop.f32.mrf.mxu2  ;;  %v1875_v18 = vsel %vm10123_vm7, %v1873_v38, %v1874_v8 }
 0x118   :  { %13891 = vst [vmem:[#allocation27_spill] sm:$0xff] %v10563_v47  ;;  %v3315_v47 = vrot.slane %v3313_v35, 5  ;;  %v3325_v11 = vrot.slane %v3323_v17, 5 }
 0x11a   :  { %8574 = vmatmul.msk.bf16.gmra.mxu3 %vm1009_vm3, %v9374_v30  ;;  %v3950_v30 = vpack.c.b16 %v3894_v33, %v3893_v19  ;;  %v3320_v5 = vor.u32 %v3319_v0, %v3315_v47  ;;  %v2049_v19 = vunpack.c.l.b16 %v1875_v18  ;;  %v3311_v33 = vrot.slane %v3310_v36, 4  ;;  %v9375_v36 = vld [vmem:[%s13857_s0 + $0x60] sm:$0xff] }
 0x11b   :  { %v10579_v23 = vpop.f32.mrf.mxu1 }
 0x11c   :  { %8352 = vmatmul.msk.bf16.gmra.mxu2 %vm1009_vm3, %v2102_v44  ;;  %v1872_v44 = vsel %vm10123_vm7, %v8321_v2, %v1871_v13  ;;  %v3321_v1 = vrot.slane %v3320_v5, 4  ;;  %v8627_v13 = vld [vmem:[%s13857_s0 + $0x78] sm:$0xf]  ;;  %v3316_v32 = vsel %vm9673_vm4, %v3311_v33, %v3315_v47  ;;  %v9468_v5 = vld [vmem:[%s13857_s0 + $0x7c] sm:$0xf] }
 0x11d   :  { %v10582_v20 = vpop.f32.mrf.mxu3  ;;  %v2048_v35 = vunpack.c.l.b16 %v1872_v44  ;;  %v3331_v44 = vshll.u32 %v8627_v13, 16  ;;  %v1878_v17 = vrot.slane %v9468_v5, 5  ;;  %v9469_v47 = vld [vmem:[%s13857_s0 + $0x80] sm:$0x1]  ;;  %v3895_v33 = vunpack.c.l.b16 %v3316_v32 }
 0x11e   :  { %13892 = vst [vmem:[#allocation28_spill] sm:$0xff] %v10582_v20 }
 0x11f   :  { %v2234_v51 = vpop.f32.mrf.mxu2  ;;  %v2103_v38 = vpack.c.b16 %v2049_v19, %v2048_v35  ;;  %v1881_v35 = vrot.slane %v9469_v47, 5 }
 0x121   :  { %v10587_v56 = vpop.f32.mrf.mxu0 }
 0x123   :  { %v1547_v31 = vpop.f32.mrf.mxu1 }
 0x124   :  { %v1548_v28 = vadd.f32 %v1547_v31, %v10087_v7  ;;  %8703 = vmatmul.msk.bf16.gmra.mxu0 %vm1009_vm3, %v3950_v30  ;;  %v8628_v7 = vld [vmem:[%s13857_s0 + $0x7c] sm:$0xf]  ;;  %v3328_v30 = vshrl.u32 %v8627_v13, 16 }
 0x125   :  { %v10601_v0 = vpop.f32.mrf.mxu3  ;;  %v3341_v31 = vshrl.u32 %v8628_v7, 16 }
 0x126   :  { %13893 = vst [vmem:[#allocation29_spill] sm:$0xff] %v10601_v0  ;;  %v10603_v8 = vadd.f32 %v2234_v51, %v1548_v28  ;;  %8288 = vmatmul.msk.bf16.gmra.mxu1 %vm1009_vm3, %v9344_v46  ;;  %v3326_v51 = vsel %vm9673_vm4, %v3321_v1, %v3325_v11  ;;  %v3337_v46 = vshll.u32 %v8628_v7, 16  ;;  %v1717_v28 = vld [vmem:[%s13857_s0 + $0x78] sm:$0xe]  ;;  %v3330_v13 = vrot.slane %v3328_v30, 4 }
 0x127   :  { %v2236_v2 = vpop.f32.mrf.mxu2  ;;  %v3896_v11 = vunpack.c.l.b16 %v3326_v51  ;;  %v3333_v7 = vrot.slane %v3331_v44, 5  ;;  %v8322_v5 = vrot.slane %v1717_v28, 9  ;;  %v1880_v0 = vrot.slane %v1878_v17, 4 }
 0x128   :  { %v3339_v20 = vrot.slane %v3337_v46, 5  ;;  %v3343_v3 = vrot.slane %v3341_v31, 4  ;;  %v8630_v31 = vld [vmem:[%s13857_s0 + $0x84] sm:$0xf] }
 0x129   :  { %v10614_v18 = vpop.f32.mrf.mxu0  ;;  %v3951_v47 = vpack.c.b16 %v3896_v11, %v3895_v33  ;;  %v1882_v30 = vsel %vm10123_vm7, %v1880_v0, %v1881_v35 }
 0x12a   :  { %8575 = vmatmul.msk.bf16.gmra.mxu3 %vm1009_vm3, %v9375_v36  ;;  %v8629_v36 = vld [vmem:[%s13857_s0 + $0x80] sm:$0x1]  ;;  %v3344_v44 = vor.u32 %v3343_v3, %v3339_v20 }
 0x12b   :  { %v1549_v19 = vpop.f32.mrf.mxu1  ;;  %v3347_v51 = vshll.u32 %v8629_v36, 16 }
 0x12c   :  { %v1550_v1 = vadd.f32 %v1549_v19, %v10121_v48  ;;  %8353 = vmatmul.msk.bf16.gmra.mxu2 %vm1009_vm3, %v2103_v38  ;;  %v3334_v48 = vor.u32 %v3333_v7, %v3330_v13  ;;  %v1879_v38 = vsel %vm10123_vm7, %v8322_v5, %v1878_v17  ;;  %v2051_v17 = vunpack.c.l.b16 %v1882_v30  ;;  %v8631_v13 = vld [vmem:[%s13857_s0 + $0x88] sm:$0xf]  ;;  %v1718_v30 = vld [vmem:[%s13857_s0 + $0x84] sm:$0xe] }
 0x12d   :  { %v10630_v57 = vpop.f32.mrf.mxu3  ;;  %v2050_v33 = vunpack.c.l.b16 %v1879_v38  ;;  %v3345_v11 = vrot.slane %v3344_v44, 4  ;;  %v3349_v0 = vrot.slane %v3347_v51, 5  ;;  %v3352_v7 = vshrl.u32 %v8630_v31, 16  ;;  %v9470_v44 = vld [vmem:[%s13857_s0 + $0x88] sm:$0xf] }
 0x12e   :  { %13894 = vst [vmem:[#allocation30_spill] sm:$0xff] %v10630_v57  ;;  %v10632_v12 = vadd.f32 %v2236_v2, %v1550_v1  ;;  %v9345_v2 = vld [vmem:[%s13857_s0 + $0x6c] sm:$0xff]  ;;  %v3335_v1 = vrot.slane %v3334_v48, 4  ;;  %v3355_v5 = vshll.u32 %v8630_v31, 16  ;;  %v1885_v51 = vrot.slane %v9470_v44, 5 }
 0x12f   :  { %v2239_v32 = vpop.f32.mrf.mxu2  ;;  %v3354_v31 = vrot.slane %v3352_v7, 4 }
 0x130   :  { %v3340_v48 = vsel %vm9673_vm4, %v3335_v1, %v3339_v20  ;;  %v1887_v44 = vrot.slane %v1885_v51, 4 }
 0x131   :  { %v4083_v19 = vpop.f32.mrf.mxu0 }
 0x133   :  { %v1552_v46 = vpop.f32.mrf.mxu1 }
 0x134   :  { %v1553_v28 = vadd.f32 %v1552_v46, %v10162_v27  ;;  %8704 = vmatmul.msk.bf16.gmra.mxu0 %vm1009_vm3, %v3951_v47  ;;  %v9376_v27 = vld [vmem:[%s13857_s0 + $0x6c] sm:$0xff]  ;;  %v2104_v47 = vpack.c.b16 %v2051_v17, %v2050_v33  ;;  %v3365_v46 = vshrl.u32 %v8631_v13, 16  ;;  %v3897_v17 = vunpack.c.l.b16 %v3340_v48 }
 0x135   :  { %v10649_v3 = vpop.f32.mrf.mxu3 }
 0x136   :  { %13895 = vst [vmem:[#allocation31_spill] sm:$0xff] %v10649_v3  ;;  %v10651_v35 = vadd.f32 %v2239_v32, %v1553_v28  ;;  %8289 = vmatmul.msk.bf16.gmra.mxu1 %vm1009_vm3, %v9345_v2  ;;  %v3350_v32 = vsel %vm9673_vm4, %v3345_v11, %v3349_v0  ;;  %v3361_v2 = vshll.u32 %v8631_v13, 16  ;;  %v3357_v28 = vrot.slane %v3355_v5, 5  ;;  %v9471_v0 = vld [vmem:[%s13857_s0 + $0x8c] sm:$0x1] }
 0x137   :  { %v2241_v36 = vpop.f32.mrf.mxu2  ;;  %v3898_v1 = vunpack.c.l.b16 %v3350_v32  ;;  %v8323_v11 = vrot.slane %v1718_v30, 9  ;;  %v1888_v3 = vrot.slane %v9471_v0, 5  ;;  %v3367_v13 = vrot.slane %v3365_v46, 4 }
 0x138   :  { %v3363_v57 = vrot.slane %v3361_v2, 5 }
 0x139   :  { %v10662_v38 = vpop.f32.mrf.mxu0  ;;  %v3952_v32 = vpack.c.b16 %v3898_v1, %v3897_v17  ;;  %v1886_v30 = vsel %vm10123_vm7, %v8323_v11, %v1885_v51  ;;  %v1889_v2 = vsel %vm10123_vm7, %v1887_v44, %v1888_v3  ;;  %v8633_v3 = vld [vmem:[%s13857_s0 + $0x90] sm:$0xf] }
 0x13a   :  { %8576 = vmatmul.msk.bf16.gmra.mxu3 %vm1009_vm3, %v9376_v27  ;;  %v3358_v27 = vor.u32 %v3357_v28, %v3354_v31  ;;  %v3368_v46 = vor.u32 %v3367_v13, %v3363_v57  ;;  %v2052_v17 = vunpack.c.l.b16 %v1886_v30  ;;  %v2053_v51 = vunpack.c.l.b16 %v1889_v2 }
 0x13b   :  { %v1554_v20 = vpop.f32.mrf.mxu1  ;;  %v3376_v30 = vshrl.u32 %v8633_v3, 16 }
 0x13c   :  { %v1555_v33 = vadd.f32 %v1554_v20, %v10200_v15  ;;  %8354 = vmatmul.msk.bf16.gmra.mxu2 %vm1009_vm3, %v2104_v47  ;;  %v8632_v15 = vld [vmem:[%s13857_s0 + $0x8c] sm:$0x1]  ;;  %v3359_v31 = vrot.slane %v3358_v27, 4  ;;  %v3369_v1 = vrot.slane %v3368_v46, 4  ;;  %v2105_v2 = vpack.c.b16 %v2053_v51, %v2052_v17  ;;  %v1719_v46 = vld [vmem:[%s13857_s0 + $0x90] sm:$0xe] }
 0x13d   :  { %v2791_v7 = vpop.f32.mrf.mxu3  ;;  %v3371_v0 = vshll.u32 %v8632_v15, 16  ;;  %v9377_v15 = vld [vmem:[%s13857_s0 + $0x78] sm:$0xff]  ;;  %v8324_v51 = vrot.slane %v1719_v46, 9 }
 0x13e   :  { %v10678_v5 = vadd.f32 %v2241_v36, %v1555_v33  ;;  %v2951_v47 = vadd.f32 %v2791_v7, %v10603_v8  ;;  %v9346_v33 = vld [vmem:[%s13857_s0 + $0x78] sm:$0xff] }
 0x13f   :  { %v2244_v48 = vpop.f32.mrf.mxu2  ;;  %v3373_v11 = vrot.slane %v3371_v0, 5 }
 0x140   :  { %v10688_v36 = vadd.f32 %v4083_v19, %v2951_v47  ;;  %v8634_v19 = vld [vmem:[%s13857_s0 + $0x94] sm:$0xf] }
 0x141   :  { %v4088_v20 = vpop.f32.mrf.mxu0  ;;  %v9472_v47 = vld [vmem:[%s13857_s0 + $0x94] sm:$0xf]  ;;  %v3389_v0 = vshrl.u32 %v8634_v19, 16 }
 0x142   :  { %13896 = vst [vmem:[#allocation32_spill] sm:$0xff] %v10688_v36 }
 0x143   :  { %v1557_v28 = vpop.f32.mrf.mxu1 }
 0x144   :  { %v1558_v8 = vadd.f32 %v1557_v28, %v10245_v10  ;;  %8705 = vmatmul.msk.bf16.gmra.mxu0 %vm1009_vm3, %v3952_v32  ;;  %v3364_v10 = vsel %vm9673_vm4, %v3359_v31, %v3363_v57  ;;  %v1892_v32 = vrot.slane %v9472_v47, 5  ;;  %v3385_v57 = vshll.u32 %v8634_v19, 16  ;;  %v9473_v28 = vld [vmem:[%s13857_s0 + $0x98] sm:$0x1] }
 0x145   :  { %v2793_v44 = vpop.f32.mrf.mxu3  ;;  %v3378_v47 = vrot.slane %v3376_v30, 4 }
 0x146   :  { %v10701_v13 = vadd.f32 %v2244_v48, %v1558_v8  ;;  %8290 = vmatmul.msk.bf16.gmra.mxu1 %vm1009_vm3, %v9346_v33  ;;  %v2952_v7 = vadd.f32 %v2793_v44, %v10632_v12  ;;  %v3379_v48 = vshll.u32 %v8633_v3, 16  ;;  %v3374_v33 = vsel %vm9673_vm4, %v3369_v1, %v3373_v11 }
 0x147   :  { %v2246_v27 = vpop.f32.mrf.mxu2  ;;  %v1895_v8 = vrot.slane %v9473_v28, 5  ;;  %v3899_v3 = vunpack.c.l.b16 %v3364_v10  ;;  %v1894_v44 = vrot.slane %v1892_v32, 4  ;;  %v3900_v1 = vunpack.c.l.b16 %v3374_v33 }
 0x148   :  { %v10719_v31 = vadd.f32 %v10662_v38, %v2952_v7  ;;  %v3381_v19 = vrot.slane %v3379_v48, 5  ;;  %v3387_v38 = vrot.slane %v3385_v57, 5  ;;  %v3391_v11 = vrot.slane %v3389_v0, 4  ;;  %v8635_v7 = vld [vmem:[%s13857_s0 + $0x98] sm:$0x1] }
 0x149   :  { %v4090_v12 = vpop.f32.mrf.mxu0  ;;  %v1893_v30 = vsel %vm10123_vm7, %v8324_v51, %v1892_v32  ;;  %v3395_v0 = vshll.u32 %v8635_v7, 16 }
 0x14a   :  { %13897 = vst [vmem:[#allocation33_spill] sm:$0xff] %v10719_v31  ;;  %8577 = vmatmul.msk.bf16.gmra.mxu3 %vm1009_vm3, %v9377_v15  ;;  %v3382_v48 = vor.u32 %v3381_v19, %v3378_v47  ;;  %v3392_v57 = vor.u32 %v3391_v11, %v3387_v38 }
 0x14b   :  { %v1559_v17 = vpop.f32.mrf.mxu1  ;;  %v3397_v51 = vrot.slane %v3395_v0, 5 }
 0x14c   :  { %v1560_v36 = vadd.f32 %v1559_v17, %v10267_v43  ;;  %8355 = vmatmul.msk.bf16.gmra.mxu2 %vm1009_vm3, %v2105_v2  ;;  %v1896_v43 = vsel %vm10123_vm7, %v1894_v44, %v1895_v8  ;;  %v3953_v2 = vpack.c.b16 %v3900_v1, %v3899_v3  ;;  %v3383_v31 = vrot.slane %v3382_v48, 4  ;;  %v8636_v3 = vld [vmem:[%s13857_s0 + $0x9c] sm:$0xf]  ;;  %v9378_v1 = vld [vmem:[%s13857_s0 + $0x84] sm:$0xff] }
 0x14d   :  { %v2796_v28 = vpop.f32.mrf.mxu3  ;;  %v3393_v8 = vrot.slane %v3392_v57, 4  ;;  %v3403_v48 = vshll.u32 %v8636_v3, 16 }
 0x14e   :  { %v10730_v10 = vadd.f32 %v2246_v27, %v1560_v36  ;;  %v2953_v15 = vadd.f32 %v2796_v28, %v10651_v35  ;;  %v9347_v36 = vld [vmem:[%s13857_s0 + $0x84] sm:$0xff]  ;;  %v2054_v27 = vunpack.c.l.b16 %v1893_v30  ;;  %v2055_v35 = vunpack.c.l.b16 %v1896_v43 }
 0x14f   :  { %v2249_v46 = vpop.f32.mrf.mxu2  ;;  %v3388_v7 = vsel %vm9673_vm4, %v3383_v31, %v3387_v38  ;;  %v3398_v43 = vsel %vm9673_vm4, %v3393_v8, %v3397_v51  ;;  %v9475_v31 = vld [vmem:[%s13857_s0 + $0xa4] sm:$0x1] }
 0x150   :  { %v10737_v17 = vadd.f32 %v4088_v20, %v2953_v15  ;;  %v8637_v20 = vld [vmem:[%s13857_s0 + $0xa0] sm:$0xf]  ;;  %v2106_v19 = vpack.c.b16 %v2055_v35, %v2054_v27  ;;  %v1902_v38 = vrot.slane %v9475_v31, 5  ;;  %v3901_v27 = vunpack.c.l.b16 %v3388_v7 }
 0x151   :  { %v4093_v33 = vpop.f32.mrf.mxu0  ;;  %v9474_v15 = vld [vmem:[%s13857_s0 + $0xa0] sm:$0xf]  ;;  %v3413_v57 = vshrl.u32 %v8637_v20, 16 }
 0x152   :  { %v1899_v30 = vrot.slane %v9474_v15, 5 }
 0x153   :  { %v1562_v28 = vpop.f32.mrf.mxu1 }
 0x154   :  { %v1563_v32 = vadd.f32 %v1562_v28, %v10303_v25  ;;  %8706 = vmatmul.msk.bf16.gmra.mxu0 %vm1009_vm3, %v3953_v2  ;;  %v3409_v2 = vshll.u32 %v8637_v20, 16  ;;  %v3902_v28 = vunpack.c.l.b16 %v3398_v43  ;;  %v1901_v8 = vrot.slane %v1899_v30, 4 }
 0x155   :  { %v2798_v44 = vpop.f32.mrf.mxu3  ;;  %v3405_v20 = vrot.slane %v3403_v48, 5 }
 0x156   :  { %v10750_v47 = vadd.f32 %v2249_v46, %v1563_v32  ;;  %8291 = vmatmul.msk.bf16.gmra.mxu1 %vm1009_vm3, %v9347_v36  ;;  %v2954_v25 = vadd.f32 %v2798_v44, %v10678_v5  ;;  %v3400_v46 = vshrl.u32 %v8636_v3, 16  ;;  %v1720_v5 = vld [vmem:[%s13857_s0 + $0x9c] sm:$0xe]  ;;  %v3415_v44 = vrot.slane %v3413_v57, 4 }
 0x157   :  { %v2251_v11 = vpop.f32.mrf.mxu2  ;;  %v8325_v32 = vrot.slane %v1720_v5, 9  ;;  %v3954_v5 = vpack.c.b16 %v3902_v28, %v3901_v27 }
 0x158   :  { %v10767_v36 = vadd.f32 %v4090_v12, %v2954_v25  ;;  %v3402_v51 = vrot.slane %v3400_v46, 4  ;;  %v3411_v12 = vrot.slane %v3409_v2, 5  ;;  %v8638_v25 = vld [vmem:[%s13857_s0 + $0xa4] sm:$0x1] }
 0x159   :  { %v4095_v0 = vpop.f32.mrf.mxu0  ;;  %v1900_v46 = vsel %vm10123_vm7, %v8325_v32, %v1899_v30  ;;  %v3419_v2 = vshll.u32 %v8638_v25, 16  ;;  %v8639_v30 = vld [vmem:[%s13857_s0 + $0xa8] sm:$0xf] }
 0x15a   :  { %8578 = vmatmul.msk.bf16.gmra.mxu3 %vm1009_vm3, %v9378_v1  ;;  %v3416_v48 = vor.u32 %v3415_v44, %v3411_v12  ;;  %v3427_v44 = vshll.u32 %v8639_v30, 16 }
 0x15b   :  { %v1564_v35 = vpop.f32.mrf.mxu1  ;;  %v3421_v32 = vrot.slane %v3419_v2, 5 }
 0x15c   :  { %v1565_v3 = vadd.f32 %v1564_v35, %v10333_v62  ;;  %8356 = vmatmul.msk.bf16.gmra.mxu2 %vm1009_vm3, %v2106_v19  ;;  %v1903_v62 = vsel %vm10123_vm7, %v1901_v8, %v1902_v38  ;;  %v3406_v19 = vor.u32 %v3405_v20, %v3402_v51  ;;  %v3417_v28 = vrot.slane %v3416_v48, 4  ;;  %v8640_v51 = vld [vmem:[%s13857_s0 + $0xac] sm:$0xf] }
 0x15d   :  { %v2801_v15 = vpop.f32.mrf.mxu3  ;;  %v3424_v20 = vshrl.u32 %v8639_v30, 16  ;;  %v3433_v48 = vshll.u32 %v8640_v51, 16  ;;  %v3437_v2 = vshrl.u32 %v8640_v51, 16 }
 0x15e   :  { %v10778_v7 = vadd.f32 %v2251_v11, %v1565_v3  ;;  %v2955_v1 = vadd.f32 %v2801_v15, %v10701_v13  ;;  %v9348_v11 = vld [vmem:[%s13857_s0 + $0x90] sm:$0xff]  ;;  %v2056_v13 = vunpack.c.l.b16 %v1900_v46  ;;  %v2057_v3 = vunpack.c.l.b16 %v1903_v62  ;;  %v1721_v62 = vld [vmem:[%s13857_s0 + $0xa8] sm:$0xe] }
 0x15f   :  { %v2254_v43 = vpop.f32.mrf.mxu2  ;;  %v3407_v38 = vrot.slane %v3406_v19, 4  ;;  %v3439_v51 = vrot.slane %v3437_v2, 4 }
 0x160   :  { %v10785_v31 = vadd.f32 %v4093_v33, %v2955_v1  ;;  %v2107_v1 = vpack.c.b16 %v2057_v3, %v2056_v13 }
 0x161   :  { %v4098_v57 = vpop.f32.mrf.mxu0 }
 0x163   :  { %v1567_v35 = vpop.f32.mrf.mxu1 }
 0x164   :  { %v1568_v27 = vadd.f32 %v1567_v35, %v10362_v54  ;;  %8707 = vmatmul.msk.bf16.gmra.mxu0 %vm1009_vm3, %v3954_v5  ;;  %v9379_v54 = vld [vmem:[%s13857_s0 + $0x90] sm:$0xff]  ;;  %v3422_v5 = vsel %vm9673_vm4, %v3417_v28, %v3421_v32  ;;  %v3426_v35 = vrot.slane %v3424_v20, 4 }
 0x165   :  { %v2803_v33 = vpop.f32.mrf.mxu3  ;;  %v9477_v28 = vld [vmem:[%s13857_s0 + $0xb0] sm:$0x1] }
 0x166   :  { %v10795_v8 = vadd.f32 %v2254_v43, %v1568_v27  ;;  %8292 = vmatmul.msk.bf16.gmra.mxu1 %vm1009_vm3, %v9348_v11  ;;  %v2956_v25 = vadd.f32 %v2803_v33, %v10730_v10  ;;  %v3412_v43 = vsel %vm9673_vm4, %v3407_v38, %v3411_v12  ;;  %v9476_v10 = vld [vmem:[%s13857_s0 + $0xac] sm:$0xf]  ;;  %v3429_v12 = vrot.slane %v3427_v44, 5 }
 0x167   :  { %v2256_v15 = vpop.f32.mrf.mxu2  ;;  %v1906_v19 = vrot.slane %v9476_v10, 5  ;;  %v3903_v30 = vunpack.c.l.b16 %v3412_v43  ;;  %v3904_v27 = vunpack.c.l.b16 %v3422_v5  ;;  %v8326_v38 = vrot.slane %v1721_v62, 9 }
 0x168   :  { %v10817_v11 = vadd.f32 %v4095_v0, %v2956_v25  ;;  %v1909_v32 = vrot.slane %v9477_v28, 5  ;;  %v3435_v0 = vrot.slane %v3433_v48, 5  ;;  %v3430_v25 = vor.u32 %v3429_v12, %v3426_v35 }
 0x169   :  { %v10809_v46 = vpop.f32.mrf.mxu0  ;;  %v1908_v33 = vrot.slane %v1906_v19, 4  ;;  %v3955_v43 = vpack.c.b16 %v3904_v27, %v3903_v30  ;;  %v1907_v5 = vsel %vm10123_vm7, %v8326_v38, %v1906_v19  ;;  %v8642_v30 = vld [vmem:[%s13857_s0 + $0xb4] sm:$0xf] }
 0x16a   :  { %8579 = vmatmul.msk.bf16.gmra.mxu3 %vm1009_vm3, %v9379_v54  ;;  %v3440_v48 = vor.u32 %v3439_v51, %v3435_v0  ;;  %v3431_v35 = vrot.slane %v3430_v25, 4  ;;  %v9380_v51 = vld [vmem:[%s13857_s0 + $0x9c] sm:$0xff] }
 0x16b   :  { %v1569_v13 = vpop.f32.mrf.mxu1  ;;  %v1910_v10 = vsel %vm10123_vm7, %v1908_v33, %v1909_v32 }
 0x16c   :  { %v1570_v3 = vadd.f32 %v1569_v13, %v10393_v41  ;;  %8357 = vmatmul.msk.bf16.gmra.mxu2 %vm1009_vm3, %v2107_v1  ;;  %v8641_v41 = vld [vmem:[%s13857_s0 + $0xb0] sm:$0x1]  ;;  %v9349_v13 = vld [vmem:[%s13857_s0 + $0x9c] sm:$0xff]  ;;  %v2059_v19 = vunpack.c.l.b16 %v1910_v10  ;;  %v3441_v27 = vrot.slane %v3440_v48, 4 }
 0x16d   :  { %v2806_v20 = vpop.f32.mrf.mxu3  ;;  %v3443_v2 = vshll.u32 %v8641_v41, 16  ;;  %v9478_v41 = vld [vmem:[%s13857_s0 + $0xb8] sm:$0xf] }
 0x16e   :  { %v10825_v44 = vadd.f32 %v2256_v15, %v1570_v3  ;;  %v2957_v54 = vadd.f32 %v2806_v20, %v10750_v47  ;;  %v2058_v3 = vunpack.c.l.b16 %v1907_v5  ;;  %v1913_v25 = vrot.slane %v9478_v41, 5  ;;  %v1722_v5 = vld [vmem:[%s13857_s0 + $0xb4] sm:$0xe] }
 0x16f   :  { %v2259_v1 = vpop.f32.mrf.mxu2  ;;  %v3445_v38 = vrot.slane %v3443_v2, 5 }
 0x170   :  { %v10835_v15 = vadd.f32 %v4098_v57, %v2957_v54  ;;  %v8643_v57 = vld [vmem:[%s13857_s0 + $0xb8] sm:$0xf]  ;;  %v3448_v54 = vshrl.u32 %v8642_v30, 16 }
 0x171   :  { %v4103_v62 = vpop.f32.mrf.mxu0  ;;  %v3461_v10 = vshrl.u32 %v8643_v57, 16  ;;  %v3446_v48 = vsel %vm9673_vm4, %v3441_v27, %v3445_v38 }
 0x172   :  { %v3906_v27 = vunpack.c.l.b16 %v3446_v48 }
 0x173   :  { %v1572_v12 = vpop.f32.mrf.mxu1  ;;  %v3463_v38 = vrot.slane %v3461_v10, 4 }
 0x174   :  { %v1573_v47 = vadd.f32 %v1572_v12, %v10419_v50  ;;  %8708 = vmatmul.msk.bf16.gmra.mxu0 %vm1009_vm3, %v3955_v43  ;;  %v3436_v50 = vsel %vm9673_vm4, %v3431_v35, %v3435_v0  ;;  %v2108_v43 = vpack.c.b16 %v2059_v19, %v2058_v3  ;;  %v3457_v0 = vshll.u32 %v8643_v57, 16 }
 0x175   :  { %v2808_v28 = vpop.f32.mrf.mxu3  ;;  %v3905_v12 = vunpack.c.l.b16 %v3436_v50  ;;  %v8327_v3 = vrot.slane %v1722_v5, 9  ;;  %v1915_v19 = vrot.slane %v1913_v25, 4 }
 0x176   :  { %v10848_v32 = vadd.f32 %v2259_v1, %v1573_v47  ;;  %8293 = vmatmul.msk.bf16.gmra.mxu1 %vm1009_vm3, %v9349_v13  ;;  %v2958_v33 = vadd.f32 %v2808_v28, %v10778_v7  ;;  %v3451_v1 = vshll.u32 %v8642_v30, 16  ;;  %v9479_v13 = vld [vmem:[%s13857_s0 + $0xbc] sm:$0x1]  ;;  %v3450_v30 = vrot.slane %v3448_v54, 4 }
 0x177   :  { %v2261_v20 = vpop.f32.mrf.mxu2  ;;  %v1916_v35 = vrot.slane %v9479_v13, 5  ;;  %v1914_v54 = vsel %vm10123_vm7, %v8327_v3, %v1913_v25 }
 0x178   :  { %v10866_v2 = vadd.f32 %v10809_v46, %v2958_v33  ;;  %v3453_v57 = vrot.slane %v3451_v1, 5  ;;  %v3459_v46 = vrot.slane %v3457_v0, 5  ;;  %v8644_v33 = vld [vmem:[%s13857_s0 + $0xbc] sm:$0x1] }
 0x179   :  { %v4105_v7 = vpop.f32.mrf.mxu0  ;;  %v3467_v10 = vshll.u32 %v8644_v33, 16 }
 0x17a   :  { %8580 = vmatmul.msk.bf16.gmra.mxu3 %vm1009_vm3, %v9380_v51  ;;  %v3454_v1 = vor.u32 %v3453_v57, %v3450_v30  ;;  %v3464_v0 = vor.u32 %v3463_v38, %v3459_v46 }
 0x17b   :  { %v1574_v47 = vpop.f32.mrf.mxu1  ;;  %v3469_v3 = vrot.slane %v3467_v10, 5 }
 0x17c   :  { %v1575_v28 = vadd.f32 %v1574_v47, %v10447_v53  ;;  %8358 = vmatmul.msk.bf16.gmra.mxu2 %vm1009_vm3, %v2108_v43  ;;  %v1917_v53 = vsel %vm10123_vm7, %v1915_v19, %v1916_v35  ;;  %v3956_v43 = vpack.c.b16 %v3906_v27, %v3905_v12  ;;  %v2060_v47 = vunpack.c.l.b16 %v1914_v54  ;;  %v8645_v12 = vld [vmem:[%s13857_s0 + $0xc0] sm:$0xf]  ;;  %v9381_v27 = vld [vmem:[%s13857_s0 + $0xa8] sm:$0xff] }
 0x17d   :  { %v2811_v41 = vpop.f32.mrf.mxu3  ;;  %v3465_v35 = vrot.slane %v3464_v0, 4 }
 0x17e   :  { %v10877_v50 = vadd.f32 %v2261_v20, %v1575_v28  ;;  %v2959_v51 = vadd.f32 %v2811_v41, %v10795_v8  ;;  %v9350_v20 = vld [vmem:[%s13857_s0 + $0xa8] sm:$0xff]  ;;  %v2061_v8 = vunpack.c.l.b16 %v1917_v53  ;;  %v3455_v41 = vrot.slane %v3454_v1, 4 }
 0x17f   :  { %v2264_v5 = vpop.f32.mrf.mxu2  ;;  %v3470_v53 = vsel %vm9673_vm4, %v3465_v35, %v3469_v3  ;;  %v3475_v1 = vshll.u32 %v8645_v12, 16 }
 0x180   :  { %v10884_v13 = vadd.f32 %v4103_v62, %v2959_v51  ;;  %v8646_v62 = vld [vmem:[%s13857_s0 + $0xc4] sm:$0xf]  ;;  %v2109_v57 = vpack.c.b16 %v2061_v8, %v2060_v47  ;;  %v3460_v33 = vsel %vm9673_vm4, %v3455_v41, %v3459_v46  ;;  %v9480_v51 = vld [vmem:[%s13857_s0 + $0xdc] sm:$0xf]  ;;  %v9481_v46 = vld [vmem:[%s13857_s0 + $0xe0] sm:$0x1]  ;;  %v3908_v41 = vunpack.c.l.b16 %v3470_v53 }
 0x181   :  { %v4108_v48 = vpop.f32.mrf.mxu0  ;;  %v1920_v54 = vrot.slane %v9480_v51, 5  ;;  %v3485_v0 = vshrl.u32 %v8646_v62, 16  ;;  %v1923_v47 = vrot.slane %v9481_v46, 5  ;;  %v3907_v8 = vunpack.c.l.b16 %v3460_v33 }
 0x183   :  { %v1577_v28 = vpop.f32.mrf.mxu1  ;;  %v1922_v35 = vrot.slane %v1920_v54, 4 }
 0x184   :  { %v1578_v25 = vadd.f32 %v1577_v28, %v10478_v9  ;;  %8709 = vmatmul.msk.bf16.gmra.mxu0 %vm1009_vm3, %v3956_v43  ;;  %v3481_v43 = vshll.u32 %v8646_v62, 16  ;;  %v3477_v62 = vrot.slane %v3475_v1, 5 }
 0x185   :  { %v2813_v19 = vpop.f32.mrf.mxu3 }
 0x186   :  { %v10897_v30 = vadd.f32 %v2264_v5, %v1578_v25  ;;  %8294 = vmatmul.msk.bf16.gmra.mxu1 %vm1009_vm3, %v9350_v20  ;;  %v2960_v9 = vadd.f32 %v2813_v19, %v10825_v44  ;;  %v3472_v5 = vshrl.u32 %v8645_v12, 16  ;;  %v1723_v44 = vld [vmem:[%s13857_s0 + $0xd8] sm:$0xe]  ;;  %v3487_v19 = vrot.slane %v3485_v0, 4 }
 0x187   :  { %v2266_v38 = vpop.f32.mrf.mxu2  ;;  %v8328_v25 = vrot.slane %v1723_v44, 9  ;;  %v3957_v44 = vpack.c.b16 %v3908_v41, %v3907_v8 }
 0x188   :  { %v10914_v20 = vadd.f32 %v4105_v7, %v2960_v9  ;;  %v3474_v3 = vrot.slane %v3472_v5, 4  ;;  %v3483_v7 = vrot.slane %v3481_v43, 5  ;;  %v8647_v9 = vld [vmem:[%s13857_s0 + $0xc8] sm:$0x1] }
 0x189   :  { %v4110_v10 = vpop.f32.mrf.mxu0  ;;  %v1921_v5 = vsel %vm10123_vm7, %v8328_v25, %v1920_v54  ;;  %v3491_v43 = vshll.u32 %v8647_v9, 16  ;;  %v8648_v54 = vld [vmem:[%s13857_s0 + $0xe4] sm:$0xf] }
 0x18a   :  { %8581 = vmatmul.msk.bf16.gmra.mxu3 %vm1009_vm3, %v9381_v27  ;;  %v3488_v1 = vor.u32 %v3487_v19, %v3483_v7  ;;  %v3499_v19 = vshll.u32 %v8648_v54, 16 }
 0x18b   :  { %v1579_v28 = vpop.f32.mrf.mxu1  ;;  %v3493_v25 = vrot.slane %v3491_v43, 5 }
 0x18c   :  { %v1580_v12 = vadd.f32 %v1579_v28, %v10503_v59  ;;  %8359 = vmatmul.msk.bf16.gmra.mxu2 %vm1009_vm3, %v2109_v57  ;;  %v1924_v59 = vsel %vm10123_vm7, %v1922_v35, %v1923_v47  ;;  %v3478_v57 = vor.u32 %v3477_v62, %v3474_v3  ;;  %v3489_v41 = vrot.slane %v3488_v1, 4  ;;  %v8649_v3 = vld [vmem:[%s13857_s0 + $0xe8] sm:$0xf] }
 0x18d   :  { %v2816_v51 = vpop.f32.mrf.mxu3  ;;  %v3496_v62 = vshrl.u32 %v8648_v54, 16  ;;  %v3505_v1 = vshll.u32 %v8649_v3, 16  ;;  %v3509_v43 = vshrl.u32 %v8649_v3, 16 }
 0x18e   :  { %v10925_v33 = vadd.f32 %v2266_v38, %v1580_v12  ;;  %v2961_v27 = vadd.f32 %v2816_v51, %v10848_v32  ;;  %v9351_v38 = vld [vmem:[%s13857_s0 + $0xb4] sm:$0xff]  ;;  %v2062_v32 = vunpack.c.l.b16 %v1921_v5  ;;  %v2063_v12 = vunpack.c.l.b16 %v1924_v59  ;;  %v1724_v59 = vld [vmem:[%s13857_s0 + $0xe4] sm:$0xe] }
 0x18f   :  { %v2269_v53 = vpop.f32.mrf.mxu2  ;;  %v3479_v47 = vrot.slane %v3478_v57, 4  ;;  %v3511_v3 = vrot.slane %v3509_v43, 4 }
 0x190   :  { %v10932_v46 = vadd.f32 %v4108_v48, %v2961_v27  ;;  %v2110_v27 = vpack.c.b16 %v2063_v12, %v2062_v32 }
 0x191   :  { %v4113_v0 = vpop.f32.mrf.mxu0 }
 0x193   :  { %v1582_v28 = vpop.f32.mrf.mxu1 }
 0x194   :  { %v1583_v8 = vadd.f32 %v1582_v28, %v10532_v49  ;;  %8710 = vmatmul.msk.bf16.gmra.mxu0 %vm1009_vm3, %v3957_v44  ;;  %v9382_v49 = vld [vmem:[%s13857_s0 + $0xb4] sm:$0xff]  ;;  %v3494_v44 = vsel %vm9673_vm4, %v3489_v41, %v3493_v25  ;;  %v3498_v28 = vrot.slane %v3496_v62, 4  ;;  %v9483_v41 = vld [vmem:[%s13857_s0 + $0xec] sm:$0x1] }
 0x195   :  { %v2818_v48 = vpop.f32.mrf.mxu3  ;;  %v1930_v25 = vrot.slane %v9483_v41, 5 }
 0x196   :  { %v10942_v35 = vadd.f32 %v2269_v53, %v1583_v8  ;;  %8295 = vmatmul.msk.bf16.gmra.mxu1 %vm1009_vm3, %v9351_v38  ;;  %v2962_v9 = vadd.f32 %v2818_v48, %v10877_v50  ;;  %v3484_v53 = vsel %vm9673_vm4, %v3479_v47, %v3483_v7  ;;  %v9482_v50 = vld [vmem:[%s13857_s0 + $0xe8] sm:$0xf]  ;;  %v3501_v7 = vrot.slane %v3499_v19, 5 }
 0x197   :  { %v2271_v51 = vpop.f32.mrf.mxu2  ;;  %v1927_v57 = vrot.slane %v9482_v50, 5  ;;  %v3909_v54 = vunpack.c.l.b16 %v3484_v53  ;;  %v3910_v8 = vunpack.c.l.b16 %v3494_v44  ;;  %v8329_v47 = vrot.slane %v1724_v59, 9 }
 0x198   :  { %v10964_v38 = vadd.f32 %v4110_v10, %v2962_v9  ;;  %v3507_v10 = vrot.slane %v3505_v1, 5  ;;  %v3502_v9 = vor.u32 %v3501_v7, %v3498_v28 }
 0x199   :  { %v10956_v5 = vpop.f32.mrf.mxu0  ;;  %v1929_v48 = vrot.slane %v1927_v57, 4  ;;  %v3958_v53 = vpack.c.b16 %v3910_v8, %v3909_v54  ;;  %v1928_v44 = vsel %vm10123_vm7, %v8329_v47, %v1927_v57  ;;  %v8651_v54 = vld [vmem:[%s13857_s0 + $0xf0] sm:$0xf] }
 0x19a   :  { %8582 = vmatmul.msk.bf16.gmra.mxu3 %vm1009_vm3, %v9382_v49  ;;  %v3512_v1 = vor.u32 %v3511_v3, %v3507_v10  ;;  %v3503_v28 = vrot.slane %v3502_v9, 4  ;;  %v9383_v3 = vld [vmem:[%s13857_s0 + $0xc0] sm:$0xff] }
 0x19b   :  { %v1584_v32 = vpop.f32.mrf.mxu1  ;;  %v1931_v50 = vsel %vm10123_vm7, %v1929_v48, %v1930_v25 }
 0x19c   :  { %v1585_v12 = vadd.f32 %v1584_v32, %v10561_v55  ;;  %8360 = vmatmul.msk.bf16.gmra.mxu2 %vm1009_vm3, %v2110_v27  ;;  %v8650_v55 = vld [vmem:[%s13857_s0 + $0xec] sm:$0x1]  ;;  %v9352_v32 = vld [vmem:[%s13857_s0 + $0xd8] sm:$0xff]  ;;  %v2065_v57 = vunpack.c.l.b16 %v1931_v50  ;;  %v3513_v8 = vrot.slane %v3512_v1, 4 }
 0x19d   :  { %v2821_v62 = vpop.f32.mrf.mxu3  ;;  %v3515_v43 = vshll.u32 %v8650_v55, 16  ;;  %v9484_v55 = vld [vmem:[%s13857_s0 + $0xf4] sm:$0xf] }
 0x19e   :  { %v10972_v19 = vadd.f32 %v2271_v51, %v1585_v12  ;;  %v2963_v49 = vadd.f32 %v2821_v62, %v10897_v30  ;;  %v2064_v12 = vunpack.c.l.b16 %v1928_v44  ;;  %v1934_v9 = vrot.slane %v9484_v55, 5  ;;  %v1725_v44 = vld [vmem:[%s13857_s0 + $0xf0] sm:$0xe] }
 0x19f   :  { %v2274_v27 = vpop.f32.mrf.mxu2  ;;  %v3517_v47 = vrot.slane %v3515_v43, 5 }
 0x1a0   :  { %v10982_v51 = vadd.f32 %v4113_v0, %v2963_v49  ;;  %v8652_v0 = vld [vmem:[%s13857_s0 + $0xf4] sm:$0xf]  ;;  %v3520_v49 = vshrl.u32 %v8651_v54, 16 }
 0x1a1   :  { %v4118_v59 = vpop.f32.mrf.mxu0  ;;  %v3533_v50 = vshrl.u32 %v8652_v0, 16  ;;  %v3518_v1 = vsel %vm9673_vm4, %v3513_v8, %v3517_v47 }
 0x1a2   :  { %v3912_v8 = vunpack.c.l.b16 %v3518_v1 }
 0x1a3   :  { %v1587_v7 = vpop.f32.mrf.mxu1  ;;  %v3535_v47 = vrot.slane %v3533_v50, 4 }
 0x1a4   :  { %v1588_v30 = vadd.f32 %v1587_v7, %v10587_v56  ;;  %8711 = vmatmul.msk.bf16.gmra.mxu0 %vm1009_vm3, %v3958_v53  ;;  %v3508_v56 = vsel %vm9673_vm4, %v3503_v28, %v3507_v10  ;;  %v2111_v53 = vpack.c.b16 %v2065_v57, %v2064_v12  ;;  %v3529_v10 = vshll.u32 %v8652_v0, 16 }
 0x1a5   :  { %v2823_v41 = vpop.f32.mrf.mxu3  ;;  %v3911_v7 = vunpack.c.l.b16 %v3508_v56  ;;  %v8330_v12 = vrot.slane %v1725_v44, 9  ;;  %v1936_v57 = vrot.slane %v1934_v9, 4 }
 0x1a6   :  { %v10995_v25 = vadd.f32 %v2274_v27, %v1588_v30  ;;  %8296 = vmatmul.msk.bf16.gmra.mxu1 %vm1009_vm3, %v9352_v32  ;;  %v2964_v48 = vadd.f32 %v2823_v41, %v10925_v33  ;;  %v3523_v27 = vshll.u32 %v8651_v54, 16  ;;  %v9485_v32 = vld [vmem:[%s13857_s0 + $0xf8] sm:$0x1]  ;;  %v3522_v54 = vrot.slane %v3520_v49, 4 }
 0x1a7   :  { %v2276_v62 = vpop.f32.mrf.mxu2  ;;  %v1937_v28 = vrot.slane %v9485_v32, 5  ;;  %v1935_v49 = vsel %vm10123_vm7, %v8330_v12, %v1934_v9 }
 0x1a8   :  { %v11013_v43 = vadd.f32 %v10956_v5, %v2964_v48  ;;  %v3525_v0 = vrot.slane %v3523_v27, 5  ;;  %v3531_v5 = vrot.slane %v3529_v10, 5  ;;  %v8653_v48 = vld [vmem:[%s13857_s0 + $0xf8] sm:$0x1] }
 0x1a9   :  { %v4120_v33 = vpop.f32.mrf.mxu0  ;;  %v3539_v50 = vshll.u32 %v8653_v48, 16 }
 0x1aa   :  { %8583 = vmatmul.msk.bf16.gmra.mxu3 %vm1009_vm3, %v9383_v3  ;;  %v3526_v27 = vor.u32 %v3525_v0, %v3522_v54  ;;  %v3536_v10 = vor.u32 %v3535_v47, %v3531_v5 }
 0x1ab   :  { %v1589_v30 = vpop.f32.mrf.mxu1  ;;  %v3541_v12 = vrot.slane %v3539_v50, 5 }
 0x1ac   :  { %v1590_v41 = vadd.f32 %v1589_v30, %v10614_v18  ;;  %8361 = vmatmul.msk.bf16.gmra.mxu2 %vm1009_vm3, %v2111_v53  ;;  %v1938_v18 = vsel %vm10123_vm7, %v1936_v57, %v1937_v28  ;;  %v3959_v53 = vpack.c.b16 %v3912_v8, %v3911_v7  ;;  %v2066_v30 = vunpack.c.l.b16 %v1935_v49  ;;  %v8654_v7 = vld [vmem:[%s13857_s0 + $0xfc] sm:$0xf]  ;;  %v9384_v8 = vld [vmem:[%s13857_s0 + $0xe4] sm:$0xff] }
 0x1ad   :  { %v2826_v55 = vpop.f32.mrf.mxu3  ;;  %v3537_v28 = vrot.slane %v3536_v10, 4 }
 0x1ae   :  { %v11024_v56 = vadd.f32 %v2276_v62, %v1590_v41  ;;  %v2965_v3 = vadd.f32 %v2826_v55, %v10942_v35  ;;  %v9353_v62 = vld [vmem:[%s13857_s0 + $0xe4] sm:$0xff]  ;;  %v2067_v35 = vunpack.c.l.b16 %v1938_v18  ;;  %v3527_v55 = vrot.slane %v3526_v27, 4 }
 0x1af   :  { %v2279_v44 = vpop.f32.mrf.mxu2  ;;  %v3542_v18 = vsel %vm9673_vm4, %v3537_v28, %v3541_v12  ;;  %v3547_v27 = vshll.u32 %v8654_v7, 16 }
 0x1b0   :  { %v11031_v32 = vadd.f32 %v4118_v59, %v2965_v3  ;;  %v8655_v59 = vld [vmem:[%s13857_s0 + $0x100] sm:$0xf]  ;;  %v2112_v0 = vpack.c.b16 %v2067_v35, %v2066_v30  ;;  %v3532_v48 = vsel %vm9673_vm4, %v3527_v55, %v3531_v5  ;;  %v9487_v5 = vld [vmem:[%s13857_s0 + $0x104] sm:$0x1]  ;;  %v3914_v55 = vunpack.c.l.b16 %v3542_v18 }
 0x1b1   :  { %v4123_v1 = vpop.f32.mrf.mxu0  ;;  %v9486_v3 = vld [vmem:[%s13857_s0 + $0x100] sm:$0xf]  ;;  %v3557_v10 = vshrl.u32 %v8655_v59, 16  ;;  %v1944_v30 = vrot.slane %v9487_v5, 5  ;;  %v3913_v35 = vunpack.c.l.b16 %v3532_v48 }
 0x1b2   :  { %v1941_v49 = vrot.slane %v9486_v3, 5 }
 0x1b3   :  { %v1592_v41 = vpop.f32.mrf.mxu1 }
 0x1b4   :  { %v1593_v9 = vadd.f32 %v1592_v41, %v10103_v22  ;;  %8712 = vmatmul.msk.bf16.gmra.mxu0 %vm1009_vm3, %v3959_v53  ;;  %v3553_v53 = vshll.u32 %v8655_v59, 16  ;;  %v1943_v28 = vrot.slane %v1941_v49, 4  ;;  %v3549_v59 = vrot.slane %v3547_v27, 5 }
 0x1b5   :  { %v2828_v57 = vpop.f32.mrf.mxu3 }
 0x1b6   :  { %v11044_v54 = vadd.f32 %v2279_v44, %v1593_v9  ;;  %8297 = vmatmul.msk.bf16.gmra.mxu1 %vm1009_vm3, %v9353_v62  ;;  %v2966_v22 = vadd.f32 %v2828_v57, %v10972_v19  ;;  %v3544_v44 = vshrl.u32 %v8654_v7, 16  ;;  %v1726_v19 = vld [vmem:[%s13857_s0 + $0xfc] sm:$0xe]  ;;  %v3559_v57 = vrot.slane %v3557_v10, 4 }
 0x1b7   :  { %v2281_v47 = vpop.f32.mrf.mxu2  ;;  %v8331_v9 = vrot.slane %v1726_v19, 9  ;;  %v3960_v19 = vpack.c.b16 %v3914_v55, %v3913_v35 }
 0x1b8   :  { %v11061_v62 = vadd.f32 %v4120_v33, %v2966_v22  ;;  %v3546_v12 = vrot.slane %v3544_v44, 4  ;;  %v3555_v33 = vrot.slane %v3553_v53, 5  ;;  %v8656_v22 = vld [vmem:[%s13857_s0 + $0x104] sm:$0x1] }
 0x1b9   :  { %v4125_v50 = vpop.f32.mrf.mxu0  ;;  %v1942_v44 = vsel %vm10123_vm7, %v8331_v9, %v1941_v49  ;;  %v3563_v53 = vshll.u32 %v8656_v22, 16  ;;  %v8657_v49 = vld [vmem:[%s13857_s0 + $0x108] sm:$0xf] }
 0x1ba   :  { %8584 = vmatmul.msk.bf16.gmra.mxu3 %vm1009_vm3, %v9384_v8  ;;  %v3560_v27 = vor.u32 %v3559_v57, %v3555_v33  ;;  %v3571_v57 = vshll.u32 %v8657_v49, 16 }
 0x1bb   :  { %v1594_v41 = vpop.f32.mrf.mxu1  ;;  %v3565_v9 = vrot.slane %v3563_v53, 5 }
 0x1bc   :  { %v1595_v7 = vadd.f32 %v1594_v41, %v10131_v63  ;;  %8362 = vmatmul.msk.bf16.gmra.mxu2 %vm1009_vm3, %v2112_v0  ;;  %v1945_v63 = vsel %vm10123_vm7, %v1943_v28, %v1944_v30  ;;  %v3550_v0 = vor.u32 %v3549_v59, %v3546_v12  ;;  %v3561_v55 = vrot.slane %v3560_v27, 4  ;;  %v8658_v12 = vld [vmem:[%s13857_s0 + $0x10c] sm:$0xf] }
 0x1bd   :  { %v2831_v3 = vpop.f32.mrf.mxu3  ;;  %v3568_v59 = vshrl.u32 %v8657_v49, 16  ;;  %v3577_v27 = vshll.u32 %v8658_v12, 16  ;;  %v3581_v53 = vshrl.u32 %v8658_v12, 16 }
 0x1be   :  { %v11072_v48 = vadd.f32 %v2281_v47, %v1595_v7  ;;  %v2967_v8 = vadd.f32 %v2831_v3, %v10995_v25  ;;  %v9354_v47 = vld [vmem:[%s13857_s0 + $0xf0] sm:$0xff]  ;;  %v2068_v25 = vunpack.c.l.b16 %v1942_v44  ;;  %v2069_v7 = vunpack.c.l.b16 %v1945_v63  ;;  %v1727_v63 = vld [vmem:[%s13857_s0 + $0x108] sm:$0xe] }
 0x1bf   :  { %v2284_v18 = vpop.f32.mrf.mxu2  ;;  %v3551_v30 = vrot.slane %v3550_v0, 4  ;;  %v3583_v12 = vrot.slane %v3581_v53, 4 }
 0x1c0   :  { %v11079_v5 = vadd.f32 %v4123_v1, %v2967_v8  ;;  %v2113_v8 = vpack.c.b16 %v2069_v7, %v2068_v25 }
 0x1c1   :  { %v4128_v10 = vpop.f32.mrf.mxu0 }
 0x1c3   :  { %v1597_v41 = vpop.f32.mrf.mxu1 }
 0x1c4   :  { %v1598_v35 = vadd.f32 %v1597_v41, %v10171_v42  ;;  %8713 = vmatmul.msk.bf16.gmra.mxu0 %vm1009_vm3, %v3960_v19  ;;  %v9385_v42 = vld [vmem:[%s13857_s0 + $0xf0] sm:$0xff]  ;;  %v3566_v19 = vsel %vm9673_vm4, %v3561_v55, %v3565_v9  ;;  %v3570_v41 = vrot.slane %v3568_v59, 4 }
 0x1c5   :  { %v2833_v1 = vpop.f32.mrf.mxu3  ;;  %v9489_v55 = vld [vmem:[%s13857_s0 + $0x110] sm:$0x1] }
 0x1c6   :  { %v11089_v28 = vadd.f32 %v2284_v18, %v1598_v35  ;;  %8298 = vmatmul.msk.bf16.gmra.mxu1 %vm1009_vm3, %v9354_v47  ;;  %v2968_v22 = vadd.f32 %v2833_v1, %v11024_v56  ;;  %v3556_v18 = vsel %vm9673_vm4, %v3551_v30, %v3555_v33  ;;  %v9488_v56 = vld [vmem:[%s13857_s0 + $0x10c] sm:$0xf]  ;;  %v3573_v33 = vrot.slane %v3571_v57, 5 }
 0x1c7   :  { %v2286_v3 = vpop.f32.mrf.mxu2  ;;  %v1948_v0 = vrot.slane %v9488_v56, 5  ;;  %v3915_v49 = vunpack.c.l.b16 %v3556_v18  ;;  %v3916_v35 = vunpack.c.l.b16 %v3566_v19  ;;  %v8332_v30 = vrot.slane %v1727_v63, 9 }
 0x1c8   :  { %v11111_v47 = vadd.f32 %v4125_v50, %v2968_v22  ;;  %v1951_v9 = vrot.slane %v9489_v55, 5  ;;  %v3579_v50 = vrot.slane %v3577_v27, 5  ;;  %v3574_v22 = vor.u32 %v3573_v33, %v3570_v41 }
 0x1c9   :  { %v11103_v44 = vpop.f32.mrf.mxu0  ;;  %v1950_v1 = vrot.slane %v1948_v0, 4  ;;  %v3961_v18 = vpack.c.b16 %v3916_v35, %v3915_v49  ;;  %v1949_v19 = vsel %vm10123_vm7, %v8332_v30, %v1948_v0  ;;  %v8660_v49 = vld [vmem:[%s13857_s0 + $0x114] sm:$0xf] }
 0x1ca   :  { %8585 = vmatmul.msk.bf16.gmra.mxu3 %vm1009_vm3, %v9385_v42  ;;  %v3584_v27 = vor.u32 %v3583_v12, %v3579_v50  ;;  %v3575_v41 = vrot.slane %v3574_v22, 4  ;;  %v9386_v12 = vld [vmem:[%s13857_s0 + $0xfc] sm:$0xff] }
 0x1cb   :  { %v1599_v25 = vpop.f32.mrf.mxu1  ;;  %v1952_v56 = vsel %vm10123_vm7, %v1950_v1, %v1951_v9 }
 0x1cc   :  { %v1600_v7 = vadd.f32 %v1599_v25, %v10220_v40  ;;  %8363 = vmatmul.msk.bf16.gmra.mxu2 %vm1009_vm3, %v2113_v8  ;;  %v8659_v40 = vld [vmem:[%s13857_s0 + $0x110] sm:$0x1]  ;;  %v9355_v25 = vld [vmem:[%s13857_s0 + $0xfc] sm:$0xff]  ;;  %v2071_v0 = vunpack.c.l.b16 %v1952_v56  ;;  %v3585_v35 = vrot.slane %v3584_v27, 4 }
 0x1cd   :  { %v2836_v59 = vpop.f32.mrf.mxu3  ;;  %v3587_v53 = vshll.u32 %v8659_v40, 16  ;;  %v9490_v40 = vld [vmem:[%s13857_s0 + $0x118] sm:$0xf] }
 0x1ce   :  { %v11119_v57 = vadd.f32 %v2286_v3, %v1600_v7  ;;  %v2969_v42 = vadd.f32 %v2836_v59, %v11044_v54  ;;  %v2070_v7 = vunpack.c.l.b16 %v1949_v19  ;;  %v1955_v22 = vrot.slane %v9490_v40, 5  ;;  %v1728_v19 = vld [vmem:[%s13857_s0 + $0x114] sm:$0xe] }
 0x1cf   :  { %v2289_v8 = vpop.f32.mrf.mxu2  ;;  %v3589_v30 = vrot.slane %v3587_v53, 5 }
 0x1d0   :  { %v11129_v3 = vadd.f32 %v4128_v10, %v2969_v42  ;;  %v8661_v10 = vld [vmem:[%s13857_s0 + $0x118] sm:$0xf]  ;;  %v3592_v42 = vshrl.u32 %v8660_v49, 16 }
 0x1d1   :  { %v4133_v63 = vpop.f32.mrf.mxu0  ;;  %v3605_v56 = vshrl.u32 %v8661_v10, 16  ;;  %v3590_v27 = vsel %vm9673_vm4, %v3585_v35, %v3589_v30 }
 0x1d2   :  { %v3918_v35 = vunpack.c.l.b16 %v3590_v27 }
 0x1d3   :  { %v1602_v33 = vpop.f32.mrf.mxu1  ;;  %v3607_v30 = vrot.slane %v3605_v56, 4 }
 0x1d4   :  { %v1603_v54 = vadd.f32 %v1602_v33, %v10257_v26  ;;  %8714 = vmatmul.msk.bf16.gmra.mxu0 %vm1009_vm3, %v3961_v18  ;;  %v3580_v26 = vsel %vm9673_vm4, %v3575_v41, %v3579_v50  ;;  %v2114_v18 = vpack.c.b16 %v2071_v0, %v2070_v7  ;;  %v3601_v50 = vshll.u32 %v8661_v10, 16 }
 0x1d5   :  { %v2838_v55 = vpop.f32.mrf.mxu3  ;;  %v3917_v33 = vunpack.c.l.b16 %v3580_v26  ;;  %v8333_v7 = vrot.slane %v1728_v19, 9  ;;  %v1957_v0 = vrot.slane %v1955_v22, 4 }
 0x1d6   :  { %v11142_v9 = vadd.f32 %v2289_v8, %v1603_v54  ;;  %8299 = vmatmul.msk.bf16.gmra.mxu1 %vm1009_vm3, %v9355_v25  ;;  %v2970_v1 = vadd.f32 %v2838_v55, %v11072_v48  ;;  %v3595_v8 = vshll.u32 %v8660_v49, 16  ;;  %v9491_v25 = vld [vmem:[%s13857_s0 + $0x11c] sm:$0x1]  ;;  %v3594_v49 = vrot.slane %v3592_v42, 4 }
 0x1d7   :  { %v2291_v59 = vpop.f32.mrf.mxu2  ;;  %v1958_v41 = vrot.slane %v9491_v25, 5  ;;  %v1956_v42 = vsel %vm10123_vm7, %v8333_v7, %v1955_v22 }
 0x1d8   :  { %v11160_v53 = vadd.f32 %v11103_v44, %v2970_v1  ;;  %v3597_v10 = vrot.slane %v3595_v8, 5  ;;  %v3603_v44 = vrot.slane %v3601_v50, 5  ;;  %v8662_v1 = vld [vmem:[%s13857_s0 + $0x11c] sm:$0x1] }
 0x1d9   :  { %v4135_v48 = vpop.f32.mrf.mxu0  ;;  %v3611_v56 = vshll.u32 %v8662_v1, 16 }
 0x1da   :  { %8586 = vmatmul.msk.bf16.gmra.mxu3 %vm1009_vm3, %v9386_v12  ;;  %v3598_v8 = vor.u32 %v3597_v10, %v3594_v49  ;;  %v3608_v50 = vor.u32 %v3607_v30, %v3603_v44 }
 0x1db   :  { %v1604_v54 = vpop.f32.mrf.mxu1  ;;  %v3613_v7 = vrot.slane %v3611_v56, 5 }
 0x1dc   :  { %v1605_v55 = vadd.f32 %v1604_v54, %v10291_v4  ;;  %8364 = vmatmul.msk.bf16.gmra.mxu2 %vm1009_vm3, %v2114_v18  ;;  %v1959_v4 = vsel %vm10123_vm7, %v1957_v0, %v1958_v41  ;;  %v3962_v18 = vpack.c.b16 %v3918_v35, %v3917_v33  ;;  %v2072_v54 = vunpack.c.l.b16 %v1956_v42  ;;  %v8663_v33 = vld [vmem:[%s13857_s0 + $0x120] sm:$0xf]  ;;  %v9387_v35 = vld [vmem:[%s13857_s0 + $0x108] sm:$0xff] }
 0x1dd   :  { %v2841_v40 = vpop.f32.mrf.mxu3  ;;  %v3609_v41 = vrot.slane %v3608_v50, 4 }
 0x1de   :  { %v11171_v26 = vadd.f32 %v2291_v59, %v1605_v55  ;;  %v2971_v12 = vadd.f32 %v2841_v40, %v11089_v28  ;;  %v9356_v59 = vld [vmem:[%s13857_s0 + $0x108] sm:$0xff]  ;;  %v2073_v28 = vunpack.c.l.b16 %v1959_v4  ;;  %v3599_v40 = vrot.slane %v3598_v8, 4 }
 0x1df   :  { %v2294_v19 = vpop.f32.mrf.mxu2  ;;  %v3614_v4 = vsel %vm9673_vm4, %v3609_v41, %v3613_v7  ;;  %v3619_v8 = vshll.u32 %v8663_v33, 16 }
 0x1e0   :  { %v11178_v25 = vadd.f32 %v4133_v63, %v2971_v12  ;;  %v8664_v63 = vld [vmem:[%s13857_s0 + $0x124] sm:$0xf]  ;;  %v2115_v10 = vpack.c.b16 %v2073_v28, %v2072_v54  ;;  %v3604_v1 = vsel %vm9673_vm4, %v3599_v40, %v3603_v44  ;;  %v9493_v44 = vld [vmem:[%s13857_s0 + $0x128] sm:$0x1]  ;;  %v3920_v40 = vunpack.c.l.b16 %v3614_v4 }
 0x1e1   :  { %v4138_v27 = vpop.f32.mrf.mxu0  ;;  %v9492_v12 = vld [vmem:[%s13857_s0 + $0x124] sm:$0xf]  ;;  %v3629_v50 = vshrl.u32 %v8664_v63, 16  ;;  %v1965_v54 = vrot.slane %v9493_v44, 5  ;;  %v3919_v28 = vunpack.c.l.b16 %v3604_v1 }
 0x1e2   :  { %v1962_v42 = vrot.slane %v9492_v12, 5 }
 0x1e3   :  { %v1607_v55 = vpop.f32.mrf.mxu1 }
 0x1e4   :  { %v1608_v22 = vadd.f32 %v1607_v55, %v10315_v39  ;;  %8715 = vmatmul.msk.bf16.gmra.mxu0 %vm1009_vm3, %v3962_v18  ;;  %v3625_v18 = vshll.u32 %v8664_v63, 16  ;;  %v1964_v41 = vrot.slane %v1962_v42, 4  ;;  %v3621_v63 = vrot.slane %v3619_v8, 5 }
 0x1e5   :  { %v2843_v0 = vpop.f32.mrf.mxu3 }
 0x1e6   :  { %v11191_v49 = vadd.f32 %v2294_v19, %v1608_v22  ;;  %8300 = vmatmul.msk.bf16.gmra.mxu1 %vm1009_vm3, %v9356_v59  ;;  %v2972_v39 = vadd.f32 %v2843_v0, %v11119_v57  ;;  %v3616_v19 = vshrl.u32 %v8663_v33, 16  ;;  %v1729_v57 = vld [vmem:[%s13857_s0 + $0x120] sm:$0xe]  ;;  %v3631_v0 = vrot.slane %v3629_v50, 4 }
 0x1e7   :  { %v2296_v30 = vpop.f32.mrf.mxu2  ;;  %v8334_v22 = vrot.slane %v1729_v57, 9  ;;  %v3963_v57 = vpack.c.b16 %v3920_v40, %v3919_v28 }
 0x1e8   :  { %v11208_v59 = vadd.f32 %v4135_v48, %v2972_v39  ;;  %v3618_v7 = vrot.slane %v3616_v19, 4  ;;  %v3627_v48 = vrot.slane %v3625_v18, 5  ;;  %v8665_v39 = vld [vmem:[%s13857_s0 + $0x128] sm:$0x1] }
 0x1e9   :  { %v4140_v56 = vpop.f32.mrf.mxu0  ;;  %v1963_v19 = vsel %vm10123_vm7, %v8334_v22, %v1962_v42  ;;  %v3635_v18 = vshll.u32 %v8665_v39, 16  ;;  %v8666_v42 = vld [vmem:[%s13857_s0 + $0x12c] sm:$0xf] }
 0x1ea   :  { %8587 = vmatmul.msk.bf16.gmra.mxu3 %vm1009_vm3, %v9387_v35  ;;  %v3632_v8 = vor.u32 %v3631_v0, %v3627_v48  ;;  %v3643_v0 = vshll.u32 %v8666_v42, 16 }
 0x1eb   :  { %v1609_v55 = vpop.f32.mrf.mxu1  ;;  %v3637_v22 = vrot.slane %v3635_v18, 5 }
 0x1ec   :  { %v1610_v33 = vadd.f32 %v1609_v55, %v10348_v34  ;;  %8365 = vmatmul.msk.bf16.gmra.mxu2 %vm1009_vm3, %v2115_v10  ;;  %v1966_v34 = vsel %vm10123_vm7, %v1964_v41, %v1965_v54  ;;  %v3622_v10 = vor.u32 %v3621_v63, %v3618_v7  ;;  %v3633_v40 = vrot.slane %v3632_v8, 4  ;;  %v8667_v7 = vld [vmem:[%s13857_s0 + $0x130] sm:$0xf] }
 0x1ed   :  { %v2846_v12 = vpop.f32.mrf.mxu3  ;;  %v3640_v63 = vshrl.u32 %v8666_v42, 16  ;;  %v3649_v8 = vshll.u32 %v8667_v7, 16  ;;  %v3653_v18 = vshrl.u32 %v8667_v7, 16 }
 0x1ee   :  { %v11219_v1 = vadd.f32 %v2296_v30, %v1610_v33  ;;  %v2973_v35 = vadd.f32 %v2846_v12, %v11142_v9  ;;  %v9357_v30 = vld [vmem:[%s13857_s0 + $0x114] sm:$0xff]  ;;  %v2074_v9 = vunpack.c.l.b16 %v1963_v19  ;;  %v2075_v33 = vunpack.c.l.b16 %v1966_v34  ;;  %v1730_v34 = vld [vmem:[%s13857_s0 + $0x12c] sm:$0xe] }
 0x1ef   :  { %v2299_v4 = vpop.f32.mrf.mxu2  ;;  %v3623_v54 = vrot.slane %v3622_v10, 4  ;;  %v3655_v7 = vrot.slane %v3653_v18, 4 }
 0x1f0   :  { %v11226_v44 = vadd.f32 %v4138_v27, %v2973_v35  ;;  %v2116_v35 = vpack.c.b16 %v2075_v33, %v2074_v9 }
 0x1f1   :  { %v4143_v50 = vpop.f32.mrf.mxu0 }
 0x1f3   :  { %v1612_v55 = vpop.f32.mrf.mxu1 }
 0x1f4   :  { %v1613_v28 = vadd.f32 %v1612_v55, %v10377_v16  ;;  %8716 = vmatmul.msk.bf16.gmra.mxu0 %vm1009_vm3, %v3963_v57  ;;  %v9388_v16 = vld [vmem:[%s13857_s0 + $0x114] sm:$0xff]  ;;  %v3638_v57 = vsel %vm9673_vm4, %v3633_v40, %v3637_v22  ;;  %v3642_v55 = vrot.slane %v3640_v63, 4 }
 0x1f5   :  { %v2848_v27 = vpop.f32.mrf.mxu3  ;;  %v9495_v40 = vld [vmem:[%s13857_s0 + $0x134] sm:$0x1] }
 0x1f6   :  { %v11236_v41 = vadd.f32 %v2299_v4, %v1613_v28  ;;  %8301 = vmatmul.msk.bf16.gmra.mxu1 %vm1009_vm3, %v9357_v30  ;;  %v2974_v39 = vadd.f32 %v2848_v27, %v11171_v26  ;;  %v3628_v4 = vsel %vm9673_vm4, %v3623_v54, %v3627_v48  ;;  %v9494_v26 = vld [vmem:[%s13857_s0 + $0x130] sm:$0xf]  ;;  %v3645_v48 = vrot.slane %v3643_v0, 5 }
 0x1f7   :  { %v2301_v12 = vpop.f32.mrf.mxu2  ;;  %v1969_v10 = vrot.slane %v9494_v26, 5  ;;  %v3921_v42 = vunpack.c.l.b16 %v3628_v4  ;;  %v3922_v28 = vunpack.c.l.b16 %v3638_v57  ;;  %v8335_v54 = vrot.slane %v1730_v34, 9 }
 0x1f8   :  { %v11258_v30 = vadd.f32 %v4140_v56, %v2974_v39  ;;  %v1972_v22 = vrot.slane %v9495_v40, 5  ;;  %v3651_v56 = vrot.slane %v3649_v8, 5  ;;  %v3646_v39 = vor.u32 %v3645_v48, %v3642_v55 }
 0x1f9   :  { %v11250_v19 = vpop.f32.mrf.mxu0  ;;  %v1971_v27 = vrot.slane %v1969_v10, 4  ;;  %v3964_v4 = vpack.c.b16 %v3922_v28, %v3921_v42  ;;  %v1970_v57 = vsel %vm10123_vm7, %v8335_v54, %v1969_v10  ;;  %v8669_v42 = vld [vmem:[%s13857_s0 + $0x138] sm:$0xf] }
 0x1fa   :  { %8588 = vmatmul.msk.bf16.gmra.mxu3 %vm1009_vm3, %v9388_v16  ;;  %v3656_v8 = vor.u32 %v3655_v7, %v3651_v56  ;;  %v3647_v55 = vrot.slane %v3646_v39, 4  ;;  %v9389_v7 = vld [vmem:[%s13857_s0 + $0x120] sm:$0xff] }
 0x1fb   :  { %v1614_v9 = vpop.f32.mrf.mxu1  ;;  %v1973_v26 = vsel %vm10123_vm7, %v1971_v27, %v1972_v22 }
 0x1fc   :  { %v1615_v33 = vadd.f32 %v1614_v9, %v10410_v60  ;;  %8366 = vmatmul.msk.bf16.gmra.mxu2 %vm1009_vm3, %v2116_v35  ;;  %v8668_v60 = vld [vmem:[%s13857_s0 + $0x134] sm:$0x1]  ;;  %v9358_v9 = vld [vmem:[%s13857_s0 + $0x120] sm:$0xff]  ;;  %v2077_v10 = vunpack.c.l.b16 %v1973_v26  ;;  %v3657_v28 = vrot.slane %v3656_v8, 4 }
 0x1fd   :  { %v2851_v63 = vpop.f32.mrf.mxu3  ;;  %v3659_v18 = vshll.u32 %v8668_v60, 16  ;;  %v9496_v60 = vld [vmem:[%s13857_s0 + $0x13c] sm:$0xf] }
 0x1fe   :  { %v11266_v0 = vadd.f32 %v2301_v12, %v1615_v33  ;;  %v2975_v16 = vadd.f32 %v2851_v63, %v11191_v49  ;;  %v2076_v33 = vunpack.c.l.b16 %v1970_v57  ;;  %v1976_v39 = vrot.slane %v9496_v60, 5  ;;  %v1731_v57 = vld [vmem:[%s13857_s0 + $0x138] sm:$0xe] }
 0x1ff   :  { %v2304_v35 = vpop.f32.mrf.mxu2  ;;  %v3661_v54 = vrot.slane %v3659_v18, 5 }
 0x200   :  { %v11276_v12 = vadd.f32 %v4143_v50, %v2975_v16  ;;  %v8670_v50 = vld [vmem:[%s13857_s0 + $0x13c] sm:$0xf]  ;;  %v3664_v16 = vshrl.u32 %v8669_v42, 16 }
 0x201   :  { %v4148_v34 = vpop.f32.mrf.mxu0  ;;  %v3677_v26 = vshrl.u32 %v8670_v50, 16  ;;  %v3662_v8 = vsel %vm9673_vm4, %v3657_v28, %v3661_v54 }
 0x202   :  { %v3924_v28 = vunpack.c.l.b16 %v3662_v8 }
 0x203   :  { %v1617_v48 = vpop.f32.mrf.mxu1  ;;  %v3679_v54 = vrot.slane %v3677_v26, 4 }
 0x204   :  { %v1618_v49 = vadd.f32 %v1617_v48, %v10442_v58  ;;  %8717 = vmatmul.msk.bf16.gmra.mxu0 %vm1009_vm3, %v3964_v4  ;;  %v3652_v58 = vsel %vm9673_vm4, %v3647_v55, %v3651_v56  ;;  %v2117_v4 = vpack.c.b16 %v2077_v10, %v2076_v33  ;;  %v3673_v56 = vshll.u32 %v8670_v50, 16 }
 0x205   :  { %v2853_v40 = vpop.f32.mrf.mxu3  ;;  %v3923_v48 = vunpack.c.l.b16 %v3652_v58  ;;  %v8336_v33 = vrot.slane %v1731_v57, 9  ;;  %v1978_v10 = vrot.slane %v1976_v39, 4 }
 0x206   :  { %v11289_v22 = vadd.f32 %v2304_v35, %v1618_v49  ;;  %8302 = vmatmul.msk.bf16.gmra.mxu1 %vm1009_vm3, %v9358_v9  ;;  %v2976_v27 = vadd.f32 %v2853_v40, %v11219_v1  ;;  %v3667_v35 = vshll.u32 %v8669_v42, 16  ;;  %v9497_v9 = vld [vmem:[%s13857_s0 + $0x140] sm:$0x1]  ;;  %v3666_v42 = vrot.slane %v3664_v16, 4 }
 0x207   :  { %v2306_v63 = vpop.f32.mrf.mxu2  ;;  %v1979_v55 = vrot.slane %v9497_v9, 5  ;;  %v1977_v16 = vsel %vm10123_vm7, %v8336_v33, %v1976_v39 }
 0x208   :  { %v11307_v18 = vadd.f32 %v11250_v19, %v2976_v27  ;;  %v3669_v50 = vrot.slane %v3667_v35, 5  ;;  %v3675_v19 = vrot.slane %v3673_v56, 5  ;;  %v8671_v27 = vld [vmem:[%s13857_s0 + $0x140] sm:$0x1] }
 0x209   :  { %v4150_v1 = vpop.f32.mrf.mxu0  ;;  %v3683_v26 = vshll.u32 %v8671_v27, 16 }
 0x20a   :  { %8589 = vmatmul.msk.bf16.gmra.mxu3 %vm1009_vm3, %v9389_v7  ;;  %v3670_v35 = vor.u32 %v3669_v50, %v3666_v42  ;;  %v3680_v56 = vor.u32 %v3679_v54, %v3675_v19 }
 0x20b   :  { %v1619_v49 = vpop.f32.mrf.mxu1  ;;  %v3685_v33 = vrot.slane %v3683_v26, 5 }
 0x20c   :  { %v1620_v40 = vadd.f32 %v1619_v49, %v10459_v37  ;;  %8367 = vmatmul.msk.bf16.gmra.mxu2 %vm1009_vm3, %v2117_v4  ;;  %v1980_v37 = vsel %vm10123_vm7, %v1978_v10, %v1979_v55  ;;  %v3965_v4 = vpack.c.b16 %v3924_v28, %v3923_v48  ;;  %v2078_v49 = vunpack.c.l.b16 %v1977_v16  ;;  %v8672_v48 = vld [vmem:[%s13857_s0 + $0x144] sm:$0xf]  ;;  %v9390_v28 = vld [vmem:[%s13857_s0 + $0x12c] sm:$0xff] }
 0x20d   :  { %v2856_v60 = vpop.f32.mrf.mxu3  ;;  %v3681_v55 = vrot.slane %v3680_v56, 4 }
 0x20e   :  { %v11318_v58 = vadd.f32 %v2306_v63, %v1620_v40  ;;  %v2977_v7 = vadd.f32 %v2856_v60, %v11236_v41  ;;  %v9359_v63 = vld [vmem:[%s13857_s0 + $0x12c] sm:$0xff]  ;;  %v2079_v41 = vunpack.c.l.b16 %v1980_v37  ;;  %v3671_v60 = vrot.slane %v3670_v35, 4 }
 0x20f   :  { %v2309_v57 = vpop.f32.mrf.mxu2  ;;  %v3686_v37 = vsel %vm9673_vm4, %v3681_v55, %v3685_v33  ;;  %v3691_v35 = vshll.u32 %v8672_v48, 16 }
 0x210   :  { %v11325_v9 = vadd.f32 %v4148_v34, %v2977_v7  ;;  %v8673_v34 = vld [vmem:[%s13857_s0 + $0x148] sm:$0xf]  ;;  %v2118_v50 = vpack.c.b16 %v2079_v41, %v2078_v49  ;;  %v3676_v27 = vsel %vm9673_vm4, %v3671_v60, %v3675_v19  ;;  %v9499_v19 = vld [vmem:[%s13857_s0 + $0x14c] sm:$0x1]  ;;  %v3926_v60 = vunpack.c.l.b16 %v3686_v37 }
 0x211   :  { %v4153_v8 = vpop.f32.mrf.mxu0  ;;  %v9498_v7 = vld [vmem:[%s13857_s0 + $0x148] sm:$0xf]  ;;  %v3701_v56 = vshrl.u32 %v8673_v34, 16  ;;  %v1986_v49 = vrot.slane %v9499_v19, 5  ;;  %v3925_v41 = vunpack.c.l.b16 %v3676_v27 }
 0x212   :  { %v1983_v16 = vrot.slane %v9498_v7, 5 }
 0x213   :  { %v1622_v40 = vpop.f32.mrf.mxu1 }
 0x214   :  { %v1623_v39 = vadd.f32 %v1622_v40, %v10491_v6  ;;  %8718 = vmatmul.msk.bf16.gmra.mxu0 %vm1009_vm3, %v3965_v4  ;;  %v3697_v4 = vshll.u32 %v8673_v34, 16  ;;  %v1985_v55 = vrot.slane %v1983_v16, 4  ;;  %v3693_v34 = vrot.slane %v3691_v35, 5 }
 0x215   :  { %v2858_v10 = vpop.f32.mrf.mxu3 }
 0x216   :  { %v11338_v42 = vadd.f32 %v2309_v57, %v1623_v39  ;;  %8303 = vmatmul.msk.bf16.gmra.mxu1 %vm1009_vm3, %v9359_v63  ;;  %v2978_v6 = vadd.f32 %v2858_v10, %v11266_v0  ;;  %v3688_v57 = vshrl.u32 %v8672_v48, 16  ;;  %v1732_v0 = vld [vmem:[%s13857_s0 + $0x144] sm:$0xe]  ;;  %v3703_v10 = vrot.slane %v3701_v56, 4 }
 0x217   :  { %v2311_v54 = vpop.f32.mrf.mxu2  ;;  %v8337_v39 = vrot.slane %v1732_v0, 9  ;;  %v3966_v0 = vpack.c.b16 %v3926_v60, %v3925_v41 }
 0x218   :  { %v11355_v63 = vadd.f32 %v4150_v1, %v2978_v6  ;;  %v3690_v33 = vrot.slane %v3688_v57, 4  ;;  %v3699_v1 = vrot.slane %v3697_v4, 5  ;;  %v8674_v6 = vld [vmem:[%s13857_s0 + $0x14c] sm:$0x1] }
 0x219   :  { %v4155_v26 = vpop.f32.mrf.mxu0  ;;  %v1984_v57 = vsel %vm10123_vm7, %v8337_v39, %v1983_v16  ;;  %v3707_v4 = vshll.u32 %v8674_v6, 16  ;;  %v8675_v16 = vld [vmem:[%s13857_s0 + $0x150] sm:$0xf] }
 0x21a   :  { %8590 = vmatmul.msk.bf16.gmra.mxu3 %vm1009_vm3, %v9390_v28  ;;  %v3704_v35 = vor.u32 %v3703_v10, %v3699_v1  ;;  %v3715_v10 = vshll.u32 %v8675_v16, 16 }
 0x21b   :  { %v1624_v40 = vpop.f32.mrf.mxu1  ;;  %v3709_v39 = vrot.slane %v3707_v4, 5 }
 0x21c   :  { %v1625_v48 = vadd.f32 %v1624_v40, %v10519_v21  ;;  %8368 = vmatmul.msk.bf16.gmra.mxu2 %vm1009_vm3, %v2118_v50  ;;  %v1987_v21 = vsel %vm10123_vm7, %v1985_v55, %v1986_v49  ;;  %v3694_v50 = vor.u32 %v3693_v34, %v3690_v33  ;;  %v3705_v60 = vrot.slane %v3704_v35, 4  ;;  %v8676_v33 = vld [vmem:[%s13857_s0 + $0x154] sm:$0xf] }
 0x21d   :  { %v2861_v7 = vpop.f32.mrf.mxu3  ;;  %v3712_v34 = vshrl.u32 %v8675_v16, 16  ;;  %v3721_v35 = vshll.u32 %v8676_v33, 16  ;;  %v3725_v4 = vshrl.u32 %v8676_v33, 16 }
 0x21e   :  { %v11366_v27 = vadd.f32 %v2311_v54, %v1625_v48  ;;  %v2979_v28 = vadd.f32 %v2861_v7, %v11289_v22  ;;  %v9360_v54 = vld [vmem:[%s13857_s0 + $0x138] sm:$0xff]  ;;  %v2080_v22 = vunpack.c.l.b16 %v1984_v57  ;;  %v2081_v48 = vunpack.c.l.b16 %v1987_v21  ;;  %v1733_v21 = vld [vmem:[%s13857_s0 + $0x150] sm:$0xe] }
 0x21f   :  { %v2314_v37 = vpop.f32.mrf.mxu2  ;;  %v3695_v49 = vrot.slane %v3694_v50, 4  ;;  %v3727_v33 = vrot.slane %v3725_v4, 4 }
 0x220   :  { %v11373_v19 = vadd.f32 %v4153_v8, %v2979_v28  ;;  %v2119_v28 = vpack.c.b16 %v2081_v48, %v2080_v22 }
 0x221   :  { %v4158_v56 = vpop.f32.mrf.mxu0 }
 0x223   :  { %v1627_v40 = vpop.f32.mrf.mxu1 }
 0x224   :  { %v1628_v41 = vadd.f32 %v1627_v40, %v10546_v29  ;;  %8719 = vmatmul.msk.bf16.gmra.mxu0 %vm1009_vm3, %v3966_v0  ;;  %v9391_v29 = vld [vmem:[%s13857_s0 + $0x138] sm:$0xff]  ;;  %v3710_v0 = vsel %vm9673_vm4, %v3705_v60, %v3709_v39  ;;  %v3714_v40 = vrot.slane %v3712_v34, 4 }
 0x225   :  { %v2863_v8 = vpop.f32.mrf.mxu3  ;;  %v9501_v60 = vld [vmem:[%s13857_s0 + $0x158] sm:$0x1] }
 0x226   :  { %v11383_v55 = vadd.f32 %v2314_v37, %v1628_v41  ;;  %8304 = vmatmul.msk.bf16.gmra.mxu1 %vm1009_vm3, %v9360_v54  ;;  %v2980_v6 = vadd.f32 %v2863_v8, %v11318_v58  ;;  %v3700_v37 = vsel %vm9673_vm4, %v3695_v49, %v3699_v1  ;;  %v9500_v58 = vld [vmem:[%s13857_s0 + $0x154] sm:$0xf]  ;;  %v3717_v1 = vrot.slane %v3715_v10, 5 }
 0x227   :  { %v2316_v7 = vpop.f32.mrf.mxu2  ;;  %v1990_v50 = vrot.slane %v9500_v58, 5  ;;  %v3927_v16 = vunpack.c.l.b16 %v3700_v37  ;;  %v3928_v41 = vunpack.c.l.b16 %v3710_v0  ;;  %v8338_v49 = vrot.slane %v1733_v21, 9 }
 0x228   :  { %v11405_v54 = vadd.f32 %v4155_v26, %v2980_v6  ;;  %v1993_v39 = vrot.slane %v9501_v60, 5  ;;  %v3723_v26 = vrot.slane %v3721_v35, 5  ;;  %v3718_v6 = vor.u32 %v3717_v1, %v3714_v40 }
 0x229   :  { %v11397_v57 = vpop.f32.mrf.mxu0  ;;  %v1992_v8 = vrot.slane %v1990_v50, 4  ;;  %v3967_v37 = vpack.c.b16 %v3928_v41, %v3927_v16  ;;  %v1991_v0 = vsel %vm10123_vm7, %v8338_v49, %v1990_v50  ;;  %v8678_v16 = vld [vmem:[%s13857_s0 + $0x15c] sm:$0xf] }
 0x22a   :  { %8591 = vmatmul.msk.bf16.gmra.mxu3 %vm1009_vm3, %v9391_v29  ;;  %v3728_v35 = vor.u32 %v3727_v33, %v3723_v26  ;;  %v3719_v40 = vrot.slane %v3718_v6, 4  ;;  %v9392_v33 = vld [vmem:[%s13857_s0 + $0x144] sm:$0xff] }
 0x22b   :  { %v1629_v22 = vpop.f32.mrf.mxu1  ;;  %v1994_v58 = vsel %vm10123_vm7, %v1992_v8, %v1993_v39 }
 0x22c   :  { %v1630_v48 = vadd.f32 %v1629_v22, %v10579_v23  ;;  %8369 = vmatmul.msk.bf16.gmra.mxu2 %vm1009_vm3, %v2119_v28  ;;  %v8677_v23 = vld [vmem:[%s13857_s0 + $0x158] sm:$0x1]  ;;  %v9361_v22 = vld [vmem:[%s13857_s0 + $0x144] sm:$0xff]  ;;  %v2083_v50 = vunpack.c.l.b16 %v1994_v58  ;;  %v3729_v41 = vrot.slane %v3728_v35, 4 }
 0x22d   :  { %v2866_v34 = vpop.f32.mrf.mxu3  ;;  %v3731_v4 = vshll.u32 %v8677_v23, 16  ;;  %v9502_v23 = vld [vmem:[%s13857_s0 + $0x160] sm:$0xf] }
 0x22e   :  { %v11413_v10 = vadd.f32 %v2316_v7, %v1630_v48  ;;  %v2981_v29 = vadd.f32 %v2866_v34, %v11338_v42  ;;  %v2082_v48 = vunpack.c.l.b16 %v1991_v0  ;;  %v1997_v6 = vrot.slane %v9502_v23, 5  ;;  %v1734_v0 = vld [vmem:[%s13857_s0 + $0x15c] sm:$0xe] }
 0x22f   :  { %v2319_v28 = vpop.f32.mrf.mxu2  ;;  %v3733_v49 = vrot.slane %v3731_v4, 5 }
 0x230   :  { %v11423_v7 = vadd.f32 %v4158_v56, %v2981_v29  ;;  %v8679_v56 = vld [vmem:[%s13857_s0 + $0x160] sm:$0xf]  ;;  %v3736_v29 = vshrl.u32 %v8678_v16, 16 }
 0x231   :  { %v4163_v21 = vpop.f32.mrf.mxu0  ;;  %v3749_v58 = vshrl.u32 %v8679_v56, 16  ;;  %v3734_v35 = vsel %vm9673_vm4, %v3729_v41, %v3733_v49 }
 0x232   :  { %13898 = vst [vmem:[#allocation34_spill] sm:$0xff] %v11423_v7  ;;  %v3930_v41 = vunpack.c.l.b16 %v3734_v35 }
 0x233   :  { %v1632_v1 = vpop.f32.mrf.mxu1  ;;  %v3751_v49 = vrot.slane %v3749_v58, 4 }
 0x234   :  { %v1633_v42 = vadd.f32 %v1632_v1, %v10250_v14  ;;  %8720 = vmatmul.msk.bf16.gmra.mxu0 %vm1009_vm3, %v3967_v37  ;;  %v3724_v14 = vsel %vm9673_vm4, %v3719_v40, %v3723_v26  ;;  %v2120_v37 = vpack.c.b16 %v2083_v50, %v2082_v48  ;;  %v3745_v26 = vshll.u32 %v8679_v56, 16 }
 0x235   :  { %v2868_v60 = vpop.f32.mrf.mxu3  ;;  %v3929_v1 = vunpack.c.l.b16 %v3724_v14  ;;  %v8339_v48 = vrot.slane %v1734_v0, 9  ;;  %v1999_v50 = vrot.slane %v1997_v6, 4 }
 0x236   :  { %v11436_v39 = vadd.f32 %v2319_v28, %v1633_v42  ;;  %8305 = vmatmul.msk.bf16.gmra.mxu1 %vm1009_vm3, %v9361_v22  ;;  %v2982_v8 = vadd.f32 %v2868_v60, %v11366_v27  ;;  %v3739_v28 = vshll.u32 %v8678_v16, 16  ;;  %v9503_v22 = vld [vmem:[%s13857_s0 + $0x164] sm:$0x1]  ;;  %v3738_v16 = vrot.slane %v3736_v29, 4 }
 0x237   :  { %v2321_v34 = vpop.f32.mrf.mxu2  ;;  %v2000_v40 = vrot.slane %v9503_v22, 5  ;;  %v1998_v29 = vsel %vm10123_vm7, %v8339_v48, %v1997_v6 }
 0x238   :  { %v11454_v4 = vadd.f32 %v11397_v57, %v2982_v8  ;;  %v3741_v56 = vrot.slane %v3739_v28, 5  ;;  %v3747_v57 = vrot.slane %v3745_v26, 5  ;;  %v8680_v8 = vld [vmem:[%s13857_s0 + $0x164] sm:$0x1] }
 0x239   :  { %v4165_v27 = vpop.f32.mrf.mxu0  ;;  %v3755_v58 = vshll.u32 %v8680_v8, 16 }
 0x23a   :  { %13899 = vst [vmem:[#allocation35_spill] sm:$0xff] %v11454_v4  ;;  %8592 = vmatmul.msk.bf16.gmra.mxu3 %vm1009_vm3, %v9392_v33  ;;  %v3742_v28 = vor.u32 %v3741_v56, %v3738_v16  ;;  %v3752_v26 = vor.u32 %v3751_v49, %v3747_v57  ;;  %v13926_v4 = vld [vmem:[#allocation8_spill] sm:$0xff] }
 0x23b   :  { %v1634_v42 = vpop.f32.mrf.mxu1  ;;  %v3757_v48 = vrot.slane %v3755_v58, 5 }
 0x23c   :  { %v1635_v60 = vadd.f32 %v1634_v42, %v10273_v45  ;;  %8370 = vmatmul.msk.bf16.gmra.mxu2 %vm1009_vm3, %v2120_v37  ;;  %v2001_v45 = vsel %vm10123_vm7, %v1999_v50, %v2000_v40  ;;  %v3968_v37 = vpack.c.b16 %v3930_v41, %v3929_v1  ;;  %v2084_v42 = vunpack.c.l.b16 %v1998_v29  ;;  %v8681_v1 = vld [vmem:[%s13857_s0 + $0x168] sm:$0xf]  ;;  %v9393_v41 = vld [vmem:[%s13857_s0 + $0x150] sm:$0xff] }
 0x23d   :  { %v2871_v23 = vpop.f32.mrf.mxu3  ;;  %v3753_v40 = vrot.slane %v3752_v26, 4 }
 0x23e   :  { %v11465_v14 = vadd.f32 %v2321_v34, %v1635_v60  ;;  %v2983_v33 = vadd.f32 %v2871_v23, %v11383_v55  ;;  %v9362_v34 = vld [vmem:[%s13857_s0 + $0x150] sm:$0xff]  ;;  %v2085_v55 = vunpack.c.l.b16 %v2001_v45  ;;  %v3743_v23 = vrot.slane %v3742_v28, 4 }
 0x23f   :  { %v2324_v0 = vpop.f32.mrf.mxu2  ;;  %v3758_v45 = vsel %vm9673_vm4, %v3753_v40, %v3757_v48  ;;  %v3763_v28 = vshll.u32 %v8681_v1, 16 }
 0x240   :  { %v11472_v22 = vadd.f32 %v4163_v21, %v2983_v33  ;;  %v8682_v21 = vld [vmem:[%s13857_s0 + $0x16c] sm:$0xf]  ;;  %v2121_v56 = vpack.c.b16 %v2085_v55, %v2084_v42  ;;  %v3748_v8 = vsel %vm9673_vm4, %v3743_v23, %v3747_v57  ;;  %v9505_v57 = vld [vmem:[%s13857_s0 + $0x170] sm:$0x1]  ;;  %v3932_v23 = vunpack.c.l.b16 %v3758_v45 }
 0x241   :  { %v4168_v35 = vpop.f32.mrf.mxu0  ;;  %v9504_v33 = vld [vmem:[%s13857_s0 + $0x16c] sm:$0xf]  ;;  %v3773_v26 = vshrl.u32 %v8682_v21, 16  ;;  %v2007_v42 = vrot.slane %v9505_v57, 5  ;;  %v3931_v55 = vunpack.c.l.b16 %v3748_v8 }
 0x242   :  { %13900 = vst [vmem:[#allocation36_spill] sm:$0xff] %v11472_v22  ;;  %v2004_v29 = vrot.slane %v9504_v33, 5  ;;  %v8683_v33 = vld [vmem:[%s13857_s0 + $0x170] sm:$0x1]  ;;  %v13912_v22 = vld [vmem:[#allocation21_spill] sm:$0xff] }
 0x243   :  { %v1637_v60 = vpop.f32.mrf.mxu1 }
 0x244   :  { %v1638_v6 = vadd.f32 %v1637_v60, %v10305_v61  ;;  %8721 = vmatmul.msk.bf16.gmra.mxu0 %vm1009_vm3, %v3968_v37  ;;  %v3769_v37 = vshll.u32 %v8682_v21, 16  ;;  %v2006_v40 = vrot.slane %v2004_v29, 4  ;;  %v3765_v21 = vrot.slane %v3763_v28, 5 }
 0x245   :  { %v2873_v50 = vpop.f32.mrf.mxu3 }
 0x246   :  { %v11485_v16 = vadd.f32 %v2324_v0, %v1638_v6  ;;  %8306 = vmatmul.msk.bf16.gmra.mxu1 %vm1009_vm3, %v9362_v34  ;;  %v2984_v61 = vadd.f32 %v2873_v50, %v11413_v10  ;;  %v3760_v0 = vshrl.u32 %v8681_v1, 16  ;;  %v1735_v10 = vld [vmem:[%s13857_s0 + $0x168] sm:$0xe]  ;;  %v13902_v50 = vld [vmem:[#allocation11_spill] sm:$0xff] }
 0x247   :  { %v2326_v49 = vpop.f32.mrf.mxu2  ;;  %v8340_v6 = vrot.slane %v1735_v10, 9  ;;  %v3969_v10 = vpack.c.b16 %v3932_v23, %v3931_v55  ;;  %v13904_v55 = vld [vmem:[#allocation13_spill] sm:$0xff] }
 0x248   :  { %v11502_v34 = vadd.f32 %v4165_v27, %v2984_v61  ;;  %v3762_v48 = vrot.slane %v3760_v0, 4  ;;  %v3771_v27 = vrot.slane %v3769_v37, 5  ;;  %v3775_v61 = vrot.slane %v3773_v26, 4 }
 0x249   :  { %v4170_v58 = vpop.f32.mrf.mxu0  ;;  %v2005_v0 = vsel %vm10123_vm7, %v8340_v6, %v2004_v29  ;;  %v3779_v26 = vshll.u32 %v8683_v33, 16  ;;  %v8684_v29 = vld [vmem:[%s13857_s0 + $0x174] sm:$0xf] }
 0x24a   :  { %13901 = vst [vmem:[#allocation37_spill] sm:$0xff] %v11502_v34  ;;  %8593 = vmatmul.msk.bf16.gmra.mxu3 %vm1009_vm3, %v9393_v41  ;;  %v3766_v28 = vor.u32 %v3765_v21, %v3762_v48  ;;  %v3776_v37 = vor.u32 %v3775_v61, %v3771_v27  ;;  %v8685_v21 = vld [vmem:[%s13857_s0 + $0x178] sm:$0xf]  ;;  %v3784_v61 = vshrl.u32 %v8684_v29, 16  ;;  %v3787_v33 = vshll.u32 %v8684_v29, 16 }
 0x24b   :  { %v1639_v60 = vpop.f32.mrf.mxu1  ;;  %v3797_v29 = vshrl.u32 %v8685_v21, 16 }
 0x24c   :  { %v1640_v1 = vadd.f32 %v1639_v60, %v13902_v50  ;;  %8371 = vmatmul.msk.bf16.gmra.mxu2 %vm1009_vm3, %v2121_v56  ;;  %v2008_v56 = vsel %vm10123_vm7, %v2006_v40, %v2007_v42  ;;  %v3767_v42 = vrot.slane %v3766_v28, 4  ;;  %v3777_v6 = vrot.slane %v3776_v37, 4 }
 0x24d   :  { %v2876_v57 = vpop.f32.mrf.mxu3  ;;  %v3781_v40 = vrot.slane %v3779_v26, 5  ;;  %v1736_v26 = vld [vmem:[%s13857_s0 + $0x174] sm:$0xe] }
 0x24e   :  { %v11513_v8 = vadd.f32 %v2326_v49, %v1640_v1  ;;  %v2985_v41 = vadd.f32 %v2876_v57, %v11436_v39  ;;  %v9363_v49 = vld [vmem:[%s13857_s0 + $0x15c] sm:$0xff]  ;;  %v2086_v39 = vunpack.c.l.b16 %v2005_v0  ;;  %v2087_v57 = vunpack.c.l.b16 %v2008_v56 }
 0x24f   :  { %v2329_v45 = vpop.f32.mrf.mxu2  ;;  %v3782_v28 = vsel %vm9673_vm4, %v3777_v6, %v3781_v40 }
 0x250   :  { %v11520_v50 = vadd.f32 %v4168_v35, %v2985_v41  ;;  %v2122_v56 = vpack.c.b16 %v2087_v57, %v2086_v39  ;;  %v3786_v57 = vrot.slane %v3784_v61, 4  ;;  %v3934_v40 = vunpack.c.l.b16 %v3782_v28 }
 0x251   :  { %v4173_v60 = vpop.f32.mrf.mxu0 }
 0x252   :  { %13903 = vst [vmem:[#allocation11_spill] sm:$0xff] %v11520_v50 }
 0x253   :  { %v1642_v1 = vpop.f32.mrf.mxu1 }
 0x254   :  { %v1643_v23 = vadd.f32 %v1642_v1, %v13904_v55  ;;  %8722 = vmatmul.msk.bf16.gmra.mxu0 %vm1009_vm3, %v3969_v10  ;;  %v9394_v10 = vld [vmem:[%s13857_s0 + $0x15c] sm:$0xff]  ;;  %v3793_v1 = vshll.u32 %v8685_v21, 16 }
 0x255   :  { %v2878_v35 = vpop.f32.mrf.mxu3 }
 0x256   :  { %v11530_v48 = vadd.f32 %v2329_v45, %v1643_v23  ;;  %8307 = vmatmul.msk.bf16.gmra.mxu1 %vm1009_vm3, %v9363_v49  ;;  %v2986_v41 = vadd.f32 %v2878_v35, %v11465_v14  ;;  %v3772_v45 = vsel %vm9673_vm4, %v3767_v42, %v3771_v27  ;;  %v9506_v14 = vld [vmem:[%s13857_s0 + $0x178] sm:$0xf]  ;;  %v3789_v27 = vrot.slane %v3787_v33, 5 }
 0x257   :  { %v2331_v0 = vpop.f32.mrf.mxu2  ;;  %v2011_v49 = vrot.slane %v9506_v14, 5  ;;  %v13906_v23 = vld [vmem:[#allocation15_spill] sm:$0xff]  ;;  %v3933_v6 = vunpack.c.l.b16 %v3772_v45  ;;  %v8341_v35 = vrot.slane %v1736_v26, 9  ;;  %v9507_v14 = vld [vmem:[%s13857_s0 + $0x17c] sm:$0x1] }
 0x258   :  { %v11552_v39 = vadd.f32 %v4170_v58, %v2986_v41  ;;  %v2014_v50 = vrot.slane %v9507_v14, 5  ;;  %v3795_v58 = vrot.slane %v3793_v1, 5  ;;  %v3799_v41 = vrot.slane %v3797_v29, 4 }
 0x259   :  { %v11544_v37 = vpop.f32.mrf.mxu0  ;;  %v2013_v21 = vrot.slane %v2011_v49, 4  ;;  %v3970_v28 = vpack.c.b16 %v3934_v40, %v3933_v6  ;;  %v2012_v26 = vsel %vm10123_vm7, %v8341_v35, %v2011_v49 }
 0x25a   :  { %13905 = vst [vmem:[#allocation13_spill] sm:$0xff] %v11552_v39  ;;  %8594 = vmatmul.msk.bf16.gmra.mxu3 %vm1009_vm3, %v9394_v10  ;;  %v8686_v10 = vld [vmem:[%s13857_s0 + $0x17c] sm:$0x1]  ;;  %v3800_v29 = vor.u32 %v3799_v41, %v3795_v58  ;;  %v2088_v6 = vunpack.c.l.b16 %v2012_v26  ;;  %v9508_v26 = vld [vmem:[%s13857_s0 + $0x184] sm:$0xf]  ;;  %v13910_v39 = vld [vmem:[#allocation19_spill] sm:$0xff] }
 0x25b   :  { %v1644_v55 = vpop.f32.mrf.mxu1  ;;  %v2015_v1 = vsel %vm10123_vm7, %v2013_v21, %v2014_v50  ;;  %v3803_v14 = vshll.u32 %v8686_v10, 16  ;;  %v8687_v50 = vld [vmem:[%s13857_s0 + $0x180] sm:$0xf] }
 0x25c   :  { %v1645_v42 = vadd.f32 %v1644_v55, %v13906_v23  ;;  %8372 = vmatmul.msk.bf16.gmra.mxu2 %vm1009_vm3, %v2122_v56  ;;  %v3790_v55 = vor.u32 %v3789_v27, %v3786_v57  ;;  %v2089_v49 = vunpack.c.l.b16 %v2015_v1  ;;  %v3801_v40 = vrot.slane %v3800_v29, 4 }
 0x25d   :  { %v2881_v61 = vpop.f32.mrf.mxu3  ;;  %v3805_v35 = vrot.slane %v3803_v14, 5  ;;  %v2018_v1 = vrot.slane %v9508_v26, 5  ;;  %v3808_v29 = vshrl.u32 %v8687_v50, 16 }
 0x25e   :  { %v11560_v33 = vadd.f32 %v2331_v0, %v1645_v42  ;;  %v2987_v56 = vadd.f32 %v2881_v61, %v11485_v16  ;;  %v9364_v42 = vld [vmem:[%s13857_s0 + $0x168] sm:$0xff]  ;;  %v3791_v57 = vrot.slane %v3790_v55, 4  ;;  %v2123_v14 = vpack.c.b16 %v2089_v49, %v2088_v6 }
 0x25f   :  { %v2334_v45 = vpop.f32.mrf.mxu2  ;;  %v13908_v16 = vld [vmem:[#allocation17_spill] sm:$0xff]  ;;  %v2020_v26 = vrot.slane %v2018_v1, 4 }
 0x260   :  { %v11570_v0 = vadd.f32 %v4173_v60, %v2987_v56  ;;  %v8688_v60 = vld [vmem:[%s13857_s0 + $0x184] sm:$0xf]  ;;  %v3796_v10 = vsel %vm9673_vm4, %v3791_v57, %v3795_v58  ;;  %v9395_v56 = vld [vmem:[%s13857_s0 + $0x168] sm:$0xff] }
 0x261   :  { %v4178_v23 = vpop.f32.mrf.mxu0  ;;  %v3817_v58 = vshll.u32 %v8688_v60, 16  ;;  %v3821_v57 = vshrl.u32 %v8688_v60, 16 }
 0x262   :  { %13907 = vst [vmem:[#allocation15_spill] sm:$0xff] %v11570_v0  ;;  %v3810_v0 = vrot.slane %v3808_v29, 4 }
 0x263   :  { %v1647_v27 = vpop.f32.mrf.mxu1 }
 0x264   :  { %v1648_v61 = vadd.f32 %v1647_v27, %v13908_v16  ;;  %8723 = vmatmul.msk.bf16.gmra.mxu0 %vm1009_vm3, %v3970_v28  ;;  %v3806_v27 = vsel %vm9673_vm4, %v3801_v40, %v3805_v35  ;;  %v3823_v35 = vrot.slane %v3821_v57, 4 }
 0x265   :  { %v2883_v21 = vpop.f32.mrf.mxu3  ;;  %v3936_v40 = vunpack.c.l.b16 %v3806_v27 }
 0x266   :  { %v11583_v41 = vadd.f32 %v2334_v45, %v1648_v61  ;;  %8308 = vmatmul.msk.bf16.gmra.mxu1 %vm1009_vm3, %v9364_v42  ;;  %v2988_v55 = vadd.f32 %v2883_v21, %v11513_v8  ;;  %v3811_v45 = vshll.u32 %v8687_v50, 16  ;;  %v1737_v42 = vld [vmem:[%s13857_s0 + $0x180] sm:$0xe]  ;;  %v9509_v61 = vld [vmem:[%s13857_s0 + $0x188] sm:$0x1]  ;;  %v3935_v50 = vunpack.c.l.b16 %v3796_v10 }
 0x267   :  { %v2336_v28 = vpop.f32.mrf.mxu2  ;;  %v2021_v21 = vrot.slane %v9509_v61, 5  ;;  %v8342_v49 = vrot.slane %v1737_v42, 9 }
 0x268   :  { %v11601_v16 = vadd.f32 %v11544_v37, %v2988_v55  ;;  %v3813_v60 = vrot.slane %v3811_v45, 5  ;;  %v3819_v37 = vrot.slane %v3817_v58, 5  ;;  %v8689_v55 = vld [vmem:[%s13857_s0 + $0x188] sm:$0x1] }
 0x269   :  { %v4180_v8 = vpop.f32.mrf.mxu0  ;;  %v2019_v29 = vsel %vm10123_vm7, %v8342_v49, %v2018_v1  ;;  %v3827_v57 = vshll.u32 %v8689_v55, 16 }
 0x26a   :  { %13909 = vst [vmem:[#allocation17_spill] sm:$0xff] %v11601_v16  ;;  %8595 = vmatmul.msk.bf16.gmra.mxu3 %vm1009_vm3, %v9395_v56  ;;  %v3814_v45 = vor.u32 %v3813_v60, %v3810_v0  ;;  %v3824_v58 = vor.u32 %v3823_v35, %v3819_v37 }
 0x26b   :  { %v1649_v6 = vpop.f32.mrf.mxu1  ;;  %v3829_v0 = vrot.slane %v3827_v57, 5 }
 0x26c   :  { %v1650_v34 = vadd.f32 %v1649_v6, %v13910_v39  ;;  %8373 = vmatmul.msk.bf16.gmra.mxu2 %vm1009_vm3, %v2123_v14  ;;  %v2022_v39 = vsel %vm10123_vm7, %v2020_v26, %v2021_v21  ;;  %v3971_v14 = vpack.c.b16 %v3936_v40, %v3935_v50  ;;  %v3815_v16 = vrot.slane %v3814_v45, 4  ;;  %v8690_v50 = vld [vmem:[%s13857_s0 + $0x18c] sm:$0xf]  ;;  %v9396_v40 = vld [vmem:[%s13857_s0 + $0x174] sm:$0xff] }
 0x26d   :  { %v2886_v61 = vpop.f32.mrf.mxu3  ;;  %v3825_v21 = vrot.slane %v3824_v58, 4 }
 0x26e   :  { %v11612_v10 = vadd.f32 %v2336_v28, %v1650_v34  ;;  %v2989_v56 = vadd.f32 %v2886_v61, %v11530_v48  ;;  %v9365_v34 = vld [vmem:[%s13857_s0 + $0x174] sm:$0xff]  ;;  %v2090_v28 = vunpack.c.l.b16 %v2019_v29  ;;  %v2091_v48 = vunpack.c.l.b16 %v2022_v39 }
 0x26f   :  { %v2339_v42 = vpop.f32.mrf.mxu2  ;;  %v3820_v55 = vsel %vm9673_vm4, %v3815_v16, %v3819_v37  ;;  %v3835_v29 = vshll.u32 %v8690_v50, 16  ;;  %v3830_v39 = vsel %vm9673_vm4, %v3825_v21, %v3829_v0  ;;  %v9511_v16 = vld [vmem:[%s13857_s0 + $0x194] sm:$0x1] }
 0x270   :  { %v11619_v6 = vadd.f32 %v4178_v23, %v2989_v56  ;;  %v8691_v23 = vld [vmem:[%s13857_s0 + $0x190] sm:$0xf]  ;;  %v2124_v60 = vpack.c.b16 %v2091_v48, %v2090_v28  ;;  %v3832_v56 = vshrl.u32 %v8690_v50, 16  ;;  %v2028_v37 = vrot.slane %v9511_v16, 5 }
 0x271   :  { %v4183_v27 = vpop.f32.mrf.mxu0  ;;  %v3845_v58 = vshrl.u32 %v8691_v23, 16  ;;  %v3937_v28 = vunpack.c.l.b16 %v3820_v55  ;;  %v3837_v0 = vrot.slane %v3835_v29, 5  ;;  %v13914_v50 = vld [vmem:[#allocation23_spill] sm:$0xff] }
 0x272   :  { %13911 = vst [vmem:[#allocation19_spill] sm:$0xff] %v11619_v6  ;;  %v3834_v21 = vrot.slane %v3832_v56, 4 }
 0x273   :  { %v1652_v61 = vpop.f32.mrf.mxu1 }
 0x274   :  { %v1653_v1 = vadd.f32 %v1652_v61, %v13912_v22  ;;  %8724 = vmatmul.msk.bf16.gmra.mxu0 %vm1009_vm3, %v3971_v14  ;;  %v3841_v14 = vshll.u32 %v8691_v23, 16  ;;  %v3938_v61 = vunpack.c.l.b16 %v3830_v39 }
 0x275   :  { %v2888_v49 = vpop.f32.mrf.mxu3 }
 0x276   :  { %v11632_v26 = vadd.f32 %v2339_v42, %v1653_v1  ;;  %8309 = vmatmul.msk.bf16.gmra.mxu1 %vm1009_vm3, %v9365_v34  ;;  %v2990_v22 = vadd.f32 %v2888_v49, %v11560_v33  ;;  %v1738_v42 = vld [vmem:[%s13857_s0 + $0x18c] sm:$0xe]  ;;  %v9510_v33 = vld [vmem:[%s13857_s0 + $0x190] sm:$0xf]  ;;  %v3972_v16 = vpack.c.b16 %v3938_v61, %v3937_v28  ;;  %v9366_v28 = vld [vmem:[%s13857_s0 + $0x180] sm:$0xff] }
 0x277   :  { %v2341_v35 = vpop.f32.mrf.mxu2  ;;  %v2025_v45 = vrot.slane %v9510_v33, 5  ;;  %v8343_v1 = vrot.slane %v1738_v42, 9  ;;  %v8692_v33 = vld [vmem:[%s13857_s0 + $0x194] sm:$0x1] }
 0x278   :  { %v11651_v34 = vadd.f32 %v4180_v8, %v2990_v22  ;;  %v3843_v8 = vrot.slane %v3841_v14, 5  ;;  %v3847_v22 = vrot.slane %v3845_v58, 4 }
 0x279   :  { %v11649_v57 = vpop.f32.mrf.mxu0  ;;  %v2027_v23 = vrot.slane %v2025_v45, 4  ;;  %v2026_v14 = vsel %vm10123_vm7, %v8343_v1, %v2025_v45 }
 0x27a   :  { %13913 = vst [vmem:[#allocation21_spill] sm:$0xff] %v11651_v34  ;;  %8596 = vmatmul.msk.bf16.gmra.mxu3 %vm1009_vm3, %v9396_v40  ;;  %v9512_v40 = vld [vmem:[%s13857_s0 + $0x10] sm:$0xf]  ;;  %v2092_v45 = vunpack.c.l.b16 %v2026_v14 }
 0x27b   :  { %v1654_v48 = vpop.f32.mrf.mxu1  ;;  %v4437_v55 = vrot.slane %v9512_v40, 5  ;;  %v2029_v58 = vsel %vm10123_vm7, %v2027_v23, %v2028_v37  ;;  %v8728_v37 = vld [vmem:[%s13857_s0 + $0xc] sm:$0xe] }
 0x27c   :  { %v1655_v49 = vadd.f32 %v1654_v48, %v13914_v50  ;;  %8374 = vmatmul.msk.bf16.gmra.mxu2 %vm1009_vm3, %v2124_v60  ;;  %v3838_v60 = vor.u32 %v3837_v0, %v3834_v21  ;;  %v3848_v48 = vor.u32 %v3847_v22, %v3843_v8  ;;  %v3851_v50 = vshll.u32 %v8692_v33, 16  ;;  %v8693_v33 = vld [vmem:[%s13857_s0 + $0x198] sm:$0xf] }
 0x27d   :  { %v2891_v39 = vpop.f32.mrf.mxu3  ;;  %v4439_v40 = vrot.slane %v4437_v55, 4  ;;  %v2093_v1 = vunpack.c.l.b16 %v2029_v58  ;;  %v8760_v22 = vrot.slane %v8728_v37, 9  ;;  %v3856_v37 = vshrl.u32 %v8693_v33, 16 }
 0x27e   :  { %v11665_v42 = vadd.f32 %v2341_v35, %v1655_v49  ;;  %v2991_v56 = vadd.f32 %v2891_v39, %v11583_v41  ;;  %v9513_v35 = vld [vmem:[%s13857_s0 + $0x14] sm:$0x1]  ;;  %v3839_v21 = vrot.slane %v3838_v60, 4  ;;  %v3849_v49 = vrot.slane %v3848_v48, 4  ;;  %v8694_v60 = vld [vmem:[%s13857_s0 + $0x19c] sm:$0xf] }
 0x27f   :  { %v2344_v29 = vpop.f32.mrf.mxu2  ;;  %v4440_v41 = vrot.slane %v9513_v35, 5  ;;  %v3853_v23 = vrot.slane %v3851_v50, 5  ;;  %v4438_v14 = vsel %vm10123_vm7, %v8760_v22, %v4437_v55  ;;  %v9397_v48 = vld [vmem:[%s13857_s0 + $0x180] sm:$0xff]  ;;  %v2125_v50 = vpack.c.b16 %v2093_v1, %v2092_v45  ;;  %v13918_v1 = vld [vmem:[#allocation27_spill] sm:$0xff] }
 0x280   :  { %v11672_v6 = vadd.f32 %v4183_v27, %v2991_v56  ;;  %v13916_v27 = vld [vmem:[#allocation25_spill] sm:$0xff]  ;;  %v4659_v35 = vunpack.c.l.b16 %v4438_v14 }
 0x281   :  { %v4188_v34 = vpop.f32.mrf.mxu0 }
 0x282   :  { %13915 = vst [vmem:[#allocation23_spill] sm:$0xff] %v11672_v6 }
 0x283   :  { %v1657_v61 = vpop.f32.mrf.mxu1 }
 0x284   :  { %v1658_v0 = vadd.f32 %v1657_v61, %v13916_v27  ;;  %8725 = vmatmul.msk.bf16.gmra.mxu0 %vm1009_vm3, %v3972_v16  ;;  %v4441_v16 = vsel %vm10123_vm7, %v4439_v40, %v4440_v41  ;;  %v3854_v61 = vsel %vm9673_vm4, %v3849_v49, %v3853_v23  ;;  %v3865_v40 = vshll.u32 %v8694_v60, 16 }
 0x285   :  { %v2893_v39 = vpop.f32.mrf.mxu3  ;;  %v4660_v55 = vunpack.c.l.b16 %v4441_v16  ;;  %v3869_v41 = vshrl.u32 %v8694_v60, 16  ;;  %v3858_v49 = vrot.slane %v3856_v37, 4  ;;  %v9367_v37 = vld [vmem:[%s13857_s0 + $0x18c] sm:$0xff] }
 0x286   :  { %v11688_v56 = vadd.f32 %v2344_v29, %v1658_v0  ;;  %8310 = vmatmul.msk.bf16.gmra.mxu1 %vm1009_vm3, %v9366_v28  ;;  %v2992_v58 = vadd.f32 %v2893_v39, %v11612_v10  ;;  %v3844_v28 = vsel %vm9673_vm4, %v3839_v21, %v3843_v8  ;;  %v3859_v0 = vshll.u32 %v8693_v33, 16 }
 0x287   :  { %v2346_v29 = vpop.f32.mrf.mxu2  ;;  %v11709_v22 = vpack.c.b16 %v4660_v55, %v4659_v35  ;;  %v3939_v8 = vunpack.c.l.b16 %v3844_v28  ;;  %v3940_v21 = vunpack.c.l.b16 %v3854_v61  ;;  %v3867_v14 = vrot.slane %v3865_v40, 5 }
 0x288   :  { %v11707_v10 = vadd.f32 %v11649_v57, %v2992_v58  ;;  %v3861_v23 = vrot.slane %v3859_v0, 5  ;;  %v3871_v33 = vrot.slane %v3869_v41, 4  ;;  %v8695_v57 = vld [vmem:[%s13857_s0 + $0x1a0] sm:$0x1]  ;;  %v13920_v0 = vld [vmem:[#allocation5_spill] sm:$0xff] }
 0x289   :  { %v4190_v27 = vpop.f32.mrf.mxu0  ;;  %v3973_v35 = vpack.c.b16 %v3940_v21, %v3939_v8  ;;  %v3875_v28 = vshll.u32 %v8695_v57, 16  ;;  %v9398_v21 = vld [vmem:[%s13857_s0 + $0x18c] sm:$0xff] }
 0x28a   :  { %13917 = vst [vmem:[#allocation25_spill] sm:$0xff] %v11707_v10  ;;  %8597 = vmatmul.msk.bf16.gmra.mxu3 %vm1009_vm3, %v9397_v48 }
 0x28b   :  { %v1659_v45 = vpop.f32.mrf.mxu1 }
 0x28c   :  { %v1660_v39 = vadd.f32 %v1659_v45, %v13918_v1  ;;  %8375 = vmatmul.msk.bf16.gmra.mxu2 %vm1009_vm3, %v2125_v50  ;;  %v3862_v45 = vor.u32 %v3861_v23, %v3858_v49  ;;  %v3872_v50 = vor.u32 %v3871_v33, %v3867_v14  ;;  %v9400_v23 = vld [vmem:[%s13857_s0 + $0x18] sm:$0xff] }
 0x28d   :  { %v2896_v16 = vpop.f32.mrf.mxu3 }
 0x28e   :  { %v11714_v60 = vadd.f32 %v2346_v29, %v1660_v39  ;;  %v2993_v58 = vadd.f32 %v2896_v16, %v11632_v26  ;;  %v3863_v41 = vrot.slane %v3862_v45, 4  ;;  %v3873_v1 = vrot.slane %v3872_v50, 4  ;;  %v13922_v45 = vld [vmem:[#allocation6_spill] sm:$0xff] }
 0x28f   :  { %v2349_v48 = vpop.f32.mrf.mxu2  ;;  %v3877_v26 = vrot.slane %v3875_v28, 5 }
 0x290   :  { %v11720_v61 = vadd.f32 %v4188_v34, %v2993_v58  ;;  %v3868_v16 = vsel %vm9673_vm4, %v3863_v41, %v3867_v14 }
 0x291   :  { %v4193_v55 = vpop.f32.mrf.mxu0  ;;  %v3878_v57 = vsel %vm9673_vm4, %v3873_v1, %v3877_v26  ;;  %v3941_v14 = vunpack.c.l.b16 %v3868_v16 }
 0x292   :  { %13919 = vst [vmem:[#allocation27_spill] sm:$0xff] %v11720_v61  ;;  %v3942_v28 = vunpack.c.l.b16 %v3878_v57 }
 0x293   :  { %v1662_v29 = vpop.f32.mrf.mxu1 }
 0x294   :  { %v1663_v40 = vadd.f32 %v1662_v29, %v13920_v0  ;;  %8726 = vmatmul.msk.bf16.gmra.mxu0 %vm1009_vm3, %v3973_v35  ;;  %v9049_v35 = vld [vmem:[%s13857_s0 + $0x1c] sm:$0xf] }
 0x295   :  { %v2898_v39 = vpop.f32.mrf.mxu3  ;;  %v5754_v41 = vshrl.u32 %v9049_v35, 16 }
 0x296   :  { %v11727_v8 = vadd.f32 %v2349_v48, %v1663_v40  ;;  %8311 = vmatmul.msk.bf16.gmra.mxu1 %vm1009_vm3, %v9367_v37  ;;  %v2994_v34 = vadd.f32 %v2898_v39, %v11665_v42  ;;  %v9048_v42 = vld [vmem:[%s13857_s0 + $0x18] sm:$0xf]  ;;  %v5750_v40 = vshll.u32 %v9049_v35, 16  ;;  %v3974_v39 = vpack.c.b16 %v3942_v28, %v3941_v14 }
 0x297   :  { %v2351_v49 = vpop.f32.mrf.mxu2  ;;  %v5741_v37 = vshrl.u32 %v9048_v42, 16  ;;  %v13924_v14 = vld [vmem:[#allocation7_spill] sm:$0xff] }
 0x298   :  { %v11741_v58 = vadd.f32 %v4190_v27, %v2994_v34  ;;  %v5744_v27 = vshll.u32 %v9048_v42, 16  ;;  %v7066_v34 = vrot.slane %v9049_v35, 5  ;;  %v11762_v57 = vrot.slane %v5750_v40, 5  ;;  %v9514_v35 = vld [vmem:[%s13857_s0 + $0x1c] sm:$0xf] }
 0x299   :  { %v4195_v33 = vpop.f32.mrf.mxu0  ;;  %v5743_v10 = vrot.slane %v5741_v37, 4 }
 0x29a   :  { %13921 = vst [vmem:[#allocation5_spill] sm:$0xff] %v11741_v58  ;;  %8598 = vmatmul.msk.bf16.gmra.mxu3 %vm1009_vm3, %v9398_v21  ;;  %v7068_v37 = vrot.slane %v7066_v34, 4 }
 0x29b   :  { %v1664_v48 = vpop.f32.mrf.mxu1 }
 0x29c   :  { %v1665_v50 = vadd.f32 %v1664_v48, %v13922_v45  ;;  %9016 = vmatmul.msk.bf16.vlgmr.msra.gmra.mxu2 %vm1009_vm3, %v9400_v23  ;;  %v5746_v48 = vrot.slane %v5744_v27, 5  ;;  %v9176_v23 = vld [vmem:[%s13857_s0 + $0x18] sm:$0xe]  ;;  %v4444_v45 = vrot.slane %v9514_v35, 5 }
 0x29d   :  { %v2901_v29 = vpop.f32.mrf.mxu3  ;;  %v9208_v28 = vrot.slane %v9176_v23, 9 }
 0x29e   :  { %v11752_v0 = vadd.f32 %v2351_v49, %v1665_v50  ;;  %v2995_v1 = vadd.f32 %v2901_v29, %v11688_v56  ;;  %v5756_v49 = vrot.slane %v5754_v41, 4  ;;  %v8729_v56 = vld [vmem:[%s13857_s0 + $0x18] sm:$0xe]  ;;  %v9050_v50 = vld [vmem:[%s13857_s0 + $0x20] sm:$0x1]  ;;  %v5747_v29 = vor.u32 %v5746_v48, %v5743_v10 }
 0x29f   :  { %v2354_v26 = vpop.f32.mrf.mxu2  ;;  %v7069_v27 = vrot.slane %v9050_v50, 5  ;;  %v9399_v10 = vld [vmem:[%s13857_s0 + $0x198] sm:$0xff]  ;;  %v4446_v48 = vrot.slane %v4444_v45, 4  ;;  %v7067_v23 = vsel %vm10123_vm7, %v9208_v28, %v7066_v34 }
 0x2a0   :  { %v11760_v16 = vadd.f32 %v4193_v55, %v2995_v1  ;;  %v8761_v1 = vrot.slane %v8729_v56, 9  ;;  %v5757_v35 = vor.u32 %v5756_v49, %v11762_v57  ;;  %v5748_v34 = vrot.slane %v5747_v29, 4 }
 0x2a1   :  { %v11755_v21 = vpop.f32.mrf.mxu0  ;;  %v7070_v49 = vsel %vm10123_vm7, %v7068_v37, %v7069_v27  ;;  %v7288_v58 = vunpack.c.l.b16 %v7067_v23 }
 0x2a2   :  { %13923 = vst [vmem:[#allocation6_spill] sm:$0xff] %v11760_v16  ;;  %v5760_v16 = vshll.u32 %v9050_v50, 16  ;;  %v11802_v50 = vld [vmem:[%s13857_s0 + $0x28] sm:$0xf]  ;;  %v5758_v28 = vrot.slane %v5757_v35, 4  ;;  %v7289_v61 = vunpack.c.l.b16 %v7070_v49 }
 0x2a3   :  { %v1667_v42 = vpop.f32.mrf.mxu1 }
 0x2a4   :  { %v1668_v55 = vadd.f32 %v1667_v42, %v13924_v14  ;;  %8727 = vmatmul.msk.bf16.gmra.mxu0 %vm1009_vm3, %v3974_v39  ;;  %v9515_v42 = vld [vmem:[%s13857_s0 + $0x20] sm:$0x1] }
 0x2a5   :  { %v2903_v40 = vpop.f32.mrf.mxu3  ;;  %v4447_v14 = vrot.slane %v9515_v42, 5  ;;  %v5762_v42 = vrot.slane %v5760_v16, 5 }
 0x2a6   :  { %v11775_v41 = vadd.f32 %v2354_v26, %v1668_v55  ;;  %8792 = vmatmul.msk.bf16.vlgmr.msra.gmra.mxu1 %vm1009_vm3, %v11709_v22  ;;  %v2996_v39 = vadd.f32 %v2903_v40, %v11714_v60  ;;  %v9401_v22 = vld [vmem:[%s13857_s0 + $0x24] sm:$0xff]  ;;  %v4445_v40 = vsel %vm10123_vm7, %v8761_v1, %v4444_v45  ;;  %v5778_v45 = vshrl.u32 %v11802_v50, 16 }
 0x2a7   :  { %v2356_v26 = vpop.f32.mrf.mxu2  ;;  %v9051_v60 = vld [vmem:[%s13857_s0 + $0x24] sm:$0xf]  ;;  %v4448_v27 = vsel %vm10123_vm7, %v4446_v48, %v4447_v14  ;;  %v4661_v1 = vunpack.c.l.b16 %v4445_v40  ;;  %v5753_v48 = vsel %vm9673_vm4, %v5748_v34, %v11762_v57  ;;  %v9516_v57 = vld [vmem:[%s13857_s0 + $0x28] sm:$0xf] }
 0x2a8   :  { %v11804_v55 = vadd.f32 %v4195_v33, %v2996_v39  ;;  %v5765_v6 = vshrl.u32 %v9051_v60, 16  ;;  %v5768_v33 = vshll.u32 %v9051_v60, 16  ;;  %v5774_v39 = vshll.u32 %v11802_v50, 16 }
 0x2a9   :  { %v11797_v56 = vpop.f32.mrf.mxu0  ;;  %v4662_v35 = vunpack.c.l.b16 %v4448_v27  ;;  %v4451_v40 = vrot.slane %v9516_v57, 5  ;;  %v6508_v34 = vunpack.c.l.b16 %v5753_v48 }
 0x2aa   :  { %13925 = vst [vmem:[#allocation7_spill] sm:$0xff] %v11804_v55  ;;  %8599 = vmatmul.msk.bf16.gmra.mxu3 %vm1009_vm3, %v9399_v10  ;;  %v5767_v23 = vrot.slane %v5765_v6, 4  ;;  %v5770_v49 = vrot.slane %v5768_v33, 5  ;;  %v5776_v60 = vrot.slane %v5774_v39, 5  ;;  %v9053_v6 = vld [vmem:[%s13857_s0 + $0x2c] sm:$0x1] }
 0x2ab   :  { %v1669_v37 = vpop.f32.mrf.mxu1  ;;  %v5784_v39 = vshll.u32 %v9053_v6, 16 }
 0x2ac   :  { %v1670_v7 = vadd.f32 %v1669_v37, %v13926_v4  ;;  %9017 = vmatmul.msk.bf16.gmra.mxu2 %vm1009_vm3, %v9401_v22  ;;  %v5763_v4 = vsel %vm9673_vm4, %v5758_v28, %v5762_v42  ;;  %v7352_v22 = vpack.c.b16 %v7289_v61, %v7288_v58  ;;  %v5780_v37 = vrot.slane %v5778_v45, 4  ;;  %v9177_v61 = vld [vmem:[%s13857_s0 + $0x24] sm:$0xe] }
 0x2ad   :  { %v2906_v29 = vpop.f32.mrf.mxu3  ;;  %v13928_v28 = vld [vmem:[#allocation9_spill] sm:$0xff]  ;;  %v5771_v27 = vor.u32 %v5770_v49, %v5767_v23  ;;  %v9209_v45 = vrot.slane %v9177_v61, 9 }
 0x2ae   :  { %v11815_v16 = vadd.f32 %v2356_v26, %v1670_v7  ;;  %v2997_v10 = vadd.f32 %v2906_v29, %v11727_v8  ;;  %v7073_v7 = vrot.slane %v11802_v50, 5  ;;  %v4724_v8 = vpack.c.b16 %v4662_v35, %v4661_v1  ;;  %v9517_v35 = vld [vmem:[%s13857_s0 + $0x2c] sm:$0x1] }
 0x2af   :  { %v2359_v14 = vpop.f32.mrf.mxu2  ;;  %v6509_v50 = vunpack.c.l.b16 %v5763_v4  ;;  %v5781_v33 = vor.u32 %v5780_v37, %v5776_v60  ;;  %v7076_v1 = vrot.slane %v9053_v6, 5  ;;  %v9402_v37 = vld [vmem:[%s13857_s0 + $0x30] sm:$0xff]  ;;  %v5772_v6 = vrot.slane %v5771_v27, 4 }
 0x2b0   :  { %v11827_v26 = vadd.f32 %v11755_v21, %v2997_v10  ;;  %v8730_v21 = vld [vmem:[%s13857_s0 + $0x24] sm:$0xe]  ;;  %v7075_v29 = vrot.slane %v7073_v7, 4  ;;  %v4454_v10 = vrot.slane %v9517_v35, 5  ;;  %v5786_v35 = vrot.slane %v5784_v39, 5  ;;  %v13930_v27 = vld [vmem:[#allocation10_spill] sm:$0xff] }
 0x2b1   :  { %v11823_v55 = vpop.f32.mrf.mxu0  ;;  %v8762_v57 = vrot.slane %v8730_v21, 9  ;;  %v6572_v23 = vpack.c.b16 %v6509_v50, %v6508_v34  ;;  %v5782_v61 = vrot.slane %v5781_v33, 4  ;;  %v9054_v50 = vld [vmem:[%s13857_s0 + $0x30] sm:$0xf] }
 0x2b2   :  { %13927 = vst [vmem:[#allocation8_spill] sm:$0xff] %v11827_v26 }
 0x2b3   :  { %v1672_v58 = vpop.f32.mrf.mxu1 }
 0x2b4   :  { %v1673_v42 = vadd.f32 %v1672_v58, %v13928_v28  ;;  %9240 = vmatmul.msk.bf16.vlgmr.msra.gmra.mxu0 %vm1009_vm3, %v7352_v22  ;;  %v4453_v58 = vrot.slane %v4451_v40, 4 }
 0x2b5   :  { %v2908_v48 = vpop.f32.mrf.mxu3 }
 0x2b6   :  { %v11846_v4 = vadd.f32 %v2359_v14, %v1673_v42  ;;  %8793 = vmatmul.msk.bf16.gmra.mxu1 %vm1009_vm3, %v4724_v8  ;;  %v2998_v22 = vadd.f32 %v2908_v48, %v11752_v0  ;;  %v7074_v14 = vsel %vm10123_vm7, %v9209_v45, %v7073_v7  ;;  %v7077_v8 = vsel %vm10123_vm7, %v7075_v29, %v7076_v1  ;;  %v9055_v7 = vld [vmem:[%s13857_s0 + $0x34] sm:$0xf] }
 0x2b7   :  { %v2361_v49 = vpop.f32.mrf.mxu2  ;;  %v4452_v0 = vsel %vm10123_vm7, %v8762_v57, %v4451_v40  ;;  %v4455_v34 = vsel %vm10123_vm7, %v4453_v58, %v4454_v10  ;;  %v5777_v40 = vsel %vm9673_vm4, %v5772_v6, %v5776_v60  ;;  %v7290_v33 = vunpack.c.l.b16 %v7074_v14 }
 0x2b8   :  { %v11860_v21 = vadd.f32 %v11797_v56, %v2998_v22  ;;  %v7291_v39 = vunpack.c.l.b16 %v7077_v8  ;;  %v4663_v45 = vunpack.c.l.b16 %v4452_v0  ;;  %v4664_v29 = vunpack.c.l.b16 %v4455_v34 }
 0x2b9   :  { %v11853_v28 = vpop.f32.mrf.mxu0  ;;  %v5787_v1 = vsel %vm9673_vm4, %v5782_v61, %v5786_v35  ;;  %v5789_v10 = vshrl.u32 %v9054_v50, 16  ;;  %v5792_v58 = vshll.u32 %v9054_v50, 16  ;;  %v5798_v22 = vshll.u32 %v9055_v7, 16 }
 0x2ba   :  { %13929 = vst [vmem:[#allocation9_spill] sm:$0xff] %v11860_v21  ;;  %9144 = vmatmul.msk.bf16.vlgmr.msra.gmra.mxu3 %vm1009_vm3, %v6572_v23  ;;  %v5802_v23 = vshrl.u32 %v9055_v7, 16  ;;  %v7353_v21 = vpack.c.b16 %v7291_v39, %v7290_v33  ;;  %v4725_v6 = vpack.c.b16 %v4664_v29, %v4663_v45  ;;  %v6511_v14 = vunpack.c.l.b16 %v5787_v1  ;;  %v13932_v33 = vld [vmem:[#allocation12_spill] sm:$0xff]  ;;  %v9056_v39 = vld [vmem:[%s13857_s0 + $0x38] sm:$0x1] }
 0x2bb   :  { %v1674_v42 = vpop.f32.mrf.mxu1  ;;  %v7080_v8 = vrot.slane %v9055_v7, 5  ;;  %v5791_v61 = vrot.slane %v5789_v10, 4  ;;  %v5794_v35 = vrot.slane %v5792_v58, 5  ;;  %v7083_v1 = vrot.slane %v9056_v39, 5 }
 0x2bc   :  { %v1675_v56 = vadd.f32 %v1674_v42, %v13930_v27  ;;  %9018 = vmatmul.msk.bf16.gmra.mxu2 %vm1009_vm3, %v9402_v37  ;;  %v6510_v27 = vunpack.c.l.b16 %v5777_v40  ;;  %v5804_v34 = vrot.slane %v5802_v23, 4 }
 0x2bd   :  { %v2911_v48 = vpop.f32.mrf.mxu3  ;;  %v7082_v29 = vrot.slane %v7080_v8, 4 }
 0x2be   :  { %v11879_v57 = vadd.f32 %v2361_v49, %v1675_v56  ;;  %v2999_v42 = vadd.f32 %v2911_v48, %v11775_v41  ;;  %v11887_v49 = vrot.slane %v5798_v22, 5  ;;  %v9178_v41 = vld [vmem:[%s13857_s0 + $0x30] sm:$0xe]  ;;  %v9518_v56 = vld [vmem:[%s13857_s0 + $0x34] sm:$0xf]  ;;  %v6573_v58 = vpack.c.b16 %v6511_v14, %v6510_v27 }
 0x2bf   :  { %v2364_v37 = vpop.f32.mrf.mxu2  ;;  %v4458_v40 = vrot.slane %v9518_v56, 5  ;;  %v9210_v45 = vrot.slane %v9178_v41, 9  ;;  %v5795_v22 = vor.u32 %v5794_v35, %v5791_v61  ;;  %v9519_v41 = vld [vmem:[%s13857_s0 + $0x38] sm:$0x1]  ;;  %v9057_v61 = vld [vmem:[%s13857_s0 + $0x3c] sm:$0xf] }
 0x2c0   :  { %v11885_v0 = vadd.f32 %v11823_v55, %v2999_v42  ;;  %v8731_v55 = vld [vmem:[%s13857_s0 + $0x30] sm:$0xe] }
 0x2c1   :  { %v11882_v60 = vpop.f32.mrf.mxu0  ;;  %v4460_v56 = vrot.slane %v4458_v40, 4  ;;  %v7081_v27 = vsel %vm10123_vm7, %v9210_v45, %v7080_v8  ;;  %v5796_v8 = vrot.slane %v5795_v22, 4  ;;  %v13934_v45 = vld [vmem:[#allocation14_spill] sm:$0xff] }
 0x2c2   :  { %13931 = vst [vmem:[#allocation10_spill] sm:$0xff] %v11885_v0 }
 0x2c3   :  { %v1677_v50 = vpop.f32.mrf.mxu1 }
 0x2c4   :  { %v1678_v7 = vadd.f32 %v1677_v50, %v13932_v33  ;;  %9241 = vmatmul.msk.bf16.gmra.mxu0 %vm1009_vm3, %v7353_v21  ;;  %v5805_v21 = vor.u32 %v5804_v34, %v11887_v49  ;;  %v8763_v50 = vrot.slane %v8731_v55, 9  ;;  %v4461_v33 = vrot.slane %v9519_v41, 5 }
 0x2c5   :  { %v2913_v10 = vpop.f32.mrf.mxu3  ;;  %v5816_v41 = vshll.u32 %v9057_v61, 16 }
 0x2c6   :  { %v11903_v48 = vadd.f32 %v2364_v37, %v1678_v7  ;;  %8794 = vmatmul.msk.bf16.gmra.mxu1 %vm1009_vm3, %v4725_v6  ;;  %v3000_v23 = vadd.f32 %v2913_v10, %v11815_v16  ;;  %v9403_v37 = vld [vmem:[%s13857_s0 + $0x3c] sm:$0xff]  ;;  %v5808_v7 = vshll.u32 %v9056_v39, 16  ;;  %v7084_v16 = vsel %vm10123_vm7, %v7082_v29, %v7083_v1 }
 0x2c7   :  { %v2366_v42 = vpop.f32.mrf.mxu2  ;;  %v4459_v34 = vsel %vm10123_vm7, %v8763_v50, %v4458_v40  ;;  %v4462_v55 = vsel %vm10123_vm7, %v4460_v56, %v4461_v33  ;;  %v5806_v39 = vrot.slane %v5805_v21, 4  ;;  %v7292_v1 = vunpack.c.l.b16 %v7081_v27 }
 0x2c8   :  { %v11921_v14 = vadd.f32 %v11853_v28, %v3000_v23  ;;  %v5810_v28 = vrot.slane %v5808_v7, 5  ;;  %v7293_v10 = vunpack.c.l.b16 %v7084_v16  ;;  %v5813_v23 = vshrl.u32 %v9057_v61, 16 }
 0x2c9   :  { %v11914_v6 = vpop.f32.mrf.mxu0  ;;  %v4665_v50 = vunpack.c.l.b16 %v4459_v34  ;;  %v4666_v56 = vunpack.c.l.b16 %v4462_v55 }
 0x2ca   :  { %13933 = vst [vmem:[#allocation12_spill] sm:$0xff] %v11921_v14  ;;  %9145 = vmatmul.msk.bf16.gmra.mxu3 %vm1009_vm3, %v6573_v58  ;;  %v9058_v58 = vld [vmem:[%s13857_s0 + $0x40] sm:$0xf]  ;;  %v5811_v7 = vsel %vm9673_vm4, %v5806_v39, %v5810_v28  ;;  %v7354_v27 = vpack.c.b16 %v7293_v10, %v7292_v1  ;;  %v5815_v61 = vrot.slane %v5813_v23, 4  ;;  %v8732_v28 = vld [vmem:[%s13857_s0 + $0x3c] sm:$0xe] }
 0x2cb   :  { %v1679_v35 = vpop.f32.mrf.mxu1  ;;  %v5822_v33 = vshll.u32 %v9058_v58, 16  ;;  %v13936_v10 = vld [vmem:[#allocation16_spill] sm:$0xff]  ;;  %v9059_v23 = vld [vmem:[%s13857_s0 + $0x44] sm:$0x1] }
 0x2cc   :  { %v1680_v29 = vadd.f32 %v1679_v35, %v13934_v45  ;;  %9019 = vmatmul.msk.bf16.gmra.mxu2 %vm1009_vm3, %v9403_v37  ;;  %v5826_v35 = vshrl.u32 %v9058_v58, 16  ;;  %v5801_v37 = vsel %vm9673_vm4, %v5796_v8, %v11887_v49  ;;  %v7087_v45 = vrot.slane %v9058_v58, 5  ;;  %v9179_v49 = vld [vmem:[%s13857_s0 + $0x3c] sm:$0xe] }
 0x2cd   :  { %v2916_v14 = vpop.f32.mrf.mxu3  ;;  %v6512_v39 = vunpack.c.l.b16 %v5801_v37  ;;  %v5824_v1 = vrot.slane %v5822_v33, 5 }
 0x2ce   :  { %v11936_v40 = vadd.f32 %v2366_v42, %v1680_v29  ;;  %v3001_v22 = vadd.f32 %v2916_v14, %v11846_v4  ;;  %v5818_v42 = vrot.slane %v5816_v41, 5  ;;  %v4726_v4 = vpack.c.b16 %v4666_v56, %v4665_v50  ;;  %v9520_v14 = vld [vmem:[%s13857_s0 + $0x40] sm:$0xf] }
 0x2cf   :  { %v2369_v21 = vpop.f32.mrf.mxu2  ;;  %v4465_v55 = vrot.slane %v9520_v14, 5  ;;  %v6513_v29 = vunpack.c.l.b16 %v5811_v7  ;;  %v9211_v50 = vrot.slane %v9179_v49, 9  ;;  %v7089_v56 = vrot.slane %v7087_v45, 4 }
 0x2d0   :  { %v11947_v34 = vadd.f32 %v11882_v60, %v3001_v22  ;;  %v5828_v60 = vrot.slane %v5826_v35, 4  ;;  %v5819_v41 = vor.u32 %v5818_v42, %v5815_v61  ;;  %v7090_v22 = vrot.slane %v9059_v23, 5  ;;  %v9521_v35 = vld [vmem:[%s13857_s0 + $0x44] sm:$0x1] }
 0x2d1   :  { %v11944_v16 = vpop.f32.mrf.mxu0  ;;  %v8764_v14 = vrot.slane %v8732_v28, 9  ;;  %v4467_v33 = vrot.slane %v4465_v55, 4  ;;  %v5832_v42 = vshll.u32 %v9059_v23, 16 }
 0x2d2   :  { %13935 = vst [vmem:[#allocation14_spill] sm:$0xff] %v11947_v34  ;;  %v5829_v61 = vor.u32 %v5828_v60, %v5824_v1  ;;  %v7091_v28 = vsel %vm10123_vm7, %v7089_v56, %v7090_v22 }
 0x2d3   :  { %v1682_v8 = vpop.f32.mrf.mxu1  ;;  %v7295_v22 = vunpack.c.l.b16 %v7091_v28 }
 0x2d4   :  { %v1683_v58 = vadd.f32 %v1682_v8, %v13936_v10  ;;  %9242 = vmatmul.msk.bf16.gmra.mxu0 %vm1009_vm3, %v7354_v27  ;;  %v4468_v27 = vrot.slane %v9521_v35, 5  ;;  %v6574_v10 = vpack.c.b16 %v6513_v29, %v6512_v39  ;;  %v5820_v29 = vrot.slane %v5819_v41, 4 }
 0x2d5   :  { %v2918_v37 = vpop.f32.mrf.mxu3  ;;  %v5830_v23 = vrot.slane %v5829_v61, 4 }
 0x2d6   :  { %v11963_v7 = vadd.f32 %v2369_v21, %v1683_v58  ;;  %8795 = vmatmul.msk.bf16.gmra.mxu1 %vm1009_vm3, %v4726_v4  ;;  %v3002_v8 = vadd.f32 %v2918_v37, %v11879_v57  ;;  %v9404_v21 = vld [vmem:[%s13857_s0 + $0x48] sm:$0xff]  ;;  %v7088_v4 = vsel %vm10123_vm7, %v9211_v50, %v7087_v45  ;;  %v4466_v57 = vsel %vm10123_vm7, %v8764_v14, %v4465_v55 }
 0x2d7   :  { %v2371_v34 = vpop.f32.mrf.mxu2  ;;  %v4469_v39 = vsel %vm10123_vm7, %v4467_v33, %v4468_v27  ;;  %v5834_v37 = vrot.slane %v5832_v42, 5  ;;  %v9060_v45 = vld [vmem:[%s13857_s0 + $0x48] sm:$0xf]  ;;  %v9061_v55 = vld [vmem:[%s13857_s0 + $0x4c] sm:$0xf]  ;;  %v4667_v41 = vunpack.c.l.b16 %v4466_v57  ;;  %v5825_v27 = vsel %vm9673_vm4, %v5820_v29, %v5824_v1 }
 0x2d8   :  { %v11980_v58 = vadd.f32 %v11914_v6, %v3002_v8  ;;  %v13938_v50 = vld [vmem:[#allocation18_spill] sm:$0xff]  ;;  %v7294_v6 = vunpack.c.l.b16 %v7088_v4  ;;  %v4668_v14 = vunpack.c.l.b16 %v4469_v39  ;;  %v5837_v8 = vshrl.u32 %v9060_v45, 16 }
 0x2d9   :  { %v11973_v49 = vpop.f32.mrf.mxu0  ;;  %v5846_v4 = vshll.u32 %v9061_v55, 16  ;;  %v5850_v28 = vshrl.u32 %v9061_v55, 16  ;;  %v6514_v57 = vunpack.c.l.b16 %v5825_v27  ;;  %v7094_v39 = vrot.slane %v9061_v55, 5  ;;  %v13940_v55 = vld [vmem:[#allocation20_spill] sm:$0xff] }
 0x2da   :  { %13937 = vst [vmem:[#allocation16_spill] sm:$0xff] %v11980_v58  ;;  %9146 = vmatmul.msk.bf16.gmra.mxu3 %vm1009_vm3, %v6574_v10  ;;  %v5840_v10 = vshll.u32 %v9060_v45, 16  ;;  %v5839_v29 = vrot.slane %v5837_v8, 4 }
 0x2db   :  { %v1684_v60 = vpop.f32.mrf.mxu1  ;;  %v7096_v8 = vrot.slane %v7094_v39, 4 }
 0x2dc   :  { %v1685_v56 = vadd.f32 %v1684_v60, %v13938_v50  ;;  %9020 = vmatmul.msk.bf16.gmra.mxu2 %vm1009_vm3, %v9404_v21  ;;  %v5835_v21 = vsel %vm9673_vm4, %v5830_v23, %v5834_v37  ;;  %v7355_v60 = vpack.c.b16 %v7295_v22, %v7294_v6  ;;  %v5842_v45 = vrot.slane %v5840_v10, 5  ;;  %v8733_v23 = vld [vmem:[%s13857_s0 + $0x48] sm:$0xe]  ;;  %v9522_v37 = vld [vmem:[%s13857_s0 + $0x4c] sm:$0xf] }
 0x2dd   :  { %v2921_v33 = vpop.f32.mrf.mxu3  ;;  %v6515_v1 = vunpack.c.l.b16 %v5835_v21  ;;  %v4472_v6 = vrot.slane %v9522_v37, 5  ;;  %v5852_v22 = vrot.slane %v5850_v28, 4  ;;  %v8765_v37 = vrot.slane %v8733_v23, 9 }
 0x2de   :  { %v11995_v35 = vadd.f32 %v2371_v34, %v1685_v56  ;;  %v3003_v61 = vadd.f32 %v2921_v33, %v11903_v48  ;;  %v4727_v56 = vpack.c.b16 %v4668_v14, %v4667_v41  ;;  %v9180_v48 = vld [vmem:[%s13857_s0 + $0x48] sm:$0xe]  ;;  %v9062_v14 = vld [vmem:[%s13857_s0 + $0x50] sm:$0x1] }
 0x2df   :  { %v2374_v42 = vpop.f32.mrf.mxu2  ;;  %v9212_v27 = vrot.slane %v9180_v48, 9  ;;  %v7097_v10 = vrot.slane %v9062_v14, 5 }
 0x2e0   :  { %v12005_v34 = vadd.f32 %v11944_v16, %v3003_v61  ;;  %v5848_v16 = vrot.slane %v5846_v4, 5  ;;  %v5843_v4 = vor.u32 %v5842_v45, %v5839_v29  ;;  %v9063_v29 = vld [vmem:[%s13857_s0 + $0x54] sm:$0xf] }
 0x2e1   :  { %v12002_v50 = vpop.f32.mrf.mxu0 }
 0x2e2   :  { %13939 = vst [vmem:[#allocation18_spill] sm:$0xff] %v12005_v34  ;;  %v6575_v34 = vpack.c.b16 %v6515_v1, %v6514_v57  ;;  %v5853_v48 = vor.u32 %v5852_v22, %v5848_v16  ;;  %v7095_v57 = vsel %vm10123_vm7, %v9212_v27, %v7094_v39  ;;  %v4473_v1 = vsel %vm10123_vm7, %v8765_v37, %v4472_v6 }
 0x2e3   :  { %v1687_v33 = vpop.f32.mrf.mxu1  ;;  %v5844_v39 = vrot.slane %v5843_v4, 4  ;;  %v5861_v37 = vshrl.u32 %v9063_v29, 16 }
 0x2e4   :  { %v1688_v41 = vadd.f32 %v1687_v33, %v13940_v55  ;;  %9243 = vmatmul.msk.bf16.gmra.mxu0 %vm1009_vm3, %v7355_v60  ;;  %v4474_v55 = vrot.slane %v4472_v6, 4  ;;  %v9523_v60 = vld [vmem:[%s13857_s0 + $0x50] sm:$0x1]  ;;  %v5854_v22 = vrot.slane %v5853_v48, 4 }
 0x2e5   :  { %v2923_v61 = vpop.f32.mrf.mxu3  ;;  %v4475_v58 = vrot.slane %v9523_v60, 5 }
 0x2e6   :  { %v12021_v21 = vadd.f32 %v2374_v42, %v1688_v41  ;;  %8796 = vmatmul.msk.bf16.gmra.mxu1 %vm1009_vm3, %v4727_v56  ;;  %v3004_v28 = vadd.f32 %v2923_v61, %v11936_v40  ;;  %v9405_v42 = vld [vmem:[%s13857_s0 + $0x54] sm:$0xff]  ;;  %v5856_v41 = vshll.u32 %v9062_v14, 16  ;;  %v7098_v40 = vsel %vm10123_vm7, %v7096_v8, %v7097_v10  ;;  %v13942_v14 = vld [vmem:[#allocation22_spill] sm:$0xff] }
 0x2e7   :  { %v2376_v33 = vpop.f32.mrf.mxu2  ;;  %v4476_v23 = vsel %vm10123_vm7, %v4474_v55, %v4475_v58  ;;  %v7296_v8 = vunpack.c.l.b16 %v7095_v57  ;;  %v7297_v10 = vunpack.c.l.b16 %v7098_v40  ;;  %v4669_v61 = vunpack.c.l.b16 %v4473_v1 }
 0x2e8   :  { %v12038_v56 = vadd.f32 %v11973_v49, %v3004_v28  ;;  %v9064_v49 = vld [vmem:[%s13857_s0 + $0x58] sm:$0xf]  ;;  %v5858_v6 = vrot.slane %v5856_v41, 5  ;;  %v4670_v58 = vunpack.c.l.b16 %v4476_v23  ;;  %v5863_v1 = vrot.slane %v5861_v37, 4 }
 0x2e9   :  { %v12031_v0 = vpop.f32.mrf.mxu0  ;;  %v5870_v4 = vshll.u32 %v9064_v49, 16  ;;  %v5874_v55 = vshrl.u32 %v9064_v49, 16  ;;  %v7356_v41 = vpack.c.b16 %v7297_v10, %v7296_v8  ;;  %v7101_v57 = vrot.slane %v9064_v49, 5  ;;  %v8734_v49 = vld [vmem:[%s13857_s0 + $0x54] sm:$0xe]  ;;  %v13944_v10 = vld [vmem:[#allocation24_spill] sm:$0xff] }
 0x2ea   :  { %13941 = vst [vmem:[#allocation20_spill] sm:$0xff] %v12038_v56  ;;  %9147 = vmatmul.msk.bf16.gmra.mxu3 %vm1009_vm3, %v6575_v34  ;;  %v5864_v34 = vshll.u32 %v9063_v29, 16 }
 0x2eb   :  { %v1689_v45 = vpop.f32.mrf.mxu1 }
 0x2ec   :  { %v1690_v27 = vadd.f32 %v1689_v45, %v13942_v14  ;;  %9021 = vmatmul.msk.bf16.gmra.mxu2 %vm1009_vm3, %v9405_v42  ;;  %v5849_v45 = vsel %vm9673_vm4, %v5844_v39, %v5848_v16  ;;  %v5859_v42 = vsel %vm9673_vm4, %v5854_v22, %v5858_v6  ;;  %v5866_v29 = vrot.slane %v5864_v34, 5  ;;  %v9524_v6 = vld [vmem:[%s13857_s0 + $0x58] sm:$0xf] }
 0x2ed   :  { %v2926_v28 = vpop.f32.mrf.mxu3  ;;  %v12068_v14 = vrot.slane %v5870_v4, 5  ;;  %v5876_v16 = vrot.slane %v5874_v55, 4  ;;  %v6517_v22 = vunpack.c.l.b16 %v5859_v42  ;;  %v4479_v8 = vrot.slane %v9524_v6, 5 }
 0x2ee   :  { %v12053_v60 = vadd.f32 %v2376_v33, %v1690_v27  ;;  %v3005_v48 = vadd.f32 %v2926_v28, %v11963_v7  ;;  %v9181_v33 = vld [vmem:[%s13857_s0 + $0x54] sm:$0xe]  ;;  %v4728_v7 = vpack.c.b16 %v4670_v58, %v4669_v61  ;;  %v6516_v27 = vunpack.c.l.b16 %v5849_v45 }
 0x2ef   :  { %v2379_v56 = vpop.f32.mrf.mxu2  ;;  %v9213_v37 = vrot.slane %v9181_v33, 9  ;;  %v7103_v34 = vrot.slane %v7101_v57, 4  ;;  %v5867_v58 = vor.u32 %v5866_v29, %v5863_v1  ;;  %v5877_v45 = vor.u32 %v5876_v16, %v12068_v14  ;;  %v12104_v16 = vld [vmem:[%s13857_s0 + $0x64] sm:$0xf] }
 0x2f0   :  { %v12066_v23 = vadd.f32 %v12002_v50, %v3005_v48  ;;  %v9065_v50 = vld [vmem:[%s13857_s0 + $0x5c] sm:$0x1]  ;;  %v8766_v48 = vrot.slane %v8734_v49, 9 }
 0x2f1   :  { %v12060_v40 = vpop.f32.mrf.mxu0  ;;  %v7104_v28 = vrot.slane %v9065_v50, 5  ;;  %v5880_v42 = vshll.u32 %v9065_v50, 16  ;;  %v7102_v1 = vsel %vm10123_vm7, %v9213_v37, %v7101_v57  ;;  %v5878_v49 = vrot.slane %v5877_v45, 4 }
 0x2f2   :  { %13943 = vst [vmem:[#allocation22_spill] sm:$0xff] %v12066_v23  ;;  %v6576_v23 = vpack.c.b16 %v6517_v22, %v6516_v27  ;;  %v4480_v57 = vsel %vm10123_vm7, %v8766_v48, %v4479_v8  ;;  %v5868_v22 = vrot.slane %v5867_v58, 4  ;;  %v7298_v37 = vunpack.c.l.b16 %v7102_v1 }
 0x2f3   :  { %v1692_v39 = vpop.f32.mrf.mxu1  ;;  %v7105_v29 = vsel %vm10123_vm7, %v7103_v34, %v7104_v28  ;;  %v5882_v50 = vrot.slane %v5880_v42, 5 }
 0x2f4   :  { %v1693_v61 = vadd.f32 %v1692_v39, %v13944_v10  ;;  %9244 = vmatmul.msk.bf16.gmra.mxu0 %vm1009_vm3, %v7356_v41  ;;  %v4481_v39 = vrot.slane %v4479_v8, 4  ;;  %v9525_v41 = vld [vmem:[%s13857_s0 + $0x5c] sm:$0x1]  ;;  %v7299_v34 = vunpack.c.l.b16 %v7105_v29  ;;  %v5898_v8 = vshrl.u32 %v12104_v16, 16 }
 0x2f5   :  { %v2928_v4 = vpop.f32.mrf.mxu3  ;;  %v4482_v33 = vrot.slane %v9525_v41, 5 }
 0x2f6   :  { %v12081_v55 = vadd.f32 %v2379_v56, %v1693_v61  ;;  %8797 = vmatmul.msk.bf16.gmra.mxu1 %vm1009_vm3, %v4728_v7  ;;  %v3006_v6 = vadd.f32 %v2928_v4, %v11995_v35  ;;  %v9406_v56 = vld [vmem:[%s13857_s0 + $0x60] sm:$0xff]  ;;  %v13946_v4 = vld [vmem:[#allocation26_spill] sm:$0xff]  ;;  %v7357_v1 = vpack.c.b16 %v7299_v34, %v7298_v37 }
 0x2f7   :  { %v2381_v26 = vpop.f32.mrf.mxu2  ;;  %v9066_v35 = vld [vmem:[%s13857_s0 + $0x60] sm:$0xf]  ;;  %v4483_v61 = vsel %vm10123_vm7, %v4481_v39, %v4482_v33  ;;  %v5873_v33 = vsel %vm9673_vm4, %v5868_v22, %v12068_v14 }
 0x2f8   :  { %v12107_v27 = vadd.f32 %v12031_v0, %v3006_v6  ;;  %v5885_v28 = vshrl.u32 %v9066_v35, 16  ;;  %v5888_v0 = vshll.u32 %v9066_v35, 16  ;;  %v5894_v6 = vshll.u32 %v12104_v16, 16  ;;  %v8735_v22 = vld [vmem:[%s13857_s0 + $0x60] sm:$0xe] }
 0x2f9   :  { %v12099_v7 = vpop.f32.mrf.mxu0  ;;  %v4672_v45 = vunpack.c.l.b16 %v4483_v61  ;;  %v9182_v61 = vld [vmem:[%s13857_s0 + $0x60] sm:$0xe]  ;;  %v6518_v34 = vunpack.c.l.b16 %v5873_v33  ;;  %v9527_v33 = vld [vmem:[%s13857_s0 + $0x68] sm:$0x1] }
 0x2fa   :  { %13945 = vst [vmem:[#allocation24_spill] sm:$0xff] %v12107_v27  ;;  %9148 = vmatmul.msk.bf16.gmra.mxu3 %vm1009_vm3, %v6576_v23  ;;  %v4671_v23 = vunpack.c.l.b16 %v4480_v57  ;;  %v5887_v29 = vrot.slane %v5885_v28, 4  ;;  %v5890_v35 = vrot.slane %v5888_v0, 5  ;;  %v13948_v28 = vld [vmem:[#allocation28_spill] sm:$0xff] }
 0x2fb   :  { %v1694_v10 = vpop.f32.mrf.mxu1 }
 0x2fc   :  { %v1695_v41 = vadd.f32 %v1694_v10, %v13946_v4  ;;  %9022 = vmatmul.msk.bf16.gmra.mxu2 %vm1009_vm3, %v9406_v56  ;;  %v5883_v56 = vsel %vm9673_vm4, %v5878_v49, %v5882_v50  ;;  %v5896_v10 = vrot.slane %v5894_v6, 5  ;;  %v5900_v4 = vrot.slane %v5898_v8, 4  ;;  %v9526_v49 = vld [vmem:[%s13857_s0 + $0x64] sm:$0xf] }
 0x2fd   :  { %v2931_v58 = vpop.f32.mrf.mxu3  ;;  %v4729_v14 = vpack.c.b16 %v4672_v45, %v4671_v23  ;;  %v4486_v50 = vrot.slane %v9526_v49, 5  ;;  %v8767_v8 = vrot.slane %v8735_v22, 9 }
 0x2fe   :  { %v12118_v48 = vadd.f32 %v2381_v26, %v1695_v41  ;;  %v3007_v42 = vadd.f32 %v2931_v58, %v12021_v21  ;;  %v9068_v26 = vld [vmem:[%s13857_s0 + $0x68] sm:$0x1]  ;;  %v7108_v21 = vrot.slane %v12104_v16, 5  ;;  %v6519_v16 = vunpack.c.l.b16 %v5883_v56 }
 0x2ff   :  { %v2384_v39 = vpop.f32.mrf.mxu2  ;;  %v5891_v41 = vor.u32 %v5890_v35, %v5887_v29  ;;  %v5901_v0 = vor.u32 %v5900_v4, %v5896_v10  ;;  %v5904_v6 = vshll.u32 %v9068_v26, 16  ;;  %v9214_v58 = vrot.slane %v9182_v61, 9  ;;  %v9407_v4 = vld [vmem:[%s13857_s0 + $0x6c] sm:$0xff] }
 0x300   :  { %v12133_v57 = vadd.f32 %v12060_v40, %v3007_v42  ;;  %v7110_v23 = vrot.slane %v7108_v21, 4  ;;  %v7111_v45 = vrot.slane %v9068_v26, 5  ;;  %v4489_v56 = vrot.slane %v9527_v33, 5 }
 0x301   :  { %v12126_v27 = vpop.f32.mrf.mxu0  ;;  %v6577_v29 = vpack.c.b16 %v6519_v16, %v6518_v34  ;;  %v5892_v26 = vrot.slane %v5891_v41, 4  ;;  %v5902_v22 = vrot.slane %v5901_v0, 4 }
 0x302   :  { %13947 = vst [vmem:[#allocation26_spill] sm:$0xff] %v12133_v57  ;;  %v4488_v57 = vrot.slane %v4486_v50, 4 }
 0x303   :  { %v1697_v37 = vpop.f32.mrf.mxu1 }
 0x304   :  { %v1698_v40 = vadd.f32 %v1697_v37, %v13948_v28  ;;  %9245 = vmatmul.msk.bf16.gmra.mxu0 %vm1009_vm3, %v7357_v1  ;;  %v7109_v37 = vsel %vm10123_vm7, %v9214_v58, %v7108_v21  ;;  %v4490_v16 = vsel %vm10123_vm7, %v4488_v57, %v4489_v56  ;;  %v9069_v28 = vld [vmem:[%s13857_s0 + $0x6c] sm:$0xf]  ;;  %v9070_v21 = vld [vmem:[%s13857_s0 + $0x70] sm:$0xf]  ;;  %v5897_v57 = vsel %vm9673_vm4, %v5892_v26, %v5896_v10 }
 0x305   :  { %v2933_v42 = vpop.f32.mrf.mxu3  ;;  %v7300_v0 = vunpack.c.l.b16 %v7109_v37  ;;  %v5912_v33 = vshll.u32 %v9069_v28, 16  ;;  %v5918_v56 = vshll.u32 %v9070_v21, 16  ;;  %v7115_v10 = vrot.slane %v9070_v21, 5 }
 0x306   :  { %v12146_v49 = vadd.f32 %v2384_v39, %v1698_v40  ;;  %8798 = vmatmul.msk.bf16.gmra.mxu1 %vm1009_vm3, %v4729_v14  ;;  %v3008_v1 = vadd.f32 %v2933_v42, %v12053_v60  ;;  %v5906_v39 = vrot.slane %v5904_v6, 5  ;;  %v4487_v14 = vsel %vm10123_vm7, %v8767_v8, %v4486_v50  ;;  %v13949_v50 = vld [vmem:[#allocation29_spill] sm:$0xff] }
 0x307   :  { %v2386_v35 = vpop.f32.mrf.mxu2  ;;  %v7112_v60 = vsel %vm10123_vm7, %v7110_v23, %v7111_v45  ;;  %v4674_v8 = vunpack.c.l.b16 %v4490_v16  ;;  %v5909_v23 = vshrl.u32 %v9069_v28, 16 }
 0x308   :  { %v12165_v34 = vadd.f32 %v12099_v7, %v3008_v1  ;;  %v4673_v7 = vunpack.c.l.b16 %v4487_v14  ;;  %v7301_v6 = vunpack.c.l.b16 %v7112_v60  ;;  %v5907_v58 = vsel %vm9673_vm4, %v5902_v22, %v5906_v39 }
 0x309   :  { %v12156_v61 = vpop.f32.mrf.mxu0  ;;  %v5922_v1 = vshrl.u32 %v9070_v21, 16  ;;  %v6520_v14 = vunpack.c.l.b16 %v5897_v57  ;;  %v5911_v22 = vrot.slane %v5909_v23, 4  ;;  %v5914_v39 = vrot.slane %v5912_v33, 5 }
 0x30a   :  { %9149 = vmatmul.msk.bf16.gmra.mxu3 %vm1009_vm3, %v6577_v29  ;;  %v7358_v37 = vpack.c.b16 %v7301_v6, %v7300_v0  ;;  %v4730_v16 = vpack.c.b16 %v4674_v8, %v4673_v7  ;;  %v13951_v0 = vld [vmem:[#allocation30_spill] sm:$0xff]  ;;  %v9071_v6 = vld [vmem:[%s13857_s0 + $0x74] sm:$0x1]  ;;  %v7117_v57 = vrot.slane %v7115_v10, 4 }
 0x30b   :  { %v1699_v40 = vpop.f32.mrf.mxu1  ;;  %v5924_v28 = vrot.slane %v5922_v1, 4 }
 0x30c   :  { %v1700_v41 = vadd.f32 %v1699_v40, %v13949_v50  ;;  %9023 = vmatmul.msk.bf16.gmra.mxu2 %vm1009_vm3, %v9407_v4  ;;  %v6521_v40 = vunpack.c.l.b16 %v5907_v58  ;;  %v7118_v58 = vrot.slane %v9071_v6, 5 }
 0x30d   :  { %v2936_v45 = vpop.f32.mrf.mxu3 }
 0x30e   :  { %v12182_v42 = vadd.f32 %v2386_v35, %v1700_v41  ;;  %v3009_v29 = vadd.f32 %v2936_v45, %v12081_v55  ;;  %v12190_v35 = vrot.slane %v5918_v56, 5  ;;  %v9183_v55 = vld [vmem:[%s13857_s0 + $0x6c] sm:$0xe]  ;;  %v9528_v41 = vld [vmem:[%s13857_s0 + $0x70] sm:$0xf]  ;;  %v6578_v33 = vpack.c.b16 %v6521_v40, %v6520_v14 }
 0x30f   :  { %v2389_v4 = vpop.f32.mrf.mxu2  ;;  %v4493_v7 = vrot.slane %v9528_v41, 5  ;;  %v9215_v8 = vrot.slane %v9183_v55, 9  ;;  %v5915_v56 = vor.u32 %v5914_v39, %v5911_v22  ;;  %v9529_v55 = vld [vmem:[%s13857_s0 + $0x74] sm:$0x1]  ;;  %v9072_v22 = vld [vmem:[%s13857_s0 + $0x78] sm:$0xf] }
 0x310   :  { %v12188_v26 = vadd.f32 %v12126_v27, %v3009_v29  ;;  %v8736_v27 = vld [vmem:[%s13857_s0 + $0x6c] sm:$0xe]  ;;  %v5925_v1 = vor.u32 %v5924_v28, %v12190_v35 }
 0x311   :  { %v12185_v60 = vpop.f32.mrf.mxu0  ;;  %v4495_v41 = vrot.slane %v4493_v7, 4  ;;  %v7116_v14 = vsel %vm10123_vm7, %v9215_v8, %v7115_v10  ;;  %v5916_v10 = vrot.slane %v5915_v56, 4  ;;  %v13953_v8 = vld [vmem:[#allocation31_spill] sm:$0xff] }
 0x312   :  { %13950 = vst [vmem:[#allocation28_spill] sm:$0xff] %v12188_v26 }
 0x313   :  { %v1702_v50 = vpop.f32.mrf.mxu1 }
 0x314   :  { %v1703_v21 = vadd.f32 %v1702_v50, %v13951_v0  ;;  %9246 = vmatmul.msk.bf16.gmra.mxu0 %vm1009_vm3, %v7358_v37  ;;  %v8768_v50 = vrot.slane %v8736_v27, 9  ;;  %v4496_v0 = vrot.slane %v9529_v55, 5  ;;  %v5936_v55 = vshll.u32 %v9072_v22, 16 }
 0x315   :  { %v2938_v23 = vpop.f32.mrf.mxu3 }
 0x316   :  { %v12206_v45 = vadd.f32 %v2389_v4, %v1703_v21  ;;  %8799 = vmatmul.msk.bf16.gmra.mxu1 %vm1009_vm3, %v4730_v16  ;;  %v3010_v29 = vadd.f32 %v2938_v23, %v12118_v48  ;;  %v9408_v4 = vld [vmem:[%s13857_s0 + $0x78] sm:$0xff]  ;;  %v5928_v21 = vshll.u32 %v9071_v6, 16  ;;  %v7119_v48 = vsel %vm10123_vm7, %v7117_v57, %v7118_v58 }
 0x317   :  { %v2391_v37 = vpop.f32.mrf.mxu2  ;;  %v4494_v28 = vsel %vm10123_vm7, %v8768_v50, %v4493_v7  ;;  %v4497_v27 = vsel %vm10123_vm7, %v4495_v41, %v4496_v0  ;;  %v5926_v6 = vrot.slane %v5925_v1, 4  ;;  %v7302_v58 = vunpack.c.l.b16 %v7116_v14 }
 0x318   :  { %v12224_v40 = vadd.f32 %v12156_v61, %v3010_v29  ;;  %v5930_v61 = vrot.slane %v5928_v21, 5  ;;  %v7303_v23 = vunpack.c.l.b16 %v7119_v48  ;;  %v5933_v29 = vshrl.u32 %v9072_v22, 16 }
 0x319   :  { %v12217_v16 = vpop.f32.mrf.mxu0  ;;  %v4675_v50 = vunpack.c.l.b16 %v4494_v28  ;;  %v4676_v41 = vunpack.c.l.b16 %v4497_v27 }
 0x31a   :  { %13952 = vst [vmem:[#allocation29_spill] sm:$0xff] %v12224_v40  ;;  %9150 = vmatmul.msk.bf16.gmra.mxu3 %vm1009_vm3, %v6578_v33  ;;  %v9073_v33 = vld [vmem:[%s13857_s0 + $0x7c] sm:$0xf]  ;;  %v5931_v21 = vsel %vm9673_vm4, %v5926_v6, %v5930_v61  ;;  %v7359_v14 = vpack.c.b16 %v7303_v23, %v7302_v58  ;;  %v5935_v22 = vrot.slane %v5933_v29, 4  ;;  %v8737_v61 = vld [vmem:[%s13857_s0 + $0x78] sm:$0xe] }
 0x31b   :  { %v1704_v39 = vpop.f32.mrf.mxu1  ;;  %v5942_v0 = vshll.u32 %v9073_v33, 16  ;;  %v13955_v23 = vld [vmem:[#allocation32_spill] sm:$0xff] }
 0x31c   :  { %v1705_v57 = vadd.f32 %v1704_v39, %v13953_v8  ;;  %9024 = vmatmul.msk.bf16.gmra.mxu2 %vm1009_vm3, %v9408_v4  ;;  %v5946_v39 = vshrl.u32 %v9073_v33, 16  ;;  %v5921_v4 = vsel %vm9673_vm4, %v5916_v10, %v12190_v35  ;;  %v7122_v8 = vrot.slane %v9073_v33, 5  ;;  %v9184_v35 = vld [vmem:[%s13857_s0 + $0x78] sm:$0xe]  ;;  %v9074_v29 = vld [vmem:[%s13857_s0 + $0x80] sm:$0x1] }
 0x31d   :  { %v2941_v40 = vpop.f32.mrf.mxu3  ;;  %v6522_v6 = vunpack.c.l.b16 %v5921_v4  ;;  %v5944_v58 = vrot.slane %v5942_v0, 5 }
 0x31e   :  { %v12239_v7 = vadd.f32 %v2391_v37, %v1705_v57  ;;  %v3011_v56 = vadd.f32 %v2941_v40, %v12146_v49  ;;  %v5938_v37 = vrot.slane %v5936_v55, 5  ;;  %v4731_v49 = vpack.c.b16 %v4676_v41, %v4675_v50  ;;  %v9530_v40 = vld [vmem:[%s13857_s0 + $0x7c] sm:$0xf] }
 0x31f   :  { %v5420_v1 = vpop.f32.mrf.mxu2  ;;  %v4500_v27 = vrot.slane %v9530_v40, 5  ;;  %v6523_v57 = vunpack.c.l.b16 %v5931_v21  ;;  %v9216_v50 = vrot.slane %v9184_v35, 9  ;;  %v7124_v41 = vrot.slane %v7122_v8, 4 }
 0x320   :  { %v12250_v28 = vadd.f32 %v12185_v60, %v3011_v56  ;;  %v5948_v60 = vrot.slane %v5946_v39, 4  ;;  %v5939_v55 = vor.u32 %v5938_v37, %v5935_v22  ;;  %v7125_v56 = vrot.slane %v9074_v29, 5  ;;  %v9531_v39 = vld [vmem:[%s13857_s0 + $0x80] sm:$0x1] }
 0x321   :  { %v12247_v48 = vpop.f32.mrf.mxu0  ;;  %v8769_v40 = vrot.slane %v8737_v61, 9  ;;  %v4502_v0 = vrot.slane %v4500_v27, 4  ;;  %v5952_v37 = vshll.u32 %v9074_v29, 16 }
 0x322   :  { %13954 = vst [vmem:[#allocation30_spill] sm:$0xff] %v12250_v28  ;;  %v5949_v22 = vor.u32 %v5948_v60, %v5944_v58  ;;  %v7126_v61 = vsel %vm10123_vm7, %v7124_v41, %v7125_v56 }
 0x323   :  { %v4863_v10 = vpop.f32.mrf.mxu1  ;;  %v7305_v56 = vunpack.c.l.b16 %v7126_v61 }
 0x324   :  { %v5023_v33 = vadd.f32 %v4863_v10, %v13955_v23  ;;  %9247 = vmatmul.msk.bf16.gmra.mxu0 %vm1009_vm3, %v7359_v14  ;;  %v4503_v14 = vrot.slane %v9531_v39, 5  ;;  %v6579_v23 = vpack.c.b16 %v6523_v57, %v6522_v6  ;;  %v5940_v57 = vrot.slane %v5939_v55, 4 }
 0x325   :  { %v2943_v4 = vpop.f32.mrf.mxu3  ;;  %v5950_v29 = vrot.slane %v5949_v22, 4 }
 0x326   :  { %v12266_v21 = vadd.f32 %v5420_v1, %v5023_v33  ;;  %8800 = vmatmul.msk.bf16.gmra.mxu1 %vm1009_vm3, %v4731_v49  ;;  %v3012_v10 = vadd.f32 %v2943_v4, %v12182_v42  ;;  %v9409_v1 = vld [vmem:[%s13857_s0 + $0x84] sm:$0xff]  ;;  %v7123_v49 = vsel %vm10123_vm7, %v9216_v50, %v7122_v8  ;;  %v4501_v42 = vsel %vm10123_vm7, %v8769_v40, %v4500_v27 }
 0x327   :  { %v5422_v28 = vpop.f32.mrf.mxu2  ;;  %v4504_v6 = vsel %vm10123_vm7, %v4502_v0, %v4503_v14  ;;  %v5954_v4 = vrot.slane %v5952_v37, 5  ;;  %v9075_v8 = vld [vmem:[%s13857_s0 + $0x84] sm:$0xf]  ;;  %v9076_v27 = vld [vmem:[%s13857_s0 + $0x88] sm:$0xf]  ;;  %v4677_v55 = vunpack.c.l.b16 %v4501_v42  ;;  %v5945_v14 = vsel %vm9673_vm4, %v5940_v57, %v5944_v58 }
 0x328   :  { %v12283_v33 = vadd.f32 %v12217_v16, %v3012_v10  ;;  %v13957_v50 = vld [vmem:[#allocation33_spill] sm:$0xff]  ;;  %v7304_v16 = vunpack.c.l.b16 %v7123_v49  ;;  %v4678_v40 = vunpack.c.l.b16 %v4504_v6  ;;  %v5957_v10 = vshrl.u32 %v9075_v8, 16 }
 0x329   :  { %v12276_v35 = vpop.f32.mrf.mxu0  ;;  %v5966_v49 = vshll.u32 %v9076_v27, 16  ;;  %v5970_v61 = vshrl.u32 %v9076_v27, 16  ;;  %v6524_v42 = vunpack.c.l.b16 %v5945_v14  ;;  %v7129_v6 = vrot.slane %v9076_v27, 5 }
 0x32a   :  { %13956 = vst [vmem:[#allocation31_spill] sm:$0xff] %v12283_v33  ;;  %9151 = vmatmul.msk.bf16.gmra.mxu3 %vm1009_vm3, %v6579_v23  ;;  %v5960_v23 = vshll.u32 %v9075_v8, 16  ;;  %v5959_v57 = vrot.slane %v5957_v10, 4 }
 0x32b   :  { %v4865_v60 = vpop.f32.mrf.mxu1  ;;  %v7131_v14 = vrot.slane %v7129_v6, 4 }
 0x32c   :  { %v5024_v41 = vadd.f32 %v4865_v60, %v13957_v50  ;;  %9025 = vmatmul.msk.bf16.gmra.mxu2 %vm1009_vm3, %v9409_v1  ;;  %v5955_v1 = vsel %vm9673_vm4, %v5950_v29, %v5954_v4  ;;  %v7360_v60 = vpack.c.b16 %v7305_v56, %v7304_v16  ;;  %v5962_v8 = vrot.slane %v5960_v23, 5  ;;  %v8738_v29 = vld [vmem:[%s13857_s0 + $0x84] sm:$0xe]  ;;  %v9532_v4 = vld [vmem:[%s13857_s0 + $0x88] sm:$0xf] }
 0x32d   :  { %v2946_v0 = vpop.f32.mrf.mxu3  ;;  %v6525_v58 = vunpack.c.l.b16 %v5955_v1  ;;  %v4507_v16 = vrot.slane %v9532_v4, 5  ;;  %v5972_v56 = vrot.slane %v5970_v61, 4 }
 0x32e   :  { %v12298_v39 = vadd.f32 %v5422_v28, %v5024_v41  ;;  %v3013_v22 = vadd.f32 %v2946_v0, %v12206_v45  ;;  %v4732_v41 = vpack.c.b16 %v4678_v40, %v4677_v55  ;;  %v9185_v45 = vld [vmem:[%s13857_s0 + $0x84] sm:$0xe]  ;;  %v9077_v55 = vld [vmem:[%s13857_s0 + $0x8c] sm:$0x1]  ;;  %v5963_v4 = vor.u32 %v5962_v8, %v5959_v57  ;;  %v9078_v8 = vld [vmem:[%s13857_s0 + $0x90] sm:$0xf] }
 0x32f   :  { %v5425_v37 = vpop.f32.mrf.mxu2  ;;  %v9217_v40 = vrot.slane %v9185_v45, 9  ;;  %v7132_v10 = vrot.slane %v9077_v55, 5  ;;  %v6580_v1 = vpack.c.b16 %v6525_v58, %v6524_v42 }
 0x330   :  { %v12308_v28 = vadd.f32 %v12247_v48, %v3013_v22  ;;  %v12319_v48 = vrot.slane %v5966_v49, 5  ;;  %v8770_v49 = vrot.slane %v8738_v29, 9 }
 0x331   :  { %v12305_v50 = vpop.f32.mrf.mxu0  ;;  %v7130_v42 = vsel %vm10123_vm7, %v9217_v40, %v7129_v6  ;;  %v5964_v6 = vrot.slane %v5963_v4, 4 }
 0x332   :  { %13958 = vst [vmem:[#allocation32_spill] sm:$0xff] %v12308_v28  ;;  %v5973_v45 = vor.u32 %v5972_v56, %v12319_v48  ;;  %v4508_v57 = vsel %vm10123_vm7, %v8770_v49, %v4507_v16  ;;  %v5984_v49 = vshll.u32 %v9078_v8, 16 }
 0x333   :  { %v4868_v0 = vpop.f32.mrf.mxu1 }
 0x334   :  { %v5025_v27 = vadd.f32 %v4868_v0, %v10737_v17  ;;  %9248 = vmatmul.msk.bf16.gmra.mxu0 %vm1009_vm3, %v7360_v60  ;;  %v4509_v0 = vrot.slane %v4507_v16, 4  ;;  %v9533_v60 = vld [vmem:[%s13857_s0 + $0x8c] sm:$0x1] }
 0x335   :  { %v2948_v23 = vpop.f32.mrf.mxu3  ;;  %v4510_v28 = vrot.slane %v9533_v60, 5 }
 0x336   :  { %v12326_v22 = vadd.f32 %v5425_v37, %v5025_v27  ;;  %8801 = vmatmul.msk.bf16.gmra.mxu1 %vm1009_vm3, %v4732_v41  ;;  %v3014_v61 = vadd.f32 %v2948_v23, %v12239_v7  ;;  %v9410_v37 = vld [vmem:[%s13857_s0 + $0x90] sm:$0xff]  ;;  %v5976_v27 = vshll.u32 %v9077_v55, 16  ;;  %v7133_v7 = vsel %vm10123_vm7, %v7131_v14, %v7132_v10 }
 0x337   :  { %v5427_v17 = vpop.f32.mrf.mxu2  ;;  %v4511_v56 = vsel %vm10123_vm7, %v4509_v0, %v4510_v28  ;;  %v5974_v55 = vrot.slane %v5973_v45, 4  ;;  %v7306_v14 = vunpack.c.l.b16 %v7130_v42  ;;  %v7307_v10 = vunpack.c.l.b16 %v7133_v7 }
 0x338   :  { %v12344_v58 = vadd.f32 %v12276_v35, %v3014_v61  ;;  %v12357_v35 = vld [vmem:[%s13857_s0 + $0x94] sm:$0xf]  ;;  %v5978_v16 = vrot.slane %v5976_v27, 5  ;;  %v4679_v23 = vunpack.c.l.b16 %v4508_v57  ;;  %v4680_v28 = vunpack.c.l.b16 %v4511_v56 }
 0x339   :  { %v12337_v41 = vpop.f32.mrf.mxu0  ;;  %v5990_v4 = vshll.u32 %v12357_v35, 16  ;;  %v5994_v0 = vshrl.u32 %v12357_v35, 16  ;;  %v7361_v42 = vpack.c.b16 %v7307_v10, %v7306_v14  ;;  %v9080_v10 = vld [vmem:[%s13857_s0 + $0x98] sm:$0x1] }
 0x33a   :  { %13959 = vst [vmem:[#allocation33_spill] sm:$0xff] %v12344_v58  ;;  %9152 = vmatmul.msk.bf16.gmra.mxu3 %vm1009_vm3, %v6580_v1  ;;  %v5981_v1 = vshrl.u32 %v9078_v8, 16  ;;  %v5979_v27 = vsel %vm9673_vm4, %v5974_v55, %v5978_v16  ;;  %v5986_v8 = vrot.slane %v5984_v49, 5  ;;  %v4733_v56 = vpack.c.b16 %v4680_v28, %v4679_v23 }
 0x33b   :  { %v4870_v29 = vpop.f32.mrf.mxu1  ;;  %v6527_v16 = vunpack.c.l.b16 %v5979_v27 }
 0x33c   :  { %v5026_v40 = vadd.f32 %v4870_v29, %v10767_v36  ;;  %9026 = vmatmul.msk.bf16.gmra.mxu2 %vm1009_vm3, %v9410_v37  ;;  %v9439_v36 = vld [vmem:[%s13861_s4 + $0x38] sm:$0xff]  ;;  %v5983_v57 = vrot.slane %v5981_v1, 4  ;;  %v7136_v29 = vrot.slane %v12357_v35, 5  ;;  %v9534_v35 = vld [vmem:[%s13857_s0 + $0x94] sm:$0xf] }
 0x33d   :  { %v6712_v61 = vpop.f32.mrf.mxu3  ;;  %v9447_v37 = vld [vmem:[%s13862_s5 + $0x38] sm:$0xff]  ;;  %8077 = vmatpush.bf16.msrb.mxu2 %v9439_v36  ;;  %v4514_v14 = vrot.slane %v9534_v35, 5  ;;  %v12400_v1 = vld [vmem:[%s13860_s3] ss:$0 sm:$0xff] }
 0x33e   :  { %v12361_v60 = vadd.f32 %v5427_v17, %v5026_v40  ;;  %v6872_v45 = vadd.f32 %v6712_v61, %v12266_v21  ;;  %v5969_v17 = vsel %vm9673_vm4, %v5964_v6, %v12319_v48  ;;  %8008 = vmatpush.bf16.msrb.mxu1 %v9447_v37  ;;  %v12381_v40 = vrot.slane %v5990_v4, 5  ;;  %v9186_v48 = vld [vmem:[%s13857_s0 + $0x90] sm:$0xe] }
 0x33f   :  { %v5430_v58 = vpop.f32.mrf.mxu2  ;;  %v5996_v61 = vrot.slane %v5994_v0, 4  ;;  %v6526_v55 = vunpack.c.l.b16 %v5969_v17  ;;  %v5987_v49 = vor.u32 %v5986_v8, %v5983_v57  ;;  %v9218_v28 = vrot.slane %v9186_v48, 9  ;;  %v9535_v57 = vld [vmem:[%s13857_s0 + $0x98] sm:$0x1] }
 0x340   :  { %v7652_v7 = vadd.f32 %v12305_v50, %v6872_v45  ;;  %v8739_v50 = vld [vmem:[%s13857_s0 + $0x90] sm:$0xe]  ;;  %v7138_v4 = vrot.slane %v7136_v29, 4  ;;  %v7139_v0 = vrot.slane %v9080_v10, 5  ;;  %v4516_v35 = vrot.slane %v4514_v14, 4 }
 0x341   :  { %v12378_v21 = vpop.f32.mrf.mxu0  ;;  %v8771_v37 = vrot.slane %v8739_v50, 9  ;;  %v5997_v17 = vor.u32 %v5996_v61, %v12381_v40  ;;  %v4517_v8 = vrot.slane %v9535_v57, 5  ;;  %v12427_v50 = vld [vmem:[%s13857_s0 + $0xa0] sm:$0xf] }
 0x342   :  { %v7719_v61 = vadd.f32 %v12400_v1, %v7652_v7 }
 0x343   :  { %v4873_v6 = vpop.f32.mrf.mxu1  ;;  %v5998_v7 = vrot.slane %v5997_v17, 4 }
 0x344   :  { %v5027_v23 = vadd.f32 %v4873_v6, %v10785_v31  ;;  %9249 = vmatmul.msk.bf16.gmra.mxu0 %vm1009_vm3, %v7361_v42  ;;  %v6000_v31 = vshll.u32 %v9080_v10, 16  ;;  %v6581_v42 = vpack.c.b16 %v6527_v16, %v6526_v55  ;;  %v7137_v55 = vsel %vm10123_vm7, %v9218_v28, %v7136_v29 }
 0x345   :  { %v6714_v45 = vpop.f32.mrf.mxu3  ;;  %v7140_v16 = vsel %vm10123_vm7, %v7138_v4, %v7139_v0  ;;  %v4515_v10 = vsel %vm10123_vm7, %v8771_v37, %v4514_v14  ;;  %v4518_v29 = vsel %vm10123_vm7, %v4516_v35, %v4517_v8  ;;  %v7308_v57 = vunpack.c.l.b16 %v7137_v55 }
 0x346   :  { %v12402_v36 = vadd.f32 %v5430_v58, %v5027_v23  ;;  %8802 = vmatmul.msk.bf16.gmra.mxu1 %vm1009_vm3, %v4733_v56  ;;  %v6873_v27 = vadd.f32 %v6714_v45, %v12298_v39  ;;  %v9411_v58 = vld [vmem:[%s13857_s0 + $0x9c] sm:$0xff]  ;;  %v5988_v23 = vrot.slane %v5987_v49, 4  ;;  %v6002_v45 = vrot.slane %v6000_v31, 5 }
 0x347   :  { %v5432_v6 = vpop.f32.mrf.mxu2  ;;  %v9081_v56 = vld [vmem:[%s13857_s0 + $0x9c] sm:$0xf]  ;;  %v7309_v33 = vunpack.c.l.b16 %v7140_v16  ;;  %v6014_v14 = vshll.u32 %v12427_v50, 16  ;;  %v7783_v49 = vmax.f32 %v7719_v61, 0.0  ;;  %v4681_v17 = vunpack.c.l.b16 %v4515_v10 }
 0x348   :  { %v7653_v39 = vadd.f32 %v12337_v41, %v6873_v27  ;;  %v6005_v28 = vshrl.u32 %v9081_v56, 16  ;;  %v6008_v4 = vshll.u32 %v9081_v56, 16  ;;  %v6018_v31 = vshrl.u32 %v12427_v50, 16 }
 0x349   :  { %v12418_v48 = vpop.f32.mrf.mxu0  ;;  %v4682_v26 = vunpack.c.l.b16 %v4518_v29  ;;  %v5993_v35 = vsel %vm9673_vm4, %v5988_v23, %v12381_v40  ;;  %v7362_v16 = vpack.c.b16 %v7309_v33, %v7308_v57  ;;  %v12447_v10 = vrot.slane %v6014_v14, 5  ;;  %v9083_v40 = vld [vmem:[%s13857_s0 + $0xa4] sm:$0x1] }
 0x34a   :  { %v7720_v41 = vadd.f32 %v12400_v1, %v7653_v39  ;;  %9153 = vmatmul.msk.bf16.gmra.mxu3 %vm1009_vm3, %v6581_v42  ;;  %v6007_v61 = vrot.slane %v6005_v28, 4  ;;  %v6010_v55 = vrot.slane %v6008_v4, 5  ;;  %v6020_v23 = vrot.slane %v6018_v31, 4 }
 0x34b   :  { %v4875_v27 = vpop.f32.mrf.mxu1  ;;  %v7146_v31 = vrot.slane %v9083_v40, 5 }
 0x34c   :  { %v5028_v0 = vadd.f32 %v4875_v27, %v10817_v11  ;;  %9027 = vmatmul.msk.bf16.gmra.mxu2 %vm1009_vm3, %v9411_v58  ;;  %v7784_v37 = vmax.f32 %v7720_v41, 0.0  ;;  %v6003_v11 = vsel %vm9673_vm4, %v5998_v7, %v6002_v45  ;;  %v9187_v7 = vld [vmem:[%s13857_s0 + $0x9c] sm:$0xe]  ;;  %v4734_v45 = vpack.c.b16 %v4682_v26, %v4681_v17 }
 0x34d   :  { %v6717_v42 = vpop.f32.mrf.mxu3  ;;  %v6528_v27 = vunpack.c.l.b16 %v5993_v35  ;;  %v6529_v33 = vunpack.c.l.b16 %v6003_v11  ;;  %v6011_v57 = vor.u32 %v6010_v55, %v6007_v61  ;;  %v6024_v26 = vshll.u32 %v9083_v40, 16 }
 0x34e   :  { %v12439_v39 = vadd.f32 %v5432_v6, %v5028_v0  ;;  %v7847_v8 = vadd.f32 %v7784_v37, %v7783_v49  ;;  %v6874_v58 = vadd.f32 %v6717_v42, %v12326_v22  ;;  %v7143_v22 = vrot.slane %v12427_v50, 5  ;;  %v8740_v0 = vld [vmem:[%s13857_s0 + $0x9c] sm:$0xe] }
 0x34f   :  { %v5435_v56 = vpop.f32.mrf.mxu2  ;;  %v9219_v50 = vrot.slane %v9187_v7, 9  ;;  %v6021_v37 = vor.u32 %v6020_v23, %v12447_v10  ;;  %v6582_v11 = vpack.c.b16 %v6529_v33, %v6528_v27  ;;  %v6012_v23 = vrot.slane %v6011_v57, 4 }
 0x350   :  { %v7654_v6 = vadd.f32 %v12378_v21, %v6874_v58  ;;  %v9536_v21 = vld [vmem:[%s13857_s0 + $0xa0] sm:$0xf]  ;;  %v7145_v17 = vrot.slane %v7143_v22, 4  ;;  %v8772_v58 = vrot.slane %v8740_v0, 9 }
 0x351   :  { %v12450_v41 = vpop.f32.mrf.mxu0  ;;  %v4521_v29 = vrot.slane %v9536_v21, 5  ;;  %v7144_v40 = vsel %vm10123_vm7, %v9219_v50, %v7143_v22  ;;  %v9084_v21 = vld [vmem:[%s13857_s0 + $0xa8] sm:$0xf]  ;;  %v6017_v0 = vsel %vm9673_vm4, %v6012_v23, %v12447_v10 }
 0x352   :  { %v7721_v28 = vadd.f32 %v12400_v1, %v7654_v6  ;;  %v7147_v33 = vsel %vm10123_vm7, %v7145_v17, %v7146_v31  ;;  %v7310_v57 = vunpack.c.l.b16 %v7144_v40  ;;  %v6029_v50 = vshrl.u32 %v9084_v21, 16 }
 0x353   :  { %v4878_v4 = vpop.f32.mrf.mxu1  ;;  %v4523_v6 = vrot.slane %v4521_v29, 4 }
 0x354   :  { %v5029_v14 = vadd.f32 %v4878_v4, %v10835_v15  ;;  %9250 = vmatmul.msk.bf16.gmra.mxu0 %vm1009_vm3, %v7362_v16  ;;  %v7785_v49 = vmax.f32 %v7721_v28, 0.0  ;;  %v9537_v16 = vld [vmem:[%s13857_s0 + $0xa4] sm:$0x1]  ;;  %v4522_v28 = vsel %vm10123_vm7, %v8772_v58, %v4521_v29  ;;  %v7311_v29 = vunpack.c.l.b16 %v7147_v33 }
 0x355   :  { %v6719_v42 = vpop.f32.mrf.mxu3  ;;  %v4524_v7 = vrot.slane %v9537_v16, 5  ;;  %v4683_v17 = vunpack.c.l.b16 %v4522_v28  ;;  %v6031_v40 = vrot.slane %v6029_v50, 4 }
 0x356   :  { %v12469_v35 = vadd.f32 %v5435_v56, %v5029_v14  ;;  %8803 = vmatmul.msk.bf16.gmra.mxu1 %vm1009_vm3, %v4734_v45  ;;  %v7848_v61 = vadd.f32 %v7847_v8, %v7785_v49  ;;  %v6875_v15 = vadd.f32 %v6719_v42, %v12361_v60  ;;  %v9412_v56 = vld [vmem:[%s13857_s0 + $0xa8] sm:$0xff]  ;;  %v6022_v8 = vrot.slane %v6021_v37, 4 }
 0x357   :  { %v5437_v55 = vpop.f32.mrf.mxu2  ;;  %v6026_v60 = vrot.slane %v6024_v26, 5  ;;  %v9085_v14 = vld [vmem:[%s13857_s0 + $0xac] sm:$0xf]  ;;  %v6032_v49 = vshll.u32 %v9084_v21, 16 }
 0x358   :  { %v7655_v45 = vadd.f32 %v12418_v48, %v6875_v15  ;;  %v4525_v48 = vsel %vm10123_vm7, %v4523_v6, %v4524_v7  ;;  %v6038_v58 = vshll.u32 %v9085_v14, 16  ;;  %v6042_v6 = vshrl.u32 %v9085_v14, 16 }
 0x359   :  { %v12482_v27 = vpop.f32.mrf.mxu0  ;;  %v6027_v31 = vsel %vm9673_vm4, %v6022_v8, %v6026_v60  ;;  %v4684_v10 = vunpack.c.l.b16 %v4525_v48  ;;  %v6530_v7 = vunpack.c.l.b16 %v6017_v0  ;;  %v7150_v8 = vrot.slane %v9085_v14, 5  ;;  %v9086_v0 = vld [vmem:[%s13857_s0 + $0xb0] sm:$0x1] }
 0x35a   :  { %v7722_v4 = vadd.f32 %v12400_v1, %v7655_v45  ;;  %9154 = vmatmul.msk.bf16.gmra.mxu3 %vm1009_vm3, %v6582_v11  ;;  %v6531_v23 = vunpack.c.l.b16 %v6027_v31  ;;  %v6034_v45 = vrot.slane %v6032_v49, 5  ;;  %v6044_v28 = vrot.slane %v6042_v6, 4 }
 0x35b   :  { %v4880_v22 = vpop.f32.mrf.mxu1  ;;  %v4735_v60 = vpack.c.b16 %v4684_v10, %v4683_v17  ;;  %v7152_v49 = vrot.slane %v7150_v8, 4 }
 0x35c   :  { %v5030_v26 = vadd.f32 %v4880_v22, %v10866_v2  ;;  %9028 = vmatmul.msk.bf16.gmra.mxu2 %vm1009_vm3, %v9412_v56  ;;  %v7786_v37 = vmax.f32 %v7722_v4, 0.0  ;;  %v7363_v56 = vpack.c.b16 %v7311_v29, %v7310_v57  ;;  %v8741_v22 = vld [vmem:[%s13857_s0 + $0xa8] sm:$0xe]  ;;  %v6583_v14 = vpack.c.b16 %v6531_v23, %v6530_v7  ;;  %v9539_v23 = vld [vmem:[%s13857_s0 + $0xb0] sm:$0x1] }
 0x35d   :  { %v6722_v42 = vpop.f32.mrf.mxu3 }
 0x35e   :  { %v12505_v11 = vadd.f32 %v5437_v55, %v5030_v26  ;;  %v7849_v15 = vadd.f32 %v7848_v61, %v7786_v37  ;;  %v6876_v16 = vadd.f32 %v6722_v42, %v12402_v36  ;;  %v12511_v55 = vrot.slane %v6038_v58, 5  ;;  %v9188_v61 = vld [vmem:[%s13857_s0 + $0xa8] sm:$0xe] }
 0x35f   :  { %v5440_v2 = vpop.f32.mrf.mxu2  ;;  %v6035_v26 = vor.u32 %v6034_v45, %v6031_v40  ;;  %v9220_v50 = vrot.slane %v9188_v61, 9  ;;  %v7153_v37 = vrot.slane %v9086_v0, 5  ;;  %v8773_v42 = vrot.slane %v8741_v22, 9  ;;  %v9087_v40 = vld [vmem:[%s13857_s0 + $0xb4] sm:$0xf] }
 0x360   :  { %v7656_v33 = vadd.f32 %v12450_v41, %v6876_v16  ;;  %v9538_v41 = vld [vmem:[%s13857_s0 + $0xac] sm:$0xf]  ;;  %v6045_v10 = vor.u32 %v6044_v28, %v12511_v55  ;;  %v6048_v58 = vshll.u32 %v9086_v0, 16  ;;  %v6056_v0 = vshll.u32 %v9087_v40, 16 }
 0x361   :  { %v12509_v21 = vpop.f32.mrf.mxu0  ;;  %v4528_v48 = vrot.slane %v9538_v41, 5  ;;  %v6036_v61 = vrot.slane %v6035_v26, 4  ;;  %v6053_v41 = vshrl.u32 %v9087_v40, 16 }
 0x362   :  { %v7723_v36 = vadd.f32 %v12400_v1, %v7656_v33  ;;  %v7154_v33 = vsel %vm10123_vm7, %v7152_v49, %v7153_v37 }
 0x363   :  { %v4883_v4 = vpop.f32.mrf.mxu1  ;;  %v4530_v7 = vrot.slane %v4528_v48, 4  ;;  %v4529_v28 = vsel %vm10123_vm7, %v8773_v42, %v4528_v48 }
 0x364   :  { %v5031_v57 = vadd.f32 %v4883_v4, %v10884_v13  ;;  %9251 = vmatmul.msk.bf16.gmra.mxu0 %vm1009_vm3, %v7363_v56  ;;  %v7787_v29 = vmax.f32 %v7723_v36, 0.0  ;;  %v4531_v56 = vrot.slane %v9539_v23, 5  ;;  %v6046_v36 = vrot.slane %v6045_v10, 4 }
 0x365   :  { %v6724_v17 = vpop.f32.mrf.mxu3  ;;  %v6050_v4 = vrot.slane %v6048_v58, 5  ;;  %v4685_v49 = vunpack.c.l.b16 %v4529_v28  ;;  %v6041_v10 = vsel %vm9673_vm4, %v6036_v61, %v12511_v55  ;;  %v6055_v23 = vrot.slane %v6053_v41, 4  ;;  %v9089_v55 = vld [vmem:[%s13857_s0 + $0xbc] sm:$0x1] }
 0x366   :  { %v12528_v31 = vadd.f32 %v5440_v2, %v5031_v57  ;;  %8804 = vmatmul.msk.bf16.gmra.mxu1 %vm1009_vm3, %v4735_v60  ;;  %v7850_v6 = vadd.f32 %v7849_v15, %v7787_v29  ;;  %v6877_v13 = vadd.f32 %v6724_v17, %v12439_v39  ;;  %v9413_v2 = vld [vmem:[%s13857_s0 + $0xb4] sm:$0xff]  ;;  %v7151_v39 = vsel %vm10123_vm7, %v9220_v50, %v7150_v8 }
 0x367   :  { %v5442_v16 = vpop.f32.mrf.mxu2  ;;  %v12552_v60 = vld [vmem:[%s13857_s0 + $0xb8] sm:$0xf]  ;;  %v4532_v8 = vsel %vm10123_vm7, %v4530_v7, %v4531_v56  ;;  %v7312_v29 = vunpack.c.l.b16 %v7151_v39  ;;  %v7313_v50 = vunpack.c.l.b16 %v7154_v33  ;;  %v6058_v56 = vrot.slane %v6056_v0, 5 }
 0x368   :  { %v7657_v45 = vadd.f32 %v12482_v27, %v6877_v13  ;;  %v6062_v48 = vshll.u32 %v12552_v60, 16  ;;  %v6066_v37 = vshrl.u32 %v12552_v60, 16  ;;  %v4686_v42 = vunpack.c.l.b16 %v4532_v8 }
 0x369   :  { %v12543_v15 = vpop.f32.mrf.mxu0  ;;  %v6532_v28 = vunpack.c.l.b16 %v6041_v10  ;;  %v6059_v8 = vor.u32 %v6058_v56, %v6055_v23 }
 0x36a   :  { %v7724_v27 = vadd.f32 %v12400_v1, %v7657_v45  ;;  %9155 = vmatmul.msk.bf16.gmra.mxu3 %vm1009_vm3, %v6583_v14  ;;  %v12572_v40 = vrot.slane %v6062_v48, 5  ;;  %v6068_v39 = vrot.slane %v6066_v37, 4  ;;  %v4736_v33 = vpack.c.b16 %v4686_v42, %v4685_v49 }
 0x36b   :  { %v4885_v22 = vpop.f32.mrf.mxu1  ;;  %v7160_v48 = vrot.slane %v9089_v55, 5  ;;  %v6060_v56 = vrot.slane %v6059_v8, 4 }
 0x36c   :  { %v5032_v57 = vadd.f32 %v4885_v22, %v10914_v20  ;;  %9029 = vmatmul.msk.bf16.gmra.mxu2 %vm1009_vm3, %v9413_v2  ;;  %v7788_v26 = vmax.f32 %v7724_v27, 0.0  ;;  %v6051_v20 = vsel %vm9673_vm4, %v6046_v36, %v6050_v4  ;;  %v7364_v2 = vpack.c.b16 %v7313_v50, %v7312_v29  ;;  %v8742_v22 = vld [vmem:[%s13857_s0 + $0xb4] sm:$0xe] }
 0x36d   :  { %v6727_v17 = vpop.f32.mrf.mxu3  ;;  %v6533_v61 = vunpack.c.l.b16 %v6051_v20  ;;  %v6069_v29 = vor.u32 %v6068_v39, %v12572_v40 }
 0x36e   :  { %v12564_v14 = vadd.f32 %v5442_v16, %v5032_v57  ;;  %v7851_v58 = vadd.f32 %v7850_v6, %v7788_v26  ;;  %v6878_v13 = vadd.f32 %v6727_v17, %v12469_v35  ;;  %v9189_v6 = vld [vmem:[%s13857_s0 + $0xb4] sm:$0xe]  ;;  %v7157_v35 = vrot.slane %v12552_v60, 5 }
 0x36f   :  { %v5445_v7 = vpop.f32.mrf.mxu2  ;;  %v6072_v60 = vshll.u32 %v9089_v55, 16  ;;  %v9221_v0 = vrot.slane %v9189_v6, 9  ;;  %v6584_v37 = vpack.c.b16 %v6533_v61, %v6532_v28  ;;  %v8774_v17 = vrot.slane %v8742_v22, 9  ;;  %v9090_v6 = vld [vmem:[%s13857_s0 + $0xc0] sm:$0xf] }
 0x370   :  { %v7658_v16 = vadd.f32 %v12509_v21, %v6878_v13  ;;  %v9540_v21 = vld [vmem:[%s13857_s0 + $0xb8] sm:$0xf]  ;;  %v7159_v50 = vrot.slane %v7157_v35, 4  ;;  %v9541_v13 = vld [vmem:[%s13857_s0 + $0xbc] sm:$0x1]  ;;  %v6065_v61 = vsel %vm9673_vm4, %v6060_v56, %v12572_v40  ;;  %v6077_v22 = vshrl.u32 %v9090_v6, 16 }
 0x371   :  { %v12575_v45 = vpop.f32.mrf.mxu0  ;;  %v4535_v36 = vrot.slane %v9540_v21, 5  ;;  %v4538_v23 = vrot.slane %v9541_v13, 5  ;;  %v6080_v8 = vshll.u32 %v9090_v6, 16 }
 0x372   :  { %v7725_v4 = vadd.f32 %v12400_v1, %v7658_v16  ;;  %v7161_v39 = vsel %vm10123_vm7, %v7159_v50, %v7160_v48 }
 0x373   :  { %v4888_v27 = vpop.f32.mrf.mxu1  ;;  %v4537_v42 = vrot.slane %v4535_v36, 4  ;;  %v6082_v56 = vrot.slane %v6080_v8, 5 }
 0x374   :  { %v5033_v41 = vadd.f32 %v4888_v27, %v10932_v46  ;;  %9252 = vmatmul.msk.bf16.gmra.mxu0 %vm1009_vm3, %v7364_v2  ;;  %v7789_v57 = vmax.f32 %v7725_v4, 0.0  ;;  %v7158_v2 = vsel %vm10123_vm7, %v9221_v0, %v7157_v35  ;;  %v12626_v4 = vld [vmem:[%s13857_s0 + $0xc4] sm:$0xf]  ;;  %v7315_v27 = vunpack.c.l.b16 %v7161_v39 }
 0x375   :  { %v6729_v26 = vpop.f32.mrf.mxu3  ;;  %v7314_v21 = vunpack.c.l.b16 %v7158_v2  ;;  %v6086_v50 = vshll.u32 %v12626_v4, 16  ;;  %v6090_v48 = vshrl.u32 %v12626_v4, 16 }
 0x376   :  { %v12594_v49 = vadd.f32 %v5445_v7, %v5033_v41  ;;  %8805 = vmatmul.msk.bf16.gmra.mxu1 %vm1009_vm3, %v4736_v33  ;;  %v7852_v10 = vadd.f32 %v7851_v58, %v7789_v57  ;;  %v6879_v46 = vadd.f32 %v6729_v26, %v12505_v11  ;;  %v9414_v7 = vld [vmem:[%s13857_s0 + $0xc0] sm:$0xff]  ;;  %v6070_v58 = vrot.slane %v6069_v29, 4 }
 0x377   :  { %v5447_v20 = vpop.f32.mrf.mxu2  ;;  %v6074_v11 = vrot.slane %v6072_v60, 5  ;;  %v4536_v33 = vsel %vm10123_vm7, %v8774_v17, %v4535_v36  ;;  %v6534_v17 = vunpack.c.l.b16 %v6065_v61  ;;  %v7365_v13 = vpack.c.b16 %v7315_v27, %v7314_v21 }
 0x378   :  { %v7659_v16 = vadd.f32 %v12543_v15, %v6879_v46  ;;  %v4539_v15 = vsel %vm10123_vm7, %v4537_v42, %v4538_v23  ;;  %v4687_v60 = vunpack.c.l.b16 %v4536_v33  ;;  %v9438_v42 = vld [vmem:[%s13861_s4 + $0x30] sm:$0xff]  ;;  %v6079_v23 = vrot.slane %v6077_v22, 4  ;;  %v9542_v33 = vld [vmem:[%s13857_s0 + $0xc4] sm:$0xf] }
 0x379   :  { %v12607_v55 = vpop.f32.mrf.mxu0  ;;  %v6075_v0 = vsel %vm9673_vm4, %v6070_v58, %v6074_v11  ;;  %v4688_v29 = vunpack.c.l.b16 %v4539_v15  ;;  %v9446_v46 = vld [vmem:[%s13862_s5 + $0x30] sm:$0xff]  ;;  %8078 = vmatpush.bf16.msrb.mxu2 %v9438_v42  ;;  %v6092_v58 = vrot.slane %v6090_v48, 4  ;;  %v9190_v11 = vld [vmem:[%s13857_s0 + $0xc0] sm:$0xe]  ;;  %v9093_v42 = vld [vmem:[%s13857_s0 + $0xcc] sm:$0xf] }
 0x37a   :  { %v7726_v28 = vadd.f32 %v12400_v1, %v7659_v16  ;;  %9156 = vmatmul.msk.bf16.gmra.mxu3 %vm1009_vm3, %v6584_v37  ;;  %8009 = vmatpush.bf16.msrb.mxu1 %v9446_v46  ;;  %v12647_v16 = vrot.slane %v6086_v50, 5  ;;  %v6083_v21 = vor.u32 %v6082_v56, %v6079_v23 }
 0x37b   :  { %v4890_v35 = vpop.f32.mrf.mxu1 }
 0x37c   :  { %v5034_v36 = vadd.f32 %v4890_v35, %v10964_v38  ;;  %9030 = vmatmul.msk.bf16.gmra.mxu2 %vm1009_vm3, %v9414_v7  ;;  %v7790_v41 = vmax.f32 %v7726_v28, 0.0  ;;  %v4542_v28 = vrot.slane %v9542_v33, 5  ;;  %v9092_v35 = vld [vmem:[%s13857_s0 + $0xc8] sm:$0x1]  ;;  %v6084_v56 = vrot.slane %v6083_v21, 4 }
 0x37d   :  { %v6732_v57 = vpop.f32.mrf.mxu3  ;;  %v7167_v22 = vrot.slane %v9092_v35, 5 }
 0x37e   :  { %v12632_v40 = vadd.f32 %v5447_v20, %v5034_v36  ;;  %v7853_v26 = vadd.f32 %v7852_v10, %v7790_v41  ;;  %v6880_v38 = vadd.f32 %v6732_v57, %v12528_v31  ;;  %v6535_v20 = vunpack.c.l.b16 %v6075_v0 }
 0x37f   :  { %v5450_v37 = vpop.f32.mrf.mxu2  ;;  %v7164_v31 = vrot.slane %v12626_v4, 5  ;;  %v4737_v10 = vpack.c.b16 %v4688_v29, %v4687_v60  ;;  %v9222_v36 = vrot.slane %v9190_v11, 9  ;;  %v6093_v0 = vor.u32 %v6092_v58, %v12647_v16 }
 0x380   :  { %v7660_v7 = vadd.f32 %v12575_v45, %v6880_v38  ;;  %v8743_v45 = vld [vmem:[%s13857_s0 + $0xc0] sm:$0xe]  ;;  %v6585_v61 = vpack.c.b16 %v6535_v20, %v6534_v17  ;;  %v6096_v57 = vshll.u32 %v9092_v35, 16  ;;  %v4544_v48 = vrot.slane %v4542_v28, 4  ;;  %v9543_v38 = vld [vmem:[%s13857_s0 + $0xc8] sm:$0x1] }
 0x381   :  { %v12644_v2 = vpop.f32.mrf.mxu0  ;;  %v7166_v27 = vrot.slane %v7164_v31, 4  ;;  %v8775_v60 = vrot.slane %v8743_v45, 9  ;;  %v4545_v17 = vrot.slane %v9543_v38, 5  ;;  %v6101_v11 = vshrl.u32 %v9093_v42, 16 }
 0x382   :  { %v7727_v39 = vadd.f32 %v12400_v1, %v7660_v7  ;;  %v6094_v7 = vrot.slane %v6093_v0, 4 }
 0x383   :  { %v4893_v6 = vpop.f32.mrf.mxu1  ;;  %v7168_v20 = vsel %vm10123_vm7, %v7166_v27, %v7167_v22  ;;  %v4543_v23 = vsel %vm10123_vm7, %v8775_v60, %v4542_v28  ;;  %v6089_v27 = vsel %vm9673_vm4, %v6084_v56, %v12647_v16  ;;  %v6103_v0 = vrot.slane %v6101_v11, 4  ;;  %v9095_v16 = vld [vmem:[%s13857_s0 + $0xd4] sm:$0x1]  ;;  %v8744_v56 = vld [vmem:[%s13857_s0 + $0xe4] sm:$0xe] }
 0x384   :  { %v5035_v15 = vadd.f32 %v4893_v6, %v10982_v51  ;;  %9253 = vmatmul.msk.bf16.gmra.mxu0 %vm1009_vm3, %v7365_v13  ;;  %v7791_v4 = vmax.f32 %v7727_v39, 0.0  ;;  %v12688_v13 = vld [vmem:[%s13857_s0 + $0xd0] sm:$0xf]  ;;  %v6104_v39 = vshll.u32 %v9093_v42, 16  ;;  %v7317_v33 = vunpack.c.l.b16 %v7168_v20 }
 0x385   :  { %v6734_v8 = vpop.f32.mrf.mxu3  ;;  %v6110_v28 = vshll.u32 %v12688_v13, 16  ;;  %v6114_v21 = vshrl.u32 %v12688_v13, 16  ;;  %v6536_v42 = vunpack.c.l.b16 %v6089_v27 }
 0x386   :  { %v12664_v41 = vadd.f32 %v5450_v37, %v5035_v15  ;;  %8806 = vmatmul.msk.bf16.gmra.mxu1 %vm1009_vm3, %v4737_v10  ;;  %v7854_v29 = vadd.f32 %v7853_v26, %v7791_v4  ;;  %v6881_v51 = vadd.f32 %v6734_v8, %v12564_v14  ;;  %v9415_v37 = vld [vmem:[%s13857_s0 + $0xcc] sm:$0xff]  ;;  %v7165_v14 = vsel %vm10123_vm7, %v9222_v36, %v7164_v31 }
 0x387   :  { %v5452_v50 = vpop.f32.mrf.mxu2  ;;  %v6098_v10 = vrot.slane %v6096_v57, 5  ;;  %v4546_v31 = vsel %vm10123_vm7, %v4544_v48, %v4545_v17  ;;  %v7316_v45 = vunpack.c.l.b16 %v7165_v14  ;;  %v4689_v15 = vunpack.c.l.b16 %v4543_v23 }
 0x388   :  { %v7661_v46 = vadd.f32 %v12607_v55, %v6881_v51  ;;  %v4690_v36 = vunpack.c.l.b16 %v4546_v31  ;;  %v6106_v57 = vrot.slane %v6104_v39, 5  ;;  %v12708_v48 = vrot.slane %v6110_v28, 5 }
 0x389   :  { %v12679_v26 = vpop.f32.mrf.mxu0  ;;  %v7366_v51 = vpack.c.b16 %v7317_v33, %v7316_v45  ;;  %v6116_v17 = vrot.slane %v6114_v21, 4  ;;  %v7174_v39 = vrot.slane %v9095_v16, 5  ;;  %v8776_v28 = vrot.slane %v8744_v56, 9 }
 0x38a   :  { %v7728_v55 = vadd.f32 %v12400_v1, %v7661_v46  ;;  %9157 = vmatmul.msk.bf16.gmra.mxu3 %vm1009_vm3, %v6585_v61 }
 0x38b   :  { %v4895_v58 = vpop.f32.mrf.mxu1  ;;  %v6117_v31 = vor.u32 %v6116_v17, %v12708_v48 }
 0x38c   :  { %v5036_v6 = vadd.f32 %v4895_v58, %v11013_v43  ;;  %9031 = vmatmul.msk.bf16.gmra.mxu2 %vm1009_vm3, %v9415_v37  ;;  %v7792_v35 = vmax.f32 %v7728_v55, 0.0  ;;  %v6099_v43 = vsel %vm9673_vm4, %v6094_v7, %v6098_v10  ;;  %v4738_v37 = vpack.c.b16 %v4690_v36, %v4689_v15 }
 0x38d   :  { %v6737_v4 = vpop.f32.mrf.mxu3  ;;  %v6537_v46 = vunpack.c.l.b16 %v6099_v43  ;;  %v6107_v7 = vor.u32 %v6106_v57, %v6103_v0  ;;  %v9416_v43 = vld [vmem:[%s13857_s0 + $0xf0] sm:$0xff] }
 0x38e   :  { %v12700_v61 = vadd.f32 %v5452_v50, %v5036_v6  ;;  %v7855_v22 = vadd.f32 %v7854_v29, %v7792_v35  ;;  %v6882_v8 = vadd.f32 %v6737_v4, %v12594_v49  ;;  %v9191_v29 = vld [vmem:[%s13857_s0 + $0xcc] sm:$0xe]  ;;  %v7171_v49 = vrot.slane %v12688_v13, 5  ;;  %v9545_v4 = vld [vmem:[%s13857_s0 + $0xec] sm:$0x1] }
 0x38f   :  { %v5455_v60 = vpop.f32.mrf.mxu2  ;;  %v6120_v13 = vshll.u32 %v9095_v16, 16  ;;  %v9223_v55 = vrot.slane %v9191_v29, 9  ;;  %v6586_v33 = vpack.c.b16 %v6537_v46, %v6536_v42  ;;  %v4552_v36 = vrot.slane %v9545_v4, 5 }
 0x390   :  { %v7662_v50 = vadd.f32 %v12644_v2, %v6882_v8  ;;  %v9544_v2 = vld [vmem:[%s13857_s0 + $0xe8] sm:$0xf]  ;;  %v7173_v11 = vrot.slane %v7171_v49, 4  ;;  %v6108_v27 = vrot.slane %v6107_v7, 4 }
 0x391   :  { %v12711_v38 = vpop.f32.mrf.mxu0  ;;  %v4549_v14 = vrot.slane %v9544_v2, 5  ;;  %v7172_v8 = vsel %vm10123_vm7, %v9223_v55, %v7171_v49 }
 0x392   :  { %v7729_v20 = vadd.f32 %v12400_v1, %v7662_v50  ;;  %v7175_v57 = vsel %vm10123_vm7, %v7173_v11, %v7174_v39  ;;  %v6113_v29 = vsel %vm9673_vm4, %v6108_v27, %v12708_v48  ;;  %v7318_v49 = vunpack.c.l.b16 %v7172_v8  ;;  %v8745_v8 = vld [vmem:[%s13857_s0 + $0xf0] sm:$0xe] }
 0x393   :  { %v4898_v23 = vpop.f32.mrf.mxu1  ;;  %v4551_v35 = vrot.slane %v4549_v14, 4  ;;  %v4550_v50 = vsel %vm10123_vm7, %v8776_v28, %v4549_v14  ;;  %v7319_v46 = vunpack.c.l.b16 %v7175_v57  ;;  %v6538_v11 = vunpack.c.l.b16 %v6113_v29 }
 0x394   :  { %v5037_v10 = vadd.f32 %v4898_v23, %v11031_v32  ;;  %9254 = vmatmul.msk.bf16.gmra.mxu0 %vm1009_vm3, %v7366_v51  ;;  %v7793_v58 = vmax.f32 %v7729_v20, 0.0  ;;  %v9096_v51 = vld [vmem:[%s13857_s0 + $0xf0] sm:$0xf]  ;;  %v4691_v23 = vunpack.c.l.b16 %v4550_v50 }
 0x395   :  { %v6739_v6 = vpop.f32.mrf.mxu3  ;;  %v6125_v2 = vshrl.u32 %v9096_v51, 16  ;;  %v6128_v14 = vshll.u32 %v9096_v51, 16 }
 0x396   :  { %v12730_v45 = vadd.f32 %v5455_v60, %v5037_v10  ;;  %8807 = vmatmul.msk.bf16.gmra.mxu1 %vm1009_vm3, %v4738_v37  ;;  %v7856_v15 = vadd.f32 %v7855_v22, %v7793_v58  ;;  %v6883_v32 = vadd.f32 %v6739_v6, %v12632_v40  ;;  %v6118_v22 = vrot.slane %v6117_v31, 4  ;;  %v9097_v37 = vld [vmem:[%s13857_s0 + $0xf4] sm:$0xf] }
 0x397   :  { %v5457_v21 = vpop.f32.mrf.mxu2  ;;  %v6122_v40 = vrot.slane %v6120_v13, 5  ;;  %v6134_v13 = vshll.u32 %v9097_v37, 16  ;;  %v6138_v55 = vshrl.u32 %v9097_v37, 16  ;;  %v7367_v6 = vpack.c.b16 %v7319_v46, %v7318_v49 }
 0x398   :  { %v7663_v60 = vadd.f32 %v12679_v26, %v6883_v32  ;;  %v4553_v26 = vsel %vm10123_vm7, %v4551_v35, %v4552_v36  ;;  %v6130_v28 = vrot.slane %v6128_v14, 5  ;;  %v7178_v4 = vrot.slane %v9097_v37, 5 }
 0x399   :  { %v12743_v0 = vpop.f32.mrf.mxu0  ;;  %v6123_v56 = vsel %vm9673_vm4, %v6118_v22, %v6122_v40  ;;  %v4692_v48 = vunpack.c.l.b16 %v4553_v26  ;;  %v6140_v27 = vrot.slane %v6138_v55, 4  ;;  %v9098_v22 = vld [vmem:[%s13857_s0 + $0xf8] sm:$0x1]  ;;  %v8777_v37 = vrot.slane %v8745_v8, 9 }
 0x39a   :  { %v7730_v16 = vadd.f32 %v12400_v1, %v7663_v60  ;;  %9158 = vmatmul.msk.bf16.gmra.mxu3 %vm1009_vm3, %v6586_v33  ;;  %v6539_v39 = vunpack.c.l.b16 %v6123_v56  ;;  %v6127_v33 = vrot.slane %v6125_v2, 4  ;;  %v7181_v26 = vrot.slane %v9098_v22, 5 }
 0x39b   :  { %v4900_v17 = vpop.f32.mrf.mxu1  ;;  %v4739_v36 = vpack.c.b16 %v4692_v48, %v4691_v23  ;;  %v6144_v46 = vshll.u32 %v9098_v22, 16  ;;  %v9547_v23 = vld [vmem:[%s13857_s0 + $0xf8] sm:$0x1]  ;;  %v9099_v48 = vld [vmem:[%s13857_s0 + $0xfc] sm:$0xf] }
 0x39c   :  { %v5038_v42 = vadd.f32 %v4900_v17, %v11061_v62  ;;  %9032 = vmatmul.msk.bf16.gmra.mxu2 %vm1009_vm3, %v9416_v43  ;;  %v7794_v20 = vmax.f32 %v7730_v16, 0.0  ;;  %v6587_v57 = vpack.c.b16 %v6539_v39, %v6538_v11  ;;  %v6131_v51 = vor.u32 %v6130_v28, %v6127_v33 }
 0x39d   :  { %v6742_v7 = vpop.f32.mrf.mxu3  ;;  %v7180_v17 = vrot.slane %v7178_v4, 4  ;;  %v4559_v56 = vrot.slane %v9547_v23, 5 }
 0x39e   :  { %v12766_v10 = vadd.f32 %v5457_v21, %v5038_v42  ;;  %v7857_v58 = vadd.f32 %v7856_v15, %v7794_v20  ;;  %v6884_v31 = vadd.f32 %v6742_v7, %v12664_v41  ;;  %v12772_v21 = vrot.slane %v6134_v13, 5  ;;  %v9192_v15 = vld [vmem:[%s13857_s0 + $0xf0] sm:$0xe]  ;;  %v9417_v7 = vld [vmem:[%s13857_s0 + $0xfc] sm:$0xff] }
 0x39f   :  { %v5460_v62 = vpop.f32.mrf.mxu2  ;;  %v9224_v16 = vrot.slane %v9192_v15, 9  ;;  %v6132_v11 = vrot.slane %v6131_v51, 4 }
 0x3a0   :  { %v7664_v35 = vadd.f32 %v12711_v38, %v6884_v31  ;;  %v9546_v38 = vld [vmem:[%s13857_s0 + $0xf4] sm:$0xf]  ;;  %v6141_v42 = vor.u32 %v6140_v27, %v12772_v21  ;;  %v12813_v31 = vld [vmem:[%s13857_s0 + $0x100] sm:$0xf] }
 0x3a1   :  { %v12770_v32 = vpop.f32.mrf.mxu0  ;;  %v4556_v60 = vrot.slane %v9546_v38, 5  ;;  %v6162_v38 = vshrl.u32 %v12813_v31, 16 }
 0x3a2   :  { %v7731_v41 = vadd.f32 %v12400_v1, %v7664_v35  ;;  %v6142_v39 = vrot.slane %v6141_v42, 4  ;;  %v6149_v35 = vshrl.u32 %v9099_v48, 16 }
 0x3a3   :  { %v4903_v43 = vpop.f32.mrf.mxu1  ;;  %v4558_v20 = vrot.slane %v4556_v60, 4 }
 0x3a4   :  { %v5039_v40 = vadd.f32 %v4903_v43, %v11079_v5  ;;  %9255 = vmatmul.msk.bf16.gmra.mxu0 %vm1009_vm3, %v7367_v6  ;;  %v7795_v50 = vmax.f32 %v7731_v41, 0.0  ;;  %v6146_v6 = vrot.slane %v6144_v46, 5  ;;  %v6158_v41 = vshll.u32 %v12813_v31, 16 }
 0x3a5   :  { %v6744_v29 = vpop.f32.mrf.mxu3  ;;  %v4560_v28 = vsel %vm10123_vm7, %v4558_v20, %v4559_v56 }
 0x3a6   :  { %v12789_v49 = vadd.f32 %v5460_v62, %v5039_v40  ;;  %8808 = vmatmul.msk.bf16.gmra.mxu1 %vm1009_vm3, %v4739_v36  ;;  %v7858_v2 = vadd.f32 %v7857_v58, %v7795_v50  ;;  %v6885_v5 = vadd.f32 %v6744_v29, %v12700_v61  ;;  %v7179_v61 = vsel %vm10123_vm7, %v9224_v16, %v7178_v4 }
 0x3a7   :  { %v5462_v14 = vpop.f32.mrf.mxu2  ;;  %v7182_v58 = vsel %vm10123_vm7, %v7180_v17, %v7181_v26  ;;  %v4557_v62 = vsel %vm10123_vm7, %v8777_v37, %v4556_v60  ;;  %v6152_v4 = vshll.u32 %v9099_v48, 16  ;;  %v7320_v27 = vunpack.c.l.b16 %v7179_v61 }
 0x3a8   :  { %v7665_v13 = vadd.f32 %v12743_v0, %v6885_v5  ;;  %v7321_v15 = vunpack.c.l.b16 %v7182_v58  ;;  %v4693_v8 = vunpack.c.l.b16 %v4557_v62  ;;  %v4694_v40 = vunpack.c.l.b16 %v4560_v28 }
 0x3a9   :  { %v12804_v55 = vpop.f32.mrf.mxu0  ;;  %v6151_v17 = vrot.slane %v6149_v35, 4  ;;  %v6154_v26 = vrot.slane %v6152_v4, 5  ;;  %v12833_v37 = vrot.slane %v6158_v41, 5  ;;  %v6164_v5 = vrot.slane %v6162_v38, 4 }
 0x3aa   :  { %v7732_v0 = vadd.f32 %v12400_v1, %v7665_v13  ;;  %9159 = vmatmul.msk.bf16.gmra.mxu3 %vm1009_vm3, %v6587_v57  ;;  %v6137_v57 = vsel %vm9673_vm4, %v6132_v11, %v12772_v21  ;;  %v7368_v29 = vpack.c.b16 %v7321_v15, %v7320_v27  ;;  %v9101_v21 = vld [vmem:[%s13857_s0 + $0x104] sm:$0x1]  ;;  %v8746_v13 = vld [vmem:[%s13857_s0 + $0xfc] sm:$0xe] }
 0x3ab   :  { %v4905_v33 = vpop.f32.mrf.mxu1  ;;  %v6540_v20 = vunpack.c.l.b16 %v6137_v57  ;;  %v6155_v61 = vor.u32 %v6154_v26, %v6151_v17  ;;  %v8778_v35 = vrot.slane %v8746_v13, 9  ;;  %v9549_v15 = vld [vmem:[%s13857_s0 + $0x104] sm:$0x1] }
 0x3ac   :  { %v5040_v36 = vadd.f32 %v4905_v33, %v11111_v47  ;;  %9033 = vmatmul.msk.bf16.gmra.mxu2 %vm1009_vm3, %v9417_v7  ;;  %v7796_v43 = vmax.f32 %v7732_v0, 0.0  ;;  %v6147_v47 = vsel %vm9673_vm4, %v6142_v39, %v6146_v6  ;;  %v6165_v39 = vor.u32 %v6164_v5, %v12833_v37 }
 0x3ad   :  { %v6747_v60 = vpop.f32.mrf.mxu3  ;;  %v6541_v23 = vunpack.c.l.b16 %v6147_v47  ;;  %v7188_v0 = vrot.slane %v9101_v21, 5  ;;  %v4566_v41 = vrot.slane %v9549_v15, 5 }
 0x3ae   :  { %v12825_v22 = vadd.f32 %v5462_v14, %v5040_v36  ;;  %v7859_v51 = vadd.f32 %v7858_v2, %v7796_v43  ;;  %v6886_v50 = vadd.f32 %v6747_v60, %v12730_v45  ;;  %v9193_v2 = vld [vmem:[%s13857_s0 + $0xfc] sm:$0xe]  ;;  %v7185_v45 = vrot.slane %v12813_v31, 5 }
 0x3af   :  { %v5465_v16 = vpop.f32.mrf.mxu2  ;;  %v4740_v14 = vpack.c.b16 %v4694_v40, %v4693_v8  ;;  %v6168_v31 = vshll.u32 %v9101_v21, 16  ;;  %v9225_v62 = vrot.slane %v9193_v2, 9  ;;  %v6156_v43 = vrot.slane %v6155_v61, 4  ;;  %v9418_v8 = vld [vmem:[%s13857_s0 + $0x108] sm:$0xff] }
 0x3b0   :  { %v7666_v42 = vadd.f32 %v12770_v32, %v6886_v50  ;;  %v9548_v32 = vld [vmem:[%s13857_s0 + $0x100] sm:$0xf]  ;;  %v7187_v6 = vrot.slane %v7185_v45, 4  ;;  %v6166_v57 = vrot.slane %v6165_v39, 4  ;;  %v12892_v21 = vld [vmem:[%s13857_s0 + $0x10c] sm:$0xf] }
 0x3b1   :  { %v12836_v46 = vpop.f32.mrf.mxu0  ;;  %v4563_v56 = vrot.slane %v9548_v32, 5  ;;  %v7186_v38 = vsel %vm10123_vm7, %v9225_v62, %v7185_v45  ;;  %v6186_v13 = vshrl.u32 %v12892_v21, 16  ;;  %v9437_v62 = vld [vmem:[%s13861_s4 + $0x28] sm:$0xff] }
 0x3b2   :  { %v7733_v7 = vadd.f32 %v12400_v1, %v7666_v42  ;;  %v6588_v1 = vpack.c.b16 %v6541_v23, %v6540_v20  ;;  %v7189_v47 = vsel %vm10123_vm7, %v7187_v6, %v7188_v0  ;;  %v7322_v42 = vunpack.c.l.b16 %v7186_v38  ;;  %8079 = vmatpush.bf16.msrb.mxu2 %v9437_v62  ;;  %v9104_v38 = vld [vmem:[%s13857_s0 + $0x110] sm:$0x1] }
 0x3b3   :  { %v4908_v48 = vpop.f32.mrf.mxu1  ;;  %v4565_v4 = vrot.slane %v4563_v56, 4  ;;  %v4564_v50 = vsel %vm10123_vm7, %v8778_v35, %v4563_v56  ;;  %v7323_v2 = vunpack.c.l.b16 %v7189_v47 }
 0x3b4   :  { %v5041_v58 = vadd.f32 %v4908_v48, %v11129_v3  ;;  %9256 = vmatmul.msk.bf16.gmra.mxu0 %vm1009_vm3, %v7368_v29  ;;  %v7797_v11 = vmax.f32 %v7733_v7, 0.0  ;;  %v6161_v29 = vsel %vm9673_vm4, %v6156_v43, %v12833_v37  ;;  %v4695_v23 = vunpack.c.l.b16 %v4564_v50  ;;  %v9551_v43 = vld [vmem:[%s13857_s0 + $0x10c] sm:$0xf] }
 0x3b5   :  { %v6749_v33 = vpop.f32.mrf.mxu3  ;;  %v4567_v26 = vsel %vm10123_vm7, %v4565_v4, %v4566_v41  ;;  %v6182_v48 = vshll.u32 %v12892_v21, 16  ;;  %v7369_v6 = vpack.c.b16 %v7323_v2, %v7322_v42 }
 0x3b6   :  { %v12855_v28 = vadd.f32 %v5465_v16, %v5041_v58  ;;  %8809 = vmatmul.msk.bf16.gmra.mxu1 %vm1009_vm3, %v4740_v14  ;;  %v7860_v36 = vadd.f32 %v7859_v51, %v7797_v11  ;;  %v6887_v3 = vadd.f32 %v6749_v33, %v12766_v10  ;;  %v6170_v10 = vrot.slane %v6168_v31, 5  ;;  %v9102_v51 = vld [vmem:[%s13857_s0 + $0x108] sm:$0xf]  ;;  %v12880_v16 = vld [vmem:[%s13860_s3] ss:$0 sm:$0xff] }
 0x3b7   :  { %v5467_v27 = vpop.f32.mrf.mxu2  ;;  %v6173_v45 = vshrl.u32 %v9102_v51, 16  ;;  %v6176_v14 = vshll.u32 %v9102_v51, 16  ;;  %v4696_v7 = vunpack.c.l.b16 %v4567_v26  ;;  %v6542_v31 = vunpack.c.l.b16 %v6161_v29  ;;  %v9445_v11 = vld [vmem:[%s13862_s5 + $0x28] sm:$0xff] }
 0x3b8   :  { %v7667_v60 = vadd.f32 %v12804_v55, %v6887_v3  ;;  %v6171_v32 = vsel %vm9673_vm4, %v6166_v57, %v6170_v10  ;;  %8010 = vmatpush.bf16.msrb.mxu1 %v9445_v11  ;;  %v6188_v3 = vrot.slane %v6186_v13, 4  ;;  %v12954_v13 = vld [vmem:[%s13857_s0 + $0x118] sm:$0xf] }
 0x3b9   :  { %v12868_v40 = vpop.f32.mrf.mxu0  ;;  %v6543_v39 = vunpack.c.l.b16 %v6171_v32  ;;  %v6175_v0 = vrot.slane %v6173_v45, 4  ;;  %v6178_v33 = vrot.slane %v6176_v14, 5  ;;  %v4741_v4 = vpack.c.b16 %v4696_v7, %v4695_v23  ;;  %v9552_v14 = vld [vmem:[%s13857_s0 + $0x110] sm:$0x1]  ;;  %v9419_v23 = vld [vmem:[%s13857_s0 + $0x114] sm:$0xff] }
 0x3ba   :  { %v7734_v55 = vadd.f32 %v12880_v16, %v7667_v60  ;;  %9160 = vmatmul.msk.bf16.gmra.mxu3 %vm1009_vm3, %v6588_v1  ;;  %v9105_v32 = vld [vmem:[%s13857_s0 + $0x114] sm:$0xf] }
 0x3bb   :  { %v4910_v17 = vpop.f32.mrf.mxu1  ;;  %v6589_v57 = vpack.c.b16 %v6543_v39, %v6542_v31  ;;  %v6179_v10 = vor.u32 %v6178_v33, %v6175_v0  ;;  %v6197_v39 = vshrl.u32 %v9105_v32, 16 }
 0x3bc   :  { %v5042_v5 = vadd.f32 %v4910_v17, %v11160_v53  ;;  %9034 = vmatmul.msk.bf16.gmra.mxu2 %vm1009_vm3, %v9418_v8  ;;  %v7798_v20 = vmax.f32 %v7734_v55, 0.0  ;;  %v4570_v8 = vrot.slane %v9551_v43, 5  ;;  %v7195_v55 = vrot.slane %v9104_v38, 5 }
 0x3bd   :  { %v6752_v56 = vpop.f32.mrf.mxu3 }
 0x3be   :  { %v12898_v37 = vadd.f32 %v5467_v27, %v5042_v5  ;;  %v7861_v61 = vadd.f32 %v7860_v36, %v7798_v20  ;;  %v6888_v53 = vadd.f32 %v6752_v56, %v12789_v49  ;;  %v7192_v49 = vrot.slane %v12892_v21, 5  ;;  %v9194_v27 = vld [vmem:[%s13857_s0 + $0x108] sm:$0xe] }
 0x3bf   :  { %v5470_v58 = vpop.f32.mrf.mxu2  ;;  %v12913_v36 = vrot.slane %v6182_v48, 5  ;;  %v9226_v51 = vrot.slane %v9194_v27, 9  ;;  %v6192_v21 = vshll.u32 %v9104_v38, 16  ;;  %v4572_v45 = vrot.slane %v4570_v8, 4 }
 0x3c0   :  { %v7668_v1 = vadd.f32 %v12836_v46, %v6888_v53  ;;  %v8747_v46 = vld [vmem:[%s13857_s0 + $0x108] sm:$0xe]  ;;  %v7194_v50 = vrot.slane %v7192_v49, 4  ;;  %v4573_v20 = vrot.slane %v9552_v14, 5  ;;  %v6180_v53 = vrot.slane %v6179_v10, 4 }
 0x3c1   :  { %v12910_v35 = vpop.f32.mrf.mxu0  ;;  %v8779_v29 = vrot.slane %v8747_v46, 9  ;;  %v6189_v42 = vor.u32 %v6188_v3, %v12913_v36  ;;  %v6194_v31 = vrot.slane %v6192_v21, 5  ;;  %v6210_v27 = vshrl.u32 %v12954_v13, 16  ;;  %v8748_v14 = vld [vmem:[%s13857_s0 + $0x114] sm:$0xe] }
 0x3c2   :  { %v7735_v15 = vadd.f32 %v12880_v16, %v7668_v1  ;;  %v7196_v48 = vsel %vm10123_vm7, %v7194_v50, %v7195_v55  ;;  %v4574_v11 = vsel %vm10123_vm7, %v4572_v45, %v4573_v20  ;;  %v6185_v43 = vsel %vm9673_vm4, %v6180_v53, %v12913_v36  ;;  %v9107_v36 = vld [vmem:[%s13857_s0 + $0x11c] sm:$0x1] }
 0x3c3   :  { %v4913_v41 = vpop.f32.mrf.mxu1  ;;  %v7325_v1 = vunpack.c.l.b16 %v7196_v48  ;;  %v4698_v46 = vunpack.c.l.b16 %v4574_v11  ;;  %v6544_v21 = vunpack.c.l.b16 %v6185_v43 }
 0x3c4   :  { %v5043_v60 = vadd.f32 %v4913_v41, %v11178_v25  ;;  %9257 = vmatmul.msk.bf16.gmra.mxu0 %vm1009_vm3, %v7369_v6  ;;  %v7799_v47 = vmax.f32 %v7735_v15, 0.0  ;;  %v6200_v6 = vshll.u32 %v9105_v32, 16  ;;  %v6216_v32 = vshll.u32 %v9107_v36, 16 }
 0x3c5   :  { %v6754_v17 = vpop.f32.mrf.mxu3 }
 0x3c6   :  { %v12930_v26 = vadd.f32 %v5470_v58, %v5043_v60  ;;  %8810 = vmatmul.msk.bf16.gmra.mxu1 %vm1009_vm3, %v4741_v4  ;;  %v7862_v5 = vadd.f32 %v7861_v61, %v7799_v47  ;;  %v6889_v25 = vadd.f32 %v6754_v17, %v12825_v22  ;;  %v7193_v22 = vsel %vm10123_vm7, %v9226_v51, %v7192_v49 }
 0x3c7   :  { %v5472_v2 = vpop.f32.mrf.mxu2  ;;  %v4571_v61 = vsel %vm10123_vm7, %v8779_v29, %v4570_v8  ;;  %v6190_v58 = vrot.slane %v6189_v42, 4  ;;  %v7324_v33 = vunpack.c.l.b16 %v7193_v22  ;;  %v6206_v49 = vshll.u32 %v12954_v13, 16  ;;  %v9195_v29 = vld [vmem:[%s13857_s0 + $0x114] sm:$0xe] }
 0x3c8   :  { %v7669_v56 = vadd.f32 %v12868_v40, %v6889_v25  ;;  %v4697_v3 = vunpack.c.l.b16 %v4571_v61  ;;  %v6202_v10 = vrot.slane %v6200_v6, 5  ;;  %v6212_v17 = vrot.slane %v6210_v27, 4  ;;  %v9554_v6 = vld [vmem:[%s13857_s0 + $0x11c] sm:$0x1] }
 0x3c9   :  { %v12945_v7 = vpop.f32.mrf.mxu0  ;;  %v7370_v47 = vpack.c.b16 %v7325_v1, %v7324_v33  ;;  %v12974_v51 = vrot.slane %v6206_v49, 5  ;;  %v7202_v61 = vrot.slane %v9107_v36, 5  ;;  %v9420_v1 = vld [vmem:[%s13857_s0 + $0x120] sm:$0xff] }
 0x3ca   :  { %v7736_v40 = vadd.f32 %v12880_v16, %v7669_v56  ;;  %9161 = vmatmul.msk.bf16.gmra.mxu3 %vm1009_vm3, %v6589_v57  ;;  %v6199_v57 = vrot.slane %v6197_v39, 4  ;;  %v4742_v42 = vpack.c.b16 %v4698_v46, %v4697_v3  ;;  %v9227_v56 = vrot.slane %v9195_v29, 9  ;;  %v9108_v46 = vld [vmem:[%s13857_s0 + $0x120] sm:$0xf] }
 0x3cb   :  { %v4915_v62 = vpop.f32.mrf.mxu1  ;;  %v6213_v48 = vor.u32 %v6212_v17, %v12974_v51  ;;  %v6224_v36 = vshll.u32 %v9108_v46, 16 }
 0x3cc   :  { %v5044_v0 = vadd.f32 %v4915_v62, %v11208_v59  ;;  %9035 = vmatmul.msk.bf16.gmra.mxu2 %vm1009_vm3, %v9419_v23  ;;  %v7800_v4 = vmax.f32 %v7736_v40, 0.0  ;;  %v6195_v59 = vsel %vm9673_vm4, %v6190_v58, %v6194_v31  ;;  %v6203_v20 = vor.u32 %v6202_v10, %v6199_v57  ;;  %v9109_v57 = vld [vmem:[%s13857_s0 + $0x124] sm:$0xf] }
 0x3cd   :  { %v6757_v15 = vpop.f32.mrf.mxu3  ;;  %v8780_v40 = vrot.slane %v8748_v14, 9  ;;  %v6214_v27 = vrot.slane %v6213_v48, 4  ;;  %v7206_v48 = vrot.slane %v9109_v57, 5 }
 0x3ce   :  { %v12966_v41 = vadd.f32 %v5472_v2, %v5044_v0  ;;  %v7863_v8 = vadd.f32 %v7862_v5, %v7800_v4  ;;  %v6890_v38 = vadd.f32 %v6757_v15, %v12855_v28  ;;  %v7199_v28 = vrot.slane %v12954_v13, 5 }
 0x3cf   :  { %v5475_v60 = vpop.f32.mrf.mxu2  ;;  %v6545_v5 = vunpack.c.l.b16 %v6195_v59  ;;  %v4580_v0 = vrot.slane %v9554_v6, 5  ;;  %v6204_v33 = vrot.slane %v6203_v20, 4 }
 0x3d0   :  { %v7670_v50 = vadd.f32 %v12910_v35, %v6890_v38  ;;  %v9553_v35 = vld [vmem:[%s13857_s0 + $0x118] sm:$0xf]  ;;  %v7201_v13 = vrot.slane %v7199_v28, 4  ;;  %v7200_v49 = vsel %vm10123_vm7, %v9227_v56, %v7199_v28 }
 0x3d1   :  { %v12977_v55 = vpop.f32.mrf.mxu0  ;;  %v4577_v25 = vrot.slane %v9553_v35, 5  ;;  %v6590_v31 = vpack.c.b16 %v6545_v5, %v6544_v21  ;;  %v6209_v38 = vsel %vm9673_vm4, %v6204_v33, %v12974_v51  ;;  %v6230_v5 = vshll.u32 %v9109_v57, 16 }
 0x3d2   :  { %v7737_v2 = vadd.f32 %v12880_v16, %v7670_v50  ;;  %v7203_v15 = vsel %vm10123_vm7, %v7201_v13, %v7202_v61  ;;  %v6221_v50 = vshrl.u32 %v9108_v46, 16  ;;  %v6234_v35 = vshrl.u32 %v9109_v57, 16  ;;  %v9421_v57 = vld [vmem:[%s13857_s0 + $0x12c] sm:$0xff] }
 0x3d3   :  { %v4918_v45 = vpop.f32.mrf.mxu1  ;;  %v4579_v62 = vrot.slane %v4577_v25, 4  ;;  %v4578_v43 = vsel %vm10123_vm7, %v8780_v40, %v4577_v25  ;;  %v13038_v61 = vrot.slane %v6230_v5, 5 }
 0x3d4   :  { %v5045_v23 = vadd.f32 %v4918_v45, %v11226_v44  ;;  %9258 = vmatmul.msk.bf16.gmra.mxu0 %vm1009_vm3, %v7370_v47  ;;  %v7801_v22 = vmax.f32 %v7737_v2, 0.0  ;;  %v7327_v47 = vunpack.c.l.b16 %v7203_v15  ;;  %v4699_v29 = vunpack.c.l.b16 %v4578_v43 }
 0x3d5   :  { %v6759_v53 = vpop.f32.mrf.mxu3  ;;  %v6546_v45 = vunpack.c.l.b16 %v6209_v38  ;;  %v9556_v38 = vld [vmem:[%s13857_s0 + $0x128] sm:$0x1] }
 0x3d6   :  { %v12996_v58 = vadd.f32 %v5475_v60, %v5045_v23  ;;  %8811 = vmatmul.msk.bf16.gmra.mxu1 %vm1009_vm3, %v4742_v42  ;;  %v7864_v11 = vadd.f32 %v7863_v8, %v7801_v22  ;;  %v6891_v44 = vadd.f32 %v6759_v53, %v12898_v37  ;;  %v6218_v37 = vrot.slane %v6216_v32, 5 }
 0x3d7   :  { %v5477_v39 = vpop.f32.mrf.mxu2  ;;  %v7326_v60 = vunpack.c.l.b16 %v7200_v49  ;;  %v6223_v23 = vrot.slane %v6221_v50, 4  ;;  %v6226_v32 = vrot.slane %v6224_v36, 5  ;;  %v6236_v53 = vrot.slane %v6234_v35, 4 }
 0x3d8   :  { %v7671_v4 = vadd.f32 %v12945_v7, %v6891_v44  ;;  %v4581_v7 = vsel %vm10123_vm7, %v4579_v62, %v4580_v0  ;;  %v6219_v28 = vsel %vm9673_vm4, %v6214_v27, %v6218_v37  ;;  %v8749_v62 = vld [vmem:[%s13857_s0 + $0x120] sm:$0xe]  ;;  %v9110_v44 = vld [vmem:[%s13857_s0 + $0x128] sm:$0x1]  ;;  %v7208_v49 = vrot.slane %v7206_v48, 4 }
 0x3d9   :  { %v13009_v3 = vpop.f32.mrf.mxu0  ;;  %v4700_v51 = vunpack.c.l.b16 %v4581_v7  ;;  %v6547_v14 = vunpack.c.l.b16 %v6219_v28  ;;  %v7371_v20 = vpack.c.b16 %v7327_v47, %v7326_v60  ;;  %v6227_v0 = vor.u32 %v6226_v32, %v6223_v23 }
 0x3da   :  { %v7738_v59 = vadd.f32 %v12880_v16, %v7671_v4  ;;  %9162 = vmatmul.msk.bf16.gmra.mxu3 %vm1009_vm3, %v6590_v31  ;;  %v9196_v31 = vld [vmem:[%s13857_s0 + $0x120] sm:$0xe]  ;;  %v7209_v4 = vrot.slane %v9110_v44, 5  ;;  %v8781_v15 = vrot.slane %v8749_v62, 9  ;;  %v6237_v46 = vor.u32 %v6236_v53, %v13038_v61 }
 0x3db   :  { %v4920_v8 = vpop.f32.mrf.mxu1  ;;  %v4743_v13 = vpack.c.b16 %v4700_v51, %v4699_v29  ;;  %v6591_v6 = vpack.c.b16 %v6547_v14, %v6546_v45  ;;  %v6240_v43 = vshll.u32 %v9110_v44, 16  ;;  %v4587_v60 = vrot.slane %v9556_v38, 5 }
 0x3dc   :  { %v5046_v10 = vadd.f32 %v4920_v8, %v11258_v30  ;;  %9036 = vmatmul.msk.bf16.gmra.mxu2 %vm1009_vm3, %v9420_v1  ;;  %v7802_v17 = vmax.f32 %v7738_v59, 0.0  ;;  %v9228_v1 = vrot.slane %v9196_v31, 9  ;;  %v7210_v36 = vsel %vm10123_vm7, %v7208_v49, %v7209_v4 }
 0x3dd   :  { %v6762_v42 = vpop.f32.mrf.mxu3  ;;  %v6228_v28 = vrot.slane %v6227_v0, 4  ;;  %v6242_v51 = vrot.slane %v6240_v43, 5  ;;  %v7329_v14 = vunpack.c.l.b16 %v7210_v36 }
 0x3de   :  { %v13032_v21 = vadd.f32 %v5477_v39, %v5046_v10  ;;  %v7865_v25 = vadd.f32 %v7864_v11, %v7802_v17  ;;  %v6892_v2 = vadd.f32 %v6762_v42, %v12930_v26  ;;  %v9111_v10 = vld [vmem:[%s13857_s0 + $0x12c] sm:$0xf]  ;;  %v13079_v17 = vld [vmem:[%s13857_s0 + $0x130] sm:$0xf]  ;;  %v6238_v42 = vrot.slane %v6237_v46, 4 }
 0x3df   :  { %v5480_v30 = vpop.f32.mrf.mxu2  ;;  %v6233_v31 = vsel %vm9673_vm4, %v6228_v28, %v13038_v61  ;;  %v9113_v61 = vld [vmem:[%s13857_s0 + $0x134] sm:$0x1] }
 0x3e0   :  { %v7672_v56 = vadd.f32 %v12977_v55, %v6892_v2  ;;  %v9555_v55 = vld [vmem:[%s13857_s0 + $0x124] sm:$0xf]  ;;  %v6248_v2 = vshll.u32 %v9111_v10, 16  ;;  %v6548_v4 = vunpack.c.l.b16 %v6233_v31 }
 0x3e1   :  { %v13036_v22 = vpop.f32.mrf.mxu0  ;;  %v4584_v11 = vrot.slane %v9555_v55, 5 }
 0x3e2   :  { %v7739_v26 = vadd.f32 %v12880_v16, %v7672_v56  ;;  %v6258_v56 = vshrl.u32 %v13079_v17, 16 }
 0x3e3   :  { %v4923_v40 = vpop.f32.mrf.mxu1  ;;  %v4586_v7 = vrot.slane %v4584_v11, 4  ;;  %v4585_v29 = vsel %vm10123_vm7, %v8781_v15, %v4584_v11  ;;  %v6250_v11 = vrot.slane %v6248_v2, 5 }
 0x3e4   :  { %v5047_v39 = vadd.f32 %v4923_v40, %v11276_v12  ;;  %9259 = vmatmul.msk.bf16.gmra.mxu0 %vm1009_vm3, %v7371_v20  ;;  %v7803_v33 = vmax.f32 %v7739_v26, 0.0  ;;  %v6254_v20 = vshll.u32 %v13079_v17, 16  ;;  %v4701_v32 = vunpack.c.l.b16 %v4585_v29 }
 0x3e5   :  { %v6764_v27 = vpop.f32.mrf.mxu3  ;;  %v4588_v35 = vsel %vm10123_vm7, %v4586_v7, %v4587_v60  ;;  %v6264_v7 = vshll.u32 %v9113_v61, 16 }
 0x3e6   :  { %v13055_v37 = vadd.f32 %v5480_v30, %v5047_v39  ;;  %8812 = vmatmul.msk.bf16.gmra.mxu1 %vm1009_vm3, %v4743_v13  ;;  %v7866_v59 = vadd.f32 %v7865_v25, %v7803_v33  ;;  %v6893_v12 = vadd.f32 %v6764_v27, %v12966_v41  ;;  %v7207_v41 = vsel %vm10123_vm7, %v9228_v1, %v7206_v48  ;;  %v9197_v1 = vld [vmem:[%s13857_s0 + $0x12c] sm:$0xe] }
 0x3e7   :  { %v5482_v8 = vpop.f32.mrf.mxu2  ;;  %v6245_v25 = vshrl.u32 %v9111_v10, 16  ;;  %v7328_v45 = vunpack.c.l.b16 %v7207_v41  ;;  %v4702_v53 = vunpack.c.l.b16 %v4588_v35  ;;  %v13099_v39 = vrot.slane %v6254_v20, 5 }
 0x3e8   :  { %v7673_v47 = vadd.f32 %v13009_v3, %v6893_v12  ;;  %v6260_v33 = vrot.slane %v6258_v56, 4  ;;  %v9229_v38 = vrot.slane %v9197_v1, 9 }
 0x3e9   :  { %v13070_v50 = vpop.f32.mrf.mxu0  ;;  %v6247_v55 = vrot.slane %v6245_v25, 4  ;;  %v7372_v44 = vpack.c.b16 %v7329_v14, %v7328_v45  ;;  %v4744_v49 = vpack.c.b16 %v4702_v53, %v4701_v32  ;;  %v9422_v25 = vld [vmem:[%s13857_s0 + $0x138] sm:$0xff] }
 0x3ea   :  { %v7740_v3 = vadd.f32 %v12880_v16, %v7673_v47  ;;  %9163 = vmatmul.msk.bf16.gmra.mxu3 %vm1009_vm3, %v6591_v6  ;;  %v7216_v47 = vrot.slane %v9113_v61, 5 }
 0x3eb   :  { %v4925_v5 = vpop.f32.mrf.mxu1  ;;  %v6251_v12 = vor.u32 %v6250_v11, %v6247_v55 }
 0x3ec   :  { %v5048_v30 = vadd.f32 %v4925_v5, %v11307_v18  ;;  %9037 = vmatmul.msk.bf16.gmra.mxu2 %vm1009_vm3, %v9421_v57  ;;  %v7804_v23 = vmax.f32 %v7740_v3, 0.0  ;;  %v6243_v18 = vsel %vm9673_vm4, %v6238_v42, %v6242_v51  ;;  %v6261_v57 = vor.u32 %v6260_v33, %v13099_v39  ;;  %v9558_v3 = vld [vmem:[%s13857_s0 + $0x134] sm:$0x1] }
 0x3ed   :  { %v6767_v48 = vpop.f32.mrf.mxu3  ;;  %v6549_v27 = vunpack.c.l.b16 %v6243_v18  ;;  %v4594_v5 = vrot.slane %v9558_v3, 5  ;;  %v6252_v35 = vrot.slane %v6251_v12, 4  ;;  %v13153_v18 = vld [vmem:[%s13857_s0 + $0x13c] sm:$0xf] }
 0x3ee   :  { %v13091_v13 = vadd.f32 %v5482_v8, %v5048_v30  ;;  %v7867_v26 = vadd.f32 %v7866_v59, %v7804_v23  ;;  %v6894_v40 = vadd.f32 %v6767_v48, %v12996_v58  ;;  %v7213_v58 = vrot.slane %v13079_v17, 5  ;;  %v8750_v59 = vld [vmem:[%s13857_s0 + $0x12c] sm:$0xe]  ;;  %v9114_v23 = vld [vmem:[%s13857_s0 + $0x138] sm:$0xf] }
 0x3ef   :  { %v5485_v62 = vpop.f32.mrf.mxu2  ;;  %v6592_v17 = vpack.c.b16 %v6549_v27, %v6548_v4  ;;  %v8782_v29 = vrot.slane %v8750_v59, 9  ;;  %v6262_v14 = vrot.slane %v6261_v57, 4  ;;  %v6257_v53 = vsel %vm9673_vm4, %v6252_v35, %v13099_v39 }
 0x3f0   :  { %v7674_v6 = vadd.f32 %v13036_v22, %v6894_v40  ;;  %v9557_v22 = vld [vmem:[%s13857_s0 + $0x130] sm:$0xf]  ;;  %v7215_v10 = vrot.slane %v7213_v58, 4  ;;  %v7214_v2 = vsel %vm10123_vm7, %v9229_v38, %v7213_v58  ;;  %v6272_v55 = vshll.u32 %v9114_v23, 16 }
 0x3f1   :  { %v13102_v0 = vpop.f32.mrf.mxu0  ;;  %v4591_v15 = vrot.slane %v9557_v22, 5  ;;  %v7330_v31 = vunpack.c.l.b16 %v7214_v2  ;;  %v6278_v1 = vshll.u32 %v13153_v18, 16  ;;  %v6282_v58 = vshrl.u32 %v13153_v18, 16  ;;  %v9436_v22 = vld [vmem:[%s13861_s4 + $0x20] sm:$0xff] }
 0x3f2   :  { %v7741_v46 = vadd.f32 %v12880_v16, %v7674_v6  ;;  %v7217_v20 = vsel %vm10123_vm7, %v7215_v10, %v7216_v47  ;;  %v6550_v27 = vunpack.c.l.b16 %v6257_v53  ;;  %v6274_v12 = vrot.slane %v6272_v55, 5  ;;  %8080 = vmatpush.bf16.msrb.mxu2 %v9436_v22  ;;  %v9198_v10 = vld [vmem:[%s13857_s0 + $0x138] sm:$0xe]  ;;  %v9423_v53 = vld [vmem:[%s13857_s0 + $0x144] sm:$0xff] }
 0x3f3   :  { %v4928_v43 = vpop.f32.mrf.mxu1  ;;  %v4593_v28 = vrot.slane %v4591_v15, 4  ;;  %v4592_v32 = vsel %vm10123_vm7, %v8782_v29, %v4591_v15  ;;  %v7331_v40 = vunpack.c.l.b16 %v7217_v20  ;;  %v9444_v15 = vld [vmem:[%s13862_s5 + $0x20] sm:$0xff]  ;;  %v6284_v57 = vrot.slane %v6282_v58, 4 }
 0x3f4   :  { %v5049_v8 = vadd.f32 %v4928_v43, %v11325_v9  ;;  %9260 = vmatmul.msk.bf16.gmra.mxu0 %vm1009_vm3, %v7372_v44  ;;  %v7805_v60 = vmax.f32 %v7741_v46, 0.0  ;;  %v4703_v44 = vunpack.c.l.b16 %v4592_v32  ;;  %8011 = vmatpush.bf16.msrb.mxu1 %v9444_v15 }
 0x3f5   :  { %v6769_v41 = vpop.f32.mrf.mxu3  ;;  %v7373_v43 = vpack.c.b16 %v7331_v40, %v7330_v31  ;;  %v9117_v40 = vld [vmem:[%s13857_s0 + $0x144] sm:$0xf] }
 0x3f6   :  { %v13121_v36 = vadd.f32 %v5485_v62, %v5049_v8  ;;  %8813 = vmatmul.msk.bf16.gmra.mxu1 %vm1009_vm3, %v4744_v49  ;;  %v7868_v42 = vadd.f32 %v7867_v26, %v7805_v60  ;;  %v6895_v9 = vadd.f32 %v6769_v41, %v13032_v21  ;;  %v6266_v21 = vrot.slane %v6264_v7, 5 }
 0x3f7   :  { %v5487_v51 = vpop.f32.mrf.mxu2  ;;  %v6269_v62 = vshrl.u32 %v9114_v23, 16  ;;  %v13174_v60 = vrot.slane %v6278_v1, 5 }
 0x3f8   :  { %v7675_v30 = vadd.f32 %v13070_v50, %v6895_v9  ;;  %v4595_v50 = vsel %vm10123_vm7, %v4593_v28, %v4594_v5  ;;  %v6267_v6 = vsel %vm9673_vm4, %v6262_v14, %v6266_v21  ;;  %v9116_v28 = vld [vmem:[%s13857_s0 + $0x140] sm:$0x1]  ;;  %v9230_v5 = vrot.slane %v9198_v10, 9 }
 0x3f9   :  { %v13134_v45 = vpop.f32.mrf.mxu0  ;;  %v4704_v33 = vunpack.c.l.b16 %v4595_v50  ;;  %v6551_v46 = vunpack.c.l.b16 %v6267_v6  ;;  %v6271_v59 = vrot.slane %v6269_v62, 4  ;;  %v6285_v21 = vor.u32 %v6284_v57, %v13174_v60 }
 0x3fa   :  { %v7742_v56 = vadd.f32 %v12880_v16, %v7675_v30  ;;  %9164 = vmatmul.msk.bf16.gmra.mxu3 %vm1009_vm3, %v6592_v17  ;;  %v9559_v17 = vld [vmem:[%s13857_s0 + $0x13c] sm:$0xf]  ;;  %v6288_v20 = vshll.u32 %v9116_v28, 16 }
 0x3fb   :  { %v4930_v48 = vpop.f32.mrf.mxu1  ;;  %v4745_v38 = vpack.c.b16 %v4704_v33, %v4703_v44  ;;  %v4598_v29 = vrot.slane %v9559_v17, 5  ;;  %v6593_v9 = vpack.c.b16 %v6551_v46, %v6550_v27  ;;  %v6286_v55 = vrot.slane %v6285_v21, 4 }
 0x3fc   :  { %v5050_v26 = vadd.f32 %v4930_v48, %v11355_v63  ;;  %9038 = vmatmul.msk.bf16.gmra.mxu2 %vm1009_vm3, %v9422_v25  ;;  %v7806_v11 = vmax.f32 %v7742_v56, 0.0  ;;  %v7223_v25 = vrot.slane %v9116_v28, 5  ;;  %v9560_v48 = vld [vmem:[%s13857_s0 + $0x140] sm:$0x1]  ;;  %v6290_v33 = vrot.slane %v6288_v20, 5 }
 0x3fd   :  { %v6772_v61 = vpop.f32.mrf.mxu3  ;;  %v4600_v56 = vrot.slane %v4598_v29, 4  ;;  %v4601_v50 = vrot.slane %v9560_v48, 5  ;;  %v6296_v27 = vshll.u32 %v9117_v40, 16 }
 0x3fe   :  { %v13159_v39 = vadd.f32 %v5487_v51, %v5050_v26  ;;  %v7869_v49 = vadd.f32 %v7868_v42, %v7806_v11  ;;  %v6896_v63 = vadd.f32 %v6772_v61, %v13055_v37  ;;  %v7220_v37 = vrot.slane %v13153_v18, 5  ;;  %v13215_v11 = vld [vmem:[%s13857_s0 + $0x148] sm:$0xf] }
 0x3ff   :  { %v5490_v4 = vpop.f32.mrf.mxu2  ;;  %v6275_v51 = vor.u32 %v6274_v12, %v6271_v59  ;;  %v4602_v61 = vsel %vm10123_vm7, %v4600_v56, %v4601_v50  ;;  %v6302_v22 = vshll.u32 %v13215_v11, 16  ;;  %v6306_v15 = vshrl.u32 %v13215_v11, 16 }
 0x400   :  { %v7676_v8 = vadd.f32 %v13102_v0, %v6896_v63  ;;  %v8751_v0 = vld [vmem:[%s13857_s0 + $0x138] sm:$0xe]  ;;  %v7222_v35 = vrot.slane %v7220_v37, 4  ;;  %v7221_v26 = vsel %vm10123_vm7, %v9230_v5, %v7220_v37  ;;  %v6293_v63 = vshrl.u32 %v9117_v40, 16  ;;  %v9562_v40 = vld [vmem:[%s13857_s0 + $0x14c] sm:$0x1] }
 0x401   :  { %v13171_v7 = vpop.f32.mrf.mxu0  ;;  %v8783_v14 = vrot.slane %v8751_v0, 9  ;;  %v6276_v62 = vrot.slane %v6275_v51, 4  ;;  %v7332_v58 = vunpack.c.l.b16 %v7221_v26  ;;  %v4706_v12 = vunpack.c.l.b16 %v4602_v61 }
 0x402   :  { %v7743_v47 = vadd.f32 %v12880_v16, %v7676_v8  ;;  %v6291_v57 = vsel %vm9673_vm4, %v6286_v55, %v6290_v33  ;;  %v13239_v28 = vrot.slane %v6302_v22, 5 }
 0x403   :  { %v4933_v41 = vpop.f32.mrf.mxu1  ;;  %v4599_v6 = vsel %vm10123_vm7, %v8783_v14, %v4598_v29  ;;  %v6298_v29 = vrot.slane %v6296_v27, 5  ;;  %v13960_v14 = vld [vmem:[#allocation34_spill] sm:$0xff] }
 0x404   :  { %v5051_v42 = vadd.f32 %v4933_v41, %v11373_v19  ;;  %9261 = vmatmul.msk.bf16.gmra.mxu0 %vm1009_vm3, %v7373_v43  ;;  %v7807_v3 = vmax.f32 %v7743_v47, 0.0  ;;  %v4705_v59 = vunpack.c.l.b16 %v4599_v6  ;;  %v6295_v47 = vrot.slane %v6293_v63, 4  ;;  %v9424_v6 = vld [vmem:[%s13857_s0 + $0x150] sm:$0xff] }
 0x405   :  { %v6774_v2 = vpop.f32.mrf.mxu3  ;;  %v7227_v41 = vrot.slane %v13215_v11, 5  ;;  %v13280_v63 = vld [vmem:[%s13857_s0 + $0x154] sm:$0xf] }
 0x406   :  { %v13191_v30 = vadd.f32 %v5490_v4, %v5051_v42  ;;  %8814 = vmatmul.msk.bf16.gmra.mxu1 %vm1009_vm3, %v4745_v38  ;;  %v7870_v23 = vadd.f32 %v7869_v49, %v7807_v3  ;;  %v6897_v19 = vadd.f32 %v6774_v2, %v13091_v13  ;;  %v7224_v13 = vsel %vm10123_vm7, %v7222_v35, %v7223_v25  ;;  %v9199_v42 = vld [vmem:[%s13857_s0 + $0x144] sm:$0xe] }
 0x407   :  { %v5492_v32 = vpop.f32.mrf.mxu2  ;;  %v7333_v49 = vunpack.c.l.b16 %v7224_v13  ;;  %v6281_v38 = vsel %vm9673_vm4, %v6276_v62, %v13174_v60  ;;  %v4746_v60 = vpack.c.b16 %v4706_v12, %v4705_v59  ;;  %v6553_v25 = vunpack.c.l.b16 %v6291_v57  ;;  %v8752_v2 = vld [vmem:[%s13857_s0 + $0x144] sm:$0xe] }
 0x408   :  { %v7677_v31 = vadd.f32 %v13134_v45, %v6897_v19  ;;  %v6552_v35 = vunpack.c.l.b16 %v6281_v38  ;;  %v9231_v20 = vrot.slane %v9199_v42, 9  ;;  %v6299_v56 = vor.u32 %v6298_v29, %v6295_v47 }
 0x409   :  { %v13203_v18 = vpop.f32.mrf.mxu0  ;;  %v7374_v10 = vpack.c.b16 %v7333_v49, %v7332_v58  ;;  %v8784_v26 = vrot.slane %v8752_v2, 9  ;;  %v4608_v62 = vrot.slane %v9562_v40, 5  ;;  %v6326_v57 = vshll.u32 %v13280_v63, 16 }
 0x40a   :  { %v7744_v45 = vadd.f32 %v12880_v16, %v7677_v31  ;;  %9165 = vmatmul.msk.bf16.gmra.mxu3 %vm1009_vm3, %v6593_v9  ;;  %v9561_v9 = vld [vmem:[%s13857_s0 + $0x148] sm:$0xf]  ;;  %v7228_v61 = vsel %vm10123_vm7, %v9231_v20, %v7227_v41 }
 0x40b   :  { %v4935_v44 = vpop.f32.mrf.mxu1  ;;  %v4605_v51 = vrot.slane %v9561_v9, 5  ;;  %v7334_v59 = vunpack.c.l.b16 %v7228_v61 }
 0x40c   :  { %v5052_v1 = vadd.f32 %v4935_v44, %v11405_v54  ;;  %9039 = vmatmul.msk.bf16.gmra.mxu2 %vm1009_vm3, %v9423_v53  ;;  %v7808_v4 = vmax.f32 %v7744_v45, 0.0  ;;  %v6594_v45 = vpack.c.b16 %v6553_v25, %v6552_v35  ;;  %v13300_v25 = vrot.slane %v6326_v57, 5 }
 0x40d   :  { %v6777_v46 = vpop.f32.mrf.mxu3  ;;  %v4607_v13 = vrot.slane %v4605_v51, 4 }
 0x40e   :  { %v13227_v43 = vadd.f32 %v5492_v32, %v5052_v1  ;;  %v7871_v8 = vadd.f32 %v7870_v23, %v7808_v4  ;;  %v6898_v37 = vadd.f32 %v6777_v46, %v13121_v36  ;;  %v6308_v36 = vrot.slane %v6306_v15, 4  ;;  %v9120_v1 = vld [vmem:[%s13857_s0 + $0x150] sm:$0xf] }
 0x40f   :  { %v5495_v54 = vpop.f32.mrf.mxu2  ;;  %v7229_v23 = vrot.slane %v7227_v41, 4  ;;  %v4606_v4 = vsel %vm10123_vm7, %v8784_v26, %v4605_v51  ;;  %v4609_v27 = vsel %vm10123_vm7, %v4607_v13, %v4608_v62  ;;  %v6320_v38 = vshll.u32 %v9120_v1, 16  ;;  %v13962_v26 = vld [vmem:[#allocation36_spill] sm:$0xff] }
 0x410   :  { %v7678_v0 = vadd.f32 %v13171_v7, %v6898_v37  ;;  %v9119_v7 = vld [vmem:[%s13857_s0 + $0x14c] sm:$0x1]  ;;  %v6309_v48 = vor.u32 %v6308_v36, %v13239_v28  ;;  %v13961_v37 = vld [vmem:[#allocation35_spill] sm:$0xff]  ;;  %v4707_v29 = vunpack.c.l.b16 %v4606_v4  ;;  %v4708_v36 = vunpack.c.l.b16 %v4609_v27 }
 0x411   :  { %v13237_v17 = vpop.f32.mrf.mxu0  ;;  %v7230_v19 = vrot.slane %v9119_v7, 5  ;;  %v6312_v50 = vshll.u32 %v9119_v7, 16  ;;  %v6322_v35 = vrot.slane %v6320_v38, 5 }
 0x412   :  { %v7745_v3 = vadd.f32 %v12880_v16, %v7678_v0  ;;  %v6310_v22 = vrot.slane %v6309_v48, 4  ;;  %v4747_v20 = vpack.c.b16 %v4708_v36, %v4707_v29 }
 0x413   :  { %v4938_v5 = vpop.f32.mrf.mxu1  ;;  %v7231_v33 = vsel %vm10123_vm7, %v7229_v23, %v7230_v19  ;;  %v6314_v15 = vrot.slane %v6312_v50, 5  ;;  %v9563_v23 = vld [vmem:[%s13857_s0 + $0x154] sm:$0xf] }
 0x414   :  { %v5053_v21 = vadd.f32 %v4938_v5, %v13960_v14  ;;  %9262 = vmatmul.msk.bf16.gmra.mxu0 %vm1009_vm3, %v7374_v10  ;;  %v7809_v32 = vmax.f32 %v7745_v3, 0.0  ;;  %v7335_v12 = vunpack.c.l.b16 %v7231_v33  ;;  %v6330_v10 = vshrl.u32 %v13280_v63, 16 }
 0x415   :  { %v6779_v53 = vpop.f32.mrf.mxu3  ;;  %v6315_v7 = vsel %vm9673_vm4, %v6310_v22, %v6314_v15  ;;  %v4612_v19 = vrot.slane %v9563_v23, 5 }
 0x416   :  { %v13257_v31 = vadd.f32 %v5495_v54, %v5053_v21  ;;  %8815 = vmatmul.msk.bf16.gmra.mxu1 %vm1009_vm3, %v4746_v60  ;;  %v7872_v55 = vadd.f32 %v7871_v8, %v7809_v32  ;;  %v6899_v11 = vadd.f32 %v6779_v53, %v13159_v39  ;;  %v6300_v39 = vrot.slane %v6299_v56, 4  ;;  %v9200_v32 = vld [vmem:[%s13857_s0 + $0x150] sm:$0xe] }
 0x417   :  { %v5497_v44 = vpop.f32.mrf.mxu2  ;;  %v6317_v8 = vshrl.u32 %v9120_v1, 16  ;;  %v7375_v3 = vpack.c.b16 %v7335_v12, %v7334_v59  ;;  %v6332_v2 = vrot.slane %v6330_v10, 4  ;;  %v6555_v50 = vunpack.c.l.b16 %v6315_v7  ;;  %v8753_v53 = vld [vmem:[%s13857_s0 + $0x150] sm:$0xe] }
 0x418   :  { %v7679_v58 = vadd.f32 %v13203_v18, %v6899_v11  ;;  %v6305_v42 = vsel %vm9673_vm4, %v6300_v39, %v13239_v28  ;;  %v9122_v28 = vld [vmem:[%s13857_s0 + $0x158] sm:$0x1]  ;;  %v8785_v1 = vrot.slane %v8753_v53, 9 }
 0x419   :  { %v13275_v49 = vpop.f32.mrf.mxu0  ;;  %v6319_v5 = vrot.slane %v6317_v8, 4  ;;  %v6554_v48 = vunpack.c.l.b16 %v6305_v42  ;;  %v6333_v62 = vor.u32 %v6332_v2, %v13300_v25  ;;  %v9564_v39 = vld [vmem:[%s13857_s0 + $0x158] sm:$0x1]  ;;  %v13338_v8 = vld [vmem:[%s13857_s0 + $0x160] sm:$0xf] }
 0x41a   :  { %v7746_v46 = vadd.f32 %v12880_v16, %v7679_v58  ;;  %9166 = vmatmul.msk.bf16.gmra.mxu3 %vm1009_vm3, %v6594_v45  ;;  %v9232_v45 = vrot.slane %v9200_v32, 9  ;;  %v4614_v58 = vrot.slane %v4612_v19, 4  ;;  %v4613_v10 = vsel %vm10123_vm7, %v8785_v1, %v4612_v19 }
 0x41b   :  { %v4940_v18 = vpop.f32.mrf.mxu1  ;;  %v6323_v40 = vor.u32 %v6322_v35, %v6319_v5  ;;  %v6595_v22 = vpack.c.b16 %v6555_v50, %v6554_v48  ;;  %v6334_v12 = vrot.slane %v6333_v62, 4  ;;  %v6350_v42 = vshll.u32 %v13338_v8, 16 }
 0x41c   :  { %v5054_v54 = vadd.f32 %v4940_v18, %v13961_v37  ;;  %9040 = vmatmul.msk.bf16.gmra.mxu2 %vm1009_vm3, %v9424_v6  ;;  %v7810_v47 = vmax.f32 %v7746_v46, 0.0  ;;  %v7237_v6 = vrot.slane %v9122_v28, 5  ;;  %v9123_v46 = vld [vmem:[%s13857_s0 + $0x15c] sm:$0xf]  ;;  %v4709_v35 = vunpack.c.l.b16 %v4613_v10 }
 0x41d   :  { %v6782_v41 = vpop.f32.mrf.mxu3  ;;  %v9425_v18 = vld [vmem:[%s13857_s0 + $0x15c] sm:$0xff]  ;;  %v6324_v59 = vrot.slane %v6323_v40, 4  ;;  %v6344_v29 = vshll.u32 %v9123_v46, 16  ;;  %v7241_v62 = vrot.slane %v13338_v8, 5 }
 0x41e   :  { %v13292_v0 = vadd.f32 %v5497_v44, %v5054_v54  ;;  %v7873_v60 = vadd.f32 %v7872_v55, %v7810_v47  ;;  %v6900_v9 = vadd.f32 %v6782_v41, %v13191_v30  ;;  %v7234_v30 = vrot.slane %v13280_v63, 5 }
 0x41f   :  { %v5500_v51 = vpop.f32.mrf.mxu2  ;;  %v6336_v55 = vshll.u32 %v9122_v28, 16  ;;  %v4615_v63 = vrot.slane %v9564_v39, 5  ;;  %v6341_v41 = vshrl.u32 %v9123_v46, 16  ;;  %v6346_v23 = vrot.slane %v6344_v29, 5 }
 0x420   :  { %v7680_v14 = vadd.f32 %v13237_v17, %v6900_v9  ;;  %v7236_v44 = vrot.slane %v7234_v30, 4  ;;  %v7235_v38 = vsel %vm10123_vm7, %v9232_v45, %v7234_v30  ;;  %v13963_v9 = vld [vmem:[#allocation37_spill] sm:$0xff] }
 0x421   :  { %v13303_v21 = vpop.f32.mrf.mxu0  ;;  %v6338_v54 = vrot.slane %v6336_v55, 5  ;;  %v4616_v47 = vsel %vm10123_vm7, %v4614_v58, %v4615_v63  ;;  %v7336_v7 = vunpack.c.l.b16 %v7235_v38  ;;  %v13964_v63 = vld [vmem:[#allocation11_spill] sm:$0xff] }
 0x422   :  { %v7747_v17 = vadd.f32 %v12880_v16, %v7680_v14  ;;  %v7238_v57 = vsel %vm10123_vm7, %v7236_v44, %v7237_v6  ;;  %v4710_v2 = vunpack.c.l.b16 %v4616_v47  ;;  %v9201_v44 = vld [vmem:[%s13857_s0 + $0x15c] sm:$0xe]  ;;  %v13386_v6 = vld [vmem:[%s13860_s3] ss:$0 sm:$0xff] }
 0x423   :  { %v4943_v56 = vpop.f32.mrf.mxu1  ;;  %v6339_v30 = vsel %vm9673_vm4, %v6334_v12, %v6338_v54  ;;  %v7243_v12 = vrot.slane %v7241_v62, 4 }
 0x424   :  { %v5055_v13 = vadd.f32 %v4943_v56, %v13962_v26  ;;  %9263 = vmatmul.msk.bf16.gmra.mxu0 %vm1009_vm3, %v7375_v3  ;;  %v7811_v11 = vmax.f32 %v7747_v17, 0.0  ;;  %v7337_v3 = vunpack.c.l.b16 %v7238_v57  ;;  %v13365_v56 = vrot.slane %v6350_v42, 5  ;;  %v9125_v26 = vld [vmem:[%s13857_s0 + $0x164] sm:$0x1] }
 0x425   :  { %v6784_v61 = vpop.f32.mrf.mxu3  ;;  %v4748_v55 = vpack.c.b16 %v4710_v2, %v4709_v35  ;;  %v6557_v45 = vunpack.c.l.b16 %v6339_v30  ;;  %v6360_v39 = vshll.u32 %v9125_v26, 16  ;;  %v9127_v2 = vld [vmem:[%s13857_s0 + $0x16c] sm:$0xf] }
 0x426   :  { %v13322_v33 = vadd.f32 %v5500_v51, %v5055_v13  ;;  %8816 = vmatmul.msk.bf16.gmra.mxu1 %vm1009_vm3, %v4747_v20  ;;  %v7874_v4 = vadd.f32 %v7873_v60, %v7811_v11  ;;  %v6901_v27 = vadd.f32 %v6784_v61, %v13227_v43  ;;  %v6354_v60 = vshrl.u32 %v13338_v8, 16 }
 0x427   :  { %v5502_v15 = vpop.f32.mrf.mxu2  ;;  %v6343_v20 = vrot.slane %v6341_v41, 4  ;;  %v7376_v50 = vpack.c.b16 %v7337_v3, %v7336_v7  ;;  %v7244_v8 = vrot.slane %v9125_v26, 5  ;;  %v9426_v41 = vld [vmem:[%s13857_s0 + $0x168] sm:$0xff]  ;;  %v6362_v42 = vrot.slane %v6360_v39, 5 }
 0x428   :  { %v7681_v37 = vadd.f32 %v13275_v49, %v6901_v27  ;;  %v6356_v48 = vrot.slane %v6354_v60, 4  ;;  %v9126_v3 = vld [vmem:[%s13857_s0 + $0x168] sm:$0xf]  ;;  %v6374_v26 = vshll.u32 %v9127_v2, 16  ;;  %v7248_v39 = vrot.slane %v9127_v2, 5 }
 0x429   :  { %v13341_v43 = vpop.f32.mrf.mxu0  ;;  %v6347_v1 = vor.u32 %v6346_v23, %v6343_v20  ;;  %v7245_v7 = vsel %vm10123_vm7, %v7243_v12, %v7244_v8  ;;  %v8755_v8 = vld [vmem:[%s13857_s0 + $0x168] sm:$0xe] }
 0x42a   :  { %v7748_v36 = vadd.f32 %v12880_v16, %v7681_v37  ;;  %9167 = vmatmul.msk.bf16.gmra.mxu3 %vm1009_vm3, %v6595_v22  ;;  %v6329_v16 = vsel %vm9673_vm4, %v6324_v59, %v13300_v25  ;;  %v9565_v25 = vld [vmem:[%s13857_s0 + $0x160] sm:$0xf]  ;;  %v6357_v58 = vor.u32 %v6356_v48, %v13365_v56  ;;  %v9233_v59 = vrot.slane %v9201_v44, 9 }
 0x42b   :  { %v4945_v49 = vpop.f32.mrf.mxu1  ;;  %v4619_v53 = vrot.slane %v9565_v25, 5  ;;  %v6556_v11 = vunpack.c.l.b16 %v6329_v16  ;;  %v13965_v16 = vld [vmem:[#allocation13_spill] sm:$0xff]  ;;  %v7339_v23 = vunpack.c.l.b16 %v7245_v7  ;;  %v6365_v48 = vshrl.u32 %v9126_v3, 16  ;;  %v9569_v7 = vld [vmem:[%s13857_s0 + $0x170] sm:$0x1] }
 0x42c   :  { %v5056_v51 = vadd.f32 %v4945_v49, %v13963_v9  ;;  %9041 = vmatmul.msk.bf16.gmra.mxu2 %vm1009_vm3, %v9425_v18  ;;  %v7812_v5 = vmax.f32 %v7748_v36, 0.0  ;;  %v6348_v36 = vrot.slane %v6347_v1, 4  ;;  %v6358_v49 = vrot.slane %v6357_v58, 4 }
 0x42d   :  { %v6787_v14 = vpop.f32.mrf.mxu3  ;;  %v4621_v22 = vrot.slane %v4619_v53, 4  ;;  %v6596_v10 = vpack.c.b16 %v6557_v45, %v6556_v11  ;;  %v9435_v11 = vld [vmem:[%s13861_s4 + $0x18] sm:$0xff] }
 0x42e   :  { %v13360_v28 = vadd.f32 %v5502_v15, %v5056_v51  ;;  %v7875_v19 = vadd.f32 %v7874_v4, %v7812_v5  ;;  %v6902_v32 = vadd.f32 %v6787_v14, %v13257_v31  ;;  %v8754_v31 = vld [vmem:[%s13857_s0 + $0x15c] sm:$0xe]  ;;  %v9567_v15 = vld [vmem:[%s13857_s0 + $0x164] sm:$0x1]  ;;  %8081 = vmatpush.bf16.msrb.mxu2 %v9435_v11 }
 0x42f   :  { %v5505_v17 = vpop.f32.mrf.mxu2  ;;  %v8786_v27 = vrot.slane %v8754_v31, 9  ;;  %v4622_v46 = vrot.slane %v9567_v15, 5 }
 0x430   :  { %v7682_v13 = vadd.f32 %v13303_v21, %v6902_v32  ;;  %v6353_v32 = vsel %vm9673_vm4, %v6348_v36, %v13365_v56  ;;  %v9443_v56 = vld [vmem:[%s13862_s5 + $0x18] sm:$0xff] }
 0x431   :  { %v13374_v40 = vpop.f32.mrf.mxu0  ;;  %v4620_v29 = vsel %vm10123_vm7, %v8786_v27, %v4619_v53  ;;  %v4623_v51 = vsel %vm10123_vm7, %v4621_v22, %v4622_v46  ;;  %v6368_v53 = vshll.u32 %v9126_v3, 16  ;;  %v6558_v1 = vunpack.c.l.b16 %v6353_v32  ;;  %8012 = vmatpush.bf16.msrb.mxu1 %v9443_v56 }
 0x432   :  { %v7749_v21 = vadd.f32 %v13386_v6, %v7682_v13  ;;  %v4711_v35 = vunpack.c.l.b16 %v4620_v29  ;;  %v4712_v30 = vunpack.c.l.b16 %v4623_v51  ;;  %v6378_v13 = vshrl.u32 %v9127_v2, 16 }
 0x433   :  { %v4948_v61 = vpop.f32.mrf.mxu1  ;;  %v13445_v27 = vrot.slane %v6374_v26, 5  ;;  %v8787_v51 = vrot.slane %v8755_v8, 9  ;;  %v4629_v3 = vrot.slane %v9569_v7, 5 }
 0x434   :  { %v5057_v4 = vadd.f32 %v4948_v61, %v13964_v63  ;;  %9264 = vmatmul.msk.bf16.gmra.mxu0 %vm1009_vm3, %v7376_v50  ;;  %v7813_v18 = vmax.f32 %v7749_v21, 0.0  ;;  %v4749_v45 = vpack.c.b16 %v4712_v30, %v4711_v35  ;;  %v6367_v63 = vrot.slane %v6365_v48, 4 }
 0x435   :  { %v6789_v37 = vpop.f32.mrf.mxu3  ;;  %v6380_v22 = vrot.slane %v6378_v13, 4 }
 0x436   :  { %v13395_v54 = vadd.f32 %v5505_v17, %v5057_v4  ;;  %8817 = vmatmul.msk.bf16.gmra.mxu1 %vm1009_vm3, %v4748_v55  ;;  %v7876_v38 = vadd.f32 %v7875_v19, %v7813_v18  ;;  %v6903_v57 = vadd.f32 %v6789_v37, %v13292_v0  ;;  %v7242_v0 = vsel %vm10123_vm7, %v9233_v59, %v7241_v62  ;;  %v9128_v18 = vld [vmem:[%s13857_s0 + $0x170] sm:$0x1]  ;;  %v13966_v59 = vld [vmem:[#allocation15_spill] sm:$0xff] }
 0x437   :  { %v5507_v47 = vpop.f32.mrf.mxu2  ;;  %v7338_v20 = vunpack.c.l.b16 %v7242_v0  ;;  %v6363_v17 = vsel %vm9673_vm4, %v6358_v49, %v6362_v42  ;;  %v6370_v4 = vrot.slane %v6368_v53, 5  ;;  %v6381_v36 = vor.u32 %v6380_v22, %v13445_v27  ;;  %v13967_v53 = vld [vmem:[#allocation17_spill] sm:$0xff] }
 0x438   :  { %v7683_v60 = vadd.f32 %v13341_v43, %v6903_v57  ;;  %v6559_v58 = vunpack.c.l.b16 %v6363_v17  ;;  %v7250_v57 = vrot.slane %v7248_v39, 4  ;;  %v6384_v49 = vshll.u32 %v9128_v18, 16 }
 0x439   :  { %v13405_v9 = vpop.f32.mrf.mxu0  ;;  %v7377_v44 = vpack.c.b16 %v7339_v23, %v7338_v20  ;;  %v6371_v29 = vor.u32 %v6370_v4, %v6367_v63  ;;  %v6382_v20 = vrot.slane %v6381_v36, 4 }
 0x43a   :  { %v7750_v5 = vadd.f32 %v13386_v6, %v7683_v60  ;;  %9168 = vmatmul.msk.bf16.gmra.mxu3 %vm1009_vm3, %v6596_v10  ;;  %v7251_v10 = vrot.slane %v9128_v18, 5  ;;  %v6386_v23 = vrot.slane %v6384_v49, 5 }
 0x43b   :  { %v4950_v43 = vpop.f32.mrf.mxu1  ;;  %v6372_v30 = vrot.slane %v6371_v29, 4 }
 0x43c   :  { %v5058_v14 = vadd.f32 %v4950_v43, %v13965_v16  ;;  %9042 = vmatmul.msk.bf16.gmra.mxu2 %vm1009_vm3, %v9426_v41  ;;  %v7814_v19 = vmax.f32 %v7750_v5, 0.0  ;;  %v9427_v5 = vld [vmem:[%s13857_s0 + $0x174] sm:$0xff]  ;;  %v7252_v16 = vsel %vm10123_vm7, %v7250_v57, %v7251_v10 }
 0x43d   :  { %v6792_v50 = vpop.f32.mrf.mxu3  ;;  %v7341_v13 = vunpack.c.l.b16 %v7252_v16  ;;  %v6377_v22 = vsel %vm9673_vm4, %v6372_v30, %v13445_v27  ;;  %v9570_v57 = vld [vmem:[%s13857_s0 + $0x178] sm:$0xf] }
 0x43e   :  { %v13428_v25 = vadd.f32 %v5507_v47, %v5058_v14  ;;  %v13430_v31 = vadd.f32 %v7876_v38, %v7814_v19  ;;  %v6904_v62 = vadd.f32 %v6792_v50, %v13322_v33  ;;  %v9202_v33 = vld [vmem:[%s13857_s0 + $0x168] sm:$0xe]  ;;  %v6597_v38 = vpack.c.b16 %v6559_v58, %v6558_v1  ;;  %v9129_v14 = vld [vmem:[%s13857_s0 + $0x174] sm:$0xf]  ;;  %v13483_v19 = vld [vmem:[%s13857_s0 + $0x178] sm:$0xf] }
 0x43f   :  { %v5510_v55 = vpop.f32.mrf.mxu2  ;;  %v9234_v37 = vrot.slane %v9202_v33, 9  ;;  %v7255_v18 = vrot.slane %v13483_v19, 5  ;;  %v4633_v10 = vrot.slane %v9570_v57, 5  ;;  %v6560_v36 = vunpack.c.l.b16 %v6377_v22 }
 0x440   :  { %v7684_v21 = vadd.f32 %v13374_v40, %v6904_v62  ;;  %v9568_v40 = vld [vmem:[%s13857_s0 + $0x16c] sm:$0xf]  ;;  %v6389_v62 = vshrl.u32 %v9129_v14, 16 }
 0x441   :  { %v13440_v61 = vpop.f32.mrf.mxu0  ;;  %v4626_v46 = vrot.slane %v9568_v40, 5  ;;  %v7249_v43 = vsel %vm10123_vm7, %v9234_v37, %v7248_v39  ;;  %v7257_v7 = vrot.slane %v7255_v18, 4 }
 0x442   :  { %v7751_v35 = vadd.f32 %v13386_v6, %v7684_v21  ;;  %v7340_v50 = vunpack.c.l.b16 %v7249_v43 }
 0x443   :  { %v4953_v15 = vpop.f32.mrf.mxu1  ;;  %v4628_v0 = vrot.slane %v4626_v46, 4  ;;  %v4627_v17 = vsel %vm10123_vm7, %v8787_v51, %v4626_v46  ;;  %v6391_v46 = vrot.slane %v6389_v62, 4 }
 0x444   :  { %v5059_v12 = vadd.f32 %v4953_v15, %v13966_v59  ;;  %9265 = vmatmul.msk.bf16.gmra.mxu0 %vm1009_vm3, %v7377_v44  ;;  %v7815_v11 = vmax.f32 %v7751_v35, 0.0  ;;  %v6402_v44 = vshrl.u32 %v13483_v19, 16  ;;  %v4713_v58 = vunpack.c.l.b16 %v4627_v17 }
 0x445   :  { %v6794_v47 = vpop.f32.mrf.mxu3  ;;  %v4630_v48 = vsel %vm10123_vm7, %v4628_v0, %v4629_v3  ;;  %v6387_v15 = vsel %vm9673_vm4, %v6382_v20, %v6386_v23  ;;  %v7378_v40 = vpack.c.b16 %v7341_v13, %v7340_v50  ;;  %v4635_v20 = vrot.slane %v4633_v10, 4  ;;  %v9571_v23 = vld [vmem:[%s13857_s0 + $0x17c] sm:$0x1]  ;;  %v9428_v50 = vld [vmem:[%s13857_s0 + $0x180] sm:$0xff] }
 0x446   :  { %v13458_v41 = vadd.f32 %v5510_v55, %v5059_v12  ;;  %8818 = vmatmul.msk.bf16.gmra.mxu1 %vm1009_vm3, %v4749_v45  ;;  %v6905_v42 = vadd.f32 %v6794_v47, %v13360_v28  ;;  %v6392_v55 = vshll.u32 %v9129_v14, 16  ;;  %v6398_v45 = vshll.u32 %v13483_v19, 16  ;;  %v9132_v13 = vld [vmem:[%s13857_s0 + $0x180] sm:$0xf] }
 0x447   :  { %v5512_v60 = vpop.f32.mrf.mxu2  ;;  %v4714_v33 = vunpack.c.l.b16 %v4630_v48  ;;  %v6561_v49 = vunpack.c.l.b16 %v6387_v15  ;;  %v4636_v19 = vrot.slane %v9571_v23, 5  ;;  %v6416_v15 = vshll.u32 %v9132_v13, 16 }
 0x448   :  { %v7685_v2 = vadd.f32 %v13405_v9, %v6905_v42  ;;  %v6394_v8 = vrot.slane %v6392_v55, 5  ;;  %v13507_v37 = vrot.slane %v6398_v45, 5  ;;  %v8756_v42 = vld [vmem:[%s13857_s0 + $0x174] sm:$0xe] }
 0x449   :  { %v13473_v28 = vpop.f32.mrf.mxu0  ;;  %v4750_v27 = vpack.c.b16 %v4714_v33, %v4713_v58  ;;  %v8788_v30 = vrot.slane %v8756_v42, 9  ;;  %v6598_v17 = vpack.c.b16 %v6561_v49, %v6560_v36  ;;  %v4637_v45 = vsel %vm10123_vm7, %v4635_v20, %v4636_v19  ;;  %v13970_v20 = vld [vmem:[#allocation23_spill] sm:$0xff] }
 0x44a   :  { %v7752_v32 = vadd.f32 %v13386_v6, %v7685_v2  ;;  %9169 = vmatmul.msk.bf16.gmra.mxu3 %vm1009_vm3, %v6597_v38  ;;  %v9203_v38 = vld [vmem:[%s13857_s0 + $0x174] sm:$0xe]  ;;  %v6395_v43 = vor.u32 %v6394_v8, %v6391_v46  ;;  %v6418_v49 = vrot.slane %v6416_v15, 5 }
 0x44b   :  { %v4955_v9 = vpop.f32.mrf.mxu1  ;;  %v9235_v0 = vrot.slane %v9203_v38, 9  ;;  %v4716_v38 = vunpack.c.l.b16 %v4637_v45 }
 0x44c   :  { %v5060_v26 = vadd.f32 %v4955_v9, %v13967_v53  ;;  %9043 = vmatmul.msk.bf16.gmra.mxu2 %vm1009_vm3, %v9427_v5  ;;  %v7816_v56 = vmax.f32 %v7752_v32, 0.0 }
 0x44d   :  { %v6797_v21 = vpop.f32.mrf.mxu3  ;;  %v7256_v53 = vsel %vm10123_vm7, %v9235_v0, %v7255_v18 }
 0x44e   :  { %v13495_v1 = vadd.f32 %v5512_v60, %v5060_v26  ;;  %v7884_v39 = vadd.f32 %v7816_v56, %v7815_v11  ;;  %v6906_v63 = vadd.f32 %v6797_v21, %v13395_v54  ;;  %v6404_v54 = vrot.slane %v6402_v44, 4  ;;  %v13968_v60 = vld [vmem:[#allocation19_spill] sm:$0xff]  ;;  %v13548_v11 = vld [vmem:[%s13857_s0 + $0x184] sm:$0xf] }
 0x44f   :  { %v5515_v4 = vpop.f32.mrf.mxu2  ;;  %v4634_v56 = vsel %vm10123_vm7, %v8788_v30, %v4633_v10  ;;  %v7342_v33 = vunpack.c.l.b16 %v7256_v53  ;;  %v6426_v46 = vshrl.u32 %v13548_v11, 16 }
 0x450   :  { %v7686_v59 = vadd.f32 %v13440_v61, %v6906_v63  ;;  %v9131_v61 = vld [vmem:[%s13857_s0 + $0x17c] sm:$0x1]  ;;  %v6405_v35 = vor.u32 %v6404_v54, %v13507_v37  ;;  %v6413_v63 = vshrl.u32 %v9132_v13, 16  ;;  %v4715_v54 = vunpack.c.l.b16 %v4634_v56 }
 0x451   :  { %v13505_v12 = vpop.f32.mrf.mxu0  ;;  %v7258_v3 = vrot.slane %v9131_v61, 5  ;;  %v6408_v2 = vshll.u32 %v9131_v61, 16 }
 0x452   :  { %v7753_v47 = vadd.f32 %v13386_v6, %v7686_v59  ;;  %v6406_v44 = vrot.slane %v6405_v35, 4  ;;  %v6415_v36 = vrot.slane %v6413_v63, 4 }
 0x453   :  { %v4958_v29 = vpop.f32.mrf.mxu1  ;;  %v7259_v26 = vsel %vm10123_vm7, %v7257_v7, %v7258_v3  ;;  %v6410_v21 = vrot.slane %v6408_v2, 5  ;;  %v4751_v7 = vpack.c.b16 %v4716_v38, %v4715_v54 }
 0x454   :  { %v5061_v51 = vadd.f32 %v4958_v29, %v13968_v60  ;;  %9266 = vmatmul.msk.bf16.gmra.mxu0 %vm1009_vm3, %v7378_v40  ;;  %v7817_v5 = vmax.f32 %v7753_v47, 0.0  ;;  %v6422_v40 = vshll.u32 %v13548_v11, 16  ;;  %v6428_v60 = vrot.slane %v6426_v46, 4 }
 0x455   :  { %v6799_v16 = vpop.f32.mrf.mxu3  ;;  %v6411_v47 = vsel %vm9673_vm4, %v6406_v44, %v6410_v21  ;;  %v6419_v19 = vor.u32 %v6418_v49, %v6415_v36  ;;  %v9573_v21 = vld [vmem:[%s13857_s0 + $0x188] sm:$0x1] }
 0x456   :  { %v13525_v14 = vadd.f32 %v5515_v4, %v5061_v51  ;;  %8819 = vmatmul.msk.bf16.gmra.mxu1 %vm1009_vm3, %v4750_v27  ;;  %v7885_v32 = vadd.f32 %v7884_v39, %v7817_v5  ;;  %v6907_v9 = vadd.f32 %v6799_v16, %v13428_v25  ;;  %v6396_v25 = vrot.slane %v6395_v43, 4  ;;  %v13969_v4 = vld [vmem:[#allocation21_spill] sm:$0xff] }
 0x457   :  { %v5517_v48 = vpop.f32.mrf.mxu2  ;;  %v7343_v39 = vunpack.c.l.b16 %v7259_v26  ;;  %v13568_v42 = vrot.slane %v6422_v40, 5  ;;  %v6563_v5 = vunpack.c.l.b16 %v6411_v47  ;;  %v9204_v43 = vld [vmem:[%s13857_s0 + $0x180] sm:$0xe]  ;;  %v9572_v16 = vld [vmem:[%s13857_s0 + $0x184] sm:$0xf] }
 0x458   :  { %v7687_v62 = vadd.f32 %v13473_v28, %v6907_v9  ;;  %v6401_v27 = vsel %vm9673_vm4, %v6396_v25, %v13507_v37  ;;  %v9134_v37 = vld [vmem:[%s13857_s0 + $0x188] sm:$0x1]  ;;  %v4640_v30 = vrot.slane %v9572_v16, 5 }
 0x459   :  { %v13543_v55 = vpop.f32.mrf.mxu0  ;;  %v7379_v29 = vpack.c.b16 %v7343_v39, %v7342_v33  ;;  %v6562_v3 = vunpack.c.l.b16 %v6401_v27  ;;  %v6432_v9 = vshll.u32 %v9134_v37, 16  ;;  %v7265_v53 = vrot.slane %v9134_v37, 5  ;;  %v9429_v33 = vld [vmem:[%s13857_s0 + $0x18c] sm:$0xff] }
 0x45a   :  { %v7754_v58 = vadd.f32 %v13386_v6, %v7687_v62  ;;  %9170 = vmatmul.msk.bf16.gmra.mxu3 %vm1009_vm3, %v6598_v17  ;;  %v4642_v44 = vrot.slane %v4640_v30, 4  ;;  %v6420_v39 = vrot.slane %v6419_v19, 4  ;;  %v9205_v19 = vld [vmem:[%s13857_s0 + $0x18c] sm:$0xe] }
 0x45b   :  { %v4960_v28 = vpop.f32.mrf.mxu1  ;;  %v6599_v62 = vpack.c.b16 %v6563_v5, %v6562_v3  ;;  %v6434_v63 = vrot.slane %v6432_v9, 5  ;;  %v8758_v9 = vld [vmem:[%s13857_s0 + $0x18c] sm:$0xe] }
 0x45c   :  { %v5062_v22 = vadd.f32 %v4960_v28, %v13969_v4  ;;  %9044 = vmatmul.msk.bf16.gmra.mxu2 %vm1009_vm3, %v9428_v50  ;;  %v7818_v18 = vmax.f32 %v7754_v58, 0.0  ;;  %v4643_v58 = vrot.slane %v9573_v21, 5  ;;  %v9135_v28 = vld [vmem:[%s13857_s0 + $0x18c] sm:$0xf]  ;;  %v6425_v36 = vsel %vm9673_vm4, %v6420_v39, %v13568_v42 }
 0x45d   :  { %v6802_v59 = vpop.f32.mrf.mxu3  ;;  %v6440_v54 = vshll.u32 %v9135_v28, 16 }
 0x45e   :  { %v13560_v8 = vadd.f32 %v5517_v48, %v5062_v22  ;;  %v7886_v57 = vadd.f32 %v7885_v32, %v7818_v18  ;;  %v6908_v10 = vadd.f32 %v6802_v59, %v13458_v41  ;;  %v7262_v41 = vrot.slane %v13548_v11, 5 }
 0x45f   :  { %v5520_v61 = vpop.f32.mrf.mxu2  ;;  %v6429_v32 = vor.u32 %v6428_v60, %v13568_v42  ;;  %v9236_v48 = vrot.slane %v9204_v43, 9  ;;  %v6437_v59 = vshrl.u32 %v9135_v28, 16  ;;  %v9137_v42 = vld [vmem:[%s13857_s0 + $0x194] sm:$0x1] }
 0x460   :  { %v7688_v51 = vadd.f32 %v13505_v12, %v6908_v10  ;;  %v8757_v12 = vld [vmem:[%s13857_s0 + $0x180] sm:$0xe]  ;;  %v7264_v50 = vrot.slane %v7262_v41, 4 }
 0x461   :  { %v13571_v0 = vpop.f32.mrf.mxu0  ;;  %v8789_v25 = vrot.slane %v8757_v12, 9  ;;  %v6430_v15 = vrot.slane %v6429_v32, 4  ;;  %v7263_v40 = vsel %vm10123_vm7, %v9236_v48, %v7262_v41  ;;  %v6439_v41 = vrot.slane %v6437_v59, 4 }
 0x462   :  { %v7755_v35 = vadd.f32 %v13386_v6, %v7688_v51  ;;  %v7266_v46 = vsel %vm10123_vm7, %v7264_v50, %v7265_v53  ;;  %v6564_v12 = vunpack.c.l.b16 %v6425_v36 }
 0x463   :  { %v4963_v2 = vpop.f32.mrf.mxu1  ;;  %v4641_v18 = vsel %vm10123_vm7, %v8789_v25, %v4640_v30  ;;  %v7345_v47 = vunpack.c.l.b16 %v7266_v46  ;;  %v6435_v49 = vsel %vm9673_vm4, %v6430_v15, %v6434_v63  ;;  %v13971_v25 = vld [vmem:[#allocation27_spill] sm:$0xff] }
 0x464   :  { %v5063_v23 = vadd.f32 %v4963_v2, %v13970_v20  ;;  %9267 = vmatmul.msk.bf16.gmra.mxu0 %vm1009_vm3, %v7379_v29  ;;  %v7819_v17 = vmax.f32 %v7755_v35, 0.0  ;;  %v4717_v51 = vunpack.c.l.b16 %v4641_v18  ;;  %v6565_v16 = vunpack.c.l.b16 %v6435_v49 }
 0x465   :  { %v6804_v26 = vpop.f32.mrf.mxu3 }
 0x466   :  { %v13590_v13 = vadd.f32 %v5520_v61, %v5063_v23  ;;  %8820 = vmatmul.msk.bf16.gmra.mxu1 %vm1009_vm3, %v4751_v7  ;;  %v7887_v11 = vadd.f32 %v7886_v57, %v7819_v17  ;;  %v6909_v56 = vadd.f32 %v6804_v26, %v13495_v1  ;;  %v13608_v1 = vld [vmem:[%s13857_s0 + $0x190] sm:$0xf]  ;;  %v7344_v61 = vunpack.c.l.b16 %v7263_v40 }
 0x467   :  { %v13594_v45 = vpop.f32.mrf.mxu2  ;;  %v6446_v57 = vshll.u32 %v13608_v1, 16  ;;  %v6450_v10 = vshrl.u32 %v13608_v1, 16  ;;  %v6442_v7 = vrot.slane %v6440_v54, 5  ;;  %v9574_v17 = vld [vmem:[%s13857_s0 + $0x190] sm:$0xf] }
 0x468   :  { %v7689_v4 = vadd.f32 %v13543_v55, %v6909_v56  ;;  %v4644_v55 = vsel %vm10123_vm7, %v4642_v44, %v4643_v58  ;;  %v7380_v30 = vpack.c.b16 %v7345_v47, %v7344_v61  ;;  %v4647_v48 = vrot.slane %v9574_v17, 5 }
 0x469   :  { %v13611_v22 = vpop.f32.mrf.mxu0  ;;  %v4718_v37 = vunpack.c.l.b16 %v4644_v55  ;;  %v13634_v35 = vrot.slane %v6446_v57, 5  ;;  %v6452_v2 = vrot.slane %v6450_v10, 4  ;;  %v6443_v50 = vor.u32 %v6442_v7, %v6439_v41  ;;  %v9430_v55 = vld [vmem:[%s13857_s0 + $0x198] sm:$0xff]  ;;  %v13972_v7 = vld [vmem:[#allocation5_spill] sm:$0xff] }
 0x46a   :  { %v7756_v38 = vadd.f32 %v13386_v6, %v7689_v4  ;;  %9171 = vmatmul.msk.bf16.gmra.mxu3 %vm1009_vm3, %v6599_v62  ;;  %v6456_v62 = vshll.u32 %v9137_v42, 16  ;;  %v6600_v56 = vpack.c.b16 %v6565_v16, %v6564_v12  ;;  %v9237_v44 = vrot.slane %v9205_v19, 9  ;;  %v9575_v4 = vld [vmem:[%s13857_s0 + $0x194] sm:$0x1]  ;;  %v13690_v41 = vld [vmem:[%s13857_s0 + $0x19c] sm:$0xf] }
 0x46b   :  { %v13621_v27 = vpop.f32.mrf.mxu1  ;;  %v4752_v32 = vpack.c.b16 %v4718_v37, %v4717_v51  ;;  %v6453_v26 = vor.u32 %v6452_v2, %v13634_v35  ;;  %v8790_v58 = vrot.slane %v8758_v9, 9  ;;  %v4650_v15 = vrot.slane %v9575_v4, 5 }
 0x46c   :  { %9045 = vmatmul.msk.bf16.gmra.mxu2 %vm1009_vm3, %v9429_v33  ;;  %v7820_v29 = vmax.f32 %v7756_v38, 0.0  ;;  %v7272_v33 = vrot.slane %v9137_v42, 5  ;;  %v6444_v40 = vrot.slane %v6443_v50, 4  ;;  %v6458_v38 = vrot.slane %v6456_v62, 5  ;;  %v9434_v50 = vld [vmem:[%s13861_s4 + $0x10] sm:$0xff] }
 0x46d   :  { %v6807_v60 = vpop.f32.mrf.mxu3  ;;  %v6454_v54 = vrot.slane %v6453_v26, 4  ;;  %v6474_v19 = vshrl.u32 %v13690_v41, 16  ;;  %8082 = vmatpush.bf16.msrb.mxu2 %v9434_v50 }
 0x46e   :  { %v7888_v3 = vadd.f32 %v7887_v11, %v7820_v29  ;;  %v6910_v5 = vadd.f32 %v6807_v60, %v13525_v14  ;;  %v7269_v14 = vrot.slane %v13608_v1, 5  ;;  %v4649_v1 = vrot.slane %v4647_v48, 4 }
 0x46f   :  { %v5525_v43 = vpop.f32.mrf.mxu2  ;;  %v4648_v29 = vsel %vm10123_vm7, %v8790_v58, %v4647_v48  ;;  %v6449_v60 = vsel %vm9673_vm4, %v6444_v40, %v13634_v35  ;;  %v6459_v51 = vsel %vm9673_vm4, %v6454_v54, %v6458_v38 }
 0x470   :  { %v7690_v20 = vadd.f32 %v13571_v0, %v6910_v5  ;;  %v7271_v28 = vrot.slane %v7269_v14, 4  ;;  %v7270_v57 = vsel %vm10123_vm7, %v9237_v44, %v7269_v14  ;;  %v4651_v36 = vsel %vm10123_vm7, %v4649_v1, %v4650_v15  ;;  %v9576_v1 = vld [vmem:[%s13857_s0 + $0x19c] sm:$0xf]  ;;  %v9140_v15 = vld [vmem:[%s13857_s0 + $0x1a0] sm:$0x1] }
 0x471   :  { %v13640_v23 = vpop.f32.mrf.mxu0  ;;  %v7346_v37 = vunpack.c.l.b16 %v7270_v57  ;;  %v4719_v16 = vunpack.c.l.b16 %v4648_v29  ;;  %v4720_v42 = vunpack.c.l.b16 %v4651_v36  ;;  %v6566_v17 = vunpack.c.l.b16 %v6449_v60 }
 0x472   :  { %v7757_v0 = vadd.f32 %v13386_v6, %v7690_v20  ;;  %v7273_v47 = vsel %vm10123_vm7, %v7271_v28, %v7272_v33  ;;  %v6470_v20 = vshll.u32 %v13690_v41, 16  ;;  %v6567_v48 = vunpack.c.l.b16 %v6459_v51  ;;  %v9206_v33 = vld [vmem:[%s13857_s0 + $0x198] sm:$0xe] }
 0x473   :  { %v4968_v53 = vpop.f32.mrf.mxu1  ;;  %v7347_v5 = vunpack.c.l.b16 %v7273_v47  ;;  %v7276_v44 = vrot.slane %v13690_v41, 5  ;;  %v6476_v28 = vrot.slane %v6474_v19, 4  ;;  %v4654_v4 = vrot.slane %v9576_v1, 5 }
 0x474   :  { %v5065_v11 = vadd.f32 %v4968_v53, %v13971_v25  ;;  %9268 = vmatmul.msk.bf16.gmra.mxu0 %vm1009_vm3, %v7380_v30  ;;  %v7821_v21 = vmax.f32 %v7757_v0, 0.0  ;;  %v9442_v0 = vld [vmem:[%s13862_s5 + $0x10] sm:$0xff]  ;;  %v13973_v53 = vld [vmem:[#allocation25_spill] sm:$0xff]  ;;  %v13711_v58 = vrot.slane %v6470_v20, 5 }
 0x475   :  { %v6809_v39 = vpop.f32.mrf.mxu3  ;;  %v5064_v26 = vadd.f32 %v13621_v27, %v13973_v53  ;;  %v7381_v62 = vpack.c.b16 %v7347_v5, %v7346_v37  ;;  %8013 = vmatpush.bf16.msrb.mxu1 %v9442_v0  ;;  %v7278_v57 = vrot.slane %v7276_v44, 4  ;;  %v4656_v51 = vrot.slane %v4654_v4, 4  ;;  %v9577_v37 = vld [vmem:[%s13857_s0 + $0x1a0] sm:$0x1]  ;;  %v9142_v53 = vld [vmem:[%s13857_s0 + $0x1a8] sm:$0xf] }
 0x476   :  { %v13656_v63 = vadd.f32 %v5525_v43, %v5065_v11  ;;  %8821 = vmatmul.msk.bf16.gmra.mxu1 %vm1009_vm3, %v4752_v32  ;;  %v7889_v46 = vadd.f32 %v7888_v3, %v7821_v21  ;;  %v6911_v18 = vadd.f32 %v6809_v39, %v13560_v8  ;;  %v9138_v8 = vld [vmem:[%s13857_s0 + $0x198] sm:$0xf]  ;;  %v4753_v21 = vpack.c.b16 %v4720_v42, %v4719_v16 }
 0x477   :  { %v5527_v59 = vpop.f32.mrf.mxu2  ;;  %v6461_v43 = vshrl.u32 %v9138_v8, 16  ;;  %v6464_v2 = vshll.u32 %v9138_v8, 16  ;;  %v5621_v40 = vadd.f32 %v13594_v45, %v5064_v26  ;;  %v6477_v36 = vor.u32 %v6476_v28, %v13711_v58 }
 0x478   :  { %v7691_v10 = vadd.f32 %v13611_v22, %v6911_v18  ;;  %v4657_v41 = vrot.slane %v9577_v37, 5  ;;  %v6498_v1 = vshrl.u32 %v9142_v53, 16 }
 0x479   :  { %v13669_v61 = vpop.f32.mrf.mxu0  ;;  %v6463_v25 = vrot.slane %v6461_v43, 4  ;;  %v6466_v11 = vrot.slane %v6464_v2, 5 }
 0x47a   :  { %v7758_v49 = vadd.f32 %v13386_v6, %v7691_v10  ;;  %9172 = vmatmul.msk.bf16.gmra.mxu3 %vm1009_vm3, %v6600_v56  ;;  %v7279_v10 = vrot.slane %v9140_v15, 5 }
 0x47b   :  { %v4970_v22 = vpop.f32.mrf.mxu1  ;;  %v6467_v54 = vor.u32 %v6466_v11, %v6463_v25 }
 0x47c   :  { %v5066_v3 = vadd.f32 %v4970_v22, %v13972_v7  ;;  %9046 = vmatmul.msk.bf16.gmra.mxu2 %vm1009_vm3, %v9430_v55  ;;  %v7822_v12 = vmax.f32 %v7758_v49, 0.0  ;;  %v9238_v55 = vrot.slane %v9206_v33, 9  ;;  %v6480_v49 = vshll.u32 %v9140_v15, 16  ;;  %v9431_v7 = vld [vmem:[%s13857_s0 + $0x1a4] sm:$0xff] }
 0x47d   :  { %v6812_v30 = vpop.f32.mrf.mxu3  ;;  %v7280_v2 = vsel %vm10123_vm7, %v7278_v57, %v7279_v10  ;;  %v6468_v16 = vrot.slane %v6467_v54, 4  ;;  %v13976_v57 = vld [vmem:[#allocation8_spill] sm:$0xff] }
 0x47e   :  { %v13694_v35 = vadd.f32 %v5527_v59, %v5066_v3  ;;  %v7890_v14 = vadd.f32 %v7889_v46, %v7822_v12  ;;  %v6912_v32 = vadd.f32 %v6812_v30, %v13590_v13  ;;  %v13974_v46 = vld [vmem:[#allocation6_spill] sm:$0xff]  ;;  %v6601_v59 = vpack.c.b16 %v6567_v48, %v6566_v17  ;;  %v9141_v48 = vld [vmem:[%s13857_s0 + $0x1a4] sm:$0xf] }
 0x47f   :  { %v5530_v9 = vpop.f32.mrf.mxu2  ;;  %v7277_v43 = vsel %vm10123_vm7, %v9238_v55, %v7276_v44  ;;  %v6478_v30 = vrot.slane %v6477_v36, 4  ;;  %v6482_v42 = vrot.slane %v6480_v49, 5  ;;  %v7349_v17 = vunpack.c.l.b16 %v7280_v2 }
 0x480   :  { %v7692_v56 = vadd.f32 %v13640_v23, %v6912_v32  ;;  %v8759_v23 = vld [vmem:[%s13857_s0 + $0x198] sm:$0xe]  ;;  %v6473_v11 = vsel %vm9673_vm4, %v6468_v16, %v13711_v58  ;;  %v6485_v33 = vshrl.u32 %v9141_v48, 16  ;;  %v9207_v58 = vld [vmem:[%s13857_s0 + $0x1a4] sm:$0xe] }
 0x481   :  { %v13708_v13 = vpop.f32.mrf.mxu0  ;;  %v8791_v29 = vrot.slane %v8759_v23, 9  ;;  %v6494_v23 = vshll.u32 %v9142_v53, 16  ;;  %v9239_v49 = vrot.slane %v9207_v58, 9 }
 0x482   :  { %v7759_v27 = vadd.f32 %v13386_v6, %v7692_v56  ;;  %v6483_v56 = vsel %vm9673_vm4, %v6478_v30, %v6482_v42 }
 0x483   :  { %v4973_v39 = vpop.f32.mrf.mxu1  ;;  %v4655_v12 = vsel %vm10123_vm7, %v8791_v29, %v4654_v4  ;;  %v6500_v29 = vrot.slane %v6498_v1, 4  ;;  %v13978_v1 = vld [vmem:[#allocation10_spill] sm:$0xff] }
 0x484   :  { %v5067_v18 = vadd.f32 %v4973_v39, %v13974_v46  ;;  %9269 = vmatmul.msk.bf16.gmra.mxu0 %vm1009_vm3, %v7381_v62  ;;  %v7823_v38 = vmax.f32 %v7759_v27, 0.0  ;;  %v4721_v0 = vunpack.c.l.b16 %v4655_v12  ;;  %v6488_v27 = vshll.u32 %v9141_v48, 16 }
 0x485   :  { %v6814_v47 = vpop.f32.mrf.mxu3 }
 0x486   :  { %v13729_v8 = vadd.f32 %v5530_v9, %v5067_v18  ;;  %8822 = vmatmul.msk.bf16.gmra.mxu1 %vm1009_vm3, %v4753_v21  ;;  %v7891_v45 = vadd.f32 %v7890_v14, %v7823_v38  ;;  %v6913_v22 = vadd.f32 %v6814_v47, %v5621_v40  ;;  %v13975_v14 = vld [vmem:[#allocation7_spill] sm:$0xff]  ;;  %v7348_v9 = vunpack.c.l.b16 %v7277_v43 }
 0x487   :  { %v5532_v60 = vpop.f32.mrf.mxu2  ;;  %v7283_v40 = vrot.slane %v9142_v53, 5  ;;  %v6568_v18 = vunpack.c.l.b16 %v6473_v11  ;;  %v6487_v38 = vrot.slane %v6485_v33, 4  ;;  %v6490_v55 = vrot.slane %v6488_v27, 5 }
 0x488   :  { %v7693_v3 = vadd.f32 %v13669_v61, %v6913_v22  ;;  %v4658_v61 = vsel %vm10123_vm7, %v4656_v51, %v4657_v41  ;;  %v7382_v39 = vpack.c.b16 %v7349_v17, %v7348_v9  ;;  %v6496_v47 = vrot.slane %v6494_v23, 5 }
 0x489   :  { %v7599_v5 = vpop.f32.mrf.mxu0  ;;  %v4722_v25 = vunpack.c.l.b16 %v4658_v61  ;;  %v6491_v43 = vor.u32 %v6490_v55, %v6487_v38  ;;  %v7284_v42 = vsel %vm10123_vm7, %v9239_v49, %v7283_v40  ;;  %v13979_v55 = vld [vmem:[#allocation12_spill] sm:$0xff] }
 0x48a   :  { %v7760_v20 = vadd.f32 %v13386_v6, %v7693_v3  ;;  %9173 = vmatmul.msk.bf16.gmra.mxu3 %vm1009_vm3, %v6601_v59  ;;  %v6569_v59 = vunpack.c.l.b16 %v6483_v56  ;;  %v6501_v12 = vor.u32 %v6500_v29, %v6496_v47  ;;  %v7350_v48 = vunpack.c.l.b16 %v7284_v42 }
 0x48b   :  { %v4975_v19 = vpop.f32.mrf.mxu1  ;;  %v4754_v46 = vpack.c.b16 %v4722_v25, %v4721_v0 }
 0x48c   :  { %v5068_v32 = vadd.f32 %v4975_v19, %v13975_v14  ;;  %9047 = vmatmul.msk.bf16.gmra.mxu2 %vm1009_vm3, %v9431_v7  ;;  %v7824_v50 = vmax.f32 %v7760_v20, 0.0  ;;  %v6602_v37 = vpack.c.b16 %v6569_v59, %v6568_v18  ;;  %v6492_v14 = vrot.slane %v6491_v43, 4 }
 0x48d   :  { %v6817_v26 = vpop.f32.mrf.mxu3  ;;  %v6502_v17 = vrot.slane %v6501_v12, 4 }
 0x48e   :  { %v13758_v62 = vadd.f32 %v5532_v60, %v5068_v32  ;;  %v7892_v44 = vadd.f32 %v7891_v45, %v7824_v50  ;;  %v6914_v21 = vadd.f32 %v6817_v26, %v13656_v63  ;;  %v7285_v45 = vrot.slane %v7283_v40, 4 }
 0x48f   :  { %v5535_v28 = vpop.f32.mrf.mxu2  ;;  %v6497_v11 = vsel %vm9673_vm4, %v6492_v14, %v6496_v47 }
 0x490   :  { %v7694_v4 = vadd.f32 %v13708_v13, %v6914_v21  ;;  %v9143_v13 = vld [vmem:[%s13857_s0 + $0x1ac] sm:$0x1] }
 0x491   :  { %v7602_v15 = vpop.f32.mrf.mxu0  ;;  %v7286_v22 = vrot.slane %v9143_v13, 5  ;;  %v6504_v2 = vshll.u32 %v9143_v13, 16 }
 0x492   :  { %v7761_v54 = vadd.f32 %v13386_v6, %v7694_v4 }
 0x493   :  { %v4978_v63 = vpop.f32.mrf.mxu1  ;;  %v7287_v20 = vsel %vm10123_vm7, %v7285_v45, %v7286_v22  ;;  %v6506_v32 = vrot.slane %v6504_v2, 5 }
 0x494   :  { %v5069_v10 = vadd.f32 %v4978_v63, %v13976_v57  ;;  %9270 = vmatmul.msk.bf16.gmra.mxu0 %vm1009_vm3, %v7382_v39  ;;  %v7825_v36 = vmax.f32 %v7761_v54, 0.0  ;;  %v7351_v50 = vunpack.c.l.b16 %v7287_v20  ;;  %v6570_v39 = vunpack.c.l.b16 %v6497_v11 }
 0x495   :  { %v6819_v60 = vpop.f32.mrf.mxu3  ;;  %v6507_v56 = vsel %vm9673_vm4, %v6502_v17, %v6506_v32 }
 0x496   :  { %v5626_v51 = vadd.f32 %v5535_v28, %v5069_v10  ;;  %8823 = vmatmul.msk.bf16.gmra.mxu1 %vm1009_vm3, %v4754_v46  ;;  %v7893_v41 = vadd.f32 %v7892_v44, %v7825_v36  ;;  %v6915_v7 = vadd.f32 %v6819_v60, %v13694_v35  ;;  %v13977_v35 = vld [vmem:[#allocation9_spill] sm:$0xff]  ;;  %v7383_v44 = vpack.c.b16 %v7351_v50, %v7350_v48 }
 0x497   :  { %v5537_v3 = vpop.f32.mrf.mxu2  ;;  %v6571_v23 = vunpack.c.l.b16 %v6507_v56  ;;  %v9433_v48 = vld [vmem:[%s13861_s4 + $0x8] sm:$0xff] }
 0x498   :  { %v7695_v16 = vadd.f32 %v7599_v5, %v6915_v7  ;;  %v9441_v50 = vld [vmem:[%s13862_s5 + $0x8] sm:$0xff]  ;;  %8083 = vmatpush.bf16.msrb.mxu2 %v9433_v48 }
 0x499   :  { %v7604_v30 = vpop.f32.mrf.mxu0  ;;  %v6603_v24 = vpack.c.b16 %v6571_v23, %v6570_v39  ;;  %8014 = vmatpush.bf16.msrb.mxu1 %v9441_v50 }
 0x49a   :  { %v7762_v19 = vadd.f32 %v13386_v6, %v7695_v16  ;;  %9174 = vmatmul.msk.bf16.gmra.mxu3 %vm1009_vm3, %v6602_v37  ;;  %v13980_v37 = vld [vmem:[#allocation14_spill] sm:$0xff] }
 0x49b   :  { %v4980_v61 = vpop.f32.mrf.mxu1 }
 0x49c   :  { %v5070_v9 = vadd.f32 %v4980_v61, %v13977_v35  ;;  %v7826_v5 = vmax.f32 %v7762_v19, 0.0 }
 0x49d   :  { %v6822_v0 = vpop.f32.mrf.mxu3 }
 0x49e   :  { %v5627_v53 = vadd.f32 %v5537_v3, %v5070_v9  ;;  %v7894_v26 = vadd.f32 %v7893_v41, %v7826_v5  ;;  %v6916_v25 = vadd.f32 %v6822_v0, %v13729_v8 }
 0x49f   :  { %v5540_v52 = vpop.f32.mrf.mxu2 }
 0x4a0   :  { %v7696_v21 = vadd.f32 %v7602_v15, %v6916_v25 }
 0x4a1   :  { %v7607_v28 = vpop.f32.mrf.mxu0 }
 0x4a2   :  { %v7763_v33 = vadd.f32 %v13386_v6, %v7696_v21 }
 0x4a3   :  { %v4983_v27 = vpop.f32.mrf.mxu1 }
 0x4a4   :  { %v5071_v4 = vadd.f32 %v4983_v27, %v13978_v1  ;;  %9271 = vmatmul.msk.bf16.gmra.mxu0 %vm1009_vm3, %v7383_v44  ;;  %v7827_v8 = vmax.f32 %v7763_v33, 0.0 }
 0x4a5   :  { %v6824_v40 = vpop.f32.mrf.mxu3 }
 0x4a6   :  { %v5628_v46 = vadd.f32 %v5540_v52, %v5071_v4  ;;  %v7895_v18 = vadd.f32 %v7894_v26, %v7827_v8  ;;  %v6917_v59 = vadd.f32 %v6824_v40, %v13758_v62  ;;  %v13982_v52 = vld [vmem:[#allocation18_spill] sm:$0xff] }
 0x4a7   :  { %v5542_v58 = vpop.f32.mrf.mxu2 }
 0x4a8   :  { %v7697_v54 = vadd.f32 %v7604_v30, %v6917_v59 }
 0x4a9   :  { %v7609_v15 = vpop.f32.mrf.mxu0 }
 0x4aa   :  { %v7764_v63 = vadd.f32 %v13386_v6, %v7697_v54  ;;  %9175 = vmatmul.msk.bf16.gmra.mxu3 %vm1009_vm3, %v6603_v24 }
 0x4ab   :  { %v4985_v38 = vpop.f32.mrf.mxu1 }
 0x4ac   :  { %v5072_v57 = vadd.f32 %v4985_v38, %v13979_v55  ;;  %v7828_v10 = vmax.f32 %v7764_v63, 0.0 }
 0x4ad   :  { %v6827_v13 = vpop.f32.mrf.mxu3 }
 0x4ae   :  { %v5629_v47 = vadd.f32 %v5542_v58, %v5072_v57  ;;  %v7896_v29 = vadd.f32 %v7895_v18, %v7828_v10  ;;  %v6918_v36 = vadd.f32 %v6827_v13, %v5626_v51  ;;  %v13981_v51 = vld [vmem:[#allocation16_spill] sm:$0xff] }
 0x4af   :  { %v5545_v49 = vpop.f32.mrf.mxu2 }
 0x4b0   :  { %v7698_v45 = vadd.f32 %v7607_v28, %v6918_v36 }
 0x4b1   :  { %v7612_v22 = vpop.f32.mrf.mxu0 }
 0x4b2   :  { %v7765_v62 = vadd.f32 %v13386_v6, %v7698_v45 }
 0x4b3   :  { %v4988_v60 = vpop.f32.mrf.mxu1 }
 0x4b4   :  { %v5073_v41 = vadd.f32 %v4988_v60, %v13980_v37  ;;  %v7829_v7 = vmax.f32 %v7765_v62, 0.0  ;;  %v13983_v62 = vld [vmem:[#allocation20_spill] sm:$0xff] }
 0x4b5   :  { %v6829_v3 = vpop.f32.mrf.mxu3 }
 0x4b6   :  { %v5630_v43 = vadd.f32 %v5545_v49, %v5073_v41  ;;  %v7897_v2 = vadd.f32 %v7896_v29, %v7829_v7  ;;  %v6919_v12 = vadd.f32 %v6829_v3, %v5627_v53 }
 0x4b7   :  { %v5547_v42 = vpop.f32.mrf.mxu2 }
 0x4b8   :  { %v7699_v16 = vadd.f32 %v7609_v15, %v6919_v12 }
 0x4b9   :  { %v7614_v30 = vpop.f32.mrf.mxu0 }
 0x4ba   :  { %v7766_v20 = vadd.f32 %v13386_v6, %v7699_v16  ;;  %v13810_v6 = vld [vmem:[%s13860_s3] ss:$0 sm:$0xff] }
 0x4bb   :  { %v4990_v19 = vpop.f32.mrf.mxu1 }
 0x4bc   :  { %v5074_v61 = vadd.f32 %v4990_v19, %v13981_v51  ;;  %v7830_v14 = vmax.f32 %v7766_v20, 0.0  ;;  %v13984_v20 = vld [vmem:[#allocation22_spill] sm:$0xff] }
 0x4bd   :  { %v6832_v32 = vpop.f32.mrf.mxu3 }
 0x4be   :  { %v5631_v35 = vadd.f32 %v5547_v42, %v5074_v61  ;;  %v7898_v9 = vadd.f32 %v7897_v2, %v7830_v14  ;;  %v6920_v17 = vadd.f32 %v6832_v32, %v5628_v46 }
 0x4bf   :  { %v5550_v25 = vpop.f32.mrf.mxu2 }
 0x4c0   :  { %v7700_v5 = vadd.f32 %v7612_v22, %v6920_v17 }
 0x4c1   :  { %v7617_v0 = vpop.f32.mrf.mxu0 }
 0x4c2   :  { %v7767_v53 = vadd.f32 %v13810_v6, %v7700_v5  ;;  %v13985_v5 = vld [vmem:[#allocation24_spill] sm:$0xff] }
 0x4c3   :  { %v4993_v26 = vpop.f32.mrf.mxu1 }
 0x4c4   :  { %v5075_v11 = vadd.f32 %v4993_v26, %v13982_v52  ;;  %v7831_v56 = vmax.f32 %v7767_v53, 0.0 }
 0x4c5   :  { %v6834_v44 = vpop.f32.mrf.mxu3 }
 0x4c6   :  { %v5632_v21 = vadd.f32 %v5550_v25, %v5075_v11  ;;  %v7899_v28 = vadd.f32 %v7898_v9, %v7831_v56  ;;  %v6921_v33 = vadd.f32 %v6834_v44, %v5629_v47 }
 0x4c7   :  { %v5552_v40 = vpop.f32.mrf.mxu2 }
 0x4c8   :  { %v7701_v27 = vadd.f32 %v7614_v30, %v6921_v33 }
 0x4c9   :  { %v7619_v39 = vpop.f32.mrf.mxu0 }
 0x4ca   :  { %v7768_v23 = vadd.f32 %v13810_v6, %v7701_v27  ;;  %v13986_v27 = vld [vmem:[#allocation26_spill] sm:$0xff] }
 0x4cb   :  { %v4995_v1 = vpop.f32.mrf.mxu1 }
 0x4cc   :  { %v7832_v4 = vmax.f32 %v7768_v23, 0.0  ;;  %v5076_v60 = vadd.f32 %v4995_v1, %v13983_v62 }
 0x4cd   :  { %v6837_v8 = vpop.f32.mrf.mxu3 }
 0x4ce   :  { %v7900_v46 = vadd.f32 %v7899_v28, %v7832_v4  ;;  %v6922_v18 = vadd.f32 %v6837_v8, %v5630_v43  ;;  %v5633_v43 = vadd.f32 %v5552_v40, %v5076_v60 }
 0x4cf   :  { %v5555_v57 = vpop.f32.mrf.mxu2 }
 0x4d0   :  { %v7702_v59 = vadd.f32 %v7617_v0, %v6922_v18 }
 0x4d1   :  { %v7622_v24 = vpop.f32.mrf.mxu0 }
 0x4d2   :  { %v7769_v58 = vadd.f32 %v13810_v6, %v7702_v59 }
 0x4d3   :  { %v4998_v54 = vpop.f32.mrf.mxu1 }
 0x4d4   :  { %v7833_v15 = vmax.f32 %v7769_v58, 0.0  ;;  %v5077_v19 = vadd.f32 %v4998_v54, %v13984_v20  ;;  %v9432_v58 = vld [vmem:[%s13861_s4] sm:$0xff] }
 0x4d5   :  { %v6839_v63 = vpop.f32.mrf.mxu3  ;;  %v9440_v54 = vld [vmem:[%s13862_s5] sm:$0xff]  ;;  %8084 = vmatpush.bf16.msrb.mxu2 %v9432_v58 }
 0x4d6   :  { %v7901_v38 = vadd.f32 %v7900_v46, %v7833_v15  ;;  %v6923_v55 = vadd.f32 %v6839_v63, %v5631_v35  ;;  %v5634_v35 = vadd.f32 %v5555_v57, %v5077_v19  ;;  %8015 = vmatpush.bf16.msrb.mxu1 %v9440_v54 }
 0x4d7   :  { %v5557_v7 = vpop.f32.mrf.mxu2 }
 0x4d8   :  { %v7703_v10 = vadd.f32 %v7619_v39, %v6923_v55 }
 0x4d9   :  { %v7624_v13 = vpop.f32.mrf.mxu0 }
 0x4da   :  { %v7770_v47 = vadd.f32 %v13810_v6, %v7703_v10 }
 0x4db   :  { %v5000_v36 = vpop.f32.mrf.mxu1 }
 0x4dc   :  { %v7834_v29 = vmax.f32 %v7770_v47, 0.0  ;;  %v5078_v0 = vadd.f32 %v5000_v36, %v13985_v5 }
 0x4dd   :  { %v6842_v49 = vpop.f32.mrf.mxu3 }
 0x4de   :  { %v7902_v45 = vadd.f32 %v7901_v38, %v7834_v29  ;;  %v6924_v22 = vadd.f32 %v6842_v49, %v5632_v21  ;;  %v5635_v11 = vadd.f32 %v5557_v7, %v5078_v0 }
 0x4df   :  { %v5560_v32 = vpop.f32.mrf.mxu2 }
 0x4e0   :  { %v7704_v37 = vadd.f32 %v7622_v24, %v6924_v22 }
 0x4e1   :  { %v7627_v41 = vpop.f32.mrf.mxu0 }
 0x4e2   :  { %v7771_v3 = vadd.f32 %v13810_v6, %v7704_v37 }
 0x4e3   :  { %v5003_v42 = vpop.f32.mrf.mxu1 }
 0x4e4   :  { %v7835_v2 = vmax.f32 %v7771_v3, 0.0  ;;  %v5079_v39 = vadd.f32 %v5003_v42, %v13986_v27 }
 0x4e5   :  { %v6844_v12 = vpop.f32.mrf.mxu3 }
 0x4e6   :  { %v7903_v16 = vadd.f32 %v7902_v45, %v7835_v2  ;;  %v6925_v30 = vadd.f32 %v6844_v12, %v5633_v43  ;;  %v5636_v40 = vadd.f32 %v5560_v32, %v5079_v39  ;;  %v13987_v45 = vld [vmem:[#allocation28_spill] sm:$0xff] }
 0x4e7   :  { %v5562_v44 = vpop.f32.mrf.mxu2 }
 0x4e8   :  { %v7705_v51 = vadd.f32 %v7624_v13, %v6925_v30 }
 0x4e9   :  { %v7629_v61 = vpop.f32.mrf.mxu0 }
 0x4ea   :  { %v7772_v14 = vadd.f32 %v13810_v6, %v7705_v51 }
 0x4eb   :  { %v5005_v26 = vpop.f32.mrf.mxu1 }
 0x4ec   :  { %v7836_v9 = vmax.f32 %v7772_v14, 0.0  ;;  %v5080_v63 = vadd.f32 %v5005_v26, %v12165_v34 }
 0x4ed   :  { %v6847_v17 = vpop.f32.mrf.mxu3 }
 0x4ee   :  { %v7904_v48 = vadd.f32 %v7903_v16, %v7836_v9  ;;  %v6926_v50 = vadd.f32 %v6847_v17, %v5634_v35  ;;  %v5637_v57 = vadd.f32 %v5562_v44, %v5080_v63  ;;  %v13988_v16 = vld [vmem:[#allocation29_spill] sm:$0xff]  ;;  %v13989_v9 = vld [vmem:[#allocation30_spill] sm:$0xff]  ;;  %v13990_v44 = vld [vmem:[#allocation31_spill] sm:$0xff] }
 0x4ef   :  { %v5565_v15 = vpop.f32.mrf.mxu2 }
 0x4f0   :  { %v7706_v53 = vadd.f32 %v7627_v41, %v6926_v50 }
 0x4f1   :  { %v7632_v25 = vpop.f32.mrf.mxu0 }
 0x4f2   :  { %v7773_v52 = vadd.f32 %v13810_v6, %v7706_v53 }
 0x4f3   :  { %v5008_v4 = vpop.f32.mrf.mxu1 }
 0x4f4   :  { %v7837_v56 = vmax.f32 %v7773_v52, 0.0  ;;  %v5081_v22 = vadd.f32 %v5008_v4, %v13987_v45 }
 0x4f5   :  { %v6849_v21 = vpop.f32.mrf.mxu3 }
 0x4f6   :  { %v7905_v28 = vadd.f32 %v7904_v48, %v7837_v56  ;;  %v6927_v33 = vadd.f32 %v6849_v21, %v5635_v11  ;;  %v5638_v41 = vadd.f32 %v5565_v15, %v5081_v22 }
 0x4f7   :  { %v5567_v60 = vpop.f32.mrf.mxu2 }
 0x4f8   :  { %v7707_v23 = vadd.f32 %v7629_v61, %v6927_v33 }
 0x4f9   :  { %v7634_v8 = vpop.f32.mrf.mxu0 }
 0x4fa   :  { %v7774_v1 = vadd.f32 %v13810_v6, %v7707_v23 }
 0x4fb   :  { %v5010_v13 = vpop.f32.mrf.mxu1 }
 0x4fc   :  { %v7838_v46 = vmax.f32 %v7774_v1, 0.0  ;;  %v5082_v30 = vadd.f32 %v5010_v13, %v13988_v16  ;;  %v7878_v13 = vrot.slane %v13430_v31, 4 }
 0x4fd   :  { %v6852_v18 = vpop.f32.mrf.mxu3 }
 0x4fe   :  { %v7906_v59 = vadd.f32 %v7905_v28, %v7838_v46  ;;  %v6928_v24 = vadd.f32 %v6852_v18, %v5636_v40  ;;  %v5639_v51 = vadd.f32 %v5567_v60, %v5082_v30  ;;  %v13991_v18 = vld [vmem:[#allocation32_spill] sm:$0xff] }
 0x4ff   :  { %v5570_v19 = vpop.f32.mrf.mxu2 }
 0x500   :  { %v7708_v38 = vadd.f32 %v7632_v25, %v6928_v24 }
 0x501   :  { %v7637_v29 = vpop.f32.mrf.mxu0 }
 0x502   :  { %v7775_v55 = vadd.f32 %v13810_v6, %v7708_v38 }
 0x503   :  { %v5013_v43 = vpop.f32.mrf.mxu1 }
 0x504   :  { %v7839_v10 = vmax.f32 %v7775_v55, 0.0  ;;  %v5083_v17 = vadd.f32 %v5013_v43, %v13989_v9 }
 0x505   :  { %v6854_v47 = vpop.f32.mrf.mxu3 }
 0x506   :  { %v7907_v36 = vadd.f32 %v7906_v59, %v7839_v10  ;;  %v6929_v49 = vadd.f32 %v6854_v47, %v5637_v57  ;;  %v5640_v53 = vadd.f32 %v5570_v19, %v5083_v17  ;;  %v13992_v47 = vld [vmem:[#allocation33_spill] sm:$0xff] }
 0x507   :  { %v5572_v25 = vpop.f32.mrf.mxu2 }
 0x508   :  { %v7709_v62 = vadd.f32 %v7634_v8, %v6929_v49  ;;  %v7943_v49 = vld [vmem:[%s13858_s1] sm:$0x1] }
 0x509   :  { %v7639_v12 = vpop.f32.mrf.mxu0  ;;  %8016 = vmatmul.bf16.vlgmr.msrb.gmra.mxu1 %v7943_v49 }
 0x50a   :  { %v7776_v37 = vadd.f32 %v13810_v6, %v7709_v62  ;;  %v7879_v62 = vadd.f32 %v7878_v13, %v13430_v31 }
 0x50b   :  { %v5015_v48 = vpop.f32.mrf.mxu1 }
 0x50c   :  { %v7840_v34 = vmax.f32 %v7776_v37, 0.0  ;;  %v5084_v21 = vadd.f32 %v5015_v48, %v13990_v44  ;;  %v7880_v43 = vrot.slane %v7879_v62, 2 }
 0x50d   :  { %v6857_v7 = vpop.f32.mrf.mxu3 }
 0x50e   :  { %v7908_v3 = vadd.f32 %v7907_v36, %v7840_v34  ;;  %v6930_v2 = vadd.f32 %v6857_v7, %v5638_v41  ;;  %v5641_v23 = vadd.f32 %v5572_v25, %v5084_v21  ;;  %v7881_v16 = vadd.f32 %v7880_v43, %v7879_v62 }
 0x50f   :  { %v5575_v46 = vpop.f32.mrf.mxu2 }
 0x510   :  { %v7710_v42 = vadd.f32 %v7637_v29, %v6930_v2 }
 0x511   :  { %v7642_v5 = vpop.f32.mrf.mxu0 }
 0x512   :  { %v7777_v20 = vadd.f32 %v13810_v6, %v7710_v42 }
 0x513   :  { %v5018_v33 = vpop.f32.mrf.mxu1 }
 0x514   :  { %v7841_v61 = vmax.f32 %v7777_v20, 0.0  ;;  %v5085_v59 = vadd.f32 %v5018_v33, %v13991_v18  ;;  %v7882_v20 = vrot.slane %v7881_v16, 1 }
 0x515   :  { %v6859_v14 = vpop.f32.mrf.mxu3 }
 0x516   :  { %v7909_v32 = vadd.f32 %v7908_v3, %v7841_v61  ;;  %v6931_v35 = vadd.f32 %v6859_v14, %v5639_v51  ;;  %v5642_v54 = vadd.f32 %v5575_v46, %v5085_v59  ;;  %v7883_v61 = vadd.f32 %v7882_v20, %v7881_v16 }
 0x517   :  { %v5577_v45 = vpop.f32.mrf.mxu2 }
 0x518   :  { %v7711_v50 = vadd.f32 %v7639_v12, %v6931_v35  ;;  %v7923_v31 = vmul.f32 0.00390625, %v7883_v61 }
 0x519   :  { %v7644_v39 = vpop.f32.mrf.mxu0 }
 0x51a   :  { %v7778_v0 = vadd.f32 %v13810_v6, %v7711_v50  ;;  %v7925_v17 = vpack.c.bf16 %v7923_v31, %v7923_v31 }
 0x51b   :  { %v5020_v15 = vpop.f32.mrf.mxu1 }
 0x51c   :  { %v7842_v26 = vmax.f32 %v7778_v0, 0.0  ;;  %v5086_v29 = vadd.f32 %v5020_v15, %v13992_v47 }
 0x51d   :  { %v6862_v52 = vpop.f32.mrf.mxu3 }
 0x51e   :  { %v7910_v11 = vadd.f32 %v7909_v32, %v7842_v26  ;;  %v6932_v56 = vadd.f32 %v6862_v52, %v5640_v53  ;;  %v5643_v60 = vadd.f32 %v5577_v45, %v5086_v29  ;;  %v9453_v52 = vld [vmem:[%s13863_s6] ss:$0 sm:$0xff] }
 0x520   :  { %v7712_v28 = vadd.f32 %v7642_v5, %v6932_v56  ;;  %v8023_v5 = vunpack.c.l.b16 %v7925_v17 }
 0x521   :  { %v7647_v38 = vpop.f32.mrf.mxu0 }
 0x522   :  { %v7779_v27 = vadd.f32 %v13810_v6, %v7712_v28 }
 0x524   :  { %v7843_v1 = vmax.f32 %v7779_v27, 0.0 }
 0x525   :  { %v6864_v4 = vpop.f32.mrf.mxu3 }
 0x526   :  { %v7911_v8 = vadd.f32 %v7910_v11, %v7843_v1  ;;  %v6933_v40 = vadd.f32 %v6864_v4, %v5641_v23 }
 0x528   :  { %v7713_v24 = vadd.f32 %v7644_v39, %v6933_v40 }
 0x529   :  { %v7649_v3 = vpop.f32.mrf.mxu0 }
 0x52a   :  { %v7780_v58 = vadd.f32 %v13810_v6, %v7713_v24 }
 0x52c   :  { %v7844_v63 = vmax.f32 %v7780_v58, 0.0 }
 0x52d   :  { %v6867_v55 = vpop.f32.mrf.mxu3 }
 0x52e   :  { %v7912_v57 = vadd.f32 %v7911_v8, %v7844_v63  ;;  %v6934_v10 = vadd.f32 %v6867_v55, %v5642_v54 }
 0x530   :  { %v7714_v36 = vadd.f32 %v7647_v38, %v6934_v10 }
 0x532   :  { %v7781_v22 = vadd.f32 %v13810_v6, %v7714_v36 }
 0x534   :  { %v7845_v37 = vmax.f32 %v7781_v22, 0.0 }
 0x535   :  { %v6869_v41 = vpop.f32.mrf.mxu3 }
 0x536   :  { %v7913_v34 = vadd.f32 %v7912_v57, %v7845_v37  ;;  %v6935_v7 = vadd.f32 %v6869_v41, %v5643_v60 }
 0x538   :  { %v7715_v2 = vadd.f32 %v7649_v3, %v6935_v7 }
 0x53a   :  { %v7782_v12 = vadd.f32 %v13810_v6, %v7715_v2 }
 0x53c   :  { %v7846_v30 = vmax.f32 %v7782_v12, 0.0 }
 0x53e   :  { %v7914_v42 = vadd.f32 %v7913_v34, %v7846_v30 }
 0x540   :  { %v7915_v19 = vrot.slane %v7914_v42, 4 }
 0x542   :  { %v7916_v51 = vadd.f32 %v7915_v19, %v7914_v42 }
 0x544   :  { %v7917_v14 = vrot.slane %v7916_v51, 2 }
 0x546   :  { %v7918_v32 = vadd.f32 %v7917_v14, %v7916_v51 }
 0x548   :  { %v7919_v35 = vrot.slane %v7918_v32, 1 }
 0x54a   :  { %v7920_v9 = vadd.f32 %v7919_v35, %v7918_v32 }
 0x54c   :  { %v7924_v48 = vmul.f32 0.00390625, %v7920_v9 }
 0x54e   :  { %v7926_v50 = vpack.c.bf16 %v7924_v48, %v7924_v48 }
 0x550   :  { %v8024_v0 = vunpack.c.l.b16 %v7926_v50 }
 0x552   :  { %v8026_v53 = vsel %vm8025_vm8, %v8024_v0, %v8023_v5 }
 0x553   :  { %v8027_v6 = vpack.c.b16 %v8026_v53, %v8026_v53 }
 0x555   :  { %8085 = vmatmul.bf16.vlgmr.msrb.gmra.mxu2 %v8027_v6 }
 0x586   :  { %v8017_v26 = vpop.f32.mrf.mxu1 }
 0x58e   :  { %v8019_v25 = vpop.f32.mrf.mxu1 }
 0x5d8   :  { %v8086_v11 = vpop.f32.mrf.mxu2 }
 0x5d9   :  { %v8087_v56 = vadd.f32 %v8086_v11, %v8017_v26 }
 0x5db   :  { %v8094_v44 = vadd.f32 %v9453_v52, %v8087_v56 }
 0x5dd   :  { %8095 = vst [vmem:[#allocation2] sm:$0x3] %v8094_v44 }
 0x5de   :  { %8106 = dma.vmem_to_hbm [thread:$0]  %s8102_s24, 32, %s8104_s27, [#allocation3]  }
 0x5e0   :  { %v8088_v21 = vpop.f32.mrf.mxu2 }
 0x5e1   :  { %9603 = dma.done.wait [#allocation3], 32  }
 0x5e2   :  { %9604 = vsyncadd [#allocation3], 4294967264 }
 0x5e3   :  { %8111 = vsyncpa [#allocation3], 1 }

</bundles_post_ra>
